<compile_context>
chip_gen: v5e
topology: v5e:2x2
jax: 0.10.0
libtpu: 0.0.40
codegen_flags: <defaults>
</compile_context>

<pallas_src>
import math

import jax
import jax.numpy as jnp
from jax import lax
from jax.experimental import pallas as pl
from jax.experimental.pallas import tpu as pltpu

LN_EPS = 1e-5  # PyTorch nn.LayerNorm default
_SQRT_2_OVER_PI = 0.7978845608028654


def _round_up(x, m):
    return ((x + m - 1) // m) * m


def _gelu_tanh(x):
    # tanh-approximate GELU: tanh goes to the EUP slot, the rest is a handful
    # of VPU ops.  |error| vs. exact-erf GELU ~1e-3 (well below bf16 weights).
    # TODO(synk): switch to an exact-erf path if bit-level parity with
    # PyTorch's default nn.GELU() (erf form) is ever required.
    return 0.5 * x * (1.0 + jnp.tanh(_SQRT_2_OVER_PI * (x + 0.044715 * (x * x * x))))


def _fused_blocks_kernel(x_ref, w1_ref, b1_ref, w2_ref, b2_ref, o_ref):
    """grid = (row_tiles,).  All depth blocks applied in-kernel:
         x += fc2(gelu(fc1(LN(x))))   repeated `depth` times,
       with the LN affine pre-folded into fc1 (w1/b1)."""
    depth = w1_ref.shape[0]
    x0 = x_ref[...].astype(jnp.float32)                       # (TM, C) f32 carry

    def block(d, x):
        # LayerNorm over channels (biased variance, eps=1e-5); affine folded
        # into fc1 on the host, so only the normalization remains here.
        mu = jnp.mean(x, axis=-1, keepdims=True)
        xc = x - mu
        var = jnp.mean(xc * xc, axis=-1, keepdims=True)
        xn = xc * lax.rsqrt(var + LN_EPS)                      # (TM, C) f32

        # Mlp: fc1 -> GELU -> fc2 (dropout p=0 -> identity).  MXU operands in
        # the weights' storage dtype, f32 accumulation.
        w1 = w1_ref[d]                                         # (C, Hd)
        h = jnp.dot(xn.astype(w1.dtype), w1,
                    preferred_element_type=jnp.float32) + b1_ref[d]
        h = _gelu_tanh(h)                                      # (TM, Hd) f32
        w2 = w2_ref[d]                                         # (Hd, C)
        y = jnp.dot(h.astype(w2.dtype), w2,
                    preferred_element_type=jnp.float32) + b2_ref[d]

        # Residual (drop_path=0 -> identity); carried in f32 across blocks.
        return x + y

    x = lax.fori_loop(0, depth, block, x0, unroll=bool(depth <= 8))
    o_ref[...] = x.astype(o_ref.dtype)


def _fused_forward_2d(x2d, w1, b1, w2, b2, *, tm, io_alias):
    M, C = x2d.shape
    depth, _, Hd = w1.shape
    grid = (M // tm,)

    x_isz = jnp.dtype(x2d.dtype).itemsize
    w_isz = jnp.dtype(w1.dtype).itemsize
    # Explicit VMEM budget: double-buffered x in/out tiles + fully-resident
    # weight stack + in-kernel f32 temporaries, with 2x slack.  Clamped to
    # 40 MiB so it stays well inside v7x's 64 MiB physical VMEM per core.
    est = (2 * (2 * tm * C) * x_isz             # x in + out tiles, 2 buffers each
           + depth * 2 * C * Hd * w_isz         # resident fc1 + fc2 weights
           + depth * (Hd + C) * 4               # resident biases (f32)
           + 4 * tm * Hd * 4                    # f32 temporaries (fc1 out / gelu)
           + 2 * tm * C * 4)                    # f32 carry / LN temporaries
    vmem_limit = int(min(max(2 * est + (2 << 20), 8 << 20), 40 << 20))

    return pl.pallas_call(
        _fused_blocks_kernel,
        out_shape=jax.ShapeDtypeStruct((M, C), x2d.dtype),
        grid_spec=pltpu.PrefetchScalarGridSpec(
            num_scalar_prefetch=0,
            grid=grid,
            in_specs=[
                pl.BlockSpec((tm, C), lambda i: (i, 0)),             # x row tile
                pl.BlockSpec((depth, C, Hd), lambda i: (0, 0, 0)),   # fc1 w (resident)
                pl.BlockSpec((depth, 1, Hd), lambda i: (0, 0, 0)),   # fc1 b (resident)
                pl.BlockSpec((depth, Hd, C), lambda i: (0, 0, 0)),   # fc2 w (resident)
                pl.BlockSpec((depth, 1, C), lambda i: (0, 0, 0)),    # fc2 b (resident)
            ],
            out_specs=pl.BlockSpec((tm, C), lambda i: (i, 0)),
        ),
        compiler_params=pltpu.CompilerParams(
            dimension_semantics=("parallel",),
            vmem_limit_bytes=vmem_limit,
        ),
        input_output_aliases=io_alias,
    )(x2d, w1, b1, w2, b2)


def _detect_num_tensorcores():
    """Best-effort: 1 for single-TC generations (v5e/v6e), 2 for megacore chips."""
    try:
        dev = jax.devices()[0]
        if dev.platform != "tpu":
            return 1
        kind = (getattr(dev, "device_kind", "") or "").lower()
        single_tc = ("v5 lite", "v5e", "v5lite", "v6 lite", "v6e", "v2", "v3")
        return 1 if any(t in kind for t in single_tc) else 2
    except Exception:  # pragma: no cover - defensive
        return 1


def init_basic_ast_layer_params(key, dim, depth, mlp_ratio=4.0):
    """Deterministic synthetic parameters for `depth` TransformerBlocks
    (att=False, token_mlp='ffn'), stacked along a leading depth axis.
    Linear weights are stored (in, out) = transpose of PyTorch's (out, in)."""
    hidden = int(dim * mlp_ratio)
    gs, bs, w1s, b1s, w2s, b2s = [], [], [], [], [], []
    for _ in range(depth):
        k1, k2, k3, k4, key = jax.random.split(key, 5)
        lim1 = 1.0 / math.sqrt(dim)
        lim2 = 1.0 / math.sqrt(hidden)
        gs.append(jnp.ones((1, dim), jnp.float32))
        bs.append(jnp.zeros((1, dim), jnp.float32))
        w1s.append(jax.random.uniform(k1, (dim, hidden), jnp.float32, -lim1, lim1))
        b1s.append(jax.random.uniform(k2, (1, hidden), jnp.float32, -lim1, lim1))
        w2s.append(jax.random.uniform(k3, (hidden, dim), jnp.float32, -lim2, lim2))
        b2s.append(jax.random.uniform(k4, (1, dim), jnp.float32, -lim2, lim2))
    stack = lambda xs: jnp.stack(xs, axis=0)
    return dict(gamma=stack(gs), beta=stack(bs),
                w1=stack(w1s), b1=stack(b1s), w2=stack(w2s), b2=stack(b2s))


def basic_ast_layer_forward(x, params, *, storage_dtype=jnp.bfloat16, max_tm=4096):
    """x: (B, L, C) with L = H*W.  Applies all `depth` blocks in one fused kernel.

    storage_dtype: MXU/VMEM dtype for the fc weights only (x, LN statistics,
    GELU, residual carry and matmul accumulation all stay float32; x is never
    cast/round-tripped in HBM)."""
    B, L, C = x.shape
    M = B * L

    # Fold the LayerNorm affine into fc1 (exact, since drop=0):
    #   (LN(x)*g + b) @ W1 + b1  ==  LN(x) @ (g[:,None]*W1) + (b @ W1 + b1)
    gamma = params["gamma"].astype(jnp.float32)            # (depth, 1, C)
    beta = params["beta"].astype(jnp.float32)               # (depth, 1, C)
    w1 = params["w1"].astype(jnp.float32)                    # (depth, C, Hd)
    b1 = params["b1"].astype(jnp.float32)                    # (depth, 1, Hd)
    w1_fold = (jnp.swapaxes(gamma, 1, 2) * w1).astype(storage_dtype)
    b1_fold = jnp.matmul(beta, w1) + b1                      # (depth, 1, Hd) f32
    w2 = params["w2"].astype(storage_dtype)                  # (depth, Hd, C)
    b2 = params["b2"].astype(jnp.float32)                    # (depth, 1, C)

    # Row tiling: one big tile per TensorCore where possible (amortizes the
    # ~0.35 us/step pipeline overhead).  Force an even split only on 2-TC
    # (megacore) chips; v5e/v6e get a single tile when M fits.
    n_tc = _detect_num_tensorcores()
    n_tiles = max(1, pl.cdiv(M, max_tm))
    if n_tc > 1 and M >= 512:
        n_tiles = _round_up(max(n_tiles, n_tc), n_tc)
    tm = _round_up(pl.cdiv(M, n_tiles), 8)
    m_pad = tm * n_tiles

    x2d = x.reshape(M, C)                    # no dtype cast of x
    if m_pad != M:
        x2d = jnp.pad(x2d, ((0, m_pad - M), (0, 0)))
    # Alias the x buffer to the output only when it is a fresh (padded) array
    # produced inside this trace; aliasing a non-donated entry param would
    # force XLA to insert an extra defensive copy of x.
    io_alias = {0: 0} if m_pad != M else {}

    y = _fused_forward_2d(x2d, w1_fold, b1_fold, w2, b2, tm=tm, io_alias=io_alias)
    if m_pad != M:
        y = y[:M]
    return y.reshape(B, L, C)


if __name__ == "__main__":
    # BasicASTLayer(dim=32, output_dim=32, input_resolution=(16,16), depth=2,
    #               num_heads=4, win_size=8)  -- defaults: att=False, token_mlp='ffn'.
    # num_heads / win_size are unused on the default (att=False) forward path.
    B, H, W, C = 2, 16, 16, 32
    depth = 2
    L = H * W

    key = jax.random.PRNGKey(0)
    kx, kp = jax.random.split(key)
    x = jax.random.normal(kx, (B, L, C), jnp.float32)
    params = init_basic_ast_layer_params(kp, dim=C, depth=depth, mlp_ratio=4.0)

    fwd = jax.jit(basic_ast_layer_forward)
    out = fwd(x, params)
    jax.block_until_ready(out)
    assert out.shape == (B, L, C)
    assert bool(jnp.isfinite(out).all())
    print("KERNEL_OK")
</pallas_src>

<mosaic_0001>
module attributes {stable_mosaic.version = 11 : i64} {
  func.func @_fused_blocks_kernel(%arg0: i32, %arg1: memref<512x32xf32, #tpu.memory_space<vmem>>, %arg2: memref<2x32x128xbf16, #tpu.memory_space<vmem>>, %arg3: memref<2x1x128xf32, #tpu.memory_space<vmem>>, %arg4: memref<2x128x32xbf16, #tpu.memory_space<vmem>>, %arg5: memref<2x1x32xf32, #tpu.memory_space<vmem>>, %arg6: memref<512x32xf32, #tpu.memory_space<vmem>>) attributes {dimension_semantics = [#tpu.dimension_semantics<parallel>], iteration_bounds = array<i64: 1>, scalar_prefetch = 0 : i64, scratch_operands = 0 : i64, tpu.core_type = #tpu.core_type<tc>, window_params = [{transform_indices = @transform_0, window_bounds = array<i64: 512, 32>}, {pipeline_mode = #tpu.pipeline_mode<synchronous>, transform_indices = @transform_1, window_bounds = array<i64: 2, 32, 128>}, {pipeline_mode = #tpu.pipeline_mode<synchronous>, transform_indices = @transform_2, window_bounds = array<i64: 2, 1, 128>}, {pipeline_mode = #tpu.pipeline_mode<synchronous>, transform_indices = @transform_3, window_bounds = array<i64: 2, 128, 32>}, {pipeline_mode = #tpu.pipeline_mode<synchronous>, transform_indices = @transform_4, window_bounds = array<i64: 2, 1, 32>}, {transform_indices = @transform_5, window_bounds = array<i64: 512, 32>}]} {
    %c0 = arith.constant 0 : index
    %c0_0 = arith.constant 0 : index
    %0 = vector.load %arg1[%c0, %c0_0] : memref<512x32xf32, #tpu.memory_space<vmem>>, vector<512x32xf32>
    %c0_i32 = arith.constant 0 : i32
    %cst = arith.constant dense<0.000000e+00> : vector<512xf32>
    %1 = vector.multi_reduction <add>, %0, %cst [1] : vector<512x32xf32> to vector<512xf32>
    %2 = vector.shape_cast %1 : vector<512xf32> to vector<512x1xf32>
    %cst_1 = arith.constant 3.200000e+01 : f32
    %3 = vector.broadcast %cst_1 : f32 to vector<512x1xf32>
    %4 = arith.divf %2, %3 : vector<512x1xf32>
    %5 = vector.broadcast %4 : vector<512x1xf32> to vector<512x32xf32>
    %6 = arith.subf %0, %5 : vector<512x32xf32>
    %7 = arith.mulf %6, %6 : vector<512x32xf32>
    %cst_2 = arith.constant dense<0.000000e+00> : vector<512xf32>
    %8 = vector.multi_reduction <add>, %7, %cst_2 [1] : vector<512x32xf32> to vector<512xf32>
    %9 = vector.shape_cast %8 : vector<512xf32> to vector<512x1xf32>
    %cst_3 = arith.constant 3.200000e+01 : f32
    %10 = vector.broadcast %cst_3 : f32 to vector<512x1xf32>
    %11 = arith.divf %9, %10 : vector<512x1xf32>
    %cst_4 = arith.constant 9.99999974E-6 : f32
    %12 = vector.broadcast %cst_4 : f32 to vector<512x1xf32>
    %13 = arith.addf %11, %12 : vector<512x1xf32>
    %14 = math.rsqrt %13 : vector<512x1xf32>
    %15 = vector.broadcast %14 : vector<512x1xf32> to vector<512x32xf32>
    %16 = arith.mulf %6, %15 : vector<512x32xf32>
    %17 = arith.index_cast %c0_i32 : i32 to index
    %c0_5 = arith.constant 0 : index
    %c0_6 = arith.constant 0 : index
    %18 = vector.load %arg2[%17, %c0_5, %c0_6] : memref<2x32x128xbf16, #tpu.memory_space<vmem>>, vector<1x32x128xbf16>
    %19 = vector.shape_cast %18 : vector<1x32x128xbf16> to vector<32x128xbf16>
    %20 = arith.truncf %16 : vector<512x32xf32> to vector<512x32xbf16>
    %cst_7 = arith.constant dense<0.000000e+00> : vector<512x128xf32>
    %21 = tpu.matmul %20, %19, %cst_7 {dimension_numbers = #tpu.dot_dimension_numbers<[1], [0], [0], [1], [0, 0, 1, 1], [], []>} : vector<512x32xbf16>, vector<32x128xbf16>, vector<512x128xf32> -> vector<512x128xf32>
    %22 = arith.index_cast %c0_i32 : i32 to index
    %c0_8 = arith.constant 0 : index
    %c0_9 = arith.constant 0 : index
    %23 = vector.load %arg3[%22, %c0_8, %c0_9] : memref<2x1x128xf32, #tpu.memory_space<vmem>>, vector<1x1x128xf32>
    %24 = vector.shape_cast %23 : vector<1x1x128xf32> to vector<1x128xf32>
    %25 = vector.broadcast %24 : vector<1x128xf32> to vector<512x128xf32>
    %26 = arith.addf %21, %25 : vector<512x128xf32>
    %cst_10 = arith.constant 5.000000e-01 : f32
    %27 = vector.broadcast %cst_10 : f32 to vector<512x128xf32>
    %28 = arith.mulf %27, %26 : vector<512x128xf32>
    %29 = arith.mulf %26, %26 : vector<512x128xf32>
    %30 = arith.mulf %29, %26 : vector<512x128xf32>
    %cst_11 = arith.constant 4.471500e-02 : f32
    %31 = vector.broadcast %cst_11 : f32 to vector<512x128xf32>
    %32 = arith.mulf %31, %30 : vector<512x128xf32>
    %33 = arith.addf %26, %32 : vector<512x128xf32>
    %cst_12 = arith.constant 0.797884583 : f32
    %34 = vector.broadcast %cst_12 : f32 to vector<512x128xf32>
    %35 = arith.mulf %34, %33 : vector<512x128xf32>
    %36 = math.tanh %35 : vector<512x128xf32>
    %cst_13 = arith.constant 1.000000e+00 : f32
    %37 = vector.broadcast %cst_13 : f32 to vector<512x128xf32>
    %38 = arith.addf %37, %36 : vector<512x128xf32>
    %39 = arith.mulf %28, %38 : vector<512x128xf32>
    %40 = arith.index_cast %c0_i32 : i32 to index
    %c0_14 = arith.constant 0 : index
    %c0_15 = arith.constant 0 : index
    %41 = vector.load %arg4[%40, %c0_14, %c0_15] : memref<2x128x32xbf16, #tpu.memory_space<vmem>>, vector<1x128x32xbf16>
    %42 = vector.shape_cast %41 : vector<1x128x32xbf16> to vector<128x32xbf16>
    %43 = arith.truncf %39 : vector<512x128xf32> to vector<512x128xbf16>
    %cst_16 = arith.constant dense<0.000000e+00> : vector<512x32xf32>
    %44 = tpu.matmul %43, %42, %cst_16 {dimension_numbers = #tpu.dot_dimension_numbers<[1], [0], [0], [1], [0, 0, 1, 1], [], []>} : vector<512x128xbf16>, vector<128x32xbf16>, vector<512x32xf32> -> vector<512x32xf32>
    %45 = arith.index_cast %c0_i32 : i32 to index
    %c0_17 = arith.constant 0 : index
    %c0_18 = arith.constant 0 : index
    %46 = vector.load %arg5[%45, %c0_17, %c0_18] : memref<2x1x32xf32, #tpu.memory_space<vmem>>, vector<1x1x32xf32>
    %47 = vector.shape_cast %46 : vector<1x1x32xf32> to vector<1x32xf32>
    %48 = vector.broadcast %47 : vector<1x32xf32> to vector<512x32xf32>
    %49 = arith.addf %44, %48 : vector<512x32xf32>
    %50 = arith.addf %0, %49 : vector<512x32xf32>
    %c1_i32 = arith.constant 1 : i32
    %cst_19 = arith.constant dense<0.000000e+00> : vector<512xf32>
    %51 = vector.multi_reduction <add>, %50, %cst_19 [1] : vector<512x32xf32> to vector<512xf32>
    %52 = vector.shape_cast %51 : vector<512xf32> to vector<512x1xf32>
    %cst_20 = arith.constant 3.200000e+01 : f32
    %53 = vector.broadcast %cst_20 : f32 to vector<512x1xf32>
    %54 = arith.divf %52, %53 : vector<512x1xf32>
    %55 = vector.broadcast %54 : vector<512x1xf32> to vector<512x32xf32>
    %56 = arith.subf %50, %55 : vector<512x32xf32>
    %57 = arith.mulf %56, %56 : vector<512x32xf32>
    %cst_21 = arith.constant dense<0.000000e+00> : vector<512xf32>
    %58 = vector.multi_reduction <add>, %57, %cst_21 [1] : vector<512x32xf32> to vector<512xf32>
    %59 = vector.shape_cast %58 : vector<512xf32> to vector<512x1xf32>
    %cst_22 = arith.constant 3.200000e+01 : f32
    %60 = vector.broadcast %cst_22 : f32 to vector<512x1xf32>
    %61 = arith.divf %59, %60 : vector<512x1xf32>
    %cst_23 = arith.constant 9.99999974E-6 : f32
    %62 = vector.broadcast %cst_23 : f32 to vector<512x1xf32>
    %63 = arith.addf %61, %62 : vector<512x1xf32>
    %64 = math.rsqrt %63 : vector<512x1xf32>
    %65 = vector.broadcast %64 : vector<512x1xf32> to vector<512x32xf32>
    %66 = arith.mulf %56, %65 : vector<512x32xf32>
    %67 = arith.index_cast %c1_i32 : i32 to index
    %c0_24 = arith.constant 0 : index
    %c0_25 = arith.constant 0 : index
    %68 = vector.load %arg2[%67, %c0_24, %c0_25] : memref<2x32x128xbf16, #tpu.memory_space<vmem>>, vector<1x32x128xbf16>
    %69 = vector.shape_cast %68 : vector<1x32x128xbf16> to vector<32x128xbf16>
    %70 = arith.truncf %66 : vector<512x32xf32> to vector<512x32xbf16>
    %cst_26 = arith.constant dense<0.000000e+00> : vector<512x128xf32>
    %71 = tpu.matmul %70, %69, %cst_26 {dimension_numbers = #tpu.dot_dimension_numbers<[1], [0], [0], [1], [0, 0, 1, 1], [], []>} : vector<512x32xbf16>, vector<32x128xbf16>, vector<512x128xf32> -> vector<512x128xf32>
    %72 = arith.index_cast %c1_i32 : i32 to index
    %c0_27 = arith.constant 0 : index
    %c0_28 = arith.constant 0 : index
    %73 = vector.load %arg3[%72, %c0_27, %c0_28] : memref<2x1x128xf32, #tpu.memory_space<vmem>>, vector<1x1x128xf32>
    %74 = vector.shape_cast %73 : vector<1x1x128xf32> to vector<1x128xf32>
    %75 = vector.broadcast %74 : vector<1x128xf32> to vector<512x128xf32>
    %76 = arith.addf %71, %75 : vector<512x128xf32>
    %cst_29 = arith.constant 5.000000e-01 : f32
    %77 = vector.broadcast %cst_29 : f32 to vector<512x128xf32>
    %78 = arith.mulf %77, %76 : vector<512x128xf32>
    %79 = arith.mulf %76, %76 : vector<512x128xf32>
    %80 = arith.mulf %79, %76 : vector<512x128xf32>
    %cst_30 = arith.constant 4.471500e-02 : f32
    %81 = vector.broadcast %cst_30 : f32 to vector<512x128xf32>
    %82 = arith.mulf %81, %80 : vector<512x128xf32>
    %83 = arith.addf %76, %82 : vector<512x128xf32>
    %cst_31 = arith.constant 0.797884583 : f32
    %84 = vector.broadcast %cst_31 : f32 to vector<512x128xf32>
    %85 = arith.mulf %84, %83 : vector<512x128xf32>
    %86 = math.tanh %85 : vector<512x128xf32>
    %cst_32 = arith.constant 1.000000e+00 : f32
    %87 = vector.broadcast %cst_32 : f32 to vector<512x128xf32>
    %88 = arith.addf %87, %86 : vector<512x128xf32>
    %89 = arith.mulf %78, %88 : vector<512x128xf32>
    %90 = arith.index_cast %c1_i32 : i32 to index
    %c0_33 = arith.constant 0 : index
    %c0_34 = arith.constant 0 : index
    %91 = vector.load %arg4[%90, %c0_33, %c0_34] : memref<2x128x32xbf16, #tpu.memory_space<vmem>>, vector<1x128x32xbf16>
    %92 = vector.shape_cast %91 : vector<1x128x32xbf16> to vector<128x32xbf16>
    %93 = arith.truncf %89 : vector<512x128xf32> to vector<512x128xbf16>
    %cst_35 = arith.constant dense<0.000000e+00> : vector<512x32xf32>
    %94 = tpu.matmul %93, %92, %cst_35 {dimension_numbers = #tpu.dot_dimension_numbers<[1], [0], [0], [1], [0, 0, 1, 1], [], []>} : vector<512x128xbf16>, vector<128x32xbf16>, vector<512x32xf32> -> vector<512x32xf32>
    %95 = arith.index_cast %c1_i32 : i32 to index
    %c0_36 = arith.constant 0 : index
    %c0_37 = arith.constant 0 : index
    %96 = vector.load %arg5[%95, %c0_36, %c0_37] : memref<2x1x32xf32, #tpu.memory_space<vmem>>, vector<1x1x32xf32>
    %97 = vector.shape_cast %96 : vector<1x1x32xf32> to vector<1x32xf32>
    %98 = vector.broadcast %97 : vector<1x32xf32> to vector<512x32xf32>
    %99 = arith.addf %94, %98 : vector<512x32xf32>
    %100 = arith.addf %50, %99 : vector<512x32xf32>
    %c2_i32 = arith.constant 2 : i32
    %c0_38 = arith.constant 0 : index
    %c0_39 = arith.constant 0 : index
    %101 = vector.load %arg6[%c0_38, %c0_39] : memref<512x32xf32, #tpu.memory_space<vmem>>, vector<512x32xf32>
    tpu.vector_store %arg6[%c0_38, %c0_39], %100 {strides = array<i32>} : memref<512x32xf32, #tpu.memory_space<vmem>>, vector<512x32xf32>,
    return
  }
  func.func @transform_0(%arg0: i32) -> (i32, i32) {
    %c0_i32 = arith.constant 0 : i32
    %c0_i32_0 = arith.constant 0 : i32
    return %arg0, %c0_i32 : i32, i32
  }
  func.func @transform_1(%arg0: i32) -> (i32, i32, i32) {
    %c0_i32 = arith.constant 0 : i32
    %c0_i32_0 = arith.constant 0 : i32
    %c0_i32_1 = arith.constant 0 : i32
    %c0_i32_2 = arith.constant 0 : i32
    return %c0_i32, %c0_i32_0, %c0_i32_1 : i32, i32, i32
  }
  func.func @transform_2(%arg0: i32) -> (i32, i32, i32) {
    %c0_i32 = arith.constant 0 : i32
    %c0_i32_0 = arith.constant 0 : i32
    %c0_i32_1 = arith.constant 0 : i32
    %c0_i32_2 = arith.constant 0 : i32
    return %c0_i32, %c0_i32_0, %c0_i32_1 : i32, i32, i32
  }
  func.func @transform_3(%arg0: i32) -> (i32, i32, i32) {
    %c0_i32 = arith.constant 0 : i32
    %c0_i32_0 = arith.constant 0 : i32
    %c0_i32_1 = arith.constant 0 : i32
    %c0_i32_2 = arith.constant 0 : i32
    return %c0_i32, %c0_i32_0, %c0_i32_1 : i32, i32, i32
  }
  func.func @transform_4(%arg0: i32) -> (i32, i32, i32) {
    %c0_i32 = arith.constant 0 : i32
    %c0_i32_0 = arith.constant 0 : i32
    %c0_i32_1 = arith.constant 0 : i32
    %c0_i32_2 = arith.constant 0 : i32
    return %c0_i32, %c0_i32_0, %c0_i32_1 : i32, i32, i32
  }
  func.func @transform_5(%arg0: i32) -> (i32, i32) {
    %c0_i32 = arith.constant 0 : i32
    %c0_i32_0 = arith.constant 0 : i32
    return %arg0, %c0_i32 : i32, i32
  }
}

</mosaic_0001>

<bundles_post_ra>
// kernel: basic_ast_layer_forward.1
= control target key start
LH: loop header
LB: loop body
LE: loop exit
PB: predicated region body
PF: predicated region fallthrough
CT: control target
= control target key end

     0   :  { %vm85_vm0 = vcmask 261120   ;;  %v6219_v14 = vmov 32.0   ;;  %s11666_s0 = inlined_call_operand.vmem [shape: f32[512,32], index: 0, kind: input, shape index: {}]   ;;  %s11667_s1 = inlined_call_operand.vmem [shape: bf16[2,32,128], index: 1, kind: input, shape index: {}]   ;;  %s11668_s2 = inlined_call_operand.vmem [shape: f32[2,1,128], index: 2, kind: input, shape index: {}]   ;;  %s11669_s3 = inlined_call_operand.vmem [shape: bf16[2,128,32], index: 3, kind: input, shape index: {}]   ;;  %s11670_s4 = inlined_call_operand.vmem [shape: f32[2,1,32], index: 4, kind: input, shape index: {}]   ;;  %s11671_s5 = inlined_call_operand.vmem [shape: f32[512,32], index: 5, kind: output, shape index: {}]  }
   0x1   :  { %v23_v0 = vld [vmem:[%s11666_s0 + $0x10] sm:$0xff]  ;;  %v21_v1 = vld [vmem:[%s11666_s0] sm:$0xff]  ;;  %v24_v6 = vld [vmem:[%s11666_s0 + $0x18] sm:$0xff]  ;;  %5624 = vrcp.f32 %v6219_v14 }
   0x2   :  { %v92_v2 = vsel %vm85_vm0, %v23_v0, 0.0  ;;  %v86_v3 = vsel %vm85_vm0, %v21_v1, 0.0  ;;  %v25_v4 = vld [vmem:[%s11666_s0 + $0x20] sm:$0xff]  ;;  %v22_v7 = vld [vmem:[%s11666_s0 + $0x8] sm:$0xff]  ;;  %v95_v9 = vsel %vm85_vm0, %v24_v6, 0.0  ;;  %v27_v12 = vld [vmem:[%s11666_s0 + $0x30] sm:$0xff] }
   0x3   :  { %93 = vadd.xlane.f32.xlu1 %v92_v2  ;;  %87 = vadd.xlane.f32.xlu0 %v86_v3  ;;  %v98_v5 = vsel %vm85_vm0, %v25_v4, 0.0  ;;  %v26_v8 = vld [vmem:[%s11666_s0 + $0x28] sm:$0xff]  ;;  %v89_v10 = vsel %vm85_vm0, %v22_v7, 0.0  ;;  %v104_v13 = vsel %vm85_vm0, %v27_v12, 0.0  ;;  %v6292_v33 = vld [vmem:[%s11666_s0 + $0x38] sm:$0xff]  ;;  %v6317_v47 = vld [vmem:[%s11666_s0 + $0x40] sm:$0xff] }
   0x4   :  { %99 = vadd.xlane.f32.xlu2 %v98_v5  ;;  %v101_v11 = vsel %vm85_vm0, %v26_v8, 0.0  ;;  %v107_v40 = vsel %vm85_vm0, %v6292_v33, 0.0  ;;  %v110_v51 = vsel %vm85_vm0, %v6317_v47, 0.0  ;;  %v6333_v56 = vld [vmem:[%s11666_s0 + $0x58] sm:$0xff]  ;;  %v6338_v57 = vld [vmem:[%s11666_s0 + $0x48] sm:$0xff]  ;;  %v6352_v63 = vld [vmem:[%s11666_s0 + $0x60] sm:$0xff] }
   0x5   :  { %v119_v59 = vsel %vm85_vm0, %v6333_v56, 0.0  ;;  %v113_v61 = vsel %vm85_vm0, %v6338_v57, 0.0 }
   0x7   :  { %v5625_v15 = vpop.eup %5624 }
   0x8   :  { %v279_v16 = vmul.f32 32.0, %v5625_v15  ;;  %vm283_vm1 = vweird.f32 %v5625_v15 }
   0xa   :  { %v280_v17 = vsub.f32 1.0, %v279_v16 }
   0xb   :  { %96 = vadd.xlane.f32.xlu1 %v95_v9  ;;  %90 = vadd.xlane.f32.xlu0 %v89_v10  ;;  %v5599_v9 = vld [vmem:[%s11667_s1] sm:$0xff] }
   0xc   :  { %102 = vadd.xlane.f32.xlu2 %v101_v11  ;;  %v281_v18 = vmul.f32 %v5625_v15, %v280_v17 }
   0xe   :  { %v282_v19 = vadd.f32 %v5625_v15, %v281_v18 }
  0x10   :  { %v6278_v20 = vsel %vm283_vm1, %v5625_v15, %v282_v19 }
  0x14   :  { %105 = vadd.xlane.f32.xlu2 %v104_v13 }
  0x76   :  { %v94_v21 = vpop.xlane.xlu1 %93  ;;  %v88_v22 = vpop.xlane.xlu0 %87 }
  0x77   :  { %v285_v23 = vmul.f32 %v6278_v20, %v88_v22  ;;  %v100_v24 = vpop.xlane.xlu2 %99  ;;  %v287_v36 = vmul.f32 %v6278_v20, %v94_v21 }
  0x78   :  { %v289_v32 = vmul.f32 %v6278_v20, %v100_v24 }
  0x79   :  { %v6281_v25 = vsub.f32 %v21_v1, %v285_v23  ;;  %v6309_v44 = vsub.f32 %v23_v0, %v287_v36  ;;  %v6357_v0 = vld [vmem:[%s11666_s0 + $0x50] sm:$0xff]  ;;  %v122_v1 = vsel %vm85_vm0, %v6352_v63, 0.0 }
  0x7a   :  { %v6299_v38 = vsub.f32 %v25_v4, %v289_v32  ;;  %v116_v3 = vsel %vm85_vm0, %v6357_v0, 0.0  ;;  %v6367_v4 = vld [vmem:[%s11666_s0 + $0x68] sm:$0xff] }
  0x7b   :  { %v413_v26 = vmul.f32 %v6281_v25, %v6281_v25  ;;  %v415_v48 = vmul.f32 %v6309_v44, %v6309_v44  ;;  %v125_v5 = vsel %vm85_vm0, %v6367_v4, 0.0 }
  0x7c   :  { %v417_v46 = vmul.f32 %v6299_v38, %v6299_v38 }
  0x7d   :  { %v477_v27 = vsel %vm85_vm0, %v413_v26, 0.0  ;;  %v483_v53 = vsel %vm85_vm0, %v415_v48, 0.0 }
  0x7e   :  { %v97_v28 = vpop.xlane.xlu1 %96  ;;  %478 = vadd.xlane.f32.xlu0 %v477_v27  ;;  %v91_v29 = vpop.xlane.xlu0 %90  ;;  %v489_v50 = vsel %vm85_vm0, %v417_v46, 0.0 }
  0x7f   :  { %v288_v30 = vmul.f32 %v6278_v20, %v97_v28  ;;  %v286_v31 = vmul.f32 %v6278_v20, %v91_v29  ;;  %v103_v37 = vpop.xlane.xlu2 %102 }
  0x80   :  { %v290_v45 = vmul.f32 %v6278_v20, %v103_v37 }
  0x81   :  { %v6294_v34 = vsub.f32 %v24_v6, %v288_v30  ;;  %v6296_v35 = vsub.f32 %v22_v7, %v286_v31  ;;  %v6374_v6 = vld [vmem:[%s11666_s0 + $0x70] sm:$0xff] }
  0x82   :  { %v6321_v49 = vsub.f32 %v26_v8, %v290_v45  ;;  %v128_v7 = vsel %vm85_vm0, %v6374_v6, 0.0  ;;  %v5600_v8 = vld [vmem:[%s11667_s1 + $0x8] sm:$0xff] }
  0x83   :  { %v416_v39 = vmul.f32 %v6294_v34, %v6294_v34  ;;  %v414_v41 = vmul.f32 %v6296_v35, %v6296_v35  ;;  %1655 = vmatpush.bf16.msra.mxu0 %v5600_v8  ;;  %v6437_v8 = vld [vmem:[%s11666_s0 + $0x78] sm:$0xff] }
  0x84   :  { %v418_v55 = vmul.f32 %v6321_v49, %v6321_v49 }
  0x85   :  { %v486_v42 = vsel %vm85_vm0, %v416_v39, 0.0  ;;  %v480_v43 = vsel %vm85_vm0, %v414_v41, 0.0 }
  0x86   :  { %487 = vadd.xlane.f32.xlu2 %v486_v42  ;;  %108 = vadd.xlane.f32.xlu0 %v107_v40  ;;  %v492_v60 = vsel %vm85_vm0, %v418_v55, 0.0 }
  0x87   :  { %481 = vadd.xlane.f32.xlu1 %v480_v43  ;;  %v106_v52 = vpop.xlane.xlu2 %105  ;;  %1656 = vmatpush.bf16.msra.mxu0 %v5599_v9 }
  0x88   :  { %v291_v54 = vmul.f32 %v6278_v20, %v106_v52 }
  0x8a   :  { %v6340_v58 = vsub.f32 %v27_v12, %v291_v54 }
  0x8c   :  { %v419_v62 = vmul.f32 %v6340_v58, %v6340_v58 }
  0x8e   :  { %490 = vadd.xlane.f32.xlu2 %v489_v50  ;;  %111 = vadd.xlane.f32.xlu0 %v110_v51  ;;  %v495_v2 = vsel %vm85_vm0, %v419_v62, 0.0 }
  0x8f   :  { %484 = vadd.xlane.f32.xlu1 %v483_v53 }
  0x96   :  { %120 = vadd.xlane.f32.xlu2 %v119_v59  ;;  %493 = vadd.xlane.f32.xlu0 %v492_v60 }
  0x97   :  { %114 = vadd.xlane.f32.xlu1 %v113_v61 }
  0x9e   :  { %123 = vadd.xlane.f32.xlu2 %v122_v1  ;;  %496 = vadd.xlane.f32.xlu0 %v495_v2 }
  0x9f   :  { %117 = vadd.xlane.f32.xlu1 %v116_v3 }
  0xa6   :  { %126 = vadd.xlane.f32.xlu0 %v125_v5 }
  0xae   :  { %129 = vadd.xlane.f32.xlu0 %v128_v7 }
  0xf1   :  { %v479_v10 = vpop.xlane.xlu0 %478 }
  0xf2   :  { %v669_v11 = vmul.f32 %v479_v10, %v6278_v20 }
  0xf4   :  { %v733_v12 = vadd.f32 1e-05, %v669_v11 }
  0xf6   :  { %5626 = vrsqrt.f32 %v733_v12  ;;  %vm803_vm3 = vweird.f32 %v733_v12 }
  0xf9   :  { %v488_v13 = vpop.xlane.xlu2 %487  ;;  %v109_v14 = vpop.xlane.xlu0 %108 }
  0xfa   :  { %v672_v15 = vmul.f32 %v488_v13, %v6278_v20  ;;  %v482_v16 = vpop.xlane.xlu1 %481  ;;  %v292_v17 = vmul.f32 %v6278_v20, %v109_v14 }
  0xfb   :  { %v670_v18 = vmul.f32 %v482_v16, %v6278_v20  ;;  %v131_v16 = vsel %vm85_vm0, %v6437_v8, 0.0 }
  0xfc   :  { %v6388_v19 = vpop.eup %5626  ;;  %v6391_v21 = vsub.f32 %v6292_v33, %v292_v17  ;;  %v6394_v23 = vadd.f32 1e-05, %v672_v15 }
  0xfd   :  { %v798_v22 = vmul.f32 %v6388_v19, %v733_v12  ;;  %v734_v24 = vadd.f32 1e-05, %v670_v18  ;;  %vm804_vm2 = vweird.f32 %v6388_v19 }
  0xfe   :  { %v420_v26 = vmul.f32 %v6391_v21, %v6391_v21  ;;  %vm6439_vm5 = vmor %vm803_vm3, %vm804_vm2  ;;  %vm833_vm9 = vweird.f32 %v6394_v23 }
  0xff   :  { %v799_v27 = vmul.f32 %v6388_v19, %v798_v22  ;;  %5628 = vrsqrt.f32 %v734_v24  ;;  %vm813_vm6 = vweird.f32 %v734_v24 }
 0x100   :  { %v498_v28 = vsel %vm85_vm0, %v420_v26, 0.0  ;;  %5630 = vrsqrt.f32 %v6394_v23 }
 0x101   :  { %v491_v29 = vpop.xlane.xlu2 %490  ;;  %499 = vadd.xlane.f32.xlu1 %v498_v28  ;;  %v112_v30 = vpop.xlane.xlu0 %111  ;;  %v800_v33 = vmul.f32 0.5, %v799_v27 }
 0x102   :  { %v485_v31 = vpop.xlane.xlu1 %484  ;;  %v293_v32 = vmul.f32 %v6278_v20, %v112_v30  ;;  %v673_v48 = vmul.f32 %v491_v29, %v6278_v20 }
 0x103   :  { %v671_v36 = vmul.f32 %v485_v31, %v6278_v20  ;;  %v801_v43 = vsub.f32 1.5, %v800_v33 }
 0x104   :  { %v6404_v37 = vsub.f32 %v6317_v47, %v293_v32  ;;  %v6429_v5 = vadd.f32 1e-05, %v673_v48 }
 0x105   :  { %v5629_v39 = vpop.eup %5628  ;;  %v6406_v40 = vadd.f32 1e-05, %v671_v36  ;;  %v802_v61 = vmul.f32 %v6388_v19, %v801_v43  ;;  %v6481_v43 = vld [vmem:[%s11666_s0 + $0x80] sm:$0xff] }
 0x106   :  { %v808_v41 = vmul.f32 %v5629_v39, %v734_v24  ;;  %v6408_v42 = vpop.eup %5630  ;;  %v421_v45 = vmul.f32 %v6404_v37, %v6404_v37  ;;  %vm814_vm4 = vweird.f32 %v5629_v39  ;;  %v134_v48 = vsel %vm85_vm0, %v6481_v43, 0.0 }
 0x107   :  { %5632 = vrsqrt.f32 %v6406_v40  ;;  %v828_v52 = vmul.f32 %v6408_v42, %v6394_v23  ;;  %v806_v12 = vsel %vm6439_vm5, %v6388_v19, %v802_v61  ;;  %vm6453_vm7 = vmor %vm813_vm6, %vm814_vm4  ;;  %vm834_vm10 = vweird.f32 %v6408_v42  ;;  %v6518_v61 = vld [vmem:[%s11666_s0 + $0x88] sm:$0xff] }
 0x108   :  { %v809_v46 = vmul.f32 %v5629_v39, %v808_v41  ;;  %v501_v51 = vsel %vm85_vm0, %v421_v45, 0.0  ;;  %v1437_v29 = vmul.f32 %v806_v12, %v6281_v25  ;;  %vm823_vm11 = vweird.f32 %v6406_v40  ;;  %vm835_vm13 = vmor %vm833_vm9, %vm834_vm10 }
 0x109   :  { %v121_v50 = vpop.xlane.xlu2 %120  ;;  %v494_v47 = vpop.xlane.xlu0 %493  ;;  %502 = vadd.xlane.f32.xlu1 %v501_v51  ;;  %vm843_vm2 = vweird.f32 %v6429_v5 }
 0x10a   :  { %v810_v53 = vmul.f32 0.5, %v809_v46  ;;  %v296_v54 = vmul.f32 %v6278_v20, %v121_v50  ;;  %v115_v55 = vpop.xlane.xlu1 %114  ;;  %v674_v59 = vmul.f32 %v494_v47, %v6278_v20 }
 0x10b   :  { %v294_v60 = vmul.f32 %v6278_v20, %v115_v55 }
 0x10c   :  { %v811_v62 = vsub.f32 1.5, %v810_v53  ;;  %v6423_v1 = vsub.f32 %v6333_v56, %v296_v54  ;;  %v6425_v2 = vadd.f32 1e-05, %v674_v59  ;;  %v829_v56 = vmul.f32 %v6408_v42, %v828_v52 }
 0x10d   :  { %v6427_v3 = vpop.eup %5632  ;;  %v6432_v7 = vsub.f32 %v6338_v57, %v294_v60  ;;  %v6513_v60 = vld [vmem:[%s11666_s0 + $0x98] sm:$0xff] }
 0x10e   :  { %v818_v10 = vmul.f32 %v6427_v3, %v6406_v40  ;;  %v424_v11 = vmul.f32 %v6423_v1, %v6423_v1  ;;  %v812_v13 = vmul.f32 %v5629_v39, %v811_v62  ;;  %5634 = vrsqrt.f32 %v6425_v2 }
 0x10f   :  { %v422_v57 = vmul.f32 %v6432_v7, %v6432_v7  ;;  %5636 = vrsqrt.f32 %v6429_v5  ;;  %v830_v31 = vmul.f32 0.5, %v829_v56  ;;  %vm824_vm8 = vweird.f32 %v6427_v3 }
 0x110   :  { %v819_v15 = vmul.f32 %v6427_v3, %v818_v10  ;;  %v510_v18 = vsel %vm85_vm0, %v424_v11, 0.0  ;;  %v816_v24 = vsel %vm6453_vm7, %v5629_v39, %v812_v13  ;;  %vm825_vm12 = vmor %vm823_vm11, %vm824_vm8  ;;  %v143_v56 = vsel %vm85_vm0, %v6513_v60, 0.0 }
 0x111   :  { %v124_v17 = vpop.xlane.xlu2 %123  ;;  %v504_v22 = vsel %vm85_vm0, %v422_v57, 0.0  ;;  %v6464_v19 = vpop.xlane.xlu0 %496  ;;  %511 = vadd.xlane.f32.xlu0 %v510_v18  ;;  %v1438_v30 = vmul.f32 %v816_v24, %v6296_v35  ;;  %132 = vadd.xlane.f32.xlu1 %v131_v16  ;;  %v137_v10 = vsel %vm85_vm0, %v6518_v61, 0.0  ;;  %v6539_v16 = vld [vmem:[%s11666_s0 + $0xa0] sm:$0xff]  ;;  %vm853_vm14 = vweird.f32 %v6425_v2 }
 0x112   :  { %v820_v26 = vmul.f32 0.5, %v819_v15  ;;  %v297_v27 = vmul.f32 %v6278_v20, %v124_v17  ;;  %505 = vadd.xlane.f32.xlu2 %v504_v22  ;;  %v118_v28 = vpop.xlane.xlu1 %117 }
 0x113   :  { %v295_v32 = vmul.f32 %v6278_v20, %v118_v28  ;;  %v1505_v36 = vpack.c.bf16 %v1438_v30, %v1437_v29 }
 0x114   :  { %v6473_v33 = vsub.f32 %v6352_v63, %v297_v27  ;;  %v821_v41 = vsub.f32 1.5, %v820_v26  ;;  %v6483_v25 = vpop.eup %5634  ;;  %v831_v63 = vsub.f32 1.5, %v830_v31 }
 0x115   :  { %v6476_v39 = vsub.f32 %v6357_v0, %v295_v32  ;;  %5441 = vmatmul.msk.bf16.vlgmr.msra.gmra.mxu0 %vm85_vm0, %v1505_v36  ;;  %v6488_v45 = vpop.eup %5636  ;;  %v848_v50 = vmul.f32 %v6483_v25, %v6425_v2  ;;  %vm854_vm15 = vweird.f32 %v6483_v25  ;;  %v6566_v2 = vld [vmem:[%s11666_s0 + $0xa8] sm:$0xff] }
 0x116   :  { %v425_v35 = vmul.f32 %v6473_v33, %v6473_v33  ;;  %v822_v52 = vmul.f32 %v6427_v3, %v821_v41  ;;  %v838_v54 = vmul.f32 %v6488_v45, %v6429_v5  ;;  %v832_v55 = vmul.f32 %v6408_v42, %v831_v63  ;;  %vm855_vm1 = vmor %vm853_vm14, %vm854_vm15  ;;  %v6577_v41 = vld [vmem:[%s11666_s0 + $0xb0] sm:$0xff] }
 0x117   :  { %v423_v46 = vmul.f32 %v6476_v39, %v6476_v39  ;;  %v849_v62 = vmul.f32 %v6483_v25, %v848_v50  ;;  %vm844_vm3 = vweird.f32 %v6488_v45  ;;  %v149_v31 = vsel %vm85_vm0, %v6566_v2, 0.0 }
 0x118   :  { %v513_v0 = vsel %vm85_vm0, %v425_v35, 0.0  ;;  %v826_v40 = vsel %vm825_vm12, %v6427_v3, %v822_v52  ;;  %v839_v9 = vmul.f32 %v6488_v45, %v838_v54  ;;  %v836_v11 = vsel %vm835_vm13, %v6408_v42, %v832_v55  ;;  %vm845_vm4 = vmor %vm843_vm2, %vm844_vm3  ;;  %v5606_v52 = vld [vmem:[%s11669_s3 + $0x28] sm:$0xff] }
 0x119   :  { %v507_v51 = vsel %vm85_vm0, %v423_v46, 0.0  ;;  %v127_v47 = vpop.xlane.xlu0 %126  ;;  %514 = vadd.xlane.f32.xlu0 %v513_v0  ;;  %135 = vadd.xlane.f32.xlu1 %v134_v48  ;;  %v1439_v3 = vmul.f32 %v826_v40, %v6309_v44  ;;  %v850_v12 = vmul.f32 0.5, %v849_v62  ;;  %v1440_v14 = vmul.f32 %v836_v11, %v6294_v34  ;;  %v6547_v44 = vld [vmem:[%s11666_s0 + $0x90] sm:$0xff]  ;;  %v5608_v0 = vld [vmem:[%s11669_s3 + $0x38] sm:$0xff] }
 0x11a   :  { %508 = vadd.xlane.f32.xlu2 %v507_v51  ;;  %v298_v53 = vmul.f32 %v6278_v20, %v127_v47  ;;  %v840_v15 = vmul.f32 0.5, %v839_v9  ;;  %v146_v34 = vsel %vm85_vm0, %v6539_v16, 0.0  ;;  %v675_v35 = vmul.f32 %v6464_v19, %v6278_v20  ;;  %2494 = vmatpush.bf16.msra.mxu1 %v5608_v0  ;;  %v5607_v51 = vld [vmem:[%s11669_s3 + $0x30] sm:$0xff] }
 0x11b   :  { %v1506_v17 = vpack.c.bf16 %v1440_v14, %v1439_v3  ;;  %v851_v18 = vsub.f32 1.5, %v850_v12  ;;  %v5604_v12 = vld [vmem:[%s11669_s3 + $0x18] sm:$0xff] }
 0x11c   :  { %v6508_v59 = vsub.f32 %v6367_v4, %v298_v53  ;;  %v841_v24 = vsub.f32 1.5, %v840_v15 }
 0x11d   :  { %v852_v27 = vmul.f32 %v6483_v25, %v851_v18 }
 0x11e   :  { %v426_v4 = vmul.f32 %v6508_v59, %v6508_v59  ;;  %v842_v28 = vmul.f32 %v6488_v45, %v841_v24  ;;  %2495 = vmatpush.bf16.msra.mxu1 %v5607_v51  ;;  %v6651_v51 = vld [vmem:[%s11668_s2] ss:$0 sm:$0xff] }
 0x11f   :  { %v856_v29 = vsel %vm855_vm1, %v6483_v25, %v852_v27  ;;  %v152_v25 = vsel %vm85_vm0, %v6577_v41, 0.0 }
 0x120   :  { %v516_v57 = vsel %vm85_vm0, %v426_v4, 0.0  ;;  %v846_v30 = vsel %vm845_vm4, %v6488_v45, %v842_v28  ;;  %v1442_v5 = vmul.f32 %v856_v29, %v6321_v49  ;;  %v739_v45 = vadd.f32 1e-05, %v675_v35  ;;  %v5605_v4 = vld [vmem:[%s11669_s3 + $0x20] sm:$0xff]  ;;  %v5603_v28 = vld [vmem:[%s11669_s3 + $0x10] sm:$0xff] }
 0x121   :  { %v130_v23 = vpop.xlane.xlu0 %129  ;;  %144 = vadd.xlane.f32.xlu0 %v143_v56  ;;  %517 = vadd.xlane.f32.xlu1 %v516_v57  ;;  %v1441_v32 = vmul.f32 %v846_v30, %v6299_v38 }
 0x122   :  { %138 = vadd.xlane.f32.xlu2 %v137_v10  ;;  %v299_v13 = vmul.f32 %v6278_v20, %v130_v23  ;;  %5638 = vrsqrt.f32 %v739_v45  ;;  %2496 = vmatpush.bf16.msra.mxu1 %v5606_v52  ;;  %vm863_vm5 = vweird.f32 %v739_v45 }
 0x123   :  { %v1507_v36 = vpack.c.bf16 %v1442_v5, %v1441_v32 }
 0x124   :  { %v6542_v42 = vsub.f32 %v6374_v6, %v299_v13  ;;  %v140_v6 = vsel %vm85_vm0, %v6547_v44, 0.0 }
 0x125   :  { %5442 = vmatmul.msk.bf16.gmra.mxu0 %vm85_vm0, %v1506_v17 }
 0x126   :  { %v427_v22 = vmul.f32 %v6542_v42, %v6542_v42  ;;  %2497 = vmatpush.bf16.msra.mxu1 %v5605_v4 }
 0x128   :  { %v519_v26 = vsel %vm85_vm0, %v427_v22, 0.0  ;;  %v5639_v49 = vpop.eup %5638 }
 0x129   :  { %147 = vadd.xlane.f32.xlu0 %v146_v34  ;;  %520 = vadd.xlane.f32.xlu1 %v519_v26  ;;  %v858_v38 = vmul.f32 %v5639_v49, %v739_v45  ;;  %vm864_vm6 = vweird.f32 %v5639_v49 }
 0x12a   :  { %141 = vadd.xlane.f32.xlu2 %v140_v6  ;;  %vm6601_vm7 = vmor %vm863_vm5, %vm864_vm6  ;;  %2498 = vmatpush.bf16.msra.mxu1 %v5604_v12 }
 0x12b   :  { %v859_v50 = vmul.f32 %v5639_v49, %v858_v38 }
 0x12d   :  { %v860_v19 = vmul.f32 0.5, %v859_v50 }
 0x12e   :  { %2499 = vmatpush.bf16.msra.mxu1 %v5603_v28 }
 0x12f   :  { %v861_v55 = vsub.f32 1.5, %v860_v19  ;;  %v5601_v19 = vld [vmem:[%s11669_s3] sm:$0xff] }
 0x131   :  { %150 = vadd.xlane.f32.xlu1 %v149_v31  ;;  %v862_v10 = vmul.f32 %v5639_v49, %v861_v55 }
 0x133   :  { %v866_v22 = vsel %vm6601_vm7, %v5639_v49, %v862_v10  ;;  %v5602_v49 = vld [vmem:[%s11669_s3 + $0x8] sm:$0xff] }
 0x134   :  { %v1443_v5 = vmul.f32 %v866_v22, %v6340_v58  ;;  %2500 = vmatpush.bf16.msra.mxu1 %v5602_v49 }
 0x135   :  { %5443 = vmatmul.msk.bf16.gmra.mxu0 %vm85_vm0, %v1507_v36 }
 0x138   :  { %2501 = vmatpush.bf16.msra.mxu1 %v5601_v19 }
 0x139   :  { %153 = vadd.xlane.f32.xlu1 %v152_v25 }
 0x174   :  { %v500_v63 = vpop.xlane.xlu1 %499 }
 0x175   :  { %v676_v46 = vmul.f32 %v500_v63, %v6278_v20 }
 0x177   :  { %v740_v48 = vadd.f32 1e-05, %v676_v46 }
 0x179   :  { %5640 = vrsqrt.f32 %v740_v48  ;;  %vm873_vm8 = vweird.f32 %v740_v48 }
 0x17c   :  { %v503_v47 = vpop.xlane.xlu1 %502 }
 0x17d   :  { %v677_v53 = vmul.f32 %v503_v47, %v6278_v20 }
 0x17f   :  { %v5641_v54 = vpop.eup %5640  ;;  %v6595_v40 = vadd.f32 1e-05, %v677_v53 }
 0x180   :  { %v868_v62 = vmul.f32 %v5641_v54, %v740_v48  ;;  %vm874_vm9 = vweird.f32 %v5641_v54 }
 0x181   :  { %5642 = vrsqrt.f32 %v6595_v40  ;;  %vm875_vm10 = vmor %vm873_vm8, %vm874_vm9  ;;  %vm883_vm11 = vweird.f32 %v6595_v40 }
 0x182   :  { %v869_v9 = vmul.f32 %v5641_v54, %v868_v62 }
 0x184   :  { %v870_v56 = vmul.f32 0.5, %v869_v9  ;;  %v512_v3 = vpop.xlane.xlu0 %511  ;;  %v133_v14 = vpop.xlane.xlu1 %132 }
 0x185   :  { %v506_v57 = vpop.xlane.xlu2 %505  ;;  %v680_v15 = vmul.f32 %v512_v3, %v6278_v20  ;;  %v300_v17 = vmul.f32 %v6278_v20, %v133_v14 }
 0x186   :  { %v871_v23 = vsub.f32 1.5, %v870_v56  ;;  %v678_v13 = vmul.f32 %v506_v57, %v6278_v20 }
 0x187   :  { %v6611_v18 = vpop.eup %5642  ;;  %v6621_v26 = vsub.f32 %v6437_v8, %v300_v17  ;;  %v6623_v27 = vadd.f32 1e-05, %v680_v15 }
 0x188   :  { %v6613_v34 = vadd.f32 1e-05, %v678_v13  ;;  %v872_v24 = vmul.f32 %v5641_v54, %v871_v23  ;;  %v878_v6 = vmul.f32 %v6611_v18, %v6595_v40  ;;  %vm884_vm12 = vweird.f32 %v6611_v18 }
 0x189   :  { %v428_v31 = vmul.f32 %v6621_v26, %v6621_v26  ;;  %vm6675_vm13 = vmor %vm883_vm11, %vm884_vm12  ;;  %vm913_vm3 = vweird.f32 %v6623_v27 }
 0x18a   :  { %5644 = vrsqrt.f32 %v6613_v34  ;;  %v876_v29 = vsel %vm875_vm10, %v5641_v54, %v872_v24  ;;  %v879_v30 = vmul.f32 %v6611_v18, %v878_v6  ;;  %v6691_v24 = vld [vmem:[%s11666_s0 + $0xb8] sm:$0xff]  ;;  %vm893_vm15 = vweird.f32 %v6613_v34 }
 0x18b   :  { %v1444_v32 = vmul.f32 %v876_v29, %v6391_v21  ;;  %5646 = vrsqrt.f32 %v6623_v27  ;;  %v522_v25 = vsel %vm85_vm0, %v428_v31, 0.0 }
 0x18c   :  { %v880_v8 = vmul.f32 0.5, %v879_v30  ;;  %v515_v35 = vpop.xlane.xlu0 %514  ;;  %523 = vadd.xlane.f32.xlu2 %v522_v25  ;;  %v136_v63 = vpop.xlane.xlu1 %135 }
 0x18d   :  { %v509_v36 = vpop.xlane.xlu2 %508  ;;  %v1508_v45 = vpack.c.bf16 %v1444_v32, %v1443_v5  ;;  %v301_v58 = vmul.f32 %v6278_v20, %v136_v63  ;;  %v681_v47 = vmul.f32 %v515_v35, %v6278_v20 }
 0x18e   :  { %v679_v38 = vmul.f32 %v509_v36, %v6278_v20  ;;  %v881_v46 = vsub.f32 1.5, %v880_v8  ;;  %v155_v8 = vsel %vm85_vm0, %v6691_v24, 0.0 }
 0x18f   :  { %5444 = vmatmul.msk.bf16.gmra.mxu0 %vm85_vm0, %v1508_v45  ;;  %v6646_v50 = vsub.f32 %v6481_v43, %v301_v58  ;;  %v6671_v57 = vadd.f32 1e-05, %v681_v47 }
 0x190   :  { %v5645_v21 = vpop.eup %5644  ;;  %v6642_v0 = vadd.f32 1e-05, %v679_v38  ;;  %v882_v55 = vmul.f32 %v6611_v18, %v881_v46 }
 0x191   :  { %v888_v48 = vmul.f32 %v5645_v21, %v6613_v34  ;;  %v6658_v52 = vpop.eup %5646  ;;  %v429_v43 = vmul.f32 %v6646_v50, %v6646_v50  ;;  %vm894_vm14 = vweird.f32 %v5645_v21  ;;  %vm923_vm10 = vweird.f32 %v6671_v57 }
 0x192   :  { %5648 = vrsqrt.f32 %v6642_v0  ;;  %v1658_v54 = vpop.f32.mrf.mxu0  ;;  %v908_v11 = vmul.f32 %v6658_v52, %v6623_v27  ;;  %v886_v6 = vsel %vm6675_vm13, %v6611_v18, %v882_v55  ;;  %vm6707_vm1 = vmor %vm893_vm15, %vm894_vm14  ;;  %vm914_vm4 = vweird.f32 %v6658_v52 }
 0x193   :  { %v889_v53 = vmul.f32 %v5645_v21, %v888_v48  ;;  %v6666_v4 = vadd.f32 %v6651_v51, %v1658_v54  ;;  %v525_v56 = vsel %vm85_vm0, %v429_v43, 0.0  ;;  %5650 = vrsqrt.f32 %v6671_v57  ;;  %vm6801_vm7 = vmor %vm913_vm3, %vm914_vm4 }
 0x194   :  { %v145_v10 = vpop.xlane.xlu0 %144  ;;  %526 = vadd.xlane.f32.xlu2 %v525_v56  ;;  %v518_v40 = vpop.xlane.xlu1 %517  ;;  %v1445_v45 = vmul.f32 %v886_v6, %v6404_v37  ;;  %v6745_v56 = vld [vmem:[%s11666_s0 + $0xc0] sm:$0xff]  ;;  %vm903_vm5 = vweird.f32 %v6642_v0 }
 0x195   :  { %v890_v62 = vmul.f32 0.5, %v889_v53  ;;  %v139_v9 = vpop.xlane.xlu2 %138  ;;  %v304_v12 = vmul.f32 %v6278_v20, %v145_v10  ;;  %v682_v14 = vmul.f32 %v518_v40, %v6278_v20  ;;  %v1882_v29 = vmul.f32 %v6666_v4, %v6666_v4 }
 0x196   :  { %v302_v3 = vmul.f32 %v6278_v20, %v139_v9 }
 0x197   :  { %v891_v13 = vsub.f32 1.5, %v890_v62  ;;  %v6686_v22 = vsub.f32 %v6513_v60, %v304_v12  ;;  %v909_v60 = vmul.f32 %v6658_v52, %v908_v11  ;;  %v1946_v38 = vmul.f32 %v1882_v29, %v6666_v4 }
 0x198   :  { %v6680_v15 = vpop.eup %5648  ;;  %v6683_v17 = vsub.f32 %v6518_v61, %v302_v3  ;;  %v6700_v61 = vadd.f32 1e-05, %v682_v14  ;;  %v158_v12 = vsel %vm85_vm0, %v6745_v56, 0.0 }
 0x199   :  { %v898_v28 = vmul.f32 %v6680_v15, %v6642_v0  ;;  %v892_v30 = vmul.f32 %v5645_v21, %v891_v13  ;;  %v432_v34 = vmul.f32 %v6686_v22, %v6686_v22  ;;  %v910_v19 = vmul.f32 0.5, %v909_v60  ;;  %v6733_v55 = vpop.eup %5650 }
 0x19a   :  { %v430_v31 = vmul.f32 %v6683_v17, %v6683_v17  ;;  %5652 = vrsqrt.f32 %v6700_v61  ;;  %v1660_v32 = vpop.f32.mrf.mxu0  ;;  %v2010_v11 = vmul.f32 0.044715, %v1946_v38  ;;  %vm904_vm2 = vweird.f32 %v6680_v15  ;;  %v6792_v38 = vld [vmem:[%s11666_s0 + $0xd8] sm:$0xff] }
 0x19b   :  { %v899_v5 = vmul.f32 %v6680_v15, %v898_v28  ;;  %v6718_v36 = vadd.f32 %v6651_v51, %v1660_v32  ;;  %v896_v35 = vsel %vm6707_vm1, %v5645_v21, %v892_v30  ;;  %v534_v58 = vsel %vm85_vm0, %v432_v34, 0.0  ;;  %v6777_v32 = vld [vmem:[%s11666_s0 + $0xc8] sm:$0xff]  ;;  %vm6782_vm6 = vmor %vm903_vm5, %vm904_vm2 }
 0x19c   :  { %v528_v25 = vsel %vm85_vm0, %v430_v31, 0.0  ;;  %v148_v46 = vpop.xlane.xlu0 %147  ;;  %v1446_v48 = vmul.f32 %v896_v35, %v6432_v7  ;;  %156 = vadd.xlane.f32.xlu2 %v155_v8  ;;  %v6730_v21 = vpop.xlane.xlu1 %520  ;;  %535 = vadd.xlane.f32.xlu1 %v534_v58  ;;  %v911_v3 = vsub.f32 1.5, %v910_v19  ;;  %v2074_v30 = vadd.f32 %v2010_v11, %v6666_v4 }
 0x19d   :  { %v900_v49 = vmul.f32 0.5, %v899_v5  ;;  %529 = vadd.xlane.f32.xlu0 %v528_v25  ;;  %v142_v63 = vpop.xlane.xlu2 %141  ;;  %v1883_v47 = vmul.f32 %v6718_v36, %v6718_v36  ;;  %v305_v37 = vmul.f32 %v6278_v20, %v148_v46  ;;  %v918_v31 = vmul.f32 %v6733_v55, %v6671_v57 }
 0x19e   :  { %v303_v53 = vmul.f32 %v6278_v20, %v142_v63  ;;  %v1509_v43 = vpack.c.bf16 %v1446_v48, %v1445_v45  ;;  %v912_v8 = vmul.f32 %v6658_v52, %v911_v3  ;;  %v2138_v25 = vmul.f32 0.7978846, %v2074_v30  ;;  %v6838_v30 = vld [vmem:[%s11666_s0 + $0xe0] sm:$0xff] }
 0x19f   :  { %v901_v54 = vsub.f32 1.5, %v900_v49  ;;  %v1947_v62 = vmul.f32 %v1883_v47, %v6718_v36  ;;  %v6740_v9 = vsub.f32 %v6539_v16, %v305_v37  ;;  %v161_v48 = vsel %vm85_vm0, %v6777_v32, 0.0 }
 0x1a0   :  { %v6737_v7 = vsub.f32 %v6547_v44, %v303_v53  ;;  %v6747_v10 = vpop.eup %5652  ;;  %5445 = vmatmul.msk.bf16.gmra.mxu0 %vm85_vm0, %v1509_v43  ;;  %5654 = vtanh.f32 %v2138_v25  ;;  %v919_v19 = vmul.f32 %v6733_v55, %v918_v31  ;;  %vm933_vm8 = vweird.f32 %v6700_v61 }
 0x1a1   :  { %v433_v44 = vmul.f32 %v6740_v9, %v6740_v9  ;;  %v902_v23 = vmul.f32 %v6680_v15, %v901_v54  ;;  %v2011_v13 = vmul.f32 0.044715, %v1947_v62  ;;  %v928_v14 = vmul.f32 %v6747_v10, %v6700_v61  ;;  %v6869_v61 = vld [vmem:[%s11666_s0 + $0xe8] sm:$0xff] }
 0x1a2   :  { %v431_v40 = vmul.f32 %v6737_v7, %v6737_v7  ;;  %v1663_v16 = vpop.f32.mrf.mxu0  ;;  %v920_v3 = vmul.f32 0.5, %v919_v19  ;;  %v1819_v31 = vmul.f32 0.5, %v6718_v36  ;;  %vm934_vm9 = vweird.f32 %v6747_v10 }
 0x1a3   :  { %v6761_v6 = vadd.f32 %v6651_v51, %v1663_v16  ;;  %v537_v29 = vsel %vm85_vm0, %v433_v44, 0.0  ;;  %v2075_v60 = vadd.f32 %v2011_v13, %v6718_v36  ;;  %v929_v45 = vmul.f32 %v6747_v10, %v928_v14  ;;  %v6832_v13 = vld [vmem:[%s11666_s0 + $0xd0] sm:$0xff]  ;;  %vm6859_vm11 = vmor %vm933_vm8, %vm934_vm9 }
 0x1a4   :  { %v531_v28 = vsel %vm85_vm0, %v431_v40, 0.0  ;;  %159 = vadd.xlane.f32.xlu2 %v158_v12  ;;  %v151_v5 = vpop.xlane.xlu1 %150  ;;  %538 = vadd.xlane.f32.xlu1 %v537_v29  ;;  %v906_v63 = vsel %vm6782_vm6, %v6680_v15, %v902_v23  ;;  %v916_v15 = vsel %vm6801_vm7, %v6658_v52, %v912_v8  ;;  %v1818_v23 = vmul.f32 0.5, %v6666_v4 }
 0x1a5   :  { %532 = vadd.xlane.f32.xlu0 %v531_v28  ;;  %v1884_v18 = vmul.f32 %v6761_v6, %v6761_v6  ;;  %v306_v34 = vmul.f32 %v6278_v20, %v151_v5  ;;  %v2139_v35 = vmul.f32 0.7978846, %v2075_v60  ;;  %v1447_v37 = vmul.f32 %v906_v63, %v6476_v39 }
 0x1a6   :  { %v930_v54 = vmul.f32 0.5, %v929_v45  ;;  %v1448_v52 = vmul.f32 %v916_v15, %v6423_v1  ;;  %v5655_v16 = vpop.eup %5654  ;;  %v921_v5 = vsub.f32 1.5, %v920_v3  ;;  %v164_v8 = vsel %vm85_vm0, %v6832_v13, 0.0 }
 0x1a7   :  { %v1948_v49 = vmul.f32 %v1884_v18, %v6761_v6  ;;  %v6806_v46 = vsub.f32 %v6566_v2, %v306_v34  ;;  %5656 = vtanh.f32 %v2139_v35  ;;  %v167_v2 = vsel %vm85_vm0, %v6792_v38, 0.0 }
 0x1a8   :  { %v1510_v12 = vpack.c.bf16 %v1448_v52, %v1447_v37  ;;  %v931_v1 = vsub.f32 1.5, %v930_v54  ;;  %v2266_v29 = vadd.f32 1.0, %v5655_v16  ;;  %vm924_vm12 = vweird.f32 %v6733_v55 }
 0x1a9   :  { %v2012_v47 = vmul.f32 0.044715, %v1948_v49  ;;  %v434_v53 = vmul.f32 %v6806_v46, %v6806_v46  ;;  %v922_v15 = vmul.f32 %v6733_v55, %v921_v5  ;;  %vm925_vm13 = vmor %vm923_vm10, %vm924_vm12  ;;  %v173_v52 = vsel %vm85_vm0, %v6869_v61, 0.0 }
 0x1aa   :  { %v1665_v27 = vpop.f32.mrf.mxu0  ;;  %v2330_v25 = vmul.f32 %v2266_v29, %v1818_v23  ;;  %v932_v36 = vmul.f32 %v6747_v10, %v931_v1  ;;  %v1820_v23 = vmul.f32 0.5, %v6761_v6 }
 0x1ab   :  { %v6820_v43 = vadd.f32 %v6651_v51, %v1665_v27  ;;  %v2076_v62 = vadd.f32 %v2012_v47, %v6761_v6  ;;  %v540_v11 = vsel %vm85_vm0, %v434_v53, 0.0 }
 0x1ac   :  { %541 = vadd.xlane.f32.xlu2 %v540_v11  ;;  %v154_v44 = vpop.xlane.xlu1 %153  ;;  %168 = vadd.xlane.f32.xlu1 %v167_v2  ;;  %v936_v2 = vsel %vm6859_vm11, %v6747_v10, %v932_v36 }
 0x1ad   :  { %162 = vadd.xlane.f32.xlu0 %v161_v48  ;;  %v1885_v40 = vmul.f32 %v6820_v43, %v6820_v43  ;;  %v307_v39 = vmul.f32 %v6278_v20, %v154_v44  ;;  %v5657_v14 = vpop.eup %5656  ;;  %v2140_v60 = vmul.f32 0.7978846, %v2076_v62  ;;  %v926_v62 = vsel %vm925_vm13, %v6733_v55, %v922_v15 }
 0x1ae   :  { %v2267_v18 = vadd.f32 1.0, %v5657_v14  ;;  %v1450_v3 = vmul.f32 %v936_v2, %v6508_v59  ;;  %v1449_v16 = vmul.f32 %v926_v62, %v6473_v33  ;;  %v1821_v55 = vmul.f32 0.5, %v6820_v43  ;;  %v6887_v59 = vld [vmem:[%s11666_s0 + $0xf0] sm:$0xff] }
 0x1af   :  { %v1949_v28 = vmul.f32 %v1885_v40, %v6820_v43  ;;  %v6842_v4 = vsub.f32 %v6577_v41, %v307_v39  ;;  %v170_v41 = vsel %vm85_vm0, %v6838_v30, 0.0  ;;  %5658 = vtanh.f32 %v2140_v60 }
 0x1b0   :  { %5446 = vmatmul.msk.bf16.gmra.mxu0 %vm85_vm0, %v1510_v12  ;;  %v2331_v35 = vmul.f32 %v2267_v18, %v1819_v31  ;;  %v1511_v57 = vpack.c.bf16 %v1450_v3, %v1449_v16  ;;  %v176_v18 = vsel %vm85_vm0, %v6887_v59, 0.0 }
 0x1b1   :  { %v2013_v0 = vmul.f32 0.044715, %v1949_v28  ;;  %v435_v45 = vmul.f32 %v6842_v4, %v6842_v4 }
 0x1b2   :  { %v1668_v34 = vpop.f32.mrf.mxu0  ;;  %v2410_v48 = vpack.c.bf16 %v2331_v35, %v2330_v25 }
 0x1b3   :  { %v1669_v49 = vadd.f32 %v6651_v51, %v1668_v34  ;;  %v2077_v63 = vadd.f32 %v2013_v0, %v6820_v43  ;;  %v543_v19 = vsel %vm85_vm0, %v435_v45, 0.0 }
 0x1b4   :  { %544 = vadd.xlane.f32.xlu2 %v543_v19  ;;  %171 = vadd.xlane.f32.xlu1 %v170_v41 }
 0x1b5   :  { %165 = vadd.xlane.f32.xlu0 %v164_v8  ;;  %v1886_v47 = vmul.f32 %v1669_v49, %v1669_v49  ;;  %v2141_v27 = vmul.f32 0.7978846, %v2077_v63  ;;  %2502 = vmatmul.bf16.vlgmr.msra.gmra.mxu1 %v2410_v48  ;;  %v5659_v37 = vpop.eup %5658  ;;  %v1822_v34 = vmul.f32 0.5, %v1669_v49  ;;  %v683_v63 = vmul.f32 %v6730_v21, %v6278_v20 }
 0x1b6   :  { %v2268_v10 = vadd.f32 1.0, %v5659_v37 }
 0x1b7   :  { %v1950_v53 = vmul.f32 %v1886_v47, %v1669_v49  ;;  %5660 = vtanh.f32 %v2141_v27  ;;  %v747_v58 = vadd.f32 1e-05, %v683_v63 }
 0x1b8   :  { %v2332_v33 = vmul.f32 %v2268_v10, %v1820_v23 }
 0x1b9   :  { %v2014_v54 = vmul.f32 0.044715, %v1950_v53  ;;  %vm943_vm14 = vweird.f32 %v747_v58 }
 0x1ba   :  { %v1670_v11 = vpop.f32.mrf.mxu0 }
 0x1bb   :  { %v1671_v40 = vadd.f32 %v6651_v51, %v1670_v11  ;;  %v2078_v44 = vadd.f32 %v2014_v54, %v1669_v49 }
 0x1bc   :  { %174 = vadd.xlane.f32.xlu2 %v173_v52 }
 0x1bd   :  { %v5661_v39 = vpop.eup %5660  ;;  %v1887_v12 = vmul.f32 %v1671_v40, %v1671_v40  ;;  %v2142_v28 = vmul.f32 0.7978846, %v2078_v44  ;;  %v1823_v25 = vmul.f32 0.5, %v1671_v40 }
 0x1be   :  { %v2269_v14 = vadd.f32 1.0, %v5661_v39 }
 0x1bf   :  { %v1951_v1 = vmul.f32 %v1887_v12, %v1671_v40  ;;  %5662 = vtanh.f32 %v2142_v28 }
 0x1c0   :  { %5447 = vmatmul.msk.bf16.gmra.mxu0 %vm85_vm0, %v1511_v57  ;;  %v2333_v29 = vmul.f32 %v2269_v14, %v1821_v55 }
 0x1c1   :  { %v2015_v60 = vmul.f32 0.044715, %v1951_v1 }
 0x1c2   :  { %v2411_v31 = vpack.c.bf16 %v2333_v29, %v2332_v33 }
 0x1c3   :  { %v2079_v6 = vadd.f32 %v2015_v60, %v1671_v40 }
 0x1c4   :  { %177 = vadd.xlane.f32.xlu2 %v176_v18 }
 0x1c5   :  { %v2143_v43 = vmul.f32 0.7978846, %v2079_v6  ;;  %2507 = vmatmul.bf16.gmra.mxu1 %v2411_v31  ;;  %v5663_v5 = vpop.eup %5662 }
 0x1c6   :  { %v2270_v8 = vadd.f32 1.0, %v5663_v5 }
 0x1c7   :  { %5664 = vtanh.f32 %v2143_v43 }
 0x1c8   :  { %v2334_v45 = vmul.f32 %v2270_v8, %v1822_v34  ;;  %5666 = vrsqrt.f32 %v747_v58 }
 0x1cd   :  { %v5665_v0 = vpop.eup %5664 }
 0x1ce   :  { %v2271_v35 = vadd.f32 1.0, %v5665_v0  ;;  %v6894_v48 = vpop.eup %5666 }
 0x1cf   :  { %v938_v15 = vmul.f32 %v6894_v48, %v747_v58  ;;  %vm944_vm15 = vweird.f32 %v6894_v48 }
 0x1d0   :  { %v2335_v41 = vmul.f32 %v2271_v35, %v1823_v25  ;;  %vm6924_vm3 = vmor %vm943_vm14, %vm944_vm15 }
 0x1d1   :  { %v939_v49 = vmul.f32 %v6894_v48, %v938_v15 }
 0x1d2   :  { %v2412_v36 = vpack.c.bf16 %v2335_v41, %v2334_v45 }
 0x1d3   :  { %v940_v54 = vmul.f32 0.5, %v939_v49 }
 0x1d5   :  { %2512 = vmatmul.bf16.gmra.mxu1 %v2412_v36  ;;  %v941_v40 = vsub.f32 1.5, %v940_v54 }
 0x1d7   :  { %v942_v60 = vmul.f32 %v6894_v48, %v941_v40 }
 0x1d9   :  { %v946_v36 = vsel %vm6924_vm3, %v6894_v48, %v942_v60 }
 0x1ff   :  { %v524_v19 = vpop.xlane.xlu2 %523 }
 0x200   :  { %v684_v47 = vmul.f32 %v524_v19, %v6278_v20 }
 0x202   :  { %v748_v27 = vadd.f32 1e-05, %v684_v47 }
 0x204   :  { %5668 = vrsqrt.f32 %v748_v27  ;;  %vm953_vm1 = vweird.f32 %v748_v27 }
 0x207   :  { %v527_v53 = vpop.xlane.xlu2 %526 }
 0x208   :  { %v685_v2 = vmul.f32 %v527_v53, %v6278_v20 }
 0x20a   :  { %v5669_v37 = vpop.eup %5668  ;;  %v6900_v62 = vadd.f32 1e-05, %v685_v2 }
 0x20b   :  { %v948_v11 = vmul.f32 %v5669_v37, %v748_v27  ;;  %vm954_vm2 = vweird.f32 %v5669_v37 }
 0x20c   :  { %v1673_v21 = vpop.f32.mrf.mxu0  ;;  %5670 = vrsqrt.f32 %v6900_v62  ;;  %vm955_vm4 = vmor %vm953_vm1, %vm954_vm2  ;;  %vm963_vm5 = vweird.f32 %v6900_v62 }
 0x20d   :  { %v6904_v52 = vadd.f32 %v6651_v51, %v1673_v21  ;;  %v949_v3 = vmul.f32 %v5669_v37, %v948_v11 }
 0x20f   :  { %v950_v16 = vmul.f32 0.5, %v949_v3  ;;  %v157_v10 = vpop.xlane.xlu2 %156  ;;  %v536_v39 = vpop.xlane.xlu1 %535  ;;  %v1888_v57 = vmul.f32 %v6904_v52, %v6904_v52 }
 0x210   :  { %v530_v44 = vpop.xlane.xlu0 %529  ;;  %v308_v23 = vmul.f32 %v6278_v20, %v157_v10  ;;  %v688_v14 = vmul.f32 %v536_v39, %v6278_v20 }
 0x211   :  { %v686_v12 = vmul.f32 %v530_v44, %v6278_v20  ;;  %v951_v55 = vsub.f32 1.5, %v950_v16  ;;  %v1952_v6 = vmul.f32 %v1888_v57, %v6904_v52  ;;  %v6968_v16 = vld [vmem:[%s11666_s0 + $0xf8] sm:$0xff] }
 0x212   :  { %v6914_v28 = vpop.eup %5670  ;;  %v6917_v33 = vsub.f32 %v6691_v24, %v308_v23  ;;  %v6932_v5 = vadd.f32 1e-05, %v688_v14 }
 0x213   :  { %v6912_v1 = vadd.f32 1e-05, %v686_v12  ;;  %v958_v31 = vmul.f32 %v6914_v28, %v6900_v62  ;;  %v952_v8 = vmul.f32 %v5669_v37, %v951_v55  ;;  %v2016_v19 = vmul.f32 0.044715, %v1952_v6 }
 0x214   :  { %v1675_v29 = vpop.f32.mrf.mxu0  ;;  %v436_v24 = vmul.f32 %v6917_v33, %v6917_v33  ;;  %vm964_vm6 = vweird.f32 %v6914_v28  ;;  %vm993_vm11 = vweird.f32 %v6932_v5 }
 0x215   :  { %5672 = vrsqrt.f32 %v6912_v1  ;;  %v959_v43 = vmul.f32 %v6914_v28, %v958_v31  ;;  %v6935_v0 = vadd.f32 %v6651_v51, %v1675_v29  ;;  %v956_v63 = vsel %vm955_vm4, %v5669_v37, %v952_v8  ;;  %vm7000_vm7 = vmor %vm963_vm5, %vm964_vm6 }
 0x216   :  { %v546_v34 = vsel %vm85_vm0, %v436_v24, 0.0  ;;  %v1452_v15 = vmul.f32 %v956_v63, %v6621_v26  ;;  %5674 = vrsqrt.f32 %v6932_v5  ;;  %v1451_v37 = vmul.f32 %v946_v36, %v6542_v42 }
 0x217   :  { %547 = vadd.xlane.f32.xlu0 %v546_v34  ;;  %v160_v35 = vpop.xlane.xlu2 %159  ;;  %v539_v45 = vpop.xlane.xlu1 %538  ;;  %v960_v58 = vmul.f32 0.5, %v959_v43  ;;  %v1889_v2 = vmul.f32 %v6935_v0, %v6935_v0  ;;  %v2080_v3 = vadd.f32 %v2016_v19, %v6904_v52  ;;  %v179_v8 = vsel %vm85_vm0, %v6968_v16, 0.0 }
 0x218   :  { %v533_v25 = vpop.xlane.xlu0 %532  ;;  %v309_v47 = vmul.f32 %v6278_v20, %v160_v35  ;;  %v1512_v21 = vpack.c.bf16 %v1452_v15, %v1451_v37  ;;  %v689_v24 = vmul.f32 %v539_v45, %v6278_v20  ;;  %vm973_vm8 = vweird.f32 %v6912_v1 }
 0x219   :  { %v687_v41 = vmul.f32 %v533_v25, %v6278_v20  ;;  %v961_v26 = vsub.f32 1.5, %v960_v58  ;;  %v2144_v31 = vmul.f32 0.7978846, %v2080_v3 }
 0x21a   :  { %v6954_v48 = vsub.f32 %v6745_v56, %v309_v47  ;;  %v1953_v56 = vmul.f32 %v1889_v2, %v6935_v0  ;;  %5448 = vmatmul.msk.bf16.gmra.mxu0 %vm85_vm0, %v1512_v21  ;;  %v7028_v37 = vadd.f32 1e-05, %v689_v24 }
 0x21b   :  { %v6944_v27 = vpop.eup %5672  ;;  %v6947_v49 = vadd.f32 1e-05, %v687_v41  ;;  %v962_v60 = vmul.f32 %v6914_v28, %v961_v26 }
 0x21c   :  { %v968_v53 = vmul.f32 %v6944_v27, %v6912_v1  ;;  %v437_v40 = vmul.f32 %v6954_v48, %v6954_v48  ;;  %v6970_v10 = vpop.eup %5674  ;;  %v2017_v41 = vmul.f32 0.044715, %v1953_v56  ;;  %vm974_vm9 = vweird.f32 %v6944_v27 }
 0x21d   :  { %5676 = vrsqrt.f32 %v6947_v49  ;;  %v1678_v11 = vpop.f32.mrf.mxu0  ;;  %v988_v34 = vmul.f32 %v6970_v10, %v6932_v5  ;;  %v966_v58 = vsel %vm7000_vm7, %v6914_v28, %v962_v60  ;;  %vm7024_vm10 = vmor %vm973_vm8, %vm974_vm9  ;;  %v7055_v60 = vld [vmem:[%s11666_s0 + $0x100] sm:$0xff]  ;;  %vm994_vm12 = vweird.f32 %v6970_v10 }
 0x21e   :  { %v969_v54 = vmul.f32 %v6944_v27, %v968_v53  ;;  %v6974_v39 = vadd.f32 %v6651_v51, %v1678_v11  ;;  %v549_v12 = vsel %vm85_vm0, %v437_v40, 0.0  ;;  %5678 = vtanh.f32 %v2144_v31  ;;  %vm7128_vm1 = vmor %vm993_vm11, %vm994_vm12 }
 0x21f   :  { %v542_v57 = vpop.xlane.xlu2 %541  ;;  %v169_v23 = vpop.xlane.xlu1 %168  ;;  %550 = vadd.xlane.f32.xlu0 %v549_v12  ;;  %v989_v53 = vmul.f32 %v6970_v10, %v988_v34  ;;  %v1453_v56 = vmul.f32 %v966_v58, %v6646_v50  ;;  %vm983_vm13 = vweird.f32 %v6947_v49  ;;  %vm1003_vm5 = vweird.f32 %v7028_v37 }
 0x220   :  { %v970_v44 = vmul.f32 0.5, %v969_v54  ;;  %v163_v42 = vpop.xlane.xlu0 %162  ;;  %v690_v14 = vmul.f32 %v542_v57, %v6278_v20  ;;  %v312_v29 = vmul.f32 %v6278_v20, %v169_v23  ;;  %v1890_v45 = vmul.f32 %v6974_v39, %v6974_v39 }
 0x221   :  { %v310_v55 = vmul.f32 %v6278_v20, %v163_v42  ;;  %v2081_v54 = vadd.f32 %v2017_v41, %v6935_v0  ;;  %v990_v31 = vmul.f32 0.5, %v989_v53  ;;  %v7088_v53 = vld [vmem:[%s11666_s0 + $0x108] sm:$0xff] }
 0x222   :  { %v971_v6 = vsub.f32 1.5, %v970_v44  ;;  %v6994_v35 = vsub.f32 %v6792_v38, %v312_v29  ;;  %v7010_v36 = vadd.f32 1e-05, %v690_v14  ;;  %v1954_v21 = vmul.f32 %v1890_v45, %v6974_v39 }
 0x223   :  { %v6981_v18 = vpop.eup %5676  ;;  %v6985_v43 = vsub.f32 %v6777_v32, %v310_v55  ;;  %v2145_v14 = vmul.f32 0.7978846, %v2081_v54  ;;  %v1824_v45 = vmul.f32 0.5, %v6904_v52 }
 0x224   :  { %v978_v25 = vmul.f32 %v6981_v18, %v6947_v49  ;;  %v440_v62 = vmul.f32 %v6994_v35, %v6994_v35  ;;  %v972_v15 = vmul.f32 %v6944_v27, %v971_v6  ;;  %5680 = vrsqrt.f32 %v7010_v36  ;;  %v5679_v29 = vpop.eup %5678 }
 0x225   :  { %v438_v38 = vmul.f32 %v6985_v43, %v6985_v43  ;;  %v1680_v63 = vpop.f32.mrf.mxu0  ;;  %5682 = vrsqrt.f32 %v7028_v37  ;;  %v2272_v58 = vadd.f32 1.0, %v5679_v29  ;;  %vm984_vm14 = vweird.f32 %v6981_v18 }
 0x226   :  { %v979_v1 = vmul.f32 %v6981_v18, %v978_v25  ;;  %v7019_v19 = vadd.f32 %v6651_v51, %v1680_v63  ;;  %v558_v28 = vsel %vm85_vm0, %v440_v62, 0.0  ;;  %v976_v44 = vsel %vm7024_vm10, %v6944_v27, %v972_v15  ;;  %vm7110_vm15 = vmor %vm983_vm13, %vm984_vm14 }
 0x227   :  { %v552_v47 = vsel %vm85_vm0, %v438_v38, 0.0  ;;  %v7033_v11 = vpop.xlane.xlu2 %544  ;;  %559 = vadd.xlane.f32.xlu2 %v558_v28  ;;  %v172_v3 = vpop.xlane.xlu1 %171  ;;  %180 = vadd.xlane.f32.xlu0 %v179_v8  ;;  %v1454_v57 = vmul.f32 %v976_v44, %v6683_v17  ;;  %5684 = vtanh.f32 %v2145_v14  ;;  %v182_v25 = vsel %vm85_vm0, %v7055_v60, 0.0 }
 0x228   :  { %553 = vadd.xlane.f32.xlu1 %v552_v47  ;;  %v166_v26 = vpop.xlane.xlu0 %165  ;;  %v1891_v42 = vmul.f32 %v7019_v19, %v7019_v19  ;;  %v313_v12 = vmul.f32 %v6278_v20, %v172_v3  ;;  %v980_v23 = vmul.f32 0.5, %v979_v1  ;;  %v991_v63 = vsub.f32 1.5, %v990_v31  ;;  %v7079_v47 = vld [vmem:[%s11666_s0 + $0x118] sm:$0xff] }
 0x229   :  { %v311_v40 = vmul.f32 %v6278_v20, %v166_v26  ;;  %v1513_v27 = vpack.c.bf16 %v1454_v57, %v1453_v56  ;;  %v1825_v62 = vmul.f32 0.5, %v6935_v0  ;;  %v191_v44 = vsel %vm85_vm0, %v7079_v47, 0.0 }
 0x22a   :  { %v7050_v50 = vsub.f32 %v6838_v30, %v313_v12  ;;  %v1955_v6 = vmul.f32 %v1891_v42, %v7019_v19  ;;  %v981_v30 = vsub.f32 1.5, %v980_v23  ;;  %v7068_v32 = vpop.eup %5680  ;;  %v2336_v12 = vmul.f32 %v2272_v58, %v1824_v45 }
 0x22b   :  { %v7046_v55 = vsub.f32 %v6832_v13, %v311_v40  ;;  %v2018_v13 = vmul.f32 0.044715, %v1954_v21  ;;  %5449 = vmatmul.msk.bf16.gmra.mxu0 %vm85_vm0, %v1513_v27  ;;  %v7081_v15 = vpop.eup %5682  ;;  %v1008_v26 = vmul.f32 %v7068_v32, %v7010_v36  ;;  %v185_v57 = vsel %vm85_vm0, %v7088_v53, 0.0 }
 0x22c   :  { %v441_v8 = vmul.f32 %v7050_v50, %v7050_v50  ;;  %v2019_v0 = vmul.f32 0.044715, %v1955_v6  ;;  %v982_v21 = vmul.f32 %v6981_v18, %v981_v30  ;;  %v998_v42 = vmul.f32 %v7081_v15, %v7028_v37 }
 0x22d   :  { %v439_v17 = vmul.f32 %v7046_v55, %v7046_v55  ;;  %v1683_v24 = vpop.f32.mrf.mxu0  ;;  %v2082_v2 = vadd.f32 %v2018_v13, %v6974_v39  ;;  %v5685_v28 = vpop.eup %5684  ;;  %v992_v23 = vmul.f32 %v6970_v10, %v991_v63  ;;  %v1009_v13 = vmul.f32 %v7068_v32, %v1008_v26 }
 0x22e   :  { %v7063_v34 = vadd.f32 %v6651_v51, %v1683_v24  ;;  %v561_v38 = vsel %vm85_vm0, %v441_v8, 0.0  ;;  %v2273_v3 = vadd.f32 1.0, %v5685_v28  ;;  %v2083_v56 = vadd.f32 %v2019_v0, %v7019_v19 }
 0x22f   :  { %v555_v41 = vsel %vm85_vm0, %v439_v17, 0.0  ;;  %v175_v1 = vpop.xlane.xlu2 %174  ;;  %562 = vadd.xlane.f32.xlu2 %v561_v38  ;;  %183 = vadd.xlane.f32.xlu0 %v182_v25  ;;  %v2146_v31 = vmul.f32 0.7978846, %v2082_v2  ;;  %v986_v49 = vsel %vm7110_vm15, %v6981_v18, %v982_v21  ;;  %v996_v5 = vsel %vm7128_vm1, %v6970_v10, %v992_v23  ;;  %v7150_v10 = vld [vmem:[%s11666_s0 + $0x120] sm:$0xff] }
 0x230   :  { %556 = vadd.xlane.f32.xlu1 %v555_v41  ;;  %v314_v52 = vmul.f32 %v6278_v20, %v175_v1  ;;  %v1892_v54 = vmul.f32 %v7063_v34, %v7063_v34  ;;  %v2147_v17 = vmul.f32 0.7978846, %v2083_v56  ;;  %v999_v41 = vmul.f32 %v7081_v15, %v998_v42 }
 0x231   :  { %5686 = vtanh.f32 %v2146_v31  ;;  %v1455_v63 = vmul.f32 %v986_v49, %v6737_v7  ;;  %v1010_v58 = vmul.f32 0.5, %v1009_v13  ;;  %v1456_v2 = vmul.f32 %v996_v5, %v6686_v22 }
 0x232   :  { %v7098_v40 = vsub.f32 %v6869_v61, %v314_v52  ;;  %v2337_v61 = vmul.f32 %v2273_v3, %v1825_v62  ;;  %v1956_v6 = vmul.f32 %v1892_v54, %v7063_v34  ;;  %5688 = vtanh.f32 %v2147_v17  ;;  %v7144_v62 = vld [vmem:[%s11666_s0 + $0x110] sm:$0xff] }
 0x233   :  { %v1000_v7 = vmul.f32 0.5, %v999_v41  ;;  %v188_v28 = vsel %vm85_vm0, %v7144_v62, 0.0  ;;  %v1514_v21 = vpack.c.bf16 %v1456_v2, %v1455_v63  ;;  %v194_v56 = vsel %vm85_vm0, %v7150_v10, 0.0 }
 0x234   :  { %v442_v27 = vmul.f32 %v7098_v40, %v7098_v40  ;;  %v2413_v30 = vpack.c.bf16 %v2337_v61, %v2336_v12  ;;  %v2020_v1 = vmul.f32 0.044715, %v1956_v6  ;;  %v1011_v12 = vsub.f32 1.5, %v1010_v58 }
 0x235   :  { %v1685_v29 = vpop.f32.mrf.mxu0  ;;  %v1827_v23 = vmul.f32 0.5, %v7019_v19  ;;  %vm1013_vm2 = vweird.f32 %v7010_v36  ;;  %vm1014_vm3 = vweird.f32 %v7068_v32  ;;  %v1826_v17 = vmul.f32 0.5, %v6974_v39  ;;  %v7178_v19 = vld [vmem:[%s11666_s0 + $0x128] sm:$0xff] }
 0x236   :  { %v7119_v24 = vadd.f32 %v6651_v51, %v1685_v29  ;;  %v564_v25 = vsel %vm85_vm0, %v442_v27, 0.0  ;;  %2517 = vmatmul.bf16.gmra.mxu1 %v2413_v30  ;;  %v2084_v22 = vadd.f32 %v2020_v1, %v7063_v34  ;;  %v1001_v27 = vsub.f32 1.5, %v1000_v7  ;;  %vm7181_vm4 = vmor %vm1013_vm2, %vm1014_vm3 }
 0x237   :  { %v178_v38 = vpop.xlane.xlu2 %177  ;;  %192 = vadd.xlane.f32.xlu2 %v191_v44  ;;  %565 = vadd.xlane.f32.xlu0 %v564_v25  ;;  %v5687_v54 = vpop.eup %5686  ;;  %v1012_v49 = vmul.f32 %v7068_v32, %v1011_v12  ;;  %vm1004_vm6 = vweird.f32 %v7081_v15 }
 0x238   :  { %186 = vadd.xlane.f32.xlu1 %v185_v57  ;;  %v1893_v45 = vmul.f32 %v7119_v24, %v7119_v24  ;;  %v315_v18 = vmul.f32 %v6278_v20, %v178_v38  ;;  %v5689_v42 = vpop.eup %5688  ;;  %v2274_v14 = vadd.f32 1.0, %v5687_v54  ;;  %v2148_v8 = vmul.f32 0.7978846, %v2084_v22  ;;  %vm1005_vm7 = vmor %vm1003_vm5, %vm1004_vm6 }
 0x239   :  { %v2275_v61 = vadd.f32 1.0, %v5689_v42  ;;  %v1002_v39 = vmul.f32 %v7081_v15, %v1001_v27 }
 0x23a   :  { %v1957_v52 = vmul.f32 %v1893_v45, %v7119_v24  ;;  %v7153_v0 = vsub.f32 %v6887_v59, %v315_v18  ;;  %v2338_v30 = vmul.f32 %v2274_v14, %v1826_v17  ;;  %v197_v45 = vsel %vm85_vm0, %v7178_v19, 0.0 }
 0x23b   :  { %5450 = vmatmul.msk.bf16.gmra.mxu0 %vm85_vm0, %v1514_v21  ;;  %v2339_v13 = vmul.f32 %v2275_v61, %v1827_v23  ;;  %v1016_v18 = vsel %vm7181_vm4, %v7068_v32, %v1012_v49  ;;  %v1006_v63 = vsel %vm1005_vm7, %v7081_v15, %v1002_v39 }
 0x23c   :  { %v2021_v26 = vmul.f32 0.044715, %v1957_v52  ;;  %v443_v44 = vmul.f32 %v7153_v0, %v7153_v0  ;;  %v1458_v58 = vmul.f32 %v1016_v18, %v6806_v46  ;;  %v1457_v7 = vmul.f32 %v1006_v63, %v6740_v9 }
 0x23d   :  { %v1688_v3 = vpop.f32.mrf.mxu0  ;;  %v2414_v25 = vpack.c.bf16 %v2339_v13, %v2338_v30 }
 0x23e   :  { %v7163_v59 = vadd.f32 %v6651_v51, %v1688_v3  ;;  %v2085_v57 = vadd.f32 %v2021_v26, %v7119_v24  ;;  %v567_v29 = vsel %vm85_vm0, %v443_v44, 0.0  ;;  %v1515_v26 = vpack.c.bf16 %v1458_v58, %v1457_v7 }
 0x23f   :  { %195 = vadd.xlane.f32.xlu2 %v194_v56  ;;  %568 = vadd.xlane.f32.xlu0 %v567_v29  ;;  %v1829_v3 = vmul.f32 0.5, %v7119_v24  ;;  %v1828_v56 = vmul.f32 0.5, %v7063_v34  ;;  %v691_v34 = vmul.f32 %v7033_v11, %v6278_v20 }
 0x240   :  { %189 = vadd.xlane.f32.xlu1 %v188_v28  ;;  %v2149_v31 = vmul.f32 0.7978846, %v2085_v57  ;;  %v1894_v6 = vmul.f32 %v7163_v59, %v7163_v59 }
 0x242   :  { %5690 = vtanh.f32 %v2149_v31  ;;  %v1958_v38 = vmul.f32 %v1894_v6, %v7163_v59  ;;  %v1830_v31 = vmul.f32 0.5, %v7163_v59  ;;  %v755_v6 = vadd.f32 1e-05, %v691_v34 }
 0x243   :  { %5692 = vtanh.f32 %v2148_v8 }
 0x244   :  { %v2022_v52 = vmul.f32 0.044715, %v1958_v38  ;;  %vm1023_vm8 = vweird.f32 %v755_v6 }
 0x245   :  { %v1690_v41 = vpop.f32.mrf.mxu0 }
 0x246   :  { %v1691_v5 = vadd.f32 %v6651_v51, %v1690_v41  ;;  %2522 = vmatmul.bf16.gmra.mxu1 %v2414_v25  ;;  %v7201_v51 = vld [vmem:[%s11666_s0 + $0x130] sm:$0xff]  ;;  %v2086_v21 = vadd.f32 %v2022_v52, %v7163_v59 }
 0x247   :  { %198 = vadd.xlane.f32.xlu0 %v197_v45  ;;  %v200_v15 = vsel %vm85_vm0, %v7201_v51, 0.0 }
 0x248   :  { %v1895_v37 = vmul.f32 %v1691_v5, %v1691_v5  ;;  %v5691_v1 = vpop.eup %5690  ;;  %v2150_v12 = vmul.f32 0.7978846, %v2086_v21  ;;  %v1831_v29 = vmul.f32 0.5, %v1691_v5 }
 0x249   :  { %v5693_v32 = vpop.eup %5692  ;;  %v2277_v54 = vadd.f32 1.0, %v5691_v1 }
 0x24a   :  { %v1959_v2 = vmul.f32 %v1895_v37, %v1691_v5  ;;  %v2276_v9 = vadd.f32 1.0, %v5693_v32 }
 0x24b   :  { %5451 = vmatmul.msk.bf16.gmra.mxu0 %vm85_vm0, %v1515_v26  ;;  %v2341_v42 = vmul.f32 %v2277_v54, %v1829_v3  ;;  %v7238_v3 = vld [vmem:[%s11668_s2] ss:$0 sm:$0xff] }
 0x24c   :  { %v2023_v28 = vmul.f32 0.044715, %v1959_v2  ;;  %v2340_v22 = vmul.f32 %v2276_v9, %v1828_v56 }
 0x24e   :  { %v2087_v46 = vadd.f32 %v2023_v28, %v1691_v5  ;;  %v2415_v57 = vpack.c.bf16 %v2341_v42, %v2340_v22 }
 0x24f   :  { %201 = vadd.xlane.f32.xlu0 %v200_v15 }
 0x250   :  { %v2151_v44 = vmul.f32 0.7978846, %v2087_v46 }
 0x252   :  { %5694 = vtanh.f32 %v2151_v44 }
 0x253   :  { %5696 = vtanh.f32 %v2150_v12 }
 0x254   :  { %5698 = vrsqrt.f32 %v755_v6 }
 0x256   :  { %2527 = vmatmul.bf16.gmra.mxu1 %v2415_v57 }
 0x258   :  { %v5695_v23 = vpop.eup %5694 }
 0x259   :  { %v5697_v14 = vpop.eup %5696  ;;  %v2279_v61 = vadd.f32 1.0, %v5695_v23 }
 0x25a   :  { %v2278_v27 = vadd.f32 1.0, %v5697_v14  ;;  %v7213_v36 = vpop.eup %5698 }
 0x25b   :  { %v2343_v24 = vmul.f32 %v2279_v61, %v1831_v29  ;;  %v1018_v39 = vmul.f32 %v7213_v36, %v755_v6  ;;  %vm1024_vm9 = vweird.f32 %v7213_v36 }
 0x25c   :  { %v2342_v17 = vmul.f32 %v2278_v27, %v1830_v31  ;;  %vm7243_vm12 = vmor %vm1023_vm8, %vm1024_vm9 }
 0x25d   :  { %v1019_v59 = vmul.f32 %v7213_v36, %v1018_v39 }
 0x25e   :  { %v2416_v13 = vpack.c.bf16 %v2343_v24, %v2342_v17 }
 0x25f   :  { %v1020_v11 = vmul.f32 0.5, %v1019_v59 }
 0x261   :  { %v1021_v7 = vsub.f32 1.5, %v1020_v11 }
 0x266   :  { %2532 = vmatmul.bf16.gmra.mxu1 %v2416_v13 }
 0x28a   :  { %v548_v49 = vpop.xlane.xlu0 %547 }
 0x28b   :  { %v692_v8 = vmul.f32 %v548_v49, %v6278_v20 }
 0x28d   :  { %v756_v30 = vadd.f32 1e-05, %v692_v8 }
 0x28f   :  { %5700 = vrsqrt.f32 %v756_v30  ;;  %vm1033_vm10 = vweird.f32 %v756_v30 }
 0x292   :  { %v551_v25 = vpop.xlane.xlu0 %550 }
 0x293   :  { %v693_v41 = vmul.f32 %v551_v25, %v6278_v20 }
 0x295   :  { %v5701_v45 = vpop.eup %5700  ;;  %v7218_v5 = vadd.f32 1e-05, %v693_v41 }
 0x296   :  { %v1028_v38 = vmul.f32 %v5701_v45, %v756_v30  ;;  %vm1034_vm11 = vweird.f32 %v5701_v45 }
 0x297   :  { %5702 = vrsqrt.f32 %v7218_v5  ;;  %v1693_v52 = vpop.f32.mrf.mxu0  ;;  %vm7250_vm13 = vmor %vm1033_vm10, %vm1034_vm11  ;;  %vm1043_vm14 = vweird.f32 %v7218_v5 }
 0x298   :  { %v1029_v18 = vmul.f32 %v5701_v45, %v1028_v38  ;;  %v7241_v9 = vadd.f32 %v7238_v3, %v1693_v52 }
 0x29a   :  { %v1030_v63 = vmul.f32 0.5, %v1029_v18  ;;  %v560_v58 = vpop.xlane.xlu2 %559  ;;  %v181_v2 = vpop.xlane.xlu0 %180  ;;  %v1896_v31 = vmul.f32 %v7241_v9, %v7241_v9 }
 0x29b   :  { %v554_v37 = vpop.xlane.xlu1 %553  ;;  %v316_v26 = vmul.f32 %v6278_v20, %v181_v2  ;;  %v696_v54 = vmul.f32 %v560_v58, %v6278_v20 }
 0x29c   :  { %v694_v1 = vmul.f32 %v554_v37, %v6278_v20  ;;  %v1031_v32 = vsub.f32 1.5, %v1030_v63  ;;  %v1960_v59 = vmul.f32 %v1896_v31, %v7241_v9 }
 0x29d   :  { %v7227_v15 = vpop.eup %5702  ;;  %v7231_v21 = vsub.f32 %v6968_v16, %v316_v26  ;;  %v1022_v16 = vmul.f32 %v7213_v36, %v1021_v7  ;;  %v7255_v57 = vadd.f32 1e-05, %v696_v54 }
 0x29e   :  { %v7222_v28 = vadd.f32 1e-05, %v694_v1  ;;  %v1038_v46 = vmul.f32 %v7227_v15, %v7218_v5  ;;  %v1032_v42 = vmul.f32 %v5701_v45, %v1031_v32  ;;  %vm1044_vm15 = vweird.f32 %v7227_v15 }
 0x29f   :  { %v444_v56 = vmul.f32 %v7231_v21, %v7231_v21  ;;  %v1695_v24 = vpop.f32.mrf.mxu0  ;;  %v1026_v8 = vsel %vm7243_vm12, %v7213_v36, %v1022_v16  ;;  %v2024_v52 = vmul.f32 0.044715, %v1960_v59  ;;  %vm7339_vm4 = vmor %vm1043_vm14, %vm1044_vm15  ;;  %vm1073_vm5 = vweird.f32 %v7255_v57 }
 0x2a0   :  { %5704 = vrsqrt.f32 %v7222_v28  ;;  %v1039_v22 = vmul.f32 %v7227_v15, %v1038_v46  ;;  %v1036_v27 = vsel %vm7250_vm13, %v5701_v45, %v1032_v42  ;;  %v7275_v39 = vadd.f32 %v7238_v3, %v1695_v24 }
 0x2a1   :  { %v570_v29 = vsel %vm85_vm0, %v444_v56, 0.0  ;;  %5706 = vrsqrt.f32 %v7255_v57  ;;  %v1460_v25 = vmul.f32 %v1036_v27, %v6917_v33  ;;  %v1459_v45 = vmul.f32 %v1026_v8, %v6842_v4 }
 0x2a2   :  { %v563_v14 = vpop.xlane.xlu2 %562  ;;  %571 = vadd.xlane.f32.xlu1 %v570_v29  ;;  %v184_v17 = vpop.xlane.xlu0 %183  ;;  %v1040_v34 = vmul.f32 0.5, %v1039_v22  ;;  %v1897_v18 = vmul.f32 %v7275_v39, %v7275_v39  ;;  %vm1053_vm2 = vweird.f32 %v7222_v28  ;;  %v2088_v27 = vadd.f32 %v2024_v52, %v7241_v9 }
 0x2a3   :  { %v557_v23 = vpop.xlane.xlu1 %556  ;;  %v317_v49 = vmul.f32 %v6278_v20, %v184_v17  ;;  %v1516_v37 = vpack.c.bf16 %v1460_v25, %v1459_v45  ;;  %v697_v63 = vmul.f32 %v563_v14, %v6278_v20 }
 0x2a4   :  { %v695_v61 = vmul.f32 %v557_v23, %v6278_v20  ;;  %v1041_v38 = vsub.f32 1.5, %v1040_v34  ;;  %v1961_v12 = vmul.f32 %v1897_v18, %v7275_v39 }
 0x2a5   :  { %v7283_v36 = vsub.f32 %v7055_v60, %v317_v49  ;;  %5452 = vmatmul.msk.bf16.gmra.mxu0 %vm85_vm0, %v1516_v37  ;;  %v7316_v14 = vadd.f32 1e-05, %v697_v63  ;;  %v2152_v63 = vmul.f32 0.7978846, %v2088_v27 }
 0x2a6   :  { %v7263_v13 = vpop.eup %5704  ;;  %v7265_v6 = vadd.f32 1e-05, %v695_v61  ;;  %v1042_v46 = vmul.f32 %v7227_v15, %v1041_v38  ;;  %v2025_v59 = vmul.f32 0.044715, %v1961_v12 }
 0x2a7   :  { %v1048_v30 = vmul.f32 %v7263_v13, %v7222_v28  ;;  %v445_v4 = vmul.f32 %v7283_v36, %v7283_v36  ;;  %v7293_v60 = vpop.eup %5706  ;;  %vm1054_vm1 = vweird.f32 %v7263_v13  ;;  %v7332_v28 = vld [vmem:[%s11666_s0 + $0x138] sm:$0xff]  ;;  %vm1083_vm14 = vweird.f32 %v7316_v14 }
 0x2a8   :  { %5708 = vrsqrt.f32 %v7265_v6  ;;  %v1698_v7 = vpop.f32.mrf.mxu0  ;;  %vm7322_vm3 = vmor %vm1053_vm2, %vm1054_vm1  ;;  %v1046_v5 = vsel %vm7339_vm4, %v7227_v15, %v1042_v46  ;;  %v203_v38 = vsel %vm85_vm0, %v7332_v28, 0.0  ;;  %vm1063_vm7 = vweird.f32 %v7265_v6 }
 0x2a9   :  { %v1049_v41 = vmul.f32 %v7263_v13, %v1048_v30  ;;  %v7302_v44 = vadd.f32 %v7238_v3, %v1698_v7  ;;  %v573_v16 = vsel %vm85_vm0, %v445_v4, 0.0  ;;  %5710 = vrsqrt.f32 %v7316_v14 }
 0x2aa   :  { %v193_v58 = vpop.xlane.xlu2 %192  ;;  %v566_v26 = vpop.xlane.xlu0 %565  ;;  %574 = vadd.xlane.f32.xlu1 %v573_v16  ;;  %v1461_v52 = vmul.f32 %v1046_v5, %v6954_v48  ;;  %vm1074_vm8 = vweird.f32 %v7293_v60 }
 0x2ab   :  { %v1050_v11 = vmul.f32 0.5, %v1049_v41  ;;  %v187_v33 = vpop.xlane.xlu1 %186  ;;  %v320_v32 = vmul.f32 %v6278_v20, %v193_v58  ;;  %v698_v29 = vmul.f32 %v566_v26, %v6278_v20  ;;  %v1898_v34 = vmul.f32 %v7302_v44, %v7302_v44  ;;  %vm7452_vm10 = vmor %vm1073_vm5, %vm1074_vm8 }
 0x2ac   :  { %v318_v1 = vmul.f32 %v6278_v20, %v187_v33 }
 0x2ad   :  { %v1051_v2 = vsub.f32 1.5, %v1050_v11  ;;  %v7313_v23 = vsub.f32 %v7079_v47, %v320_v32  ;;  %v7354_v8 = vadd.f32 1e-05, %v698_v29 }
 0x2ae   :  { %v7298_v54 = vpop.eup %5708  ;;  %v7305_v56 = vsub.f32 %v7088_v53, %v318_v1  ;;  %v1068_v53 = vmul.f32 %v7293_v60, %v7255_v57  ;;  %v1962_v1 = vmul.f32 %v1898_v34, %v7302_v44 }
 0x2af   :  { %v1052_v42 = vmul.f32 %v7263_v13, %v1051_v2  ;;  %v1058_v22 = vmul.f32 %v7298_v54, %v7265_v6  ;;  %v448_v47 = vmul.f32 %v7313_v23, %v7313_v23  ;;  %5712 = vrsqrt.f32 %v7354_v8  ;;  %v7389_v16 = vpop.eup %5710 }
 0x2b0   :  { %v446_v49 = vmul.f32 %v7305_v56, %v7305_v56  ;;  %v1069_v11 = vmul.f32 %v7293_v60, %v1068_v53  ;;  %v1700_v15 = vpop.f32.mrf.mxu0  ;;  %5714 = vtanh.f32 %v2152_v63  ;;  %v2026_v12 = vmul.f32 0.044715, %v1962_v1 }
 0x2b1   :  { %v1056_v24 = vsel %vm7322_vm3, %v7263_v13, %v1052_v42  ;;  %v1059_v17 = vmul.f32 %v7298_v54, %v1058_v22  ;;  %v582_v30 = vsel %vm85_vm0, %v448_v47, 0.0  ;;  %v7369_v4 = vadd.f32 %v7238_v3, %v1700_v15 }
 0x2b2   :  { %583 = vadd.xlane.f32.xlu0 %v582_v30  ;;  %v196_v13 = vpop.xlane.xlu2 %195  ;;  %v576_v41 = vsel %vm85_vm0, %v446_v49, 0.0  ;;  %v7364_v37 = vpop.xlane.xlu0 %568  ;;  %v1462_v33 = vmul.f32 %v1056_v24, %v6985_v43  ;;  %204 = vadd.xlane.f32.xlu1 %v203_v38  ;;  %v2089_v43 = vadd.f32 %v2025_v59, %v7275_v39  ;;  %v1832_v49 = vmul.f32 0.5, %v7241_v9  ;;  %v7410_v30 = vld [vmem:[%s11666_s0 + $0x158] sm:$0xff] }
 0x2b3   :  { %v190_v25 = vpop.xlane.xlu1 %189  ;;  %v321_v18 = vmul.f32 %v6278_v20, %v196_v13  ;;  %577 = vadd.xlane.f32.xlu2 %v576_v41  ;;  %v1060_v58 = vmul.f32 0.5, %v1059_v17  ;;  %v1899_v32 = vmul.f32 %v7369_v4, %v7369_v4  ;;  %vm1064_vm6 = vweird.f32 %v7298_v54 }
 0x2b4   :  { %v319_v45 = vmul.f32 %v6278_v20, %v190_v25  ;;  %v1517_v26 = vpack.c.bf16 %v1462_v33, %v1461_v52  ;;  %v2153_v46 = vmul.f32 0.7978846, %v2089_v43  ;;  %v2090_v41 = vadd.f32 %v2026_v12, %v7302_v44  ;;  %vm7437_vm9 = vmor %vm1063_vm7, %vm1064_vm6 }
 0x2b5   :  { %v7374_v2 = vsub.f32 %v7150_v10, %v321_v18  ;;  %v7387_v10 = vld [vmem:[%s11666_s0 + $0x140] sm:$0xff]  ;;  %v1061_v42 = vsub.f32 1.5, %v1060_v58  ;;  %v1963_v22 = vmul.f32 %v1899_v32, %v7369_v4  ;;  %v7397_v47 = vpop.eup %5712  ;;  %v1078_v9 = vmul.f32 %v7389_v16, %v7316_v14 }
 0x2b6   :  { %v7377_v7 = vsub.f32 %v7144_v62, %v319_v45  ;;  %v1070_v62 = vmul.f32 0.5, %v1069_v11  ;;  %5716 = vtanh.f32 %v2153_v46  ;;  %v206_v29 = vsel %vm85_vm0, %v7387_v10, 0.0  ;;  %5453 = vmatmul.msk.bf16.gmra.mxu0 %vm85_vm0, %v1517_v26  ;;  %v5715_v25 = vpop.eup %5714  ;;  %v7423_v11 = vld [vmem:[%s11666_s0 + $0x148] sm:$0xff] }
 0x2b7   :  { %v449_v48 = vmul.f32 %v7374_v2, %v7374_v2  ;;  %v1062_v59 = vmul.f32 %v7298_v54, %v1061_v42  ;;  %v2027_v13 = vmul.f32 0.044715, %v1963_v22  ;;  %v1088_v45 = vmul.f32 %v7397_v47, %v7354_v8 }
 0x2b8   :  { %v447_v61 = vmul.f32 %v7377_v7, %v7377_v7  ;;  %v1703_v27 = vpop.f32.mrf.mxu0  ;;  %v1071_v17 = vsub.f32 1.5, %v1070_v62  ;;  %v2280_v38 = vadd.f32 1.0, %v5715_v25  ;;  %v215_v63 = vsel %vm85_vm0, %v7410_v30, 0.0 }
 0x2b9   :  { %v585_v53 = vsel %vm85_vm0, %v449_v48, 0.0  ;;  %v7403_v34 = vadd.f32 %v7238_v3, %v1703_v27  ;;  %v2091_v6 = vadd.f32 %v2027_v13, %v7369_v4  ;;  %v1833_v52 = vmul.f32 0.5, %v7275_v39 }
 0x2ba   :  { %586 = vadd.xlane.f32.xlu0 %v585_v53  ;;  %v579_v31 = vsel %vm85_vm0, %v447_v61, 0.0  ;;  %v199_v24 = vpop.xlane.xlu0 %198  ;;  %207 = vadd.xlane.f32.xlu1 %v206_v29  ;;  %v1072_v58 = vmul.f32 %v7293_v60, %v1071_v17  ;;  %v209_v32 = vsel %vm85_vm0, %v7423_v11, 0.0  ;;  %v2154_v46 = vmul.f32 0.7978846, %v2090_v41  ;;  %v7469_v17 = vld [vmem:[%s11666_s0 + $0x160] sm:$0xff] }
 0x2bb   :  { %580 = vadd.xlane.f32.xlu2 %v579_v31  ;;  %v322_v5 = vmul.f32 %v6278_v20, %v199_v24  ;;  %v1900_v18 = vmul.f32 %v7403_v34, %v7403_v34  ;;  %v1089_v48 = vmul.f32 %v7397_v47, %v1088_v45  ;;  %v2344_v62 = vmul.f32 %v2280_v38, %v1832_v49 }
 0x2bc   :  { %v5717_v15 = vpop.eup %5716  ;;  %v2155_v12 = vmul.f32 0.7978846, %v2091_v6  ;;  %5718 = vtanh.f32 %v2154_v46  ;;  %v1076_v27 = vsel %vm7452_vm10, %v7293_v60, %v1072_v58  ;;  %vm1093_vm11 = vweird.f32 %v7354_v8 }
 0x2bd   :  { %v7428_v33 = vsub.f32 %v7178_v19, %v322_v5  ;;  %v2281_v43 = vadd.f32 1.0, %v5717_v15  ;;  %v1066_v19 = vsel %vm7437_vm9, %v7298_v54, %v1062_v59  ;;  %v1079_v54 = vmul.f32 %v7389_v16, %v1078_v9  ;;  %v7480_v59 = vld [vmem:[%s11666_s0 + $0x150] sm:$0xff] }
 0x2be   :  { %v1964_v22 = vmul.f32 %v1900_v18, %v7403_v34  ;;  %v1463_v49 = vmul.f32 %v1066_v19, %v7046_v55  ;;  %5720 = vtanh.f32 %v2155_v12  ;;  %v1090_v5 = vmul.f32 0.5, %v1089_v48 }
 0x2bf   :  { %v450_v26 = vmul.f32 %v7428_v33, %v7428_v33  ;;  %v2345_v42 = vmul.f32 %v2281_v43, %v1833_v52  ;;  %v1080_v13 = vmul.f32 0.5, %v1079_v54  ;;  %v1464_v9 = vmul.f32 %v1076_v27, %v6994_v35 }
 0x2c0   :  { %v1705_v53 = vpop.f32.mrf.mxu0  ;;  %v2028_v41 = vmul.f32 0.044715, %v1964_v22  ;;  %v218_v55 = vsel %vm85_vm0, %v7469_v17, 0.0  ;;  %v212_v18 = vsel %vm85_vm0, %v7480_v59, 0.0  ;;  %vm1094_vm12 = vweird.f32 %v7397_v47  ;;  %v7511_v22 = vld [vmem:[%s11666_s0 + $0x168] sm:$0xff] }
 0x2c1   :  { %v588_v61 = vsel %vm85_vm0, %v450_v26, 0.0  ;;  %v2417_v31 = vpack.c.bf16 %v2345_v42, %v2344_v62  ;;  %v7463_v57 = vadd.f32 %v7238_v3, %v1705_v53  ;;  %v1081_v1 = vsub.f32 1.5, %v1080_v13  ;;  %vm7504_vm13 = vmor %vm1093_vm11, %vm1094_vm12 }
 0x2c2   :  { %216 = vadd.xlane.f32.xlu0 %v215_v63  ;;  %v202_v29 = vpop.xlane.xlu0 %201  ;;  %589 = vadd.xlane.f32.xlu1 %v588_v61  ;;  %v5719_v15 = vpop.eup %5718  ;;  %v1091_v63 = vsub.f32 1.5, %v1090_v5  ;;  %v1835_v43 = vmul.f32 0.5, %v7369_v4  ;;  %v2092_v19 = vadd.f32 %v2028_v41, %v7403_v34  ;;  %v1834_v42 = vmul.f32 0.5, %v7302_v44 }
 0x2c3   :  { %210 = vadd.xlane.f32.xlu2 %v209_v32  ;;  %v323_v24 = vmul.f32 %v6278_v20, %v202_v29  ;;  %2537 = vmatmul.bf16.gmra.mxu1 %v2417_v31  ;;  %v1901_v60 = vmul.f32 %v7463_v57, %v7463_v57  ;;  %v2282_v26 = vadd.f32 1.0, %v5719_v15  ;;  %v1082_v61 = vmul.f32 %v7389_v16, %v1081_v1 }
 0x2c4   :  { %v5721_v58 = vpop.eup %5720  ;;  %v1092_v62 = vmul.f32 %v7397_v47, %v1091_v63  ;;  %v2156_v53 = vmul.f32 0.7978846, %v2092_v19  ;;  %vm1084_vm15 = vweird.f32 %v7389_v16  ;;  %v221_v27 = vsel %vm85_vm0, %v7511_v22, 0.0 }
 0x2c5   :  { %v7475_v25 = vsub.f32 %v7201_v51, %v323_v24  ;;  %v1965_v45 = vmul.f32 %v1901_v60, %v7463_v57  ;;  %v1518_v51 = vpack.c.bf16 %v1464_v9, %v1463_v49  ;;  %v2283_v46 = vadd.f32 1.0, %v5721_v58  ;;  %vm1085_vm1 = vmor %vm1083_vm14, %vm1084_vm15  ;;  %v7528_v9 = vld [vmem:[%s11666_s0 + $0x170] sm:$0xff] }
 0x2c6   :  { %v2346_v44 = vmul.f32 %v2282_v26, %v1834_v42  ;;  %v1096_v8 = vsel %vm7504_vm13, %v7397_v47, %v1092_v62  ;;  %v1086_v49 = vsel %vm1085_vm1, %v7389_v16, %v1082_v61  ;;  %v224_v15 = vsel %vm85_vm0, %v7528_v9, 0.0 }
 0x2c7   :  { %v451_v38 = vmul.f32 %v7475_v25, %v7475_v25  ;;  %v2029_v35 = vmul.f32 0.044715, %v1965_v45  ;;  %5454 = vmatmul.msk.bf16.gmra.mxu0 %vm85_vm0, %v1518_v51  ;;  %v2347_v12 = vmul.f32 %v2283_v46, %v1835_v43  ;;  %v1466_v5 = vmul.f32 %v1096_v8, %v7098_v40 }
 0x2c8   :  { %v1708_v52 = vpop.f32.mrf.mxu0  ;;  %v1465_v47 = vmul.f32 %v1086_v49, %v7050_v50 }
 0x2c9   :  { %v591_v6 = vsel %vm85_vm0, %v451_v38, 0.0  ;;  %v1709_v32 = vadd.f32 %v7238_v3, %v1708_v52  ;;  %v2093_v48 = vadd.f32 %v2029_v35, %v7463_v57  ;;  %v2418_v29 = vpack.c.bf16 %v2347_v12, %v2346_v44 }
 0x2ca   :  { %219 = vadd.xlane.f32.xlu0 %v218_v55  ;;  %592 = vadd.xlane.f32.xlu1 %v591_v6  ;;  %v1519_v38 = vpack.c.bf16 %v1466_v5, %v1465_v47  ;;  %v1836_v6 = vmul.f32 0.5, %v7403_v34  ;;  %v699_v34 = vmul.f32 %v7364_v37, %v6278_v20 }
 0x2cb   :  { %213 = vadd.xlane.f32.xlu2 %v212_v18  ;;  %v2157_v39 = vmul.f32 0.7978846, %v2093_v48  ;;  %v1902_v54 = vmul.f32 %v1709_v32, %v1709_v32  ;;  %v1837_v18 = vmul.f32 0.5, %v7463_v57  ;;  %v1838_v42 = vmul.f32 0.5, %v1709_v32 }
 0x2cc   :  { %v763_v4 = vadd.f32 1e-05, %v699_v34 }
 0x2cd   :  { %5722 = vtanh.f32 %v2157_v39  ;;  %v1966_v31 = vmul.f32 %v1902_v54, %v1709_v32 }
 0x2ce   :  { %5724 = vtanh.f32 %v2156_v53  ;;  %vm1103_vm2 = vweird.f32 %v763_v4 }
 0x2cf   :  { %v2030_v41 = vmul.f32 0.044715, %v1966_v31 }
 0x2d0   :  { %v1710_v24 = vpop.f32.mrf.mxu0 }
 0x2d1   :  { %v1711_v14 = vadd.f32 %v7238_v3, %v1710_v24  ;;  %v2094_v40 = vadd.f32 %v2030_v41, %v1709_v32 }
 0x2d2   :  { %222 = vadd.xlane.f32.xlu1 %v221_v27 }
 0x2d3   :  { %2542 = vmatmul.bf16.gmra.mxu1 %v2418_v29  ;;  %v1903_v60 = vmul.f32 %v1711_v14, %v1711_v14  ;;  %v5723_v13 = vpop.eup %5722  ;;  %v2158_v1 = vmul.f32 0.7978846, %v2094_v40  ;;  %v1839_v48 = vmul.f32 0.5, %v1711_v14 }
 0x2d4   :  { %v5725_v45 = vpop.eup %5724  ;;  %v2285_v16 = vadd.f32 1.0, %v5723_v13 }
 0x2d5   :  { %v1967_v55 = vmul.f32 %v1903_v60, %v1711_v14  ;;  %v2284_v63 = vadd.f32 1.0, %v5725_v45 }
 0x2d6   :  { %v2349_v35 = vmul.f32 %v2285_v16, %v1837_v18 }
 0x2d7   :  { %v2031_v51 = vmul.f32 0.044715, %v1967_v55  ;;  %5455 = vmatmul.msk.bf16.gmra.mxu0 %vm85_vm0, %v1519_v38  ;;  %v2348_v52 = vmul.f32 %v2284_v63, %v1836_v6 }
 0x2d9   :  { %v2095_v50 = vadd.f32 %v2031_v51, %v1711_v14  ;;  %v2419_v43 = vpack.c.bf16 %v2349_v35, %v2348_v52 }
 0x2da   :  { %225 = vadd.xlane.f32.xlu1 %v224_v15 }
 0x2db   :  { %v2159_v58 = vmul.f32 0.7978846, %v2095_v50 }
 0x2dd   :  { %5726 = vtanh.f32 %v2159_v58 }
 0x2de   :  { %5728 = vtanh.f32 %v2158_v1 }
 0x2df   :  { %5730 = vrsqrt.f32 %v763_v4 }
 0x2e3   :  { %2547 = vmatmul.bf16.gmra.mxu1 %v2419_v43  ;;  %v5727_v19 = vpop.eup %5726 }
 0x2e4   :  { %v5729_v26 = vpop.eup %5728  ;;  %v2287_v46 = vadd.f32 1.0, %v5727_v19 }
 0x2e5   :  { %v2286_v62 = vadd.f32 1.0, %v5729_v26  ;;  %v5731_v54 = vpop.eup %5730 }
 0x2e6   :  { %v2351_v57 = vmul.f32 %v2287_v46, %v1839_v48  ;;  %v1098_v53 = vmul.f32 %v5731_v54, %v763_v4  ;;  %vm1104_vm3 = vweird.f32 %v5731_v54 }
 0x2e7   :  { %v2350_v12 = vmul.f32 %v2286_v62, %v1838_v42  ;;  %vm7543_vm4 = vmor %vm1103_vm2, %vm1104_vm3 }
 0x2e8   :  { %v1099_v29 = vmul.f32 %v5731_v54, %v1098_v53 }
 0x2e9   :  { %v2420_v39 = vpack.c.bf16 %v2351_v57, %v2350_v12 }
 0x2ea   :  { %v1100_v27 = vmul.f32 0.5, %v1099_v29 }
 0x2ec   :  { %v1101_v49 = vsub.f32 1.5, %v1100_v27 }
 0x2ee   :  { %v1102_v13 = vmul.f32 %v5731_v54, %v1101_v49 }
 0x2f0   :  { %v1106_v50 = vsel %vm7543_vm4, %v5731_v54, %v1102_v13 }
 0x2f1   :  { %v1467_v46 = vmul.f32 %v1106_v50, %v7153_v0 }
 0x2f3   :  { %2552 = vmatmul.bf16.gmra.mxu1 %v2420_v39 }
 0x315   :  { %v572_v61 = vpop.xlane.xlu1 %571 }
 0x316   :  { %v700_v44 = vmul.f32 %v572_v61, %v6278_v20 }
 0x318   :  { %v764_v8 = vadd.f32 1e-05, %v700_v44 }
 0x31a   :  { %5732 = vrsqrt.f32 %v764_v8  ;;  %vm1113_vm5 = vweird.f32 %v764_v8 }
 0x31d   :  { %v575_v31 = vpop.xlane.xlu1 %574 }
 0x31e   :  { %v701_v24 = vmul.f32 %v575_v31, %v6278_v20 }
 0x320   :  { %v5733_v32 = vpop.eup %5732  ;;  %v7539_v5 = vadd.f32 1e-05, %v701_v24 }
 0x321   :  { %v1108_v14 = vmul.f32 %v5733_v32, %v764_v8  ;;  %vm1114_vm6 = vweird.f32 %v5733_v32 }
 0x322   :  { %5734 = vrsqrt.f32 %v7539_v5  ;;  %v1713_v15 = vpop.f32.mrf.mxu0  ;;  %vm1115_vm7 = vmor %vm1113_vm5, %vm1114_vm6  ;;  %vm1123_vm8 = vweird.f32 %v7539_v5 }
 0x323   :  { %v1109_v37 = vmul.f32 %v5733_v32, %v1108_v14  ;;  %v7564_v43 = vadd.f32 %v7238_v3, %v1713_v15 }
 0x325   :  { %v584_v60 = vpop.xlane.xlu0 %583  ;;  %v1110_v41 = vmul.f32 0.5, %v1109_v37  ;;  %v205_v51 = vpop.xlane.xlu1 %204  ;;  %v1904_v39 = vmul.f32 %v7564_v43, %v7564_v43 }
 0x326   :  { %v578_v47 = vpop.xlane.xlu2 %577  ;;  %v704_v55 = vmul.f32 %v584_v60, %v6278_v20  ;;  %v324_v18 = vmul.f32 %v6278_v20, %v205_v51 }
 0x327   :  { %v702_v38 = vmul.f32 %v578_v47, %v6278_v20  ;;  %v1111_v16 = vsub.f32 1.5, %v1110_v41  ;;  %v1968_v24 = vmul.f32 %v1904_v39, %v7564_v43 }
 0x328   :  { %v7551_v63 = vadd.f32 1e-05, %v704_v55  ;;  %v7555_v35 = vpop.eup %5734  ;;  %v7559_v58 = vsub.f32 %v7332_v28, %v324_v18 }
 0x329   :  { %v7548_v40 = vadd.f32 1e-05, %v702_v38  ;;  %v1112_v6 = vmul.f32 %v5733_v32, %v1111_v16  ;;  %v1118_v52 = vmul.f32 %v7555_v35, %v7539_v5  ;;  %vm1124_vm9 = vweird.f32 %v7555_v35  ;;  %v7609_v16 = vld [vmem:[%s11666_s0 + $0x178] sm:$0xff] }
 0x32a   :  { %v452_v19 = vmul.f32 %v7559_v58, %v7559_v58  ;;  %v1715_v34 = vpop.f32.mrf.mxu0  ;;  %v2032_v15 = vmul.f32 0.044715, %v1968_v24  ;;  %vm7626_vm12 = vmor %vm1123_vm8, %vm1124_vm9  ;;  %vm1153_vm14 = vweird.f32 %v7551_v63 }
 0x32b   :  { %5736 = vrsqrt.f32 %v7548_v40  ;;  %v1116_v1 = vsel %vm1115_vm7, %v5733_v32, %v1112_v6  ;;  %v1119_v28 = vmul.f32 %v7555_v35, %v1118_v52  ;;  %v7577_v0 = vadd.f32 %v7238_v3, %v1715_v34 }
 0x32c   :  { %5738 = vrsqrt.f32 %v7551_v63  ;;  %v1468_v48 = vmul.f32 %v1116_v1, %v7231_v21  ;;  %v594_v42 = vsel %vm85_vm0, %v452_v19, 0.0  ;;  %vm1133_vm11 = vweird.f32 %v7548_v40 }
 0x32d   :  { %v587_v26 = vpop.xlane.xlu0 %586  ;;  %v1120_v12 = vmul.f32 0.5, %v1119_v28  ;;  %595 = vadd.xlane.f32.xlu2 %v594_v42  ;;  %v208_v54 = vpop.xlane.xlu1 %207  ;;  %v1905_v27 = vmul.f32 %v7577_v0, %v7577_v0  ;;  %v2096_v39 = vadd.f32 %v2032_v15, %v7564_v43 }
 0x32e   :  { %v581_v62 = vpop.xlane.xlu2 %580  ;;  %v1520_v57 = vpack.c.bf16 %v1468_v48, %v1467_v46  ;;  %v325_v21 = vmul.f32 %v6278_v20, %v208_v54  ;;  %v705_v32 = vmul.f32 %v587_v26, %v6278_v20 }
 0x32f   :  { %v703_v4 = vmul.f32 %v581_v62, %v6278_v20  ;;  %v1121_v29 = vsub.f32 1.5, %v1120_v12  ;;  %v1969_v47 = vmul.f32 %v1905_v27, %v7577_v0 }
 0x330   :  { %5456 = vmatmul.msk.bf16.gmra.mxu0 %vm85_vm0, %v1520_v57  ;;  %v7589_v31 = vsub.f32 %v7387_v10, %v325_v21  ;;  %v7603_v55 = vadd.f32 1e-05, %v705_v32 }
 0x331   :  { %v5737_v53 = vpop.eup %5736  ;;  %v7582_v44 = vadd.f32 1e-05, %v703_v4  ;;  %v1122_v41 = vmul.f32 %v7555_v35, %v1121_v29  ;;  %v2033_v42 = vmul.f32 0.044715, %v1969_v47 }
 0x332   :  { %v1128_v61 = vmul.f32 %v5737_v53, %v7548_v40  ;;  %v7584_v8 = vpop.eup %5738  ;;  %v453_v14 = vmul.f32 %v7589_v31, %v7589_v31  ;;  %vm1134_vm10 = vweird.f32 %v5737_v53  ;;  %vm1163_vm8 = vweird.f32 %v7603_v55 }
 0x333   :  { %5740 = vrsqrt.f32 %v7582_v44  ;;  %v1148_v10 = vmul.f32 %v7584_v8, %v7551_v63  ;;  %v1718_v18 = vpop.f32.mrf.mxu0  ;;  %v1126_v62 = vsel %vm7626_vm12, %v7555_v35, %v1122_v41  ;;  %vm1135_vm13 = vmor %vm1133_vm11, %vm1134_vm10  ;;  %vm1154_vm15 = vweird.f32 %v7584_v8 }
 0x334   :  { %v1129_v49 = vmul.f32 %v5737_v53, %v1128_v61  ;;  %v597_v38 = vsel %vm85_vm0, %v453_v14, 0.0  ;;  %v7614_v1 = vadd.f32 %v7238_v3, %v1718_v18  ;;  %5742 = vrsqrt.f32 %v7603_v55  ;;  %vm7720_vm4 = vmor %vm1153_vm14, %vm1154_vm15 }
 0x335   :  { %v217_v37 = vpop.xlane.xlu0 %216  ;;  %598 = vadd.xlane.f32.xlu2 %v597_v38  ;;  %v590_v6 = vpop.xlane.xlu1 %589  ;;  %v1149_v40 = vmul.f32 %v7584_v8, %v1148_v10  ;;  %v1469_v29 = vmul.f32 %v1126_v62, %v7283_v36  ;;  %vm1143_vm2 = vweird.f32 %v7582_v44 }
 0x336   :  { %v1130_v60 = vmul.f32 0.5, %v1129_v49  ;;  %v328_v13 = vmul.f32 %v6278_v20, %v217_v37  ;;  %v211_v45 = vpop.xlane.xlu2 %210  ;;  %v706_v52 = vmul.f32 %v590_v6, %v6278_v20  ;;  %v1906_v35 = vmul.f32 %v7614_v1, %v7614_v1 }
 0x337   :  { %v326_v50 = vmul.f32 %v6278_v20, %v211_v45  ;;  %v1150_v61 = vmul.f32 0.5, %v1149_v40  ;;  %v2097_v49 = vadd.f32 %v2033_v42, %v7577_v0 }
 0x338   :  { %v1131_v51 = vsub.f32 1.5, %v1130_v60  ;;  %v7618_v19 = vsub.f32 %v7410_v30, %v328_v13  ;;  %v227_v30 = vsel %vm85_vm0, %v7609_v16, 0.0  ;;  %v7643_v12 = vadd.f32 1e-05, %v706_v52  ;;  %v7687_v52 = vld [vmem:[%s11666_s0 + $0x180] sm:$0xff] }
 0x339   :  { %v7620_v26 = vpop.eup %5740  ;;  %v7632_v28 = vsub.f32 %v7423_v11, %v326_v50  ;;  %v2160_v13 = vmul.f32 0.7978846, %v2096_v39  ;;  %v1970_v47 = vmul.f32 %v1906_v35, %v7614_v1  ;;  %v1151_v38 = vsub.f32 1.5, %v1150_v61 }
 0x33a   :  { %v1132_v48 = vmul.f32 %v5737_v53, %v1131_v51  ;;  %v1138_v5 = vmul.f32 %v7620_v26, %v7582_v44  ;;  %v456_v4 = vmul.f32 %v7618_v19, %v7618_v19  ;;  %5744 = vrsqrt.f32 %v7643_v12  ;;  %v7663_v41 = vpop.eup %5742 }
 0x33b   :  { %v454_v11 = vmul.f32 %v7632_v28, %v7632_v28  ;;  %v1720_v14 = vpop.f32.mrf.mxu0  ;;  %v2161_v18 = vmul.f32 0.7978846, %v2097_v49  ;;  %5746 = vtanh.f32 %v2160_v13  ;;  %vm1144_vm1 = vweird.f32 %v7620_v26 }
 0x33c   :  { %v1136_v57 = vsel %vm1135_vm13, %v5737_v53, %v1132_v48  ;;  %v1139_v34 = vmul.f32 %v7620_v26, %v1138_v5  ;;  %v606_v24 = vsel %vm85_vm0, %v456_v4, 0.0  ;;  %v7667_v45 = vadd.f32 %v7238_v3, %v1720_v14  ;;  %vm7702_vm3 = vmor %vm1143_vm2, %vm1144_vm1 }
 0x33d   :  { %v220_v54 = vpop.xlane.xlu0 %219  ;;  %v1470_v21 = vmul.f32 %v1136_v57, %v7305_v56  ;;  %v600_v53 = vsel %vm85_vm0, %v454_v11, 0.0  ;;  %228 = vadd.xlane.f32.xlu2 %v227_v30  ;;  %v7660_v60 = vpop.xlane.xlu1 %592  ;;  %607 = vadd.xlane.f32.xlu1 %v606_v24  ;;  %v2034_v48 = vmul.f32 0.044715, %v1970_v47  ;;  %v1158_v30 = vmul.f32 %v7663_v41, %v7603_v55 }
 0x33e   :  { %v1140_v27 = vmul.f32 0.5, %v1139_v34  ;;  %601 = vadd.xlane.f32.xlu0 %v600_v53  ;;  %v214_v32 = vpop.xlane.xlu2 %213  ;;  %v329_v56 = vmul.f32 %v6278_v20, %v220_v54  ;;  %v1907_v51 = vmul.f32 %v7667_v45, %v7667_v45  ;;  %5748 = vtanh.f32 %v2161_v18  ;;  %v7761_v11 = vpop.f32.mrf.mxu1 }
 0x33f   :  { %v327_v37 = vmul.f32 %v6278_v20, %v214_v32  ;;  %v1521_v10 = vpack.c.bf16 %v1470_v21, %v1469_v29  ;;  %v230_v57 = vsel %vm85_vm0, %v7687_v52, 0.0  ;;  %v2098_v54 = vadd.f32 %v2034_v48, %v7614_v1  ;;  %v7729_v32 = vld [vmem:[%s11666_s0 + $0x188] sm:$0xff] }
 0x340   :  { %v1141_v36 = vsub.f32 1.5, %v1140_v27  ;;  %v7676_v50 = vpop.eup %5744  ;;  %v7680_v6 = vsub.f32 %v7469_v17, %v329_v56  ;;  %v1152_v17 = vmul.f32 %v7584_v8, %v1151_v38  ;;  %v1971_v62 = vmul.f32 %v1907_v51, %v7667_v45  ;;  %v7741_v56 = vld [vmem:[%s11666_s0 + $0x198] sm:$0xff] }
 0x341   :  { %v7670_v15 = vsub.f32 %v7480_v59, %v327_v37  ;;  %5457 = vmatmul.msk.bf16.gmra.mxu0 %vm85_vm0, %v1521_v10  ;;  %v1168_v40 = vmul.f32 %v7676_v50, %v7643_v12  ;;  %v5747_v53 = vpop.eup %5746  ;;  %v1159_v49 = vmul.f32 %v7663_v41, %v1158_v30  ;;  %v2162_v47 = vmul.f32 0.7978846, %v2098_v54 }
 0x342   :  { %v1142_v46 = vmul.f32 %v7620_v26, %v1141_v36  ;;  %v2035_v39 = vmul.f32 0.044715, %v1971_v62  ;;  %v457_v35 = vmul.f32 %v7680_v6, %v7680_v6  ;;  %v1156_v24 = vsel %vm7720_vm4, %v7584_v8, %v1152_v17 }
 0x343   :  { %v455_v59 = vmul.f32 %v7670_v15, %v7670_v15  ;;  %v1169_v5 = vmul.f32 %v7676_v50, %v1168_v40  ;;  %v2288_v37 = vadd.f32 1.0, %v5747_v53  ;;  %v1840_v38 = vmul.f32 0.5, %v7564_v43 }
 0x344   :  { %v1723_v34 = vpop.f32.mrf.mxu0  ;;  %v1146_v4 = vsel %vm7702_vm3, %v7620_v26, %v1142_v46  ;;  %v2099_v27 = vadd.f32 %v2035_v39, %v7667_v45  ;;  %v609_v26 = vsel %vm85_vm0, %v457_v35, 0.0  ;;  %v5749_v36 = vpop.eup %5748  ;;  %v1841_v51 = vmul.f32 0.5, %v7577_v0 }
 0x345   :  { %v603_v42 = vsel %vm85_vm0, %v455_v59, 0.0  ;;  %231 = vadd.xlane.f32.xlu2 %v230_v57  ;;  %v223_v44 = vpop.xlane.xlu1 %222  ;;  %v7713_v21 = vadd.f32 %v7238_v3, %v1723_v34  ;;  %v1170_v63 = vmul.f32 0.5, %v1169_v5  ;;  %610 = vadd.xlane.f32.xlu1 %v609_v26  ;;  %v1471_v10 = vmul.f32 %v1146_v4, %v7377_v7  ;;  %v7768_v34 = vld [vmem:[%s11666_s0 + $0x190] sm:$0xff] }
 0x346   :  { %604 = vadd.xlane.f32.xlu0 %v603_v42  ;;  %v330_v61 = vmul.f32 %v6278_v20, %v223_v44  ;;  %v2163_v13 = vmul.f32 0.7978846, %v2099_v27  ;;  %v2289_v18 = vadd.f32 1.0, %v5749_v36  ;;  %v1472_v46 = vmul.f32 %v1156_v24, %v7313_v23 }
 0x347   :  { %v1908_v8 = vmul.f32 %v7713_v21, %v7713_v21  ;;  %v1160_v7 = vmul.f32 0.5, %v1159_v49  ;;  %v1171_v48 = vsub.f32 1.5, %v1170_v63  ;;  %v239_v40 = vsel %vm85_vm0, %v7741_v56, 0.0 }
 0x348   :  { %v7736_v14 = vsub.f32 %v7511_v22, %v330_v61  ;;  %v233_v22 = vsel %vm85_vm0, %v7729_v32, 0.0  ;;  %5750 = vtanh.f32 %v2163_v13  ;;  %v2352_v17 = vmul.f32 %v2288_v37, %v1840_v38 }
 0x349   :  { %v2353_v30 = vmul.f32 %v2289_v18, %v1841_v51  ;;  %v1522_v0 = vpack.c.bf16 %v1472_v46, %v1471_v10  ;;  %5752 = vtanh.f32 %v2162_v47  ;;  %v1972_v42 = vmul.f32 %v1908_v8, %v7713_v21  ;;  %v7808_v51 = vld [vmem:[%s11666_s0 + $0x1a0] sm:$0xff] }
 0x34a   :  { %v458_v59 = vmul.f32 %v7736_v14, %v7736_v14  ;;  %vm1173_vm5 = vweird.f32 %v7643_v12  ;;  %v1161_v44 = vsub.f32 1.5, %v1160_v7  ;;  %vm1174_vm6 = vweird.f32 %v7676_v50 }
 0x34b   :  { %v2421_v39 = vpack.c.bf16 %v2353_v30, %v2352_v17  ;;  %v1172_v54 = vmul.f32 %v7676_v50, %v1171_v48  ;;  %v2036_v53 = vmul.f32 0.044715, %v1972_v42  ;;  %v236_v27 = vsel %vm85_vm0, %v7768_v34, 0.0  ;;  %vm7784_vm7 = vmor %vm1173_vm5, %vm1174_vm6  ;;  %v7822_v17 = vld [vmem:[%s11666_s0 + $0x1a8] sm:$0xff] }
 0x34c   :  { %v1725_v43 = vpop.f32.mrf.mxu0  ;;  %v612_v62 = vsel %vm85_vm0, %v458_v59, 0.0  ;;  %v1162_v49 = vmul.f32 %v7663_v41, %v1161_v44  ;;  %vm1164_vm9 = vweird.f32 %v7663_v41  ;;  %v1843_v38 = vmul.f32 0.5, %v7667_v45  ;;  %v7843_v44 = vld [vmem:[%s11670_s4] ss:$0 sm:$0xff] }
 0x34d   :  { %v226_v5 = vpop.xlane.xlu1 %225  ;;  %v7758_v57 = vadd.f32 %v7238_v3, %v1725_v43  ;;  %613 = vadd.xlane.f32.xlu2 %v612_v62  ;;  %240 = vadd.xlane.f32.xlu1 %v239_v40  ;;  %v1176_v12 = vsel %vm7784_vm7, %v7676_v50, %v1172_v54  ;;  %v2100_v36 = vadd.f32 %v2036_v53, %v7713_v21  ;;  %vm7800_vm10 = vmor %vm1163_vm8, %vm1164_vm9  ;;  %v1842_v59 = vmul.f32 0.5, %v7614_v1 }
 0x34e   :  { %234 = vadd.xlane.f32.xlu0 %v233_v22  ;;  %v331_v23 = vmul.f32 %v6278_v20, %v226_v5  ;;  %2557 = vmatmul.bf16.gmra.mxu1 %v2421_v39  ;;  %v5751_v61 = vpop.eup %5750  ;;  %v1166_v50 = vsel %vm7800_vm10, %v7663_v41, %v1162_v49  ;;  %v1474_v7 = vmul.f32 %v1176_v12, %v7428_v33  ;;  %v242_v40 = vsel %vm85_vm0, %v7808_v51, 0.0 }
 0x34f   :  { %v1909_v35 = vmul.f32 %v7758_v57, %v7758_v57  ;;  %v2291_v10 = vadd.f32 1.0, %v5751_v61  ;;  %v2164_v48 = vmul.f32 0.7978846, %v2100_v36  ;;  %v1473_v30 = vmul.f32 %v1166_v50, %v7374_v2  ;;  %v7838_v2 = vld [vmem:[%s11666_s0 + $0x1b0] sm:$0xff] }
 0x350   :  { %v7774_v4 = vsub.f32 %v7528_v9, %v331_v23  ;;  %v5753_v9 = vpop.eup %5752  ;;  %v245_v62 = vsel %vm85_vm0, %v7822_v17, 0.0  ;;  %v248_v61 = vsel %vm85_vm0, %v7838_v2, 0.0  ;;  %v1844_v36 = vmul.f32 0.5, %v7713_v21 }
 0x351   :  { %5458 = vmatmul.msk.bf16.gmra.mxu0 %vm85_vm0, %v1522_v0  ;;  %v1973_v29 = vmul.f32 %v1909_v35, %v7758_v57  ;;  %v2290_v22 = vadd.f32 1.0, %v5753_v9  ;;  %v2355_v46 = vmul.f32 %v2291_v10, %v1843_v38  ;;  %v1523_v33 = vpack.c.bf16 %v1474_v7, %v1473_v30  ;;  %v7831_v0 = vld [vmem:[%s11668_s2] ss:$0 sm:$0xff]  ;;  %v6140_v10 = vld [vmem:[%s11666_s0 + $0x8] sm:$0xff] }
 0x352   :  { %v459_v26 = vmul.f32 %v7774_v4, %v7774_v4 }
 0x353   :  { %v2037_v63 = vmul.f32 0.044715, %v1973_v29  ;;  %v2354_v41 = vmul.f32 %v2290_v22, %v1842_v59 }
 0x354   :  { %v1728_v37 = vpop.f32.mrf.mxu0  ;;  %v615_v13 = vsel %vm85_vm0, %v459_v26, 0.0 }
 0x355   :  { %v2101_v47 = vadd.f32 %v2037_v63, %v7758_v57  ;;  %v7798_v8 = vadd.f32 %v7238_v3, %v1728_v37  ;;  %616 = vadd.xlane.f32.xlu1 %v615_v13  ;;  %v2505_v3 = vpop.f32.mrf.mxu1  ;;  %v2422_v1 = vpack.c.bf16 %v2355_v46, %v2354_v41  ;;  %v1845_v63 = vmul.f32 0.5, %v7758_v57  ;;  %v7863_v57 = vld [vmem:[%s11666_s0 + $0x1c0] sm:$0xff]  ;;  %v6141_v41 = vld [vmem:[%s11666_s0 + $0x18] sm:$0xff] }
 0x356   :  { %237 = vadd.xlane.f32.xlu0 %v236_v27  ;;  %v2506_v27 = vadd.f32 %v7843_v44, %v2505_v3  ;;  %v254_v21 = vsel %vm85_vm0, %v7863_v57, 0.0 }
 0x357   :  { %v2165_v18 = vmul.f32 0.7978846, %v2101_v47  ;;  %v1910_v45 = vmul.f32 %v7798_v8, %v7798_v8 }
 0x358   :  { %v7855_v13 = vadd.f32 %v6140_v10, %v2506_v27 }
 0x359   :  { %5754 = vtanh.f32 %v2165_v18  ;;  %v1974_v5 = vmul.f32 %v1910_v45, %v7798_v8 }
 0x35a   :  { %5756 = vtanh.f32 %v2164_v48  ;;  %11770 = vst [vmem:[#allocation2_spill] sm:$0xff] %v7855_v13  ;;  %v2730_v22 = vsel %vm85_vm0, %v7855_v13, 0.0 }
 0x35b   :  { %v2038_v35 = vmul.f32 0.044715, %v1974_v5 }
 0x35c   :  { %v1730_v43 = vpop.f32.mrf.mxu0 }
 0x35d   :  { %v1731_v42 = vadd.f32 %v7831_v0, %v1730_v43  ;;  %246 = vadd.xlane.f32.xlu1 %v245_v62  ;;  %v7847_v53 = vpop.f32.mrf.mxu1  ;;  %v2102_v9 = vadd.f32 %v2038_v35, %v7798_v8 }
 0x35e   :  { %243 = vadd.xlane.f32.xlu0 %v242_v40  ;;  %2562 = vmatmul.bf16.gmra.mxu1 %v2422_v1  ;;  %v1846_v1 = vmul.f32 0.5, %v7798_v8 }
 0x35f   :  { %v1911_v23 = vmul.f32 %v1731_v42, %v1731_v42  ;;  %v5755_v39 = vpop.eup %5754  ;;  %v2166_v55 = vmul.f32 0.7978846, %v2102_v9  ;;  %v1847_v45 = vmul.f32 0.5, %v1731_v42 }
 0x360   :  { %v5757_v29 = vpop.eup %5756  ;;  %v2293_v24 = vadd.f32 1.0, %v5755_v39 }
 0x361   :  { %5459 = vmatmul.msk.bf16.gmra.mxu0 %vm85_vm0, %v1523_v33  ;;  %v1975_v54 = vmul.f32 %v1911_v23, %v1731_v42  ;;  %v2292_v37 = vadd.f32 1.0, %v5757_v29 }
 0x362   :  { %v2357_v47 = vmul.f32 %v2293_v24, %v1845_v63 }
 0x363   :  { %v2039_v26 = vmul.f32 0.044715, %v1975_v54  ;;  %v2356_v38 = vmul.f32 %v2292_v37, %v1844_v36 }
 0x365   :  { %v2103_v49 = vadd.f32 %v2039_v26, %v1731_v42  ;;  %v2510_v50 = vpop.f32.mrf.mxu1  ;;  %v2423_v18 = vpack.c.bf16 %v2357_v47, %v2356_v38  ;;  %v707_v42 = vmul.f32 %v7660_v60, %v6278_v20 }
 0x366   :  { %249 = vadd.xlane.f32.xlu0 %v248_v61  ;;  %v2511_v46 = vadd.f32 %v7843_v44, %v2510_v50 }
 0x367   :  { %v2167_v12 = vmul.f32 0.7978846, %v2103_v49  ;;  %v771_v39 = vadd.f32 1e-05, %v707_v42 }
 0x368   :  { %v7873_v30 = vadd.f32 %v6141_v41, %v2511_v46 }
 0x369   :  { %5758 = vtanh.f32 %v2167_v12  ;;  %vm1183_vm11 = vweird.f32 %v771_v39 }
 0x36a   :  { %5760 = vtanh.f32 %v2166_v55  ;;  %11771 = vst [vmem:[#allocation3_spill] sm:$0xff] %v7873_v30  ;;  %v2736_v62 = vsel %vm85_vm0, %v7873_v30, 0.0 }
 0x36b   :  { %5762 = vrsqrt.f32 %v771_v39 }
 0x36d   :  { %v7868_v48 = vpop.f32.mrf.mxu1 }
 0x36e   :  { %2731 = vadd.xlane.f32.xlu0 %v2730_v22  ;;  %2567 = vmatmul.bf16.gmra.mxu1 %v2423_v18 }
 0x36f   :  { %v5759_v3 = vpop.eup %5758 }
 0x370   :  { %v5761_v59 = vpop.eup %5760  ;;  %v2295_v7 = vadd.f32 1.0, %v5759_v3 }
 0x371   :  { %v2294_v40 = vadd.f32 1.0, %v5761_v59  ;;  %v5763_v35 = vpop.eup %5762 }
 0x372   :  { %v2359_v43 = vmul.f32 %v2295_v7, %v1847_v45  ;;  %v1178_v61 = vmul.f32 %v5763_v35, %v771_v39  ;;  %vm1184_vm12 = vweird.f32 %v5763_v35 }
 0x373   :  { %v2358_v33 = vmul.f32 %v2294_v40, %v1846_v1  ;;  %vm7896_vm13 = vmor %vm1183_vm11, %vm1184_vm12 }
 0x374   :  { %v1179_v27 = vmul.f32 %v5763_v35, %v1178_v61 }
 0x375   :  { %v2424_v5 = vpack.c.bf16 %v2359_v43, %v2358_v33  ;;  %v7878_v23 = vpop.f32.mrf.mxu1 }
 0x376   :  { %255 = vadd.xlane.f32.xlu0 %v254_v21  ;;  %v1180_v24 = vmul.f32 0.5, %v1179_v27 }
 0x378   :  { %v1181_v12 = vsub.f32 1.5, %v1180_v24 }
 0x37a   :  { %v1182_v21 = vmul.f32 %v5763_v35, %v1181_v12 }
 0x37c   :  { %v1186_v39 = vsel %vm7896_vm13, %v5763_v35, %v1182_v21 }
 0x37d   :  { %v7945_v7 = vpop.f32.mrf.mxu1 }
 0x37e   :  { %2737 = vadd.xlane.f32.xlu0 %v2736_v62  ;;  %2572 = vmatmul.bf16.gmra.mxu1 %v2424_v5 }
 0x3a0   :  { %v596_v54 = vpop.xlane.xlu2 %595 }
 0x3a1   :  { %v708_v8 = vmul.f32 %v596_v54, %v6278_v20 }
 0x3a3   :  { %v772_v29 = vadd.f32 1e-05, %v708_v8 }
 0x3a5   :  { %5764 = vrsqrt.f32 %v772_v29  ;;  %vm1193_vm14 = vweird.f32 %v772_v29 }
 0x3a8   :  { %v599_v26 = vpop.xlane.xlu2 %598 }
 0x3a9   :  { %v709_v9 = vmul.f32 %v599_v26, %v6278_v20 }
 0x3ab   :  { %v5765_v49 = vpop.eup %5764  ;;  %v7884_v63 = vadd.f32 1e-05, %v709_v9  ;;  %v1475_v9 = vmul.f32 %v1186_v39, %v7475_v25 }
 0x3ac   :  { %v1188_v10 = vmul.f32 %v5765_v49, %v772_v29  ;;  %vm1194_vm15 = vweird.f32 %v5765_v49 }
 0x3ad   :  { %v1733_v37 = vpop.f32.mrf.mxu0  ;;  %5766 = vrsqrt.f32 %v7884_v63  ;;  %vm1195_vm1 = vmor %vm1193_vm14, %vm1194_vm15  ;;  %vm1203_vm2 = vweird.f32 %v7884_v63 }
 0x3ae   :  { %v7887_v60 = vadd.f32 %v7831_v0, %v1733_v37  ;;  %v1189_v36 = vmul.f32 %v5765_v49, %v1188_v10 }
 0x3b0   :  { %v1912_v47 = vmul.f32 %v7887_v60, %v7887_v60  ;;  %v1190_v38 = vmul.f32 0.5, %v1189_v36  ;;  %v229_v50 = vpop.xlane.xlu2 %228  ;;  %v608_v18 = vpop.xlane.xlu1 %607 }
 0x3b1   :  { %v602_v55 = vpop.xlane.xlu0 %601  ;;  %v332_v59 = vmul.f32 %v6278_v20, %v229_v50  ;;  %v712_v46 = vmul.f32 %v608_v18, %v6278_v20 }
 0x3b2   :  { %v1976_v22 = vmul.f32 %v1912_v47, %v7887_v60  ;;  %v710_v3 = vmul.f32 %v602_v55, %v6278_v20  ;;  %v1191_v45 = vsub.f32 1.5, %v1190_v38 }
 0x3b3   :  { %v7902_v41 = vpop.eup %5766  ;;  %v7905_v1 = vsub.f32 %v7609_v16, %v332_v59  ;;  %v7907_v43 = vadd.f32 1e-05, %v712_v46 }
 0x3b4   :  { %v7900_v40 = vadd.f32 1e-05, %v710_v3  ;;  %v1192_v62 = vmul.f32 %v5765_v49, %v1191_v45  ;;  %v1198_v5 = vmul.f32 %v7902_v41, %v7884_v63  ;;  %v2040_v42 = vmul.f32 0.044715, %v1976_v22 }
 0x3b5   :  { %v1735_v33 = vpop.f32.mrf.mxu0  ;;  %v460_v29 = vmul.f32 %v7905_v1, %v7905_v1  ;;  %vm1204_vm3 = vweird.f32 %v7902_v41  ;;  %vm1233_vm8 = vweird.f32 %v7907_v43 }
 0x3b6   :  { %v7914_v54 = vadd.f32 %v7831_v0, %v1735_v33  ;;  %v1196_v61 = vsel %vm1195_vm1, %v5765_v49, %v1192_v62  ;;  %v1199_v8 = vmul.f32 %v7902_v41, %v1198_v5  ;;  %5768 = vrsqrt.f32 %v7900_v40  ;;  %vm7985_vm5 = vmor %vm1203_vm2, %vm1204_vm3 }
 0x3b7   :  { %5770 = vrsqrt.f32 %v7907_v43  ;;  %v1476_v27 = vmul.f32 %v1196_v61, %v7559_v58  ;;  %v2104_v35 = vadd.f32 %v2040_v42, %v7887_v60  ;;  %v618_v10 = vsel %vm85_vm0, %v460_v29, 0.0 }
 0x3b8   :  { %v1913_v16 = vmul.f32 %v7914_v54, %v7914_v54  ;;  %v232_v26 = vpop.xlane.xlu2 %231  ;;  %v1200_v36 = vmul.f32 0.5, %v1199_v8  ;;  %619 = vadd.xlane.f32.xlu2 %v618_v10  ;;  %v611_v38 = vpop.xlane.xlu1 %610  ;;  %vm1213_vm6 = vweird.f32 %v7900_v40 }
 0x3b9   :  { %v605_v24 = vpop.xlane.xlu0 %604  ;;  %v333_v37 = vmul.f32 %v6278_v20, %v232_v26  ;;  %v1524_v47 = vpack.c.bf16 %v1476_v27, %v1475_v9  ;;  %v2168_v25 = vmul.f32 0.7978846, %v2104_v35  ;;  %v713_v46 = vmul.f32 %v611_v38, %v6278_v20  ;;  %v7979_v38 = vld [vmem:[%s11666_s0 + $0x1b8] sm:$0xff] }
 0x3ba   :  { %v1977_v49 = vmul.f32 %v1913_v16, %v7914_v54  ;;  %v711_v12 = vmul.f32 %v605_v24, %v6278_v20 }
 0x3bb   :  { %v7931_v58 = vsub.f32 %v7687_v52, %v333_v37  ;;  %5460 = vmatmul.msk.bf16.gmra.mxu0 %vm85_vm0, %v1524_v47  ;;  %v1201_v52 = vsub.f32 1.5, %v1200_v36  ;;  %v7962_v26 = vadd.f32 1e-05, %v713_v46 }
 0x3bc   :  { %v2041_v55 = vmul.f32 0.044715, %v1977_v49  ;;  %v7933_v22 = vadd.f32 1e-05, %v711_v12  ;;  %v7935_v50 = vpop.eup %5768 }
 0x3bd   :  { %v7938_v3 = vpop.eup %5770  ;;  %v1208_v21 = vmul.f32 %v7935_v50, %v7900_v40  ;;  %v461_v62 = vmul.f32 %v7931_v58, %v7931_v58  ;;  %v1202_v35 = vmul.f32 %v7902_v41, %v1201_v52  ;;  %vm1214_vm4 = vweird.f32 %v7935_v50 }
 0x3be   :  { %v1738_v18 = vpop.f32.mrf.mxu0  ;;  %v2105_v59 = vadd.f32 %v2041_v55, %v7914_v54  ;;  %5772 = vrsqrt.f32 %v7933_v22  ;;  %v1228_v5 = vmul.f32 %v7938_v3, %v7907_v43  ;;  %vm8000_vm7 = vmor %vm1213_vm6, %vm1214_vm4  ;;  %vm1234_vm9 = vweird.f32 %v7938_v3  ;;  %v6142_v43 = vld [vmem:[%s11666_s0] sm:$0xff] }
 0x3bf   :  { %v1209_v45 = vmul.f32 %v7935_v50, %v1208_v21  ;;  %v7950_v33 = vadd.f32 %v7831_v0, %v1738_v18  ;;  %5774 = vtanh.f32 %v2168_v25  ;;  %v621_v29 = vsel %vm85_vm0, %v461_v62, 0.0  ;;  %vm8079_vm13 = vmor %vm1233_vm8, %vm1234_vm9 }
 0x3c0   :  { %v2169_v39 = vmul.f32 0.7978846, %v2105_v59  ;;  %v614_v16 = vpop.xlane.xlu2 %613  ;;  %622 = vadd.xlane.f32.xlu1 %v621_v29  ;;  %v241_v10 = vpop.xlane.xlu1 %240  ;;  %v1229_v18 = vmul.f32 %v7938_v3, %v1228_v5  ;;  %v1206_v52 = vsel %vm7985_vm5, %v7902_v41, %v1202_v35  ;;  %v251_v41 = vsel %vm85_vm0, %v7979_v38, 0.0 }
 0x3c1   :  { %v235_v42 = vpop.xlane.xlu0 %234  ;;  %v1210_v61 = vmul.f32 0.5, %v1209_v45  ;;  %v1914_v8 = vmul.f32 %v7950_v33, %v7950_v33  ;;  %v714_v24 = vmul.f32 %v614_v16, %v6278_v20  ;;  %v8017_v16 = vpop.f32.mrf.mxu1  ;;  %v1477_v29 = vmul.f32 %v1206_v52, %v7589_v31 }
 0x3c2   :  { %v334_v27 = vmul.f32 %v6278_v20, %v235_v42  ;;  %5776 = vtanh.f32 %v2169_v39  ;;  %v336_v42 = vmul.f32 %v6278_v20, %v241_v10  ;;  %v1849_v52 = vmul.f32 0.5, %v7914_v54 }
 0x3c3   :  { %v1211_v49 = vsub.f32 1.5, %v1210_v61  ;;  %v1978_v37 = vmul.f32 %v1914_v8, %v7950_v33  ;;  %v7971_v36 = vadd.f32 1e-05, %v714_v24  ;;  %5778 = vrsqrt.f32 %v7962_v26 }
 0x3c4   :  { %v7965_v9 = vpop.eup %5772  ;;  %v7974_v47 = vsub.f32 %v7729_v32, %v334_v27  ;;  %vm1223_vm11 = vweird.f32 %v7933_v22  ;;  %vm1243_vm1 = vweird.f32 %v7962_v26 }
 0x3c5   :  { %v1218_v12 = vmul.f32 %v7965_v9, %v7933_v22  ;;  %v1212_v21 = vmul.f32 %v7935_v50, %v1211_v49  ;;  %v5775_v59 = vpop.eup %5774  ;;  %v2042_v45 = vmul.f32 0.044715, %v1978_v37  ;;  %5780 = vrsqrt.f32 %v7971_v36 }
 0x3c6   :  { %v1740_v55 = vpop.f32.mrf.mxu0  ;;  %v462_v61 = vmul.f32 %v7974_v47, %v7974_v47  ;;  %v2296_v35 = vadd.f32 1.0, %v5775_v59  ;;  %v1848_v59 = vmul.f32 0.5, %v7887_v60  ;;  %vm1224_vm10 = vweird.f32 %v7965_v9 }
 0x3c7   :  { %v7993_v32 = vadd.f32 %v7831_v0, %v1740_v55  ;;  %v1219_v46 = vmul.f32 %v7965_v9, %v1218_v12  ;;  %v1216_v40 = vsel %vm8000_vm7, %v7935_v50, %v1212_v21  ;;  %v1230_v50 = vmul.f32 0.5, %v1229_v18  ;;  %vm8071_vm12 = vmor %vm1223_vm11, %vm1224_vm10 }
 0x3c8   :  { %v5777_v62 = vpop.eup %5776  ;;  %v1478_v27 = vmul.f32 %v1216_v40, %v7632_v28  ;;  %252 = vadd.xlane.f32.xlu1 %v251_v41  ;;  %v624_v49 = vsel %vm85_vm0, %v462_v61, 0.0  ;;  %v2106_v12 = vadd.f32 %v2042_v45, %v7950_v33  ;;  %v8025_v55 = vpop.xlane.xlu1 %616  ;;  %v8030_v28 = vsub.f32 %v7741_v56, %v336_v42 }
 0x3c9   :  { %v1220_v5 = vmul.f32 0.5, %v1219_v46  ;;  %v1915_v39 = vmul.f32 %v7993_v32, %v7993_v32  ;;  %v238_v8 = vpop.xlane.xlu0 %237  ;;  %v2297_v10 = vadd.f32 1.0, %v5777_v62  ;;  %625 = vadd.xlane.f32.xlu2 %v624_v49  ;;  %v8027_v18 = vpop.eup %5778  ;;  %v2504_v46 = vadd.f32 %v7843_v44, %v7761_v11 }
 0x3ca   :  { %v335_v37 = vmul.f32 %v6278_v20, %v238_v8  ;;  %v1525_v25 = vpack.c.bf16 %v1478_v27, %v1477_v29  ;;  %v1231_v40 = vsub.f32 1.5, %v1230_v50  ;;  %v2360_v60 = vmul.f32 %v2296_v35, %v1848_v59 }
 0x3cb   :  { %v1979_v24 = vmul.f32 %v1915_v39, %v7993_v32  ;;  %v1221_v31 = vsub.f32 1.5, %v1220_v5  ;;  %v8034_v63 = vpop.eup %5780  ;;  %v2361_v62 = vmul.f32 %v2297_v10, %v1849_v52  ;;  %v2170_v54 = vmul.f32 0.7978846, %v2106_v12  ;;  %v8067_v10 = vpop.f32.mrf.mxu1 }
 0x3cc   :  { %5461 = vmatmul.msk.bf16.gmra.mxu0 %vm85_vm0, %v1525_v25  ;;  %v8044_v41 = vsub.f32 %v7768_v34, %v335_v37  ;;  %v1248_v42 = vmul.f32 %v8034_v63, %v7971_v36  ;;  %v464_v34 = vmul.f32 %v8030_v28, %v8030_v28  ;;  %v1232_v8 = vmul.f32 %v7938_v3, %v1231_v40 }
 0x3cd   :  { %v2043_v56 = vmul.f32 0.044715, %v1979_v24  ;;  %v1222_v5 = vmul.f32 %v7965_v9, %v1221_v31  ;;  %v2425_v39 = vpack.c.bf16 %v2361_v62, %v2360_v60  ;;  %v1238_v50 = vmul.f32 %v8027_v18, %v7962_v26 }
 0x3ce   :  { %v1743_v21 = vpop.f32.mrf.mxu0  ;;  %v630_v35 = vsel %vm85_vm0, %v464_v34, 0.0  ;;  %v463_v24 = vmul.f32 %v8044_v41, %v8044_v41  ;;  %v2509_v37 = vadd.f32 %v7843_v44, %v7847_v53  ;;  %5782 = vtanh.f32 %v2170_v54 }
 0x3cf   :  { %v8041_v45 = vadd.f32 %v7831_v0, %v1743_v21  ;;  %v2107_v27 = vadd.f32 %v2043_v56, %v7993_v32  ;;  %2577 = vmatmul.bf16.gmra.mxu1 %v2425_v39  ;;  %v1226_v53 = vsel %vm8071_vm12, %v7965_v9, %v1222_v5  ;;  %v1249_v31 = vmul.f32 %v8034_v63, %v1248_v42  ;;  %v8116_v42 = vld [vmem:[%s11666_s0 + $0x1c8] sm:$0xff] }
 0x3d0   :  { %v247_v12 = vpop.xlane.xlu1 %246  ;;  %v627_v21 = vsel %vm85_vm0, %v463_v24, 0.0  ;;  %v8094_v40 = vadd.f32 %v6142_v43, %v2504_v46  ;;  %v1236_v56 = vsel %vm8079_vm13, %v7938_v3, %v1232_v8  ;;  %v1239_v62 = vmul.f32 %v8027_v18, %v1238_v50  ;;  %v6143_v46 = vld [vmem:[%s11666_s0 + $0x10] sm:$0xff] }
 0x3d1   :  { %v1916_v11 = vmul.f32 %v8041_v45, %v8041_v45  ;;  %v244_v61 = vpop.xlane.xlu0 %243  ;;  %631 = vadd.xlane.f32.xlu2 %v630_v35  ;;  %628 = vadd.xlane.f32.xlu1 %v627_v21  ;;  %v8109_v5 = vadd.f32 %v6143_v46, %v2509_v37  ;;  %v2516_v3 = vadd.f32 %v7843_v44, %v7878_v23  ;;  %v1250_v34 = vmul.f32 0.5, %v1249_v31 }
 0x3d2   :  { %v337_v49 = vmul.f32 %v6278_v20, %v244_v61  ;;  %11782 = vst [vmem:[#allocation4_spill] sm:$0xff] %v8094_v40  ;;  %v1479_v39 = vmul.f32 %v1226_v53, %v7670_v15  ;;  %v2727_v23 = vsel %vm85_vm0, %v8094_v40, 0.0  ;;  %v1480_v35 = vmul.f32 %v1236_v56, %v7618_v19 }
 0x3d3   :  { %v1980_v29 = vmul.f32 %v1916_v11, %v8041_v45  ;;  %v2171_v11 = vmul.f32 0.7978846, %v2107_v27  ;;  %11783 = vst [vmem:[#allocation5_spill] sm:$0xff] %v8109_v5  ;;  %v1240_v24 = vmul.f32 0.5, %v1239_v62  ;;  %v257_v37 = vsel %vm85_vm0, %v8116_v42, 0.0 }
 0x3d4   :  { %v8089_v59 = vsub.f32 %v7808_v51, %v337_v49  ;;  %v338_v51 = vmul.f32 %v6278_v20, %v247_v12  ;;  %v1526_v22 = vpack.c.bf16 %v1480_v35, %v1479_v39  ;;  %v6144_v12 = vld [vmem:[%s11666_s0 + $0x28] sm:$0xff]  ;;  %v1251_v53 = vsub.f32 1.5, %v1250_v34 }
 0x3d5   :  { %v2044_v60 = vmul.f32 0.044715, %v1980_v29  ;;  %5784 = vtanh.f32 %v2171_v11  ;;  %v5783_v29 = vpop.eup %5782  ;;  %v8137_v25 = vadd.f32 %v6144_v12, %v2516_v3  ;;  %v2733_v21 = vsel %vm85_vm0, %v8109_v5, 0.0 }
 0x3d6   :  { %v1745_v52 = vpop.f32.mrf.mxu0  ;;  %v465_v54 = vmul.f32 %v8089_v59, %v8089_v59  ;;  %v8130_v49 = vsub.f32 %v7822_v17, %v338_v51  ;;  %vm1253_vm14 = vweird.f32 %v7971_v36  ;;  %v2298_v56 = vadd.f32 1.0, %v5783_v29  ;;  %v8173_v36 = vld [vmem:[%s11666_s0 + $0x1d8] sm:$0xff] }
 0x3d7   :  { %v8100_v9 = vadd.f32 %v7831_v0, %v1745_v52  ;;  %v2108_v27 = vadd.f32 %v2044_v60, %v8041_v45  ;;  %11784 = vst [vmem:[#allocation6_spill] sm:$0xff] %v8137_v25  ;;  %v8141_v52 = vpop.f32.mrf.mxu1  ;;  %v1241_v62 = vsub.f32 1.5, %v1240_v24  ;;  %vm1254_vm15 = vweird.f32 %v8034_v63 }
 0x3d8   :  { %v633_v8 = vsel %vm85_vm0, %v465_v54, 0.0  ;;  %v466_v54 = vmul.f32 %v8130_v49, %v8130_v49  ;;  %v1850_v46 = vmul.f32 0.5, %v7950_v33  ;;  %v1851_v3 = vmul.f32 0.5, %v7993_v32  ;;  %vm8163_vm3 = vmor %vm1253_vm14, %vm1254_vm15 }
 0x3d9   :  { %v1917_v61 = vmul.f32 %v8100_v9, %v8100_v9  ;;  %v8122_v50 = vpop.xlane.xlu0 %249  ;;  %634 = vadd.xlane.f32.xlu0 %v633_v8  ;;  %2728 = vadd.xlane.f32.xlu2 %v2727_v23  ;;  %v2172_v17 = vmul.f32 0.7978846, %v2108_v27  ;;  %v1252_v34 = vmul.f32 %v8034_v63, %v1251_v53  ;;  %vm1244_vm2 = vweird.f32 %v8027_v18 }
 0x3da   :  { %258 = vadd.xlane.f32.xlu1 %v257_v37  ;;  %v2362_v33 = vmul.f32 %v2298_v56, %v1850_v46  ;;  %v1242_v23 = vmul.f32 %v8027_v18, %v1241_v62  ;;  %v636_v24 = vsel %vm85_vm0, %v466_v54, 0.0  ;;  %v2519_v37 = vadd.f32 %v7843_v44, %v7945_v7  ;;  %vm8185_vm4 = vmor %vm1243_vm1, %vm1244_vm2  ;;  %v8195_v7 = vld [vmem:[%s11666_s0 + $0x1d0] sm:$0xff] }
 0x3db   :  { %v1981_v15 = vmul.f32 %v1917_v61, %v8100_v9  ;;  %v5785_v60 = vpop.eup %5784  ;;  %v2742_v61 = vsel %vm85_vm0, %v8137_v25, 0.0  ;;  %5786 = vtanh.f32 %v2172_v17  ;;  %v263_v26 = vsel %vm85_vm0, %v8173_v36, 0.0  ;;  %v6145_v54 = vld [vmem:[%s11666_s0 + $0x30] sm:$0xff] }
 0x3dc   :  { %5462 = vmatmul.msk.bf16.gmra.mxu0 %vm85_vm0, %v1526_v22  ;;  %v2299_v39 = vadd.f32 1.0, %v5785_v60  ;;  %v1256_v22 = vsel %vm8163_vm3, %v8034_v63, %v1252_v34  ;;  %v1246_v63 = vsel %vm8185_vm4, %v8027_v18, %v1242_v23  ;;  %v260_v46 = vsel %vm85_vm0, %v8195_v7, 0.0 }
 0x3dd   :  { %v2045_v31 = vmul.f32 0.044715, %v1981_v15  ;;  %v1482_v62 = vmul.f32 %v1256_v22, %v7736_v14  ;;  %v2514_v14 = vadd.f32 %v7843_v44, %v7868_v48 }
 0x3de   :  { %v1748_v19 = vpop.f32.mrf.mxu0  ;;  %v2363_v32 = vmul.f32 %v2299_v39, %v1851_v3  ;;  %v1481_v39 = vmul.f32 %v1246_v63, %v7680_v6 }
 0x3df   :  { %v8146_v43 = vadd.f32 %v7831_v0, %v1748_v19  ;;  %v2109_v51 = vadd.f32 %v2045_v31, %v8100_v9  ;;  %v8202_v56 = vpop.f32.mrf.mxu1 }
 0x3e0   :  { %v2426_v15 = vpack.c.bf16 %v2363_v32, %v2362_v33  ;;  %v1527_v29 = vpack.c.bf16 %v1482_v62, %v1481_v39  ;;  %v1853_v33 = vmul.f32 0.5, %v8100_v9  ;;  %v6146_v9 = vld [vmem:[%s11666_s0 + $0x20] sm:$0xff] }
 0x3e1   :  { %v1918_v11 = vmul.f32 %v8146_v43, %v8146_v43  ;;  %v2173_v8 = vmul.f32 0.7978846, %v2109_v51  ;;  %2743 = vadd.xlane.f32.xlu0 %v2742_v61  ;;  %v2732_v27 = vpop.xlane.xlu0 %2731  ;;  %2734 = vadd.xlane.f32.xlu2 %v2733_v21  ;;  %v5787_v17 = vpop.eup %5786 }
 0x3e2   :  { %v2920_v12 = vmul.f32 %v2732_v27, %v6278_v20  ;;  %2582 = vmatmul.bf16.gmra.mxu1 %v2426_v15  ;;  %637 = vadd.xlane.f32.xlu1 %v636_v24  ;;  %v2300_v32 = vadd.f32 1.0, %v5787_v17  ;;  %v2526_v27 = vadd.f32 %v7843_v44, %v8141_v52  ;;  %v8235_v15 = vadd.f32 %v6146_v9, %v2514_v14  ;;  %v6148_v17 = vld [vmem:[%s11666_s0 + $0x40] sm:$0xff] }
 0x3e3   :  { %v1982_v35 = vmul.f32 %v1918_v11, %v8146_v43  ;;  %5788 = vtanh.f32 %v2173_v8  ;;  %v8210_v11 = vadd.f32 %v6145_v54, %v2519_v37 }
 0x3e4   :  { %v8213_v18 = vsub.f32 %v7855_v13, %v2920_v12  ;;  %11790 = vst [vmem:[#allocation8_spill] sm:$0xff] %v8235_v15  ;;  %v2524_v12 = vadd.f32 %v7843_v44, %v8067_v10  ;;  %v2739_v10 = vsel %vm85_vm0, %v8235_v15, 0.0 }
 0x3e5   :  { %v2046_v21 = vmul.f32 0.044715, %v1982_v35  ;;  %11789 = vst [vmem:[#allocation7_spill] sm:$0xff] %v8210_v11  ;;  %v2745_v23 = vsel %vm85_vm0, %v8210_v11, 0.0  ;;  %v1852_v35 = vmul.f32 0.5, %v8041_v45 }
 0x3e6   :  { %v1750_v53 = vpop.f32.mrf.mxu0  ;;  %v3048_v6 = vmul.f32 %v8213_v18, %v8213_v18 }
 0x3e7   :  { %v8190_v19 = vadd.f32 %v7831_v0, %v1750_v53  ;;  %v2110_v34 = vadd.f32 %v2046_v21, %v8146_v43  ;;  %v2364_v37 = vmul.f32 %v2300_v32, %v1852_v35  ;;  %v6147_v53 = vld [vmem:[%s11666_s0 + $0x48] sm:$0xff]  ;;  %v8245_v63 = vpop.f32.mrf.mxu1  ;;  %v1854_v32 = vmul.f32 0.5, %v8146_v43 }
 0x3e8   :  { %v8242_v31 = vadd.f32 %v6147_v53, %v2526_v27  ;;  %v3114_v45 = vsel %vm85_vm0, %v3048_v6, 0.0  ;;  %v715_v35 = vmul.f32 %v8025_v55, %v6278_v20 }
 0x3e9   :  { %v1919_v60 = vmul.f32 %v8190_v19, %v8190_v19  ;;  %v5789_v51 = vpop.eup %5788  ;;  %264 = vadd.xlane.f32.xlu0 %v263_v26  ;;  %261 = vadd.xlane.f32.xlu2 %v260_v46  ;;  %v2174_v52 = vmul.f32 0.7978846, %v2110_v34  ;;  %v2521_v26 = vadd.f32 %v7843_v44, %v8017_v16  ;;  %v6149_v16 = vld [vmem:[%s11666_s0 + $0x38] sm:$0xff]  ;;  %v8266_v46 = vld [vmem:[%s11666_s0 + $0x1e0] sm:$0xff] }
 0x3ea   :  { %v2301_v61 = vadd.f32 1.0, %v5789_v51  ;;  %2746 = vadd.xlane.f32.xlu1 %v2745_v23  ;;  %11791 = vst [vmem:[#allocation9_spill] sm:$0xff] %v8242_v31  ;;  %v2754_v62 = vsel %vm85_vm0, %v8242_v31, 0.0 }
 0x3eb   :  { %v1983_v3 = vmul.f32 %v1919_v60, %v8190_v19  ;;  %v8254_v60 = vadd.f32 %v6148_v17, %v2524_v12  ;;  %v8261_v51 = vadd.f32 %v6149_v16, %v2521_v26  ;;  %v8290_v16 = vpop.xlane.xlu0 %255 }
 0x3ec   :  { %5463 = vmatmul.msk.bf16.gmra.mxu0 %vm85_vm0, %v1527_v29  ;;  %v2365_v24 = vmul.f32 %v2301_v61, %v1853_v33  ;;  %v266_v61 = vsel %vm85_vm0, %v8266_v46, 0.0  ;;  %v1855_v29 = vmul.f32 0.5, %v8190_v19 }
 0x3ed   :  { %v2047_v8 = vmul.f32 0.044715, %v1983_v3  ;;  %11792 = vst [vmem:[#allocation10_spill] sm:$0xff] %v8254_v60  ;;  %v2751_v39 = vsel %vm85_vm0, %v8254_v60, 0.0  ;;  %v2748_v34 = vsel %vm85_vm0, %v8261_v51, 0.0 }
 0x3ee   :  { %v2427_v21 = vpack.c.bf16 %v2365_v24, %v2364_v37  ;;  %11793 = vst [vmem:[#allocation11_spill] sm:$0xff] %v8261_v51  ;;  %v779_v24 = vadd.f32 1e-05, %v715_v35 }
 0x3ef   :  { %v2111_v48 = vadd.f32 %v2047_v8, %v8190_v19  ;;  %v8274_v8 = vpop.f32.mrf.mxu1 }
 0x3f0   :  { %vm1263_vm5 = vweird.f32 %v779_v24 }
 0x3f1   :  { %v2175_v22 = vmul.f32 0.7978846, %v2111_v48  ;;  %3115 = vadd.xlane.f32.xlu0 %v3114_v45  ;;  %2740 = vadd.xlane.f32.xlu2 %v2739_v10 }
 0x3f2   :  { %2587 = vmatmul.bf16.gmra.mxu1 %v2427_v21  ;;  %2755 = vadd.xlane.f32.xlu1 %v2754_v62 }
 0x3f3   :  { %5790 = vtanh.f32 %v2175_v22 }
 0x3f4   :  { %5792 = vtanh.f32 %v2174_v52 }
 0x3f5   :  { %5794 = vrsqrt.f32 %v779_v24 }
 0x3f7   :  { %v8278_v48 = vpop.f32.mrf.mxu1 }
 0x3f9   :  { %v5791_v54 = vpop.eup %5790  ;;  %2752 = vadd.xlane.f32.xlu0 %v2751_v39  ;;  %2749 = vadd.xlane.f32.xlu2 %v2748_v34 }
 0x3fa   :  { %v5793_v3 = vpop.eup %5792  ;;  %v2303_v14 = vadd.f32 1.0, %v5791_v54  ;;  %267 = vadd.xlane.f32.xlu1 %v266_v61 }
 0x3fb   :  { %v2302_v33 = vadd.f32 1.0, %v5793_v3  ;;  %v5795_v9 = vpop.eup %5794 }
 0x3fc   :  { %v2367_v27 = vmul.f32 %v2303_v14, %v1855_v29  ;;  %v1258_v52 = vmul.f32 %v5795_v9, %v779_v24  ;;  %vm1264_vm6 = vweird.f32 %v5795_v9 }
 0x3fd   :  { %v2366_v23 = vmul.f32 %v2302_v33, %v1854_v32  ;;  %vm8294_vm7 = vmor %vm1263_vm5, %vm1264_vm6 }
 0x3fe   :  { %v1259_v12 = vmul.f32 %v5795_v9, %v1258_v52 }
 0x3ff   :  { %v2428_v6 = vpack.c.bf16 %v2367_v27, %v2366_v23 }
 0x400   :  { %v1260_v43 = vmul.f32 0.5, %v1259_v12 }
 0x402   :  { %2592 = vmatmul.bf16.gmra.mxu1 %v2428_v6  ;;  %v1261_v10 = vsub.f32 1.5, %v1260_v43 }
 0x404   :  { %v1262_v39 = vmul.f32 %v5795_v9, %v1261_v10 }
 0x406   :  { %v1266_v24 = vsel %vm8294_vm7, %v5795_v9, %v1262_v39 }
 0x42b   :  { %v620_v37 = vpop.xlane.xlu2 %619 }
 0x42c   :  { %v716_v19 = vmul.f32 %v620_v37, %v6278_v20 }
 0x42e   :  { %v780_v22 = vadd.f32 1e-05, %v716_v19 }
 0x430   :  { %5796 = vrsqrt.f32 %v780_v22  ;;  %vm1273_vm8 = vweird.f32 %v780_v22 }
 0x433   :  { %v623_v53 = vpop.xlane.xlu1 %622 }
 0x434   :  { %v717_v45 = vmul.f32 %v623_v53, %v6278_v20 }
 0x436   :  { %v5797_v21 = vpop.eup %5796  ;;  %v8284_v26 = vadd.f32 1e-05, %v717_v45 }
 0x437   :  { %v1268_v17 = vmul.f32 %v5797_v21, %v780_v22  ;;  %vm1274_vm9 = vweird.f32 %v5797_v21 }
 0x438   :  { %v1753_v55 = vpop.f32.mrf.mxu0  ;;  %5798 = vrsqrt.f32 %v8284_v26  ;;  %vm1275_vm10 = vmor %vm1273_vm8, %vm1274_vm9  ;;  %vm1283_vm11 = vweird.f32 %v8284_v26 }
 0x439   :  { %v8288_v62 = vadd.f32 %v7831_v0, %v1753_v55  ;;  %v1269_v54 = vmul.f32 %v5797_v21, %v1268_v17  ;;  %v1483_v17 = vmul.f32 %v1266_v24, %v7774_v4 }
 0x43b   :  { %v1920_v3 = vmul.f32 %v8288_v62, %v8288_v62  ;;  %v1270_v14 = vmul.f32 0.5, %v1269_v54  ;;  %v253_v34 = vpop.xlane.xlu1 %252  ;;  %v2738_v54 = vpop.xlane.xlu0 %2737 }
 0x43c   :  { %v340_v29 = vmul.f32 %v6278_v20, %v253_v34  ;;  %v626_v33 = vpop.xlane.xlu2 %625  ;;  %v6150_v34 = vld [vmem:[%s11666_s0 + $0x58] sm:$0xff] }
 0x43d   :  { %v1271_v32 = vsub.f32 1.5, %v1270_v14  ;;  %v1984_v27 = vmul.f32 %v1920_v3, %v8288_v62  ;;  %v718_v23 = vmul.f32 %v626_v33, %v6278_v20 }
 0x43e   :  { %v8301_v6 = vpop.eup %5798  ;;  %v8304_v35 = vsub.f32 %v7979_v38, %v340_v29  ;;  %v2531_v38 = vadd.f32 %v7843_v44, %v8245_v63 }
 0x43f   :  { %v1272_v52 = vmul.f32 %v5797_v21, %v1271_v32  ;;  %v8308_v37 = vadd.f32 1e-05, %v718_v23  ;;  %v1278_v22 = vmul.f32 %v8301_v6, %v8284_v26  ;;  %v2048_v45 = vmul.f32 0.044715, %v1984_v27 }
 0x440   :  { %v1755_v19 = vpop.f32.mrf.mxu0  ;;  %v468_v43 = vmul.f32 %v8304_v35, %v8304_v35  ;;  %v8332_v61 = vadd.f32 %v6150_v34, %v2531_v38  ;;  %v339_v27 = vmul.f32 %v6278_v20, %v8122_v50  ;;  %v8348_v38 = vpop.f32.mrf.mxu1  ;;  %vm1284_vm12 = vweird.f32 %v8301_v6 }
 0x441   :  { %v8313_v12 = vadd.f32 %v7831_v0, %v1755_v19  ;;  %v1276_v53 = vsel %vm1275_vm10, %v5797_v21, %v1272_v52  ;;  %5800 = vrsqrt.f32 %v8308_v37  ;;  %v1279_v3 = vmul.f32 %v8301_v6, %v1278_v22  ;;  %vm8381_vm15 = vmor %vm1283_vm11, %vm1284_vm12 }
 0x442   :  { %v642_v10 = vsel %vm85_vm0, %v468_v43, 0.0  ;;  %v1484_v55 = vmul.f32 %v1276_v53, %v7905_v1  ;;  %v2112_v21 = vadd.f32 %v2048_v45, %v8288_v62  ;;  %11796 = vst [vmem:[#allocation12_spill] sm:$0xff] %v8332_v61  ;;  %v2760_v50 = vsel %vm85_vm0, %v8332_v61, 0.0 }
 0x443   :  { %v1921_v9 = vmul.f32 %v8313_v12, %v8313_v12  ;;  %643 = vadd.xlane.f32.xlu0 %v642_v10  ;;  %v1280_v23 = vmul.f32 0.5, %v1279_v3  ;;  %vm1293_vm14 = vweird.f32 %v8308_v37 }
 0x444   :  { %v632_v44 = vpop.xlane.xlu2 %631  ;;  %v1528_v63 = vpack.c.bf16 %v1484_v55, %v1483_v17  ;;  %v629_v1 = vpop.xlane.xlu1 %628  ;;  %v2176_v22 = vmul.f32 0.7978846, %v2112_v21  ;;  %v8358_v17 = vsub.f32 %v7838_v2, %v339_v27 }
 0x445   :  { %v1985_v39 = vmul.f32 %v1921_v9, %v8313_v12  ;;  %v720_v14 = vmul.f32 %v632_v44, %v6278_v20  ;;  %v719_v32 = vmul.f32 %v629_v1, %v6278_v20  ;;  %v1281_v55 = vsub.f32 1.5, %v1280_v23 }
 0x446   :  { %5464 = vmatmul.msk.bf16.gmra.mxu0 %vm85_vm0, %v1528_v63  ;;  %v341_v1 = vmul.f32 %v6278_v20, %v8290_v16 }
 0x447   :  { %v2049_v4 = vmul.f32 0.044715, %v1985_v39  ;;  %v8335_v29 = vpop.eup %5800  ;;  %v8337_v33 = vadd.f32 1e-05, %v720_v14  ;;  %v8346_v43 = vadd.f32 1e-05, %v719_v32  ;;  %v1282_v27 = vmul.f32 %v8301_v6, %v1281_v55 }
 0x448   :  { %v1288_v24 = vmul.f32 %v8335_v29, %v8308_v37  ;;  %vm1294_vm13 = vweird.f32 %v8335_v29 }
 0x449   :  { %v2113_v52 = vadd.f32 %v2049_v4, %v8313_v12  ;;  %v1758_v19 = vpop.f32.mrf.mxu0  ;;  %5802 = vrsqrt.f32 %v8337_v33  ;;  %vm8393_vm1 = vmor %vm1293_vm14, %vm1294_vm13  ;;  %vm1303_vm2 = vweird.f32 %v8346_v43  ;;  %vm1313_vm6 = vweird.f32 %v8337_v33 }
 0x44a   :  { %v1289_v53 = vmul.f32 %v8335_v29, %v1288_v24  ;;  %v8352_v45 = vadd.f32 %v7831_v0, %v1758_v19  ;;  %5804 = vrsqrt.f32 %v8346_v43 }
 0x44b   :  { %2761 = vadd.xlane.f32.xlu0 %v2760_v50  ;;  %v2177_v10 = vmul.f32 0.7978846, %v2113_v52  ;;  %5806 = vtanh.f32 %v2176_v22  ;;  %v2922_v22 = vmul.f32 %v2738_v54, %v6278_v20 }
 0x44c   :  { %v635_v9 = vpop.xlane.xlu0 %634  ;;  %v1290_v3 = vmul.f32 0.5, %v1289_v53  ;;  %v1922_v39 = vmul.f32 %v8352_v45, %v8352_v45  ;;  %v2729_v44 = vpop.xlane.xlu2 %2728  ;;  %v1856_v53 = vmul.f32 0.5, %v8288_v62  ;;  %v8445_v62 = vld [vmem:[%s11668_s2] ss:$0 sm:$0xff] }
 0x44d   :  { %v2919_v63 = vmul.f32 %v2729_v44, %v6278_v20  ;;  %v8367_v2 = vpop.xlane.xlu1 %258  ;;  %v721_v34 = vmul.f32 %v635_v9, %v6278_v20  ;;  %5808 = vtanh.f32 %v2177_v10 }
 0x44e   :  { %v1291_v21 = vsub.f32 1.5, %v1290_v3  ;;  %v1986_v14 = vmul.f32 %v1922_v39, %v8352_v45  ;;  %v8411_v39 = vsub.f32 %v7863_v57, %v341_v1  ;;  %v467_v57 = vmul.f32 %v8358_v17, %v8358_v17 }
 0x44f   :  { %v8370_v4 = vpop.eup %5802  ;;  %v8376_v32 = vsub.f32 %v8094_v40, %v2919_v63  ;;  %v8408_v55 = vadd.f32 1e-05, %v721_v34  ;;  %v8416_v63 = vpop.f32.mrf.mxu1 }
 0x450   :  { %v1292_v24 = vmul.f32 %v8335_v29, %v1291_v21  ;;  %v1308_v52 = vmul.f32 %v8370_v4, %v8337_v33  ;;  %v2050_v16 = vmul.f32 0.044715, %v1986_v14  ;;  %v8388_v37 = vpop.eup %5804  ;;  %vm1314_vm4 = vweird.f32 %v8370_v4 }
 0x451   :  { %v1760_v19 = vpop.f32.mrf.mxu0  ;;  %v3047_v50 = vmul.f32 %v8376_v32, %v8376_v32  ;;  %v1298_v54 = vmul.f32 %v8388_v37, %v8346_v43  ;;  %v5807_v3 = vpop.eup %5806  ;;  %5810 = vrsqrt.f32 %v8408_v55  ;;  %vm1304_vm3 = vweird.f32 %v8388_v37  ;;  %vm8487_vm7 = vmor %vm1313_vm6, %vm1314_vm4 }
 0x452   :  { %v8398_v26 = vadd.f32 %v7831_v0, %v1760_v19  ;;  %v1296_v9 = vsel %vm8393_vm1, %v8335_v29, %v1292_v24  ;;  %v1309_v10 = vmul.f32 %v8370_v4, %v1308_v52  ;;  %v1286_v29 = vsel %vm8381_vm15, %v8301_v6, %v1282_v27  ;;  %vm8472_vm5 = vmor %vm1303_vm2, %vm1304_vm3 }
 0x453   :  { %v3111_v44 = vsel %vm85_vm0, %v3047_v50, 0.0  ;;  %v1299_v21 = vmul.f32 %v8388_v37, %v1298_v54  ;;  %v2114_v14 = vadd.f32 %v2050_v16, %v8352_v45  ;;  %v5809_v1 = vpop.eup %5808  ;;  %v8426_v24 = vsub.f32 %v7873_v30, %v2922_v22 }
 0x454   :  { %v1923_v0 = vmul.f32 %v8398_v26, %v8398_v26  ;;  %3112 = vadd.xlane.f32.xlu2 %v3111_v44  ;;  %v2735_v34 = vpop.xlane.xlu2 %2734  ;;  %v1486_v23 = vmul.f32 %v1296_v9, %v7974_v47  ;;  %v1310_v6 = vmul.f32 0.5, %v1309_v10  ;;  %v1485_v44 = vmul.f32 %v1286_v29, %v7931_v58 }
 0x455   :  { %v2921_v19 = vmul.f32 %v2735_v34, %v6278_v20  ;;  %v1300_v27 = vmul.f32 0.5, %v1299_v21  ;;  %v638_v16 = vpop.xlane.xlu1 %637  ;;  %v2304_v22 = vadd.f32 1.0, %v5807_v3  ;;  %v2178_v30 = vmul.f32 0.7978846, %v2114_v14 }
 0x456   :  { %v1987_v52 = vmul.f32 %v1923_v0, %v8398_v26  ;;  %v722_v54 = vmul.f32 %v638_v16, %v6278_v20  ;;  %v2305_v13 = vadd.f32 1.0, %v5809_v1  ;;  %v639_v47 = vsel %vm85_vm0, %v467_v57, 0.0 }
 0x457   :  { %v8436_v0 = vsub.f32 %v8109_v5, %v2921_v19  ;;  %v1529_v21 = vpack.c.bf16 %v1486_v23, %v1485_v44  ;;  %v1311_v3 = vsub.f32 1.5, %v1310_v6  ;;  %v1301_v29 = vsub.f32 1.5, %v1300_v27  ;;  %v8456_v19 = vpop.eup %5810  ;;  %v8465_v16 = vpop.f32.mrf.mxu1 }
 0x458   :  { %v2051_v50 = vmul.f32 0.044715, %v1987_v52  ;;  %v8440_v10 = vadd.f32 1e-05, %v722_v54  ;;  %v1857_v14 = vmul.f32 0.5, %v8313_v12  ;;  %v2368_v52 = vmul.f32 %v2304_v22, %v1856_v53  ;;  %v2744_v22 = vpop.xlane.xlu0 %2743 }
 0x459   :  { %v1763_v34 = vpop.f32.mrf.mxu0  ;;  %5465 = vmatmul.msk.bf16.gmra.mxu0 %vm85_vm0, %v1529_v21  ;;  %v3049_v12 = vmul.f32 %v8436_v0, %v8436_v0  ;;  %v1312_v53 = vmul.f32 %v8370_v4, %v1311_v3  ;;  %v1318_v44 = vmul.f32 %v8456_v19, %v8408_v55  ;;  %v469_v43 = vmul.f32 %v8411_v39, %v8411_v39 }
 0x45a   :  { %v2115_v9 = vadd.f32 %v2051_v50, %v8398_v26  ;;  %v8448_v58 = vadd.f32 %v8445_v62, %v1763_v34  ;;  %5812 = vrsqrt.f32 %v8440_v10  ;;  %v2369_v23 = vmul.f32 %v2305_v13, %v1857_v14 }
 0x45b   :  { %5814 = vtanh.f32 %v2178_v30  ;;  %v1302_v50 = vmul.f32 %v8388_v37, %v1301_v29  ;;  %v3117_v13 = vsel %vm85_vm0, %v3049_v12, 0.0  ;;  %v3050_v34 = vmul.f32 %v8426_v24, %v8426_v24 }
 0x45c   :  { %v2179_v57 = vmul.f32 0.7978846, %v2115_v9  ;;  %v1924_v1 = vmul.f32 %v8448_v58, %v8448_v58  ;;  %v8459_v6 = vpop.xlane.xlu2 %261  ;;  %640 = vadd.xlane.f32.xlu2 %v639_v47  ;;  %v2429_v54 = vpack.c.bf16 %v2369_v23, %v2368_v52  ;;  %3118 = vadd.xlane.f32.xlu1 %v3117_v13  ;;  %v1316_v33 = vsel %vm8487_vm7, %v8370_v4, %v1312_v53 }
 0x45d   :  { %v2924_v52 = vmul.f32 %v2744_v22, %v6278_v20  ;;  %v1319_v12 = vmul.f32 %v8456_v19, %v1318_v44  ;;  %vm1333_vm8 = vweird.f32 %v8440_v10  ;;  %vm1323_vm10 = vweird.f32 %v8408_v55 }
 0x45e   :  { %5816 = vtanh.f32 %v2179_v57  ;;  %v1988_v27 = vmul.f32 %v1924_v1, %v8448_v58  ;;  %2597 = vmatmul.bf16.gmra.mxu1 %v2429_v54  ;;  %v1306_v57 = vsel %vm8472_vm5, %v8388_v37, %v1302_v50  ;;  %v3120_v54 = vsel %vm85_vm0, %v3050_v34, 0.0 }
 0x45f   :  { %v645_v37 = vsel %vm85_vm0, %v469_v43, 0.0  ;;  %v1487_v44 = vmul.f32 %v1306_v57, %v8044_v41  ;;  %v8515_v34 = vsub.f32 %v8137_v25, %v2924_v52  ;;  %v8521_v43 = vld [vmem:[%s11666_s0 + $0x1e8] sm:$0xff]  ;;  %v1320_v41 = vmul.f32 0.5, %v1319_v12 }
 0x460   :  { %v2052_v47 = vmul.f32 0.044715, %v1988_v27  ;;  %v8483_v21 = vpop.eup %5812  ;;  %v269_v12 = vsel %vm85_vm0, %v8521_v43, 0.0  ;;  %vm1324_vm11 = vweird.f32 %v8456_v19  ;;  %v343_v55 = vmul.f32 %v6278_v20, %v8459_v6 }
 0x461   :  { %v1765_v9 = vpop.f32.mrf.mxu0  ;;  %v5815_v14 = vpop.eup %5814  ;;  %v1328_v1 = vmul.f32 %v8483_v21, %v8440_v10  ;;  %vm1334_vm9 = vweird.f32 %v8483_v21  ;;  %vm8578_vm13 = vmor %vm1323_vm10, %vm1324_vm11 }
 0x462   :  { %v8492_v29 = vadd.f32 %v8445_v62, %v1765_v9  ;;  %v2116_v4 = vadd.f32 %v2052_v47, %v8448_v58  ;;  %v1488_v9 = vmul.f32 %v1316_v33, %v8030_v28  ;;  %v2306_v47 = vadd.f32 1.0, %v5815_v14  ;;  %vm8569_vm12 = vmor %vm1333_vm8, %vm1334_vm9 }
 0x463   :  { %v1329_v13 = vmul.f32 %v8483_v21, %v1328_v1  ;;  %v1859_v1 = vmul.f32 0.5, %v8398_v26  ;;  %v8533_v26 = vpop.f32.mrf.mxu1  ;;  %v342_v14 = vmul.f32 %v6278_v20, %v8367_v2  ;;  %v3052_v2 = vmul.f32 %v8515_v34, %v8515_v34 }
 0x464   :  { %v5817_v23 = vpop.eup %5816  ;;  %v1925_v27 = vmul.f32 %v8492_v29, %v8492_v29  ;;  %v2741_v53 = vpop.xlane.xlu2 %2740  ;;  %3121 = vadd.xlane.f32.xlu2 %v3120_v54  ;;  %646 = vadd.xlane.f32.xlu1 %v645_v37  ;;  %v2180_v52 = vmul.f32 0.7978846, %v2116_v4  ;;  %v1858_v54 = vmul.f32 0.5, %v8352_v45  ;;  %v1530_v25 = vpack.c.bf16 %v1488_v9, %v1487_v44 }
 0x465   :  { %v2307_v50 = vadd.f32 1.0, %v5817_v23  ;;  %v2923_v22 = vmul.f32 %v2741_v53, %v6278_v20  ;;  %v1330_v3 = vmul.f32 0.5, %v1329_v13  ;;  %v8526_v23 = vld [vmem:[%s11670_s4] ss:$0 sm:$0xff]  ;;  %v1321_v4 = vsub.f32 1.5, %v1320_v41  ;;  %v6153_v41 = vld [vmem:[%s11666_s0 + $0x50] sm:$0xff] }
 0x466   :  { %v1989_v30 = vmul.f32 %v1925_v27, %v8492_v29  ;;  %v2529_v28 = vadd.f32 %v8526_v23, %v8202_v56  ;;  %5818 = vtanh.f32 %v2180_v52 }
 0x467   :  { %v8531_v57 = vsub.f32 %v8235_v15, %v2923_v22  ;;  %v2371_v13 = vmul.f32 %v2307_v50, %v1859_v1  ;;  %v1331_v37 = vsub.f32 1.5, %v1330_v3  ;;  %v1322_v52 = vmul.f32 %v8456_v19, %v1321_v4 }
 0x468   :  { %v2053_v33 = vmul.f32 0.044715, %v1989_v30  ;;  %v2370_v30 = vmul.f32 %v2306_v47, %v1858_v54  ;;  %v3126_v47 = vsel %vm85_vm0, %v3052_v2, 0.0  ;;  %v1861_v54 = vmul.f32 0.5, %v8492_v29 }
 0x469   :  { %v1768_v27 = vpop.f32.mrf.mxu0  ;;  %v3051_v22 = vmul.f32 %v8531_v57, %v8531_v57  ;;  %5466 = vmatmul.msk.bf16.gmra.mxu0 %vm85_vm0, %v1530_v25  ;;  %v1332_v25 = vmul.f32 %v8483_v21, %v1331_v37  ;;  %v2747_v37 = vpop.xlane.xlu1 %2746 }
 0x46a   :  { %v2117_v53 = vadd.f32 %v2053_v33, %v8492_v29  ;;  %v8540_v56 = vadd.f32 %v8445_v62, %v1768_v27  ;;  %v2430_v44 = vpack.c.bf16 %v2371_v13, %v2370_v30  ;;  %v8562_v33 = vadd.f32 %v6153_v41, %v2529_v28  ;;  %v8576_v27 = vld [vmem:[%s11666_s0 + $0x1f0] sm:$0xff]  ;;  %v265_v28 = vpop.xlane.xlu0 %264 }
 0x46b   :  { %v3123_v9 = vsel %vm85_vm0, %v3051_v22, 0.0  ;;  %v8592_v22 = vld [vmem:[%s11666_s0 + $0x1f8] sm:$0xff]  ;;  %v8594_v4 = vpop.f32.mrf.mxu1 }
 0x46c   :  { %v2181_v45 = vmul.f32 0.7978846, %v2117_v53  ;;  %v1926_v50 = vmul.f32 %v8540_v56, %v8540_v56  ;;  %270 = vadd.xlane.f32.xlu2 %v269_v12  ;;  %v2750_v1 = vpop.xlane.xlu2 %2749  ;;  %3124 = vadd.xlane.f32.xlu0 %v3123_v9  ;;  %11805 = vst [vmem:[#allocation13_spill] sm:$0xff] %v8562_v33  ;;  %v8584_v12 = vsub.f32 %v8116_v42, %v342_v14  ;;  %v5819_v2 = vpop.eup %5818  ;;  %v272_v42 = vsel %vm85_vm0, %v8576_v27, 0.0 }
 0x46d   :  { %3127 = vadd.xlane.f32.xlu1 %v3126_v47  ;;  %v2926_v53 = vmul.f32 %v2750_v1, %v6278_v20  ;;  %v2757_v9 = vsel %vm85_vm0, %v8562_v33, 0.0 }
 0x46e   :  { %5820 = vtanh.f32 %v2181_v45  ;;  %v1990_v3 = vmul.f32 %v1926_v50, %v8540_v56  ;;  %2602 = vmatmul.bf16.gmra.mxu1 %v2430_v44  ;;  %v1336_v45 = vsel %vm8569_vm12, %v8483_v21, %v1332_v25  ;;  %v1326_v50 = vsel %vm8578_vm13, %v8456_v19, %v1322_v52 }
 0x46f   :  { %v8610_v1 = vsub.f32 %v8261_v51, %v2926_v53  ;;  %v275_v21 = vsel %vm85_vm0, %v8592_v22, 0.0  ;;  %v1490_v19 = vmul.f32 %v1336_v45, %v8130_v49  ;;  %v470_v41 = vmul.f32 %v8584_v12, %v8584_v12 }
 0x470   :  { %v2054_v13 = vmul.f32 0.044715, %v1990_v3  ;;  %v2534_v52 = vadd.f32 %v8526_v23, %v8274_v8  ;;  %v2925_v53 = vmul.f32 %v2747_v37, %v6278_v20  ;;  %v1489_v49 = vmul.f32 %v1326_v50, %v8089_v59 }
 0x471   :  { %v1770_v10 = vpop.f32.mrf.mxu0  ;;  %v3054_v8 = vmul.f32 %v8610_v1, %v8610_v1  ;;  %v648_v29 = vsel %vm85_vm0, %v470_v41, 0.0  ;;  %v8637_v59 = vsub.f32 %v8195_v7, %v343_v55 }
 0x472   :  { %v8587_v30 = vadd.f32 %v8445_v62, %v1770_v10  ;;  %v2118_v3 = vadd.f32 %v2054_v13, %v8540_v56  ;;  %v2308_v13 = vadd.f32 1.0, %v5819_v2  ;;  %v344_v10 = vmul.f32 %v6278_v20, %v265_v28  ;;  %v6154_v28 = vld [vmem:[%s11666_s0 + $0x60] sm:$0xff]  ;;  %v8639_v2 = vpop.xlane.xlu0 %3115 }
 0x473   :  { %v8634_v37 = vadd.f32 %v6154_v28, %v2534_v52  ;;  %11811 = vst [vmem:[#allocation15_spill] sm:$0xff] %v8637_v59  ;;  %v8642_v50 = vsub.f32 %v8210_v11, %v2925_v53  ;;  %v3132_v7 = vsel %vm85_vm0, %v3054_v8, 0.0  ;;  %v471_v52 = vmul.f32 %v8637_v59, %v8637_v59  ;;  %v6159_v11 = vld [vmem:[%s11666_s0 + $0x88] sm:$0xff] }
 0x474   :  { %v5821_v14 = vpop.eup %5820  ;;  %v1927_v44 = vmul.f32 %v8587_v30, %v8587_v30  ;;  %2758 = vadd.xlane.f32.xlu2 %v2757_v9  ;;  %273 = vadd.xlane.f32.xlu0 %v272_v42  ;;  %v2182_v45 = vmul.f32 0.7978846, %v2118_v3  ;;  %v1860_v42 = vmul.f32 0.5, %v8448_v58  ;;  %v1531_v9 = vpack.c.bf16 %v1490_v19, %v1489_v49  ;;  %v2756_v3 = vpop.xlane.xlu1 %2755 }
 0x475   :  { %v2309_v25 = vadd.f32 1.0, %v5821_v14  ;;  %276 = vadd.xlane.f32.xlu1 %v275_v21  ;;  %11810 = vst [vmem:[#allocation14_spill] sm:$0xff] %v8634_v37  ;;  %v2763_v41 = vsel %vm85_vm0, %v8634_v37, 0.0  ;;  %v3053_v55 = vmul.f32 %v8642_v50, %v8642_v50  ;;  %v651_v53 = vsel %vm85_vm0, %v471_v52, 0.0 }
 0x476   :  { %v1991_v47 = vmul.f32 %v1927_v44, %v8587_v30  ;;  %v2372_v58 = vmul.f32 %v2308_v13, %v1860_v42  ;;  %5822 = vtanh.f32 %v2182_v45  ;;  %v1863_v28 = vmul.f32 0.5, %v8587_v30 }
 0x477   :  { %v2373_v44 = vmul.f32 %v2309_v25, %v1861_v54  ;;  %v8645_v25 = vpop.f32.mrf.mxu1  ;;  %v3129_v49 = vsel %vm85_vm0, %v3053_v55, 0.0 }
 0x478   :  { %v2055_v14 = vmul.f32 0.044715, %v1991_v47  ;;  %v8648_v47 = vsub.f32 %v8173_v36, %v344_v10  ;;  %v2928_v36 = vmul.f32 %v2756_v3, %v6278_v20  ;;  %v6155_v3 = vld [vmem:[%s11666_s0 + $0x68] sm:$0xff] }
 0x479   :  { %5467 = vmatmul.msk.bf16.gmra.mxu0 %vm85_vm0, %v1531_v9  ;;  %v2431_v19 = vpack.c.bf16 %v2373_v44, %v2372_v58  ;;  %v2539_v9 = vadd.f32 %v8526_v23, %v8348_v38 }
 0x47a   :  { %v2119_v6 = vadd.f32 %v2055_v14, %v8587_v30  ;;  %11812 = vst [vmem:[#allocation16_spill] sm:$0xff] %v8648_v47  ;;  %v472_v54 = vmul.f32 %v8648_v47, %v8648_v47  ;;  %v2536_v14 = vadd.f32 %v8526_v23, %v8278_v48  ;;  %v8665_v42 = vsub.f32 %v8242_v31, %v2928_v36  ;;  %v2753_v44 = vpop.xlane.xlu0 %2752  ;;  %v6156_v30 = vld [vmem:[%s11666_s0 + $0x70] sm:$0xff] }
 0x47b   :  { %v8686_v52 = vadd.f32 %v6156_v30, %v2539_v9 }
 0x47c   :  { %v2183_v21 = vmul.f32 0.7978846, %v2119_v6  ;;  %649 = vadd.xlane.f32.xlu2 %v648_v29  ;;  %3133 = vadd.xlane.f32.xlu0 %v3132_v7  ;;  %v5823_v13 = vpop.eup %5822  ;;  %v268_v45 = vpop.xlane.xlu1 %267  ;;  %11813 = vst [vmem:[#allocation17_spill] sm:$0xff] %v8665_v42  ;;  %v654_v8 = vsel %vm85_vm0, %v472_v54, 0.0  ;;  %v1862_v7 = vmul.f32 0.5, %v8540_v56  ;;  %v3056_v38 = vmul.f32 %v8665_v42, %v8665_v42 }
 0x47d   :  { %2764 = vadd.xlane.f32.xlu1 %v2763_v41  ;;  %v2310_v48 = vadd.f32 1.0, %v5823_v13  ;;  %v345_v58 = vmul.f32 %v6278_v20, %v268_v45 }
 0x47e   :  { %5824 = vtanh.f32 %v2183_v21  ;;  %2607 = vmatmul.bf16.gmra.mxu1 %v2431_v19  ;;  %v8677_v21 = vadd.f32 %v6155_v3, %v2536_v14  ;;  %v2927_v19 = vmul.f32 %v2753_v44, %v6278_v20  ;;  %v2541_v44 = vadd.f32 %v8526_v23, %v8416_v63 }
 0x47f   :  { %v8670_v29 = vpop.f32.mrf.mxu1  ;;  %v2374_v55 = vmul.f32 %v2310_v48, %v1862_v7  ;;  %v8689_v36 = vsub.f32 %v8266_v46, %v345_v58  ;;  %v3304_v58 = vmul.f32 %v8639_v2, %v6278_v20 }
 0x480   :  { %v8692_v54 = vsub.f32 %v8254_v60, %v2927_v19  ;;  %v2766_v56 = vsel %vm85_vm0, %v8677_v21, 0.0 }
 0x481   :  { %11814 = vst [vmem:[#allocation18_spill] sm:$0xff] %v8689_v36  ;;  %v473_v14 = vmul.f32 %v8689_v36, %v8689_v36  ;;  %v8718_v3 = vadd.f32 1e-05, %v3304_v58 }
 0x482   :  { %11815 = vst [vmem:[#allocation19_spill] sm:$0xff] %v8692_v54  ;;  %v3055_v46 = vmul.f32 %v8692_v54, %v8692_v54 }
 0x483   :  { %v657_v45 = vsel %vm85_vm0, %v473_v14, 0.0  ;;  %5826 = vrsqrt.f32 %v8718_v3  ;;  %vm3447_vm1 = vweird.f32 %v8718_v3 }
 0x484   :  { %v5825_v10 = vpop.eup %5824  ;;  %3130 = vadd.xlane.f32.xlu2 %v3129_v49  ;;  %652 = vadd.xlane.f32.xlu0 %v651_v53  ;;  %v3138_v53 = vsel %vm85_vm0, %v3056_v38, 0.0 }
 0x485   :  { %v2311_v6 = vadd.f32 1.0, %v5825_v10  ;;  %655 = vadd.xlane.f32.xlu1 %v654_v8  ;;  %v2769_v10 = vsel %vm85_vm0, %v8686_v52, 0.0  ;;  %v3135_v8 = vsel %vm85_vm0, %v3055_v46, 0.0 }
 0x487   :  { %v2375_v41 = vmul.f32 %v2311_v6, %v1863_v28  ;;  %v8703_v49 = vpop.f32.mrf.mxu1  ;;  %v6157_v6 = vld [vmem:[%s11666_s0 + $0x78] sm:$0xff] }
 0x488   :  { %v8712_v9 = vadd.f32 %v6157_v6, %v2541_v44 }
 0x489   :  { %v2432_v13 = vpack.c.bf16 %v2375_v41, %v2374_v55  ;;  %v8730_v55 = vpop.eup %5826 }
 0x48a   :  { %v2772_v28 = vsel %vm85_vm0, %v8712_v9, 0.0  ;;  %vm3448_vm14 = vweird.f32 %v8730_v55 }
 0x48b   :  { %vm8784_vm2 = vmor %vm3447_vm1, %vm3448_vm14 }
 0x48c   :  { %2767 = vadd.xlane.f32.xlu2 %v2766_v56  ;;  %3139 = vadd.xlane.f32.xlu0 %v3138_v53 }
 0x48d   :  { %2770 = vadd.xlane.f32.xlu1 %v2769_v10  ;;  %v3442_v10 = vmul.f32 %v8730_v55, %v8718_v3  ;;  %v2546_v3 = vadd.f32 %v8526_v23, %v8533_v26 }
 0x48e   :  { %2612 = vmatmul.bf16.gmra.mxu1 %v2432_v13 }
 0x48f   :  { %v3443_v6 = vmul.f32 %v8730_v55, %v3442_v10  ;;  %v8811_v15 = vpop.f32.mrf.mxu1 }
 0x494   :  { %3136 = vadd.xlane.f32.xlu2 %v3135_v8  ;;  %658 = vadd.xlane.f32.xlu0 %v657_v45 }
 0x49c   :  { %2773 = vadd.xlane.f32.xlu2 %v2772_v28 }
 0x4b6   :  { %v644_v48 = vpop.xlane.xlu0 %643 }
 0x4b7   :  { %v724_v2 = vmul.f32 %v644_v48, %v6278_v20 }
 0x4b9   :  { %v8739_v46 = vadd.f32 1e-05, %v724_v2 }
 0x4bb   :  { %vm1353_vm5 = vweird.f32 %v8739_v46 }
 0x4be   :  { %v2762_v63 = vpop.xlane.xlu0 %2761 }
 0x4bf   :  { %v2930_v19 = vmul.f32 %v2762_v63, %v6278_v20 }
 0x4c1   :  { %v8723_v7 = vsub.f32 %v8332_v61, %v2930_v19  ;;  %v3444_v19 = vmul.f32 0.5, %v3443_v6 }
 0x4c3   :  { %11816 = vst [vmem:[#allocation20_spill] sm:$0xff] %v8723_v7  ;;  %v1773_v41 = vpop.f32.mrf.mxu0  ;;  %v3058_v38 = vmul.f32 %v8723_v7, %v8723_v7  ;;  %v3445_v61 = vsub.f32 1.5, %v3444_v19 }
 0x4c4   :  { %v8728_v30 = vadd.f32 %v8445_v62, %v1773_v41 }
 0x4c5   :  { %v3144_v56 = vsel %vm85_vm0, %v3058_v38, 0.0  ;;  %v5610_v38 = vld [vmem:[%s11667_s1 + $0x18] sm:$0xff]  ;;  %v3446_v19 = vmul.f32 %v8730_v55, %v3445_v61 }
 0x4c6   :  { %v1928_v13 = vmul.f32 %v8728_v30, %v8728_v30  ;;  %3145 = vadd.xlane.f32.xlu0 %v3144_v56  ;;  %4291 = vmatpush.bf16.msra.mxu2 %v5610_v38 }
 0x4c7   :  { %v3113_v53 = vpop.xlane.xlu2 %3112  ;;  %v3450_v26 = vsel %vm8784_vm2, %v8730_v55, %v3446_v19  ;;  %v8818_v55 = vadd.f32 %v6159_v11, %v2546_v3  ;;  %v6161_v3 = vld [vmem:[%s11666_s0 + $0x98] sm:$0xff] }
 0x4c8   :  { %v3303_v14 = vmul.f32 %v3113_v53, %v6278_v20  ;;  %v1992_v45 = vmul.f32 %v1928_v13, %v8728_v30 }
 0x4ca   :  { %v3367_v44 = vadd.f32 1e-05, %v3303_v14  ;;  %v2056_v48 = vmul.f32 0.044715, %v1992_v45  ;;  %v5609_v14 = vld [vmem:[%s11667_s1 + $0x10] sm:$0xff] }
 0x4cb   :  { %v1775_v8 = vpop.f32.mrf.mxu0  ;;  %4292 = vmatpush.bf16.msra.mxu2 %v5609_v14 }
 0x4cc   :  { %5828 = vrsqrt.f32 %v3367_v44  ;;  %v8745_v28 = vadd.f32 %v8445_v62, %v1775_v8  ;;  %v2120_v13 = vadd.f32 %v2056_v48, %v8728_v30  ;;  %vm3437_vm3 = vweird.f32 %v3367_v44 }
 0x4cd   :  { %5830 = vrsqrt.f32 %v8739_v46 }
 0x4ce   :  { %v1929_v58 = vmul.f32 %v8745_v28, %v8745_v28  ;;  %v2184_v38 = vmul.f32 0.7978846, %v2120_v13 }
 0x4cf   :  { %v641_v63 = vpop.xlane.xlu2 %640  ;;  %v3119_v53 = vpop.xlane.xlu1 %3118 }
 0x4d0   :  { %v723_v41 = vmul.f32 %v641_v63, %v6278_v20  ;;  %v1993_v2 = vmul.f32 %v1929_v58, %v8745_v28  ;;  %v3305_v63 = vmul.f32 %v3119_v53, %v6278_v20 }
 0x4d2   :  { %v5829_v56 = vpop.eup %5828  ;;  %v8755_v10 = vadd.f32 1e-05, %v723_v41  ;;  %v2057_v6 = vmul.f32 0.044715, %v1993_v2  ;;  %v8765_v31 = vadd.f32 1e-05, %v3305_v63  ;;  %v2544_v2 = vadd.f32 %v8526_v23, %v8465_v16 }
 0x4d3   :  { %v8760_v45 = vpop.eup %5830  ;;  %v3432_v8 = vmul.f32 %v5829_v56, %v3367_v44  ;;  %vm3438_vm15 = vweird.f32 %v5829_v56 }
 0x4d4   :  { %5832 = vrsqrt.f32 %v8755_v10  ;;  %v2121_v48 = vadd.f32 %v2057_v6, %v8745_v28  ;;  %v1348_v41 = vmul.f32 %v8760_v45, %v8739_v46  ;;  %vm3439_vm4 = vmor %vm3437_vm3, %vm3438_vm15  ;;  %vm1354_vm6 = vweird.f32 %v8760_v45 }
 0x4d5   :  { %v3433_v58 = vmul.f32 %v5829_v56, %v3432_v8  ;;  %5834 = vrsqrt.f32 %v8765_v31  ;;  %vm8870_vm7 = vmor %vm1353_vm5, %vm1354_vm6  ;;  %vm1343_vm9 = vweird.f32 %v8755_v10  ;;  %vm3457_vm13 = vweird.f32 %v8765_v31 }
 0x4d6   :  { %v1778_v53 = vpop.f32.mrf.mxu0  ;;  %v2185_v63 = vmul.f32 0.7978846, %v2121_v48  ;;  %5836 = vtanh.f32 %v2184_v38  ;;  %v2551_v38 = vadd.f32 %v8526_v23, %v8645_v25 }
 0x4d7   :  { %v3434_v60 = vmul.f32 0.5, %v3433_v58  ;;  %v3122_v51 = vpop.xlane.xlu2 %3121  ;;  %v8776_v13 = vadd.f32 %v8445_v62, %v1778_v53  ;;  %v1349_v58 = vmul.f32 %v8760_v45, %v1348_v41  ;;  %v647_v16 = vpop.xlane.xlu1 %646  ;;  %v2549_v41 = vadd.f32 %v8526_v23, %v8594_v4  ;;  %v6158_v4 = vld [vmem:[%s11666_s0 + $0x80] sm:$0xff] }
 0x4d8   :  { %v3306_v8 = vmul.f32 %v3122_v51, %v6278_v20  ;;  %v8809_v25 = vadd.f32 %v6158_v4, %v2544_v2  ;;  %v725_v2 = vmul.f32 %v647_v16, %v6278_v20 }
 0x4d9   :  { %v3435_v6 = vsub.f32 1.5, %v3434_v60  ;;  %v1930_v48 = vmul.f32 %v8776_v13, %v8776_v13 }
 0x4da   :  { %v8778_v14 = vpop.eup %5832  ;;  %v8782_v61 = vadd.f32 1e-05, %v3306_v8 }
 0x4db   :  { %v3436_v60 = vmul.f32 %v5829_v56, %v3435_v6  ;;  %v1338_v51 = vmul.f32 %v8778_v14, %v8755_v10  ;;  %v8800_v44 = vpop.eup %5834  ;;  %v1350_v6 = vmul.f32 0.5, %v1349_v58  ;;  %v1994_v5 = vmul.f32 %v1930_v48, %v8776_v13 }
 0x4dc   :  { %5838 = vrsqrt.f32 %v8782_v61  ;;  %vm1344_vm8 = vweird.f32 %v8778_v14  ;;  %vm3458_vm11 = vweird.f32 %v8800_v44  ;;  %vm3467_vm14 = vweird.f32 %v8782_v61 }
 0x4dd   :  { %5840 = vtanh.f32 %v2185_v63  ;;  %v1339_v53 = vmul.f32 %v8778_v14, %v1338_v51  ;;  %v3440_v8 = vsel %vm3439_vm4, %v5829_v56, %v3436_v60  ;;  %v5837_v51 = vpop.eup %5836  ;;  %v3452_v56 = vmul.f32 %v8800_v44, %v8765_v31  ;;  %vm8893_vm10 = vmor %vm1343_vm9, %vm1344_vm8 }
 0x4de   :  { %v4071_v63 = vmul.f32 %v3440_v8, %v8376_v32  ;;  %v1780_v19 = vpop.f32.mrf.mxu0  ;;  %v4072_v60 = vmul.f32 %v3450_v26, %v8213_v18  ;;  %v6160_v32 = vld [vmem:[%s11666_s0 + $0x90] sm:$0xff]  ;;  %v8832_v8 = vadd.f32 %v6161_v3, %v2551_v38  ;;  %v1351_v7 = vsub.f32 1.5, %v1350_v6  ;;  %vm8966_vm15 = vmor %vm3457_vm13, %vm3458_vm11 }
 0x4df   :  { %v271_v40 = vpop.xlane.xlu2 %270  ;;  %v3125_v58 = vpop.xlane.xlu0 %3124  ;;  %v8827_v48 = vadd.f32 %v6160_v32, %v2549_v41  ;;  %v1340_v4 = vmul.f32 0.5, %v1339_v53  ;;  %v8835_v11 = vadd.f32 %v8445_v62, %v1780_v19  ;;  %v2058_v42 = vmul.f32 0.044715, %v1994_v5 }
 0x4e0   :  { %11819 = vst [vmem:[#allocation21_spill] sm:$0xff] %v8832_v8  ;;  %v346_v18 = vmul.f32 %v6278_v20, %v271_v40  ;;  %v3128_v26 = vpop.xlane.xlu1 %3127  ;;  %v3307_v36 = vmul.f32 %v3125_v58, %v6278_v20  ;;  %v4140_v41 = vpack.c.bf16 %v4072_v60, %v4071_v63  ;;  %v2312_v53 = vadd.f32 1.0, %v5837_v51 }
 0x4e1   :  { %v3453_v19 = vmul.f32 %v8800_v44, %v3452_v56  ;;  %v8845_v3 = vadd.f32 1e-05, %v725_v2  ;;  %v1931_v6 = vmul.f32 %v8835_v11, %v8835_v11  ;;  %v3308_v40 = vmul.f32 %v3128_v26, %v6278_v20 }
 0x4e2   :  { %v8837_v16 = vpop.eup %5838  ;;  %5518 = vmatmul.msk.bf16.vlgmr.msra.gmra.mxu2 %vm85_vm0, %v4140_v41  ;;  %v1341_v63 = vsub.f32 1.5, %v1340_v4  ;;  %v8852_v58 = vadd.f32 1e-05, %v3307_v36  ;;  %v1864_v5 = vmul.f32 0.5, %v8728_v30  ;;  %v1352_v51 = vmul.f32 %v8760_v45, %v1351_v7 }
 0x4e3   :  { %v5841_v32 = vpop.eup %5840  ;;  %v3462_v38 = vmul.f32 %v8837_v16, %v8782_v61  ;;  %v1995_v56 = vmul.f32 %v1931_v6, %v8835_v11  ;;  %v8858_v2 = vsub.f32 %v8521_v43, %v346_v18  ;;  %v2122_v54 = vadd.f32 %v2058_v42, %v8776_v13  ;;  %v8880_v18 = vpop.f32.mrf.mxu1 }
 0x4e4   :  { %v2313_v60 = vadd.f32 1.0, %v5841_v32  ;;  %v8862_v41 = vadd.f32 1e-05, %v3308_v40  ;;  %v1865_v4 = vmul.f32 0.5, %v8745_v28  ;;  %v3454_v47 = vmul.f32 0.5, %v3453_v19 }
 0x4e5   :  { %v3463_v26 = vmul.f32 %v8837_v16, %v3462_v38  ;;  %5842 = vrsqrt.f32 %v8845_v3  ;;  %v2059_v30 = vmul.f32 0.044715, %v1995_v56  ;;  %v2376_v59 = vmul.f32 %v2312_v53, %v1864_v5 }
 0x4e6   :  { %v1783_v7 = vpop.f32.mrf.mxu0  ;;  %v1342_v42 = vmul.f32 %v8778_v14, %v1341_v63  ;;  %5844 = vrsqrt.f32 %v8852_v58  ;;  %v2377_v38 = vmul.f32 %v2313_v60, %v1865_v4  ;;  %v474_v19 = vmul.f32 %v8858_v2, %v8858_v2 }
 0x4e7   :  { %v2759_v36 = vpop.xlane.xlu2 %2758  ;;  %v274_v6 = vpop.xlane.xlu0 %273  ;;  %v8878_v28 = vadd.f32 %v8445_v62, %v1783_v7  ;;  %v2123_v32 = vadd.f32 %v2059_v30, %v8835_v11  ;;  %v2186_v40 = vmul.f32 0.7978846, %v2122_v54  ;;  %v3464_v63 = vmul.f32 0.5, %v3463_v26 }
 0x4e8   :  { %v2929_v46 = vmul.f32 %v2759_v36, %v6278_v20  ;;  %v277_v53 = vpop.xlane.xlu1 %276  ;;  %5846 = vrsqrt.f32 %v8862_v41  ;;  %v1356_v5 = vsel %vm8870_vm7, %v8760_v45, %v1352_v51  ;;  %v3455_v56 = vsub.f32 1.5, %v3454_v47 }
 0x4e9   :  { %v2433_v4 = vpack.c.bf16 %v2377_v38, %v2376_v59  ;;  %v660_v36 = vsel %vm85_vm0, %v474_v19, 0.0  ;;  %v1346_v54 = vsel %vm8893_vm10, %v8778_v14, %v1342_v42  ;;  %v2187_v10 = vmul.f32 0.7978846, %v2123_v32 }
 0x4ea   :  { %v1932_v26 = vmul.f32 %v8878_v28, %v8878_v28  ;;  %661 = vadd.xlane.f32.xlu1 %v660_v36  ;;  %v347_v47 = vmul.f32 %v6278_v20, %v274_v6  ;;  %v8907_v51 = vsub.f32 %v8562_v33, %v2929_v46  ;;  %v2775_v59 = vsel %vm85_vm0, %v8809_v25, 0.0 }
 0x4eb   :  { %v8904_v45 = vpop.eup %5842  ;;  %2617 = vmatmul.bf16.gmra.mxu1 %v2433_v4  ;;  %v8913_v30 = vsel %vm85_vm0, %v8818_v55, 0.0  ;;  %v8917_v14 = vsel %vm85_vm0, %v8827_v48, 0.0  ;;  %5848 = vtanh.f32 %v2186_v40  ;;  %v3465_v6 = vsub.f32 1.5, %v3464_v63 }
 0x4ec   :  { %11824 = vst [vmem:[#allocation22_spill] sm:$0xff] %v8907_v51  ;;  %v8919_v7 = vpop.eup %5844  ;;  %v1492_v43 = vmul.f32 %v1356_v5, %v8304_v35  ;;  %v8924_v32 = vsel %vm85_vm0, %v8832_v8, 0.0  ;;  %vm3468_vm12 = vweird.f32 %v8837_v16  ;;  %v8929_v38 = vsub.f32 %v8576_v27, %v347_v47 }
 0x4ed   :  { %v1491_v46 = vmul.f32 %v1346_v54, %v8358_v17  ;;  %v3456_v35 = vmul.f32 %v8800_v44, %v3455_v56  ;;  %5850 = vtanh.f32 %v2187_v10  ;;  %v1996_v63 = vmul.f32 %v1932_v26, %v8878_v28  ;;  %vm8976_vm1 = vmor %vm3467_vm14, %vm3468_vm12 }
 0x4ee   :  { %11825 = vst [vmem:[#allocation23_spill] sm:$0xff] %v8929_v38  ;;  %v1785_v19 = vpop.f32.mrf.mxu0  ;;  %v8932_v40 = vpop.eup %5846  ;;  %v1358_v4 = vmul.f32 %v8904_v45, %v8845_v3  ;;  %v3057_v17 = vmul.f32 %v8907_v51, %v8907_v51  ;;  %v3466_v54 = vmul.f32 %v8837_v16, %v3465_v6  ;;  %v3472_v56 = vmul.f32 %v8919_v7, %v8852_v58 }
 0x4ef   :  { %v650_v42 = vpop.xlane.xlu2 %649  ;;  %v3134_v60 = vpop.xlane.xlu0 %3133  ;;  %v8937_v5 = vadd.f32 %v8445_v62, %v1785_v19  ;;  %v1532_v36 = vpack.c.bf16 %v1492_v43, %v1491_v46  ;;  %v348_v10 = vmul.f32 %v6278_v20, %v277_v53  ;;  %v3482_v43 = vmul.f32 %v8932_v40, %v8862_v41 }
 0x4f0   :  { %v726_v27 = vmul.f32 %v650_v42, %v6278_v20  ;;  %v2765_v47 = vpop.xlane.xlu1 %2764  ;;  %v8950_v19 = vpop.f32.mrf.mxu1  ;;  %v3141_v46 = vsel %vm85_vm0, %v3057_v17, 0.0  ;;  %v475_v6 = vmul.f32 %v8929_v38, %v8929_v38  ;;  %v2554_v53 = vadd.f32 %v8526_v23, %v8670_v29 }
 0x4f1   :  { %v1933_v26 = vmul.f32 %v8937_v5, %v8937_v5  ;;  %5468 = vmatmul.msk.bf16.gmra.mxu0 %vm85_vm0, %v1532_v36  ;;  %v5849_v33 = vpop.eup %5848  ;;  %v2060_v8 = vmul.f32 0.044715, %v1996_v63  ;;  %3142 = vadd.xlane.f32.xlu2 %v3141_v46  ;;  %v1866_v23 = vmul.f32 0.5, %v8776_v13  ;;  %v3473_v61 = vmul.f32 %v8919_v7, %v3472_v56 }
 0x4f2   :  { %v8955_v42 = vadd.f32 1e-05, %v726_v27  ;;  %2776 = vadd.xlane.f32.xlu1 %v2775_v59  ;;  %v1359_v27 = vmul.f32 %v8904_v45, %v1358_v4  ;;  %v663_v17 = vsel %vm85_vm0, %v475_v6, 0.0  ;;  %v8982_v59 = vsub.f32 %v8592_v22, %v348_v10 }
 0x4f3   :  { %v5851_v31 = vpop.eup %5850  ;;  %v1997_v63 = vmul.f32 %v1933_v26, %v8937_v5  ;;  %664 = vadd.xlane.f32.xlu0 %v663_v17  ;;  %v3310_v4 = vmul.f32 %v3134_v60, %v6278_v20  ;;  %v3483_v13 = vmul.f32 %v8932_v40, %v3482_v43  ;;  %v3460_v6 = vsel %vm8966_vm15, %v8800_v44, %v3456_v35 }
 0x4f4   :  { %5852 = vrsqrt.f32 %v8955_v42  ;;  %11830 = vst [vmem:[#allocation24_spill] sm:$0xff] %v8982_v59  ;;  %v3470_v38 = vsel %vm8976_vm1, %v8837_v16, %v3466_v54  ;;  %v2314_v51 = vadd.f32 1.0, %v5849_v33  ;;  %v2124_v22 = vadd.f32 %v2060_v8, %v8878_v28 }
 0x4f5   :  { %v2931_v10 = vmul.f32 %v2765_v47, %v6278_v20  ;;  %v8995_v26 = vadd.f32 1e-05, %v3310_v4  ;;  %v1867_v60 = vmul.f32 0.5, %v8835_v11  ;;  %v4073_v43 = vmul.f32 %v3460_v6, %v8436_v0 }
 0x4f6   :  { %v1788_v56 = vpop.f32.mrf.mxu0  ;;  %v4074_v17 = vmul.f32 %v3470_v38, %v8426_v24  ;;  %v2315_v35 = vadd.f32 1.0, %v5851_v31  ;;  %v2061_v16 = vmul.f32 0.044715, %v1997_v63  ;;  %v2378_v33 = vmul.f32 %v2314_v51, %v1866_v23 }
 0x4f7   :  { %v3131_v46 = vpop.xlane.xlu2 %3130  ;;  %v9001_v44 = vadd.f32 %v8445_v62, %v1788_v56  ;;  %v653_v36 = vpop.xlane.xlu0 %652  ;;  %5854 = vrsqrt.f32 %v8995_v26  ;;  %v476_v24 = vmul.f32 %v8982_v59, %v8982_v59  ;;  %v3474_v38 = vmul.f32 0.5, %v3473_v61  ;;  %v6162_v56 = vld [vmem:[%s11666_s0 + $0xa0] sm:$0xff] }
 0x4f8   :  { %v3309_v8 = vmul.f32 %v3131_v46, %v6278_v20  ;;  %v656_v47 = vpop.xlane.xlu1 %655  ;;  %v4141_v29 = vpack.c.bf16 %v4074_v17, %v4073_v43  ;;  %v2379_v11 = vmul.f32 %v2315_v35, %v1867_v60  ;;  %v9014_v63 = vsub.f32 %v8634_v37, %v2931_v10  ;;  %v9019_v23 = vpop.f32.mrf.mxu1 }
 0x4f9   :  { %v1934_v0 = vmul.f32 %v9001_v44, %v9001_v44  ;;  %2779 = vadd.xlane.f32.xlu2 %v8913_v30  ;;  %v666_v6 = vsel %vm85_vm0, %v476_v24, 0.0  ;;  %v728_v61 = vmul.f32 %v656_v47, %v6278_v20  ;;  %v9028_v10 = vadd.f32 %v6162_v56, %v2554_v53 }
 0x4fa   :  { %v9005_v54 = vpop.eup %5852  ;;  %11831 = vst [vmem:[#allocation25_spill] sm:$0xff] %v9014_v63  ;;  %v9016_v51 = vadd.f32 1e-05, %v3309_v8  ;;  %5519 = vmatmul.msk.bf16.gmra.mxu2 %vm85_vm0, %v4141_v29  ;;  %v2434_v46 = vpack.c.bf16 %v2379_v11, %v2378_v33  ;;  %v2125_v60 = vadd.f32 %v2061_v16, %v8937_v5  ;;  %667 = vadd.xlane.f32.xlu1 %v666_v6  ;;  %v9033_v17 = vmul.f32 0.5, %v1359_v27 }
 0x4fb   :  { %v1368_v31 = vmul.f32 %v9005_v54, %v8955_v42  ;;  %v1998_v4 = vmul.f32 %v1934_v0, %v9001_v44  ;;  %11832 = vst [vmem:[#allocation26_spill] sm:$0xff] %v9028_v10  ;;  %v727_v30 = vmul.f32 %v653_v36, %v6278_v20  ;;  %v3484_v35 = vmul.f32 0.5, %v3483_v13 }
 0x4fc   :  { %5856 = vrsqrt.f32 %v9016_v51  ;;  %2622 = vmatmul.bf16.gmra.mxu1 %v2434_v46  ;;  %v9036_v8 = vadd.f32 1e-05, %v728_v61  ;;  %v3059_v36 = vmul.f32 %v9014_v63, %v9014_v63  ;;  %v3475_v27 = vsub.f32 1.5, %v3474_v38 }
 0x4fd   :  { %v1369_v33 = vmul.f32 %v9005_v54, %v1368_v31  ;;  %v9038_v29 = vpop.eup %5854  ;;  %v2062_v53 = vmul.f32 0.044715, %v1998_v4  ;;  %v9040_v0 = vadd.f32 1e-05, %v727_v30  ;;  %v2188_v11 = vmul.f32 0.7978846, %v2124_v22 }
 0x4fe   :  { %v1790_v47 = vpop.f32.mrf.mxu0  ;;  %v3502_v13 = vmul.f32 %v9038_v29, %v8995_v26  ;;  %5858 = vrsqrt.f32 %v9036_v8  ;;  %vm3487_vm2 = vweird.f32 %v8862_v41  ;;  %v2189_v24 = vmul.f32 0.7978846, %v2125_v60 }
 0x4ff   :  { %v2768_v43 = vpop.xlane.xlu2 %2767  ;;  %v9043_v16 = vadd.f32 %v8445_v62, %v1790_v47  ;;  %5860 = vrsqrt.f32 %v9040_v0  ;;  %v9054_v31 = vsel %vm85_vm0, %v9028_v10, 0.0  ;;  %v3485_v62 = vsub.f32 1.5, %v3484_v35  ;;  %v3140_v38 = vpop.xlane.xlu0 %3139 }
 0x500   :  { %vm3477_vm3 = vweird.f32 %v8852_v58  ;;  %v1370_v4 = vmul.f32 0.5, %v1369_v33  ;;  %v1361_v6 = vsub.f32 1.5, %v9033_v17  ;;  %vm1364_vm4 = vweird.f32 %v8904_v45  ;;  %v2771_v37 = vpop.xlane.xlu1 %2770 }
 0x501   :  { %v1935_v22 = vmul.f32 %v9043_v16, %v9043_v16  ;;  %vm3478_vm5 = vweird.f32 %v8919_v7  ;;  %v2126_v61 = vadd.f32 %v2062_v53, %v9001_v44  ;;  %v3147_v56 = vsel %vm85_vm0, %v3059_v36, 0.0  ;;  %v9077_v53 = vpop.f32.mrf.mxu1 }
 0x502   :  { %v9059_v46 = vpop.eup %5856  ;;  %v3476_v60 = vmul.f32 %v8919_v7, %v3475_v27  ;;  %5862 = vtanh.f32 %v2188_v11  ;;  %v3503_v30 = vmul.f32 %v9038_v29, %v3502_v13  ;;  %3148 = vadd.xlane.f32.xlu2 %v3147_v56  ;;  %vm1363_vm6 = vweird.f32 %v8845_v3  ;;  %2782 = vadd.xlane.f32.xlu1 %v8917_v14  ;;  %vm9088_vm8 = vmor %vm3477_vm3, %vm3478_vm5 }
 0x503   :  { %v3492_v35 = vmul.f32 %v9059_v46, %v9016_v51  ;;  %vm3488_vm7 = vweird.f32 %v8932_v40  ;;  %5864 = vtanh.f32 %v2189_v24  ;;  %v1999_v17 = vmul.f32 %v1935_v22, %v9043_v16  ;;  %vm9132_vm13 = vmor %vm1363_vm6, %vm1364_vm4 }
 0x504   :  { %v3312_v33 = vmul.f32 %v3140_v38, %v6278_v20  ;;  %v9075_v47 = vpop.eup %5858  ;;  %v3486_v36 = vmul.f32 %v8932_v40, %v3485_v62  ;;  %v1371_v27 = vsub.f32 1.5, %v1370_v4  ;;  %v2932_v13 = vmul.f32 %v2768_v43, %v6278_v20  ;;  %vm3489_vm10 = vmor %vm3487_vm2, %vm3488_vm7 }
 0x505   :  { %v3493_v11 = vmul.f32 %v9059_v46, %v3492_v35  ;;  %v9082_v56 = vpop.eup %5860  ;;  %vm1373_vm9 = vweird.f32 %v8955_v42  ;;  %v2190_v24 = vmul.f32 0.7978846, %v2126_v61  ;;  %v2063_v22 = vmul.f32 0.044715, %v1999_v17 }
 0x506   :  { %v9093_v62 = vadd.f32 1e-05, %v3312_v33  ;;  %v3504_v38 = vmul.f32 0.5, %v3503_v30  ;;  %v1388_v43 = vmul.f32 %v9075_v47, %v9036_v8  ;;  %v3480_v58 = vsel %vm9088_vm8, %v8919_v7, %v3476_v60 }
 0x507   :  { %v3137_v4 = vpop.xlane.xlu2 %3136  ;;  %v3494_v35 = vmul.f32 0.5, %v3493_v11  ;;  %vm1374_vm11 = vweird.f32 %v9005_v54  ;;  %v1378_v61 = vmul.f32 %v9082_v56, %v9040_v0  ;;  %v2127_v30 = vadd.f32 %v2063_v22, %v9043_v16 }
 0x508   :  { %5866 = vrsqrt.f32 %v9093_v62  ;;  %v5863_v17 = vpop.eup %5862  ;;  %v1362_v33 = vmul.f32 %v8904_v45, %v1361_v6  ;;  %v1372_v11 = vmul.f32 %v9005_v54, %v1371_v27  ;;  %v9112_v7 = vsub.f32 %v8677_v21, %v2932_v13  ;;  %vm9120_vm12 = vmor %vm1373_vm9, %vm1374_vm11 }
 0x509   :  { %v3490_v41 = vsel %vm3489_vm10, %v8932_v40, %v3486_v36  ;;  %v5865_v60 = vpop.eup %5864  ;;  %v2191_v14 = vmul.f32 0.7978846, %v2127_v30  ;;  %v2933_v63 = vmul.f32 %v2771_v37, %v6278_v20  ;;  %v4075_v10 = vmul.f32 %v3480_v58, %v8531_v57 }
 0x50a   :  { %v4076_v22 = vmul.f32 %v3490_v41, %v8515_v34  ;;  %v3505_v6 = vsub.f32 1.5, %v3504_v38  ;;  %5868 = vtanh.f32 %v2190_v24  ;;  %v3495_v27 = vsub.f32 1.5, %v3494_v35  ;;  %2785 = vadd.xlane.f32.xlu2 %v8924_v32 }
 0x50b   :  { %v1389_v13 = vmul.f32 %v9075_v47, %v1388_v43  ;;  %v1379_v40 = vmul.f32 %v9082_v56, %v1378_v61  ;;  %v1868_v57 = vmul.f32 0.5, %v8878_v28  ;;  %v2316_v36 = vadd.f32 1.0, %v5863_v17 }
 0x50c   :  { %v4142_v37 = vpack.c.bf16 %v4076_v22, %v4075_v10  ;;  %v1869_v42 = vmul.f32 0.5, %v8937_v5  ;;  %v2317_v24 = vadd.f32 1.0, %v5865_v60  ;;  %v3311_v38 = vmul.f32 %v3137_v4, %v6278_v20  ;;  %v9150_v5 = vpop.f32.mrf.mxu1 }
 0x50d   :  { %v3060_v32 = vmul.f32 %v9112_v7, %v9112_v7  ;;  %v1366_v28 = vsel %vm9132_vm13, %v8904_v45, %v1362_v33  ;;  %v1376_v3 = vsel %vm9120_vm12, %v9005_v54, %v1372_v11  ;;  %vm3498_vm14 = vweird.f32 %v9059_v46 }
 0x50e   :  { %v9140_v10 = vpop.eup %5866  ;;  %5870 = vtanh.f32 %v2191_v14  ;;  %5520 = vmatmul.msk.bf16.gmra.mxu2 %vm85_vm0, %v4142_v37  ;;  %v1390_v4 = vmul.f32 0.5, %v1389_v13  ;;  %v9153_v35 = vsub.f32 %v8686_v52, %v2933_v63  ;;  %v2380_v43 = vmul.f32 %v2316_v36, %v1868_v57  ;;  %v9197_v57 = vld [vmem:[%s11670_s4] ss:$0 sm:$0xff] }
 0x50f   :  { %v2381_v58 = vmul.f32 %v2317_v24, %v1869_v42  ;;  %v3496_v61 = vmul.f32 %v9059_v46, %v3495_v27  ;;  %v1380_v45 = vmul.f32 0.5, %v1379_v40  ;;  %v9156_v30 = vadd.f32 1e-05, %v3311_v38  ;;  %v2774_v54 = vpop.xlane.xlu2 %2773 }
 0x510   :  { %v3150_v59 = vsel %vm85_vm0, %v3060_v32, 0.0  ;;  %v5869_v17 = vpop.eup %5868  ;;  %v3506_v33 = vmul.f32 %v9038_v29, %v3505_v6  ;;  %vm3508_vm15 = vweird.f32 %v9038_v29  ;;  %v3522_v11 = vmul.f32 %v9140_v10, %v9093_v62 }
 0x511   :  { %v2435_v63 = vpack.c.bf16 %v2381_v58, %v2380_v43  ;;  %3151 = vadd.xlane.f32.xlu0 %v3150_v59  ;;  %vm3497_vm1 = vweird.f32 %v9016_v51  ;;  %5872 = vrsqrt.f32 %v9156_v30  ;;  %v1493_v41 = vmul.f32 %v1366_v28, %v8411_v39 }
 0x512   :  { %v1494_v60 = vmul.f32 %v1376_v3, %v8584_v12  ;;  %vm3507_vm2 = vweird.f32 %v8995_v26  ;;  %vm9170_vm3 = vmor %vm3497_vm1, %vm3498_vm14  ;;  %v1391_v22 = vsub.f32 1.5, %v1390_v4  ;;  %2788 = vadd.xlane.f32.xlu2 %v9054_v31  ;;  %v2934_v51 = vmul.f32 %v2774_v54, %v6278_v20 }
 0x513   :  { %2627 = vmatmul.bf16.gmra.mxu1 %v2435_v63  ;;  %vm9178_vm4 = vmor %vm3507_vm2, %vm3508_vm15  ;;  %v1381_v12 = vsub.f32 1.5, %v1380_v45  ;;  %v3061_v27 = vmul.f32 %v9153_v35, %v9153_v35  ;;  %v3500_v13 = vsel %vm9170_vm3, %v9059_v46, %v3496_v61  ;;  %v3523_v31 = vmul.f32 %v9140_v10, %v3522_v11 }
 0x514   :  { %v5871_v6 = vpop.eup %5870  ;;  %v1533_v26 = vpack.c.bf16 %v1494_v60, %v1493_v41  ;;  %v9189_v40 = vsub.f32 %v8712_v9, %v2934_v51  ;;  %v3510_v37 = vsel %vm9178_vm4, %v9038_v29, %v3506_v33  ;;  %v2556_v36 = vadd.f32 %v9197_v57, %v8703_v49  ;;  %v9213_v32 = vpop.f32.mrf.mxu1  ;;  %v6164_v33 = vld [vmem:[%s11666_s0 + $0xa8] sm:$0xff] }
 0x515   :  { %vm1393_vm5 = vweird.f32 %v9036_v8  ;;  %vm1394_vm6 = vweird.f32 %v9075_v47  ;;  %v4077_v46 = vmul.f32 %v3500_v13, %v8642_v50  ;;  %v1392_v34 = vmul.f32 %v9075_v47, %v1391_v22  ;;  %v11848_v51 = vld [vmem:[#allocation15_spill] sm:$0xff] }
 0x516   :  { %5469 = vmatmul.msk.bf16.gmra.mxu0 %vm85_vm0, %v1533_v26  ;;  %vm1383_vm7 = vweird.f32 %v9040_v0  ;;  %vm1384_vm8 = vweird.f32 %v9082_v56  ;;  %v2319_v29 = vadd.f32 1.0, %v5871_v6  ;;  %v1382_v24 = vmul.f32 %v9082_v56, %v1381_v12  ;;  %vm9215_vm9 = vmor %vm1393_vm5, %vm1394_vm6  ;;  %v11849_v6 = vld [vmem:[#allocation16_spill] sm:$0xff] }
 0x517   :  { %v5873_v42 = vpop.eup %5872  ;;  %v3153_v49 = vsel %vm85_vm0, %v3061_v27, 0.0  ;;  %v4078_v8 = vmul.f32 %v3510_v37, %v8610_v1  ;;  %v3062_v38 = vmul.f32 %v9189_v40, %v9189_v40  ;;  %v3524_v28 = vmul.f32 0.5, %v3523_v31  ;;  %vm9223_vm10 = vmor %vm1383_vm7, %vm1384_vm8  ;;  %v6165_v27 = vld [vmem:[%s11666_s0 + $0xb0] sm:$0xff] }
 0x518   :  { %v3512_v3 = vmul.f32 %v5873_v42, %v9156_v30  ;;  %v1871_v4 = vmul.f32 0.5, %v9043_v16  ;;  %v2318_v43 = vadd.f32 1.0, %v5869_v17  ;;  %v1870_v59 = vmul.f32 0.5, %v9001_v44 }
 0x519   :  { %3154 = vadd.xlane.f32.xlu0 %v3153_v49  ;;  %v4143_v58 = vpack.c.bf16 %v4078_v8, %v4077_v46  ;;  %v3156_v61 = vsel %vm85_vm0, %v3062_v38, 0.0  ;;  %v9232_v16 = vadd.f32 %v6164_v33, %v2556_v36  ;;  %v1396_v0 = vsel %vm9215_vm9, %v9075_v47, %v1392_v34 }
 0x51a   :  { %v3513_v45 = vmul.f32 %v5873_v42, %v3512_v3  ;;  %v2383_v54 = vmul.f32 %v2319_v29, %v1871_v4  ;;  %3157 = vadd.xlane.f32.xlu1 %v3156_v61  ;;  %v1386_v17 = vsel %vm9223_vm10, %v9082_v56, %v1382_v24  ;;  %v3525_v11 = vsub.f32 1.5, %v3524_v28  ;;  %v5618_v3 = vld [vmem:[%s11669_s3 + $0x78] sm:$0xff] }
 0x51b   :  { %11847 = vst [vmem:[#allocation27_spill] sm:$0xff] %v9232_v16  ;;  %v2382_v41 = vmul.f32 %v2318_v43, %v1870_v59  ;;  %vm3518_vm11 = vweird.f32 %v5873_v42  ;;  %v2559_v14 = vadd.f32 %v9197_v57, %v8811_v15  ;;  %v2790_v22 = vsel %vm85_vm0, %v9232_v16, 0.0  ;;  %5132 = vmatpush.bf16.msra.mxu3 %v5618_v3 }
 0x51c   :  { %v3514_v63 = vmul.f32 0.5, %v3513_v45  ;;  %v1495_v47 = vmul.f32 %v1386_v17, %v11848_v51  ;;  %v1496_v39 = vmul.f32 %v1396_v0, %v11849_v6  ;;  %v3526_v56 = vmul.f32 %v9140_v10, %v3525_v11  ;;  %v9250_v26 = vpop.f32.mrf.mxu1  ;;  %v9291_v45 = vld [vmem:[%s11668_s2 + $0x1] ss:$0 sm:$0xff] }
 0x51d   :  { %v2436_v60 = vpack.c.bf16 %v2383_v54, %v2382_v41  ;;  %vm3528_vm12 = vweird.f32 %v9140_v10  ;;  %vm3517_vm13 = vweird.f32 %v9156_v30  ;;  %vm3527_vm15 = vweird.f32 %v9093_v62  ;;  %v11850_v30 = vld [vmem:[#allocation19_spill] sm:$0xff]  ;;  %v11851_v62 = vld [vmem:[#allocation17_spill] sm:$0xff]  ;;  %v5617_v41 = vld [vmem:[%s11669_s3 + $0x70] sm:$0xff] }
 0x51e   :  { %5521 = vmatmul.msk.bf16.gmra.mxu2 %vm85_vm0, %v4143_v58  ;;  %v3515_v44 = vsub.f32 1.5, %v3514_v63  ;;  %vm3519_vm14 = vmor %vm3517_vm13, %vm3518_vm11  ;;  %v9256_v13 = vadd.f32 %v6165_v27, %v2559_v14  ;;  %v1534_v31 = vpack.c.bf16 %v1496_v39, %v1495_v47  ;;  %v2561_v59 = vadd.f32 %v9197_v57, %v8880_v18  ;;  %v5616_v39 = vld [vmem:[%s11669_s3 + $0x68] sm:$0xff] }
 0x51f   :  { %vm3529_vm1 = vmor %vm3527_vm15, %vm3528_vm12  ;;  %v2564_v54 = vadd.f32 %v9197_v57, %v8950_v19  ;;  %v6166_v19 = vld [vmem:[%s11666_s0 + $0xb8] sm:$0xff]  ;;  %5133 = vmatpush.bf16.msra.mxu3 %v5617_v41  ;;  %v9372_v41 = vld [vmem:[%s11668_s2] ss:$0 sm:$0xff] }
 0x520   :  { %v3516_v12 = vmul.f32 %v5873_v42, %v3515_v44  ;;  %v3530_v37 = vsel %vm3529_vm1, %v9140_v10, %v3526_v56  ;;  %v2793_v46 = vsel %vm85_vm0, %v9256_v13, 0.0  ;;  %v9310_v14 = vadd.f32 %v6166_v19, %v2561_v59 }
 0x521   :  { %2791 = vadd.xlane.f32.xlu0 %v2790_v22  ;;  %v4080_v34 = vmul.f32 %v3530_v37, %v11851_v62  ;;  %v6167_v22 = vld [vmem:[%s11666_s0 + $0xc0] sm:$0xff]  ;;  %v9363_v59 = vadd.f32 %v9197_v57, %v9077_v53 }
 0x522   :  { %v3520_v15 = vsel %vm3519_vm14, %v5873_v42, %v3516_v12  ;;  %v659_v42 = vpop.xlane.xlu0 %658  ;;  %11852 = vst [vmem:[#allocation15_spill] sm:$0xff] %v9310_v14  ;;  %v9315_v51 = vadd.f32 %v6167_v22, %v2564_v54  ;;  %v2566_v12 = vadd.f32 %v9197_v57, %v9019_v23 }
 0x523   :  { %2632 = vmatmul.bf16.gmra.mxu1 %v2436_v60  ;;  %v4079_v36 = vmul.f32 %v3520_v15, %v11850_v30  ;;  %v729_v49 = vmul.f32 %v659_v42, %v6278_v20  ;;  %5134 = vmatpush.bf16.msra.mxu3 %v5616_v39  ;;  %v6168_v42 = vld [vmem:[%s11666_s0 + $0xc8] sm:$0xff] }
 0x524   :  { %11853 = vst [vmem:[#allocation16_spill] sm:$0xff] %v9315_v51  ;;  %v9354_v3 = vsel %vm85_vm0, %v9315_v51, 0.0 }
 0x525   :  { %v4144_v29 = vpack.c.bf16 %v4080_v34, %v4079_v36  ;;  %v9267_v10 = vadd.f32 1e-05, %v729_v49 }
 0x526   :  { %5470 = vmatmul.msk.bf16.gmra.mxu0 %vm85_vm0, %v1534_v31 }
 0x527   :  { %5874 = vrsqrt.f32 %v9267_v10  ;;  %vm1403_vm2 = vweird.f32 %v9267_v10 }
 0x529   :  { %2794 = vadd.xlane.f32.xlu0 %v2793_v46 }
 0x52d   :  { %v9273_v50 = vpop.eup %5874 }
 0x52e   :  { %5522 = vmatmul.msk.bf16.gmra.mxu2 %vm85_vm0, %v4144_v29  ;;  %v1398_v1 = vmul.f32 %v9273_v50, %v9267_v10  ;;  %v2796_v29 = vsel %vm85_vm0, %v9310_v14, 0.0  ;;  %vm1404_vm3 = vweird.f32 %v9273_v50 }
 0x52f   :  { %vm9386_vm5 = vmor %vm1403_vm2, %vm1404_vm3 }
 0x530   :  { %v1399_v33 = vmul.f32 %v9273_v50, %v1398_v1 }
 0x532   :  { %v1400_v47 = vmul.f32 0.5, %v1399_v33 }
 0x534   :  { %v1401_v62 = vsub.f32 1.5, %v1400_v47 }
 0x539   :  { %v3146_v24 = vpop.xlane.xlu0 %3145 }
 0x53a   :  { %v3314_v8 = vmul.f32 %v3146_v24, %v6278_v20  ;;  %v9345_v24 = vadd.f32 %v6168_v42, %v2566_v12 }
 0x53c   :  { %v9269_v38 = vadd.f32 1e-05, %v3314_v8  ;;  %11854 = vst [vmem:[#allocation19_spill] sm:$0xff] %v9345_v24 }
 0x53e   :  { %5876 = vrsqrt.f32 %v9269_v38  ;;  %vm3547_vm9 = vweird.f32 %v9269_v38 }
 0x544   :  { %v9278_v4 = vpop.eup %5876 }
 0x545   :  { %v3542_v61 = vmul.f32 %v9278_v4, %v9269_v38  ;;  %vm3548_vm6 = vweird.f32 %v9278_v4 }
 0x546   :  { %vm9433_vm10 = vmor %vm3547_vm9, %vm3548_vm6 }
 0x547   :  { %v3543_v17 = vmul.f32 %v9278_v4, %v3542_v61 }
 0x549   :  { %v3544_v37 = vmul.f32 0.5, %v3543_v17 }
 0x54b   :  { %v3545_v54 = vsub.f32 1.5, %v3544_v37 }
 0x55d   :  { %v662_v28 = vpop.xlane.xlu1 %661 }
 0x55e   :  { %v730_v43 = vmul.f32 %v662_v28, %v6278_v20  ;;  %v5615_v28 = vld [vmem:[%s11669_s3 + $0x60] sm:$0xff] }
 0x55f   :  { %5135 = vmatpush.bf16.msra.mxu3 %v5615_v28 }
 0x560   :  { %v9283_v58 = vadd.f32 1e-05, %v730_v43 }
 0x562   :  { %5878 = vrsqrt.f32 %v9283_v58  ;;  %vm1413_vm7 = vweird.f32 %v9283_v58 }
 0x564   :  { %v3143_v63 = vpop.xlane.xlu2 %3142 }
 0x565   :  { %v4294_v0 = vpop.f32.mrf.mxu2  ;;  %v2777_v11 = vpop.xlane.xlu1 %2776  ;;  %v3313_v60 = vmul.f32 %v3143_v63, %v6278_v20 }
 0x566   :  { %v2935_v44 = vmul.f32 %v2777_v11, %v6278_v20  ;;  %v9305_v18 = vadd.f32 %v9291_v45, %v4294_v0  ;;  %v665_v6 = vpop.xlane.xlu0 %664  ;;  %v1402_v11 = vmul.f32 %v9273_v50, %v1401_v62 }
 0x567   :  { %v9327_v27 = vadd.f32 1e-05, %v3313_v60  ;;  %v731_v31 = vmul.f32 %v665_v6, %v6278_v20  ;;  %v5614_v60 = vld [vmem:[%s11669_s3 + $0x58] sm:$0xff] }
 0x568   :  { %v9320_v56 = vpop.eup %5878  ;;  %v9325_v15 = vsub.f32 %v8809_v25, %v2935_v44  ;;  %v4518_v46 = vmul.f32 %v9305_v18, %v9305_v18  ;;  %5136 = vmatpush.bf16.msra.mxu3 %v5614_v60 }
 0x569   :  { %v1408_v30 = vmul.f32 %v9320_v56, %v9283_v58  ;;  %5880 = vrsqrt.f32 %v9327_v27  ;;  %v9333_v36 = vadd.f32 1e-05, %v731_v31  ;;  %vm1414_vm4 = vweird.f32 %v9320_v56 }
 0x56a   :  { %v3063_v23 = vmul.f32 %v9325_v15, %v9325_v15  ;;  %v4582_v33 = vmul.f32 %v4518_v46, %v9305_v18  ;;  %vm9410_vm8 = vmor %vm1413_vm7, %vm1414_vm4  ;;  %v5613_v46 = vld [vmem:[%s11669_s3 + $0x50] sm:$0xff]  ;;  %vm3537_vm11 = vweird.f32 %v9327_v27 }
 0x56b   :  { %v1409_v34 = vmul.f32 %v9320_v56, %v1408_v30  ;;  %5882 = vrsqrt.f32 %v9333_v36  ;;  %v9406_v30 = vmul.f32 %v9278_v4, %v3545_v54  ;;  %vm1423_vm13 = vweird.f32 %v9333_v36 }
 0x56c   :  { %v3159_v49 = vsel %vm85_vm0, %v3063_v23, 0.0  ;;  %v2780_v1 = vpop.xlane.xlu2 %2779  ;;  %v4646_v23 = vmul.f32 0.044715, %v4582_v33  ;;  %5137 = vmatpush.bf16.msra.mxu3 %v5613_v46  ;;  %v5611_v46 = vld [vmem:[%s11669_s3 + $0x40] sm:$0xff] }
 0x56d   :  { %v4296_v8 = vpop.f32.mrf.mxu2  ;;  %v1410_v43 = vmul.f32 0.5, %v1409_v34  ;;  %3160 = vadd.xlane.f32.xlu1 %v3159_v49  ;;  %v2936_v17 = vmul.f32 %v2780_v1, %v6278_v20  ;;  %v668_v53 = vpop.xlane.xlu1 %667  ;;  %v1406_v34 = vsel %vm9386_vm5, %v9273_v50, %v1402_v11  ;;  %v11861_v11 = vld [vmem:[#allocation18_spill] sm:$0xff] }
 0x56e   :  { %v9359_v61 = vadd.f32 %v9291_v45, %v4296_v8  ;;  %v1793_v0 = vpop.f32.mrf.mxu0  ;;  %v732_v47 = vmul.f32 %v668_v53, %v6278_v20  ;;  %v3550_v53 = vsel %vm9433_vm10, %v9278_v4, %v9406_v30  ;;  %v4710_v60 = vadd.f32 %v4646_v23, %v9305_v18 }
 0x56f   :  { %v1411_v63 = vsub.f32 1.5, %v1410_v43  ;;  %v9375_v44 = vadd.f32 %v9372_v41, %v1793_v0  ;;  %v9380_v19 = vpop.eup %5880  ;;  %v9393_v6 = vsub.f32 %v8818_v55, %v2936_v17 }
 0x570   :  { %v4519_v39 = vmul.f32 %v9359_v61, %v9359_v61  ;;  %v3532_v10 = vmul.f32 %v9380_v19, %v9327_v27  ;;  %v9414_v62 = vadd.f32 1e-05, %v732_v47  ;;  %vm3538_vm12 = vweird.f32 %v9380_v19 }
 0x571   :  { %v1412_v12 = vmul.f32 %v9320_v56, %v1411_v63  ;;  %v1936_v31 = vmul.f32 %v9375_v44, %v9375_v44  ;;  %v9403_v37 = vpop.eup %5882  ;;  %v3064_v58 = vmul.f32 %v9393_v6, %v9393_v6  ;;  %v1497_v63 = vmul.f32 %v1406_v34, %v11861_v11  ;;  %vm9482_vm1 = vmor %vm3537_vm11, %vm3538_vm12 }
 0x572   :  { %v3533_v49 = vmul.f32 %v9380_v19, %v3532_v10  ;;  %v1418_v8 = vmul.f32 %v9403_v37, %v9333_v36  ;;  %5884 = vrsqrt.f32 %v9414_v62  ;;  %v4583_v43 = vmul.f32 %v4519_v39, %v9359_v61  ;;  %v11868_v36 = vld [vmem:[#allocation21_spill] sm:$0xff] }
 0x573   :  { %v1416_v42 = vsel %vm9410_vm8, %v9320_v56, %v1412_v12  ;;  %v2000_v28 = vmul.f32 %v1936_v31, %v9375_v44  ;;  %v3162_v54 = vsel %vm85_vm0, %v3064_v58, 0.0  ;;  %vm1424_vm14 = vweird.f32 %v9403_v37 }
 0x574   :  { %v3534_v56 = vmul.f32 0.5, %v3533_v49  ;;  %v1419_v1 = vmul.f32 %v9403_v37, %v1418_v8  ;;  %v1498_v38 = vmul.f32 %v1416_v42, %v8858_v2  ;;  %3163 = vadd.xlane.f32.xlu2 %v3162_v54  ;;  %v4647_v4 = vmul.f32 0.044715, %v4583_v43  ;;  %vm9504_vm3 = vmor %vm1423_vm13, %vm1424_vm14 }
 0x575   :  { %2797 = vadd.xlane.f32.xlu1 %v2796_v29  ;;  %v2064_v33 = vmul.f32 0.044715, %v2000_v28  ;;  %v3149_v17 = vpop.xlane.xlu2 %3148  ;;  %v2783_v39 = vpop.xlane.xlu1 %2782  ;;  %v5612_v28 = vld [vmem:[%s11669_s3 + $0x48] sm:$0xff]  ;;  %vm1433_vm15 = vweird.f32 %v9414_v62  ;;  %v4774_v54 = vmul.f32 0.7978846, %v4710_v60 }
 0x576   :  { %v1795_v0 = vpop.f32.mrf.mxu0  ;;  %v3535_v22 = vsub.f32 1.5, %v3534_v56  ;;  %v1420_v47 = vmul.f32 0.5, %v1419_v1  ;;  %v3315_v2 = vmul.f32 %v3149_v17, %v6278_v20  ;;  %v2937_v10 = vmul.f32 %v2783_v39, %v6278_v20  ;;  %5138 = vmatpush.bf16.msra.mxu3 %v5612_v28 }
 0x577   :  { %v9447_v29 = vadd.f32 %v9372_v41, %v1795_v0  ;;  %v2128_v12 = vadd.f32 %v2064_v33, %v9375_v44  ;;  %v1535_v31 = vpack.c.bf16 %v1498_v38, %v1497_v63  ;;  %v4711_v1 = vadd.f32 %v4647_v4, %v9359_v61 }
 0x578   :  { %v1421_v30 = vsub.f32 1.5, %v1420_v47  ;;  %v9458_v58 = vadd.f32 1e-05, %v3315_v2  ;;  %v9460_v34 = vpop.eup %5884  ;;  %v3536_v42 = vmul.f32 %v9380_v19, %v3535_v22  ;;  %v9465_v8 = vsub.f32 %v8827_v48, %v2937_v10  ;;  %v11867_v10 = vld [vmem:[#allocation20_spill] sm:$0xff] }
 0x579   :  { %v1937_v23 = vmul.f32 %v9447_v29, %v9447_v29  ;;  %v2192_v49 = vmul.f32 0.7978846, %v2128_v12  ;;  %5471 = vmatmul.msk.bf16.gmra.mxu0 %vm85_vm0, %v1535_v31  ;;  %v1428_v43 = vmul.f32 %v9460_v34, %v9414_v62  ;;  %vm1434_vm2 = vweird.f32 %v9460_v34  ;;  %v11866_v12 = vld [vmem:[#allocation22_spill] sm:$0xff]  ;;  %v6170_v62 = vld [vmem:[%s11666_s0 + $0xd0] sm:$0xff] }
 0x57a   :  { %v3065_v56 = vmul.f32 %v9465_v8, %v9465_v8  ;;  %v1422_v33 = vmul.f32 %v9403_v37, %v1421_v30  ;;  %5886 = vrsqrt.f32 %v9458_v58  ;;  %v3540_v60 = vsel %vm9482_vm1, %v9380_v19, %v3536_v42  ;;  %vm9522_vm4 = vmor %vm1433_vm15, %vm1434_vm2  ;;  %5139 = vmatpush.bf16.msra.mxu3 %v5611_v46 }
 0x57b   :  { %v2001_v50 = vmul.f32 %v1937_v23, %v9447_v29  ;;  %v1429_v0 = vmul.f32 %v9460_v34, %v1428_v43  ;;  %5888 = vtanh.f32 %v2192_v49  ;;  %v4081_v19 = vmul.f32 %v3540_v60, %v11866_v12 }
 0x57c   :  { %v3165_v63 = vsel %vm85_vm0, %v3065_v56, 0.0  ;;  %v4082_v31 = vmul.f32 %v3550_v53, %v11867_v10  ;;  %v4775_v4 = vmul.f32 0.7978846, %v4711_v1  ;;  %5890 = vtanh.f32 %v4774_v54 }
 0x57d   :  { %v2065_v17 = vmul.f32 0.044715, %v2001_v50  ;;  %2800 = vadd.xlane.f32.xlu1 %v9354_v3  ;;  %v4299_v11 = vpop.f32.mrf.mxu2  ;;  %v2786_v27 = vpop.xlane.xlu2 %2785  ;;  %v1430_v22 = vmul.f32 0.5, %v1429_v0  ;;  %3166 = vadd.xlane.f32.xlu2 %v3165_v63  ;;  %v1426_v50 = vsel %vm9504_vm3, %v9403_v37, %v1422_v33  ;;  %v9537_v38 = vadd.f32 %v6170_v62, %v9363_v59  ;;  %v11874_v62 = vld [vmem:[#allocation26_spill] sm:$0xff] }
 0x57e   :  { %v9497_v39 = vadd.f32 %v9291_v45, %v4299_v11  ;;  %v2938_v3 = vmul.f32 %v2786_v27, %v6278_v20  ;;  %v4145_v28 = vpack.c.bf16 %v4082_v31, %v4081_v19  ;;  %5892 = vtanh.f32 %v4775_v4  ;;  %v9546_v11 = vpop.f32.mrf.mxu1  ;;  %v11872_v19 = vld [vmem:[#allocation23_spill] sm:$0xff]  ;;  %v11873_v31 = vld [vmem:[#allocation24_spill] sm:$0xff] }
 0x57f   :  { %v2129_v47 = vadd.f32 %v2065_v17, %v9447_v29  ;;  %v1431_v30 = vsub.f32 1.5, %v1430_v22  ;;  %11871 = vst [vmem:[#allocation17_spill] sm:$0xff] %v9537_v38  ;;  %v2802_v37 = vsel %vm85_vm0, %v9345_v24, 0.0  ;;  %v4454_v60 = vmul.f32 0.5, %v9305_v18 }
 0x580   :  { %v4520_v42 = vmul.f32 %v9497_v39, %v9497_v39  ;;  %v9516_v49 = vsub.f32 %v11868_v36, %v2938_v3  ;;  %v9526_v43 = vpop.eup %5886  ;;  %5523 = vmatmul.msk.bf16.gmra.mxu2 %vm85_vm0, %v4145_v28  ;;  %v1499_v10 = vmul.f32 %v1426_v50, %v11872_v19  ;;  %v4455_v53 = vmul.f32 0.5, %v9359_v61 }
 0x581   :  { %v2193_v23 = vmul.f32 0.7978846, %v2129_v47  ;;  %v1432_v56 = vmul.f32 %v9460_v34, %v1431_v30  ;;  %v5889_v54 = vpop.eup %5888  ;;  %v3552_v0 = vmul.f32 %v9526_v43, %v9458_v58  ;;  %v1873_v61 = vmul.f32 0.5, %v9447_v29 }
 0x582   :  { %v4584_v1 = vmul.f32 %v4520_v42, %v9497_v39  ;;  %v3066_v33 = vmul.f32 %v9516_v49, %v9516_v49  ;;  %v5891_v22 = vpop.eup %5890  ;;  %v2320_v18 = vadd.f32 1.0, %v5889_v54  ;;  %vm3558_vm5 = vweird.f32 %v9526_v43 }
 0x583   :  { %5894 = vtanh.f32 %v2193_v23  ;;  %v1436_v63 = vsel %vm9522_vm4, %v9460_v34, %v1432_v56  ;;  %v3553_v47 = vmul.f32 %v9526_v43, %v3552_v0  ;;  %v4902_v28 = vadd.f32 1.0, %v5891_v22 }
 0x584   :  { %v3152_v17 = vpop.xlane.xlu0 %3151  ;;  %v4648_v59 = vmul.f32 0.044715, %v4584_v1  ;;  %v3168_v12 = vsel %vm85_vm0, %v3066_v33, 0.0  ;;  %v1500_v46 = vmul.f32 %v1436_v63, %v11873_v31  ;;  %v5893_v23 = vpop.eup %5892  ;;  %vm3557_vm6 = vweird.f32 %v9458_v58 }
 0x585   :  { %v3316_v27 = vmul.f32 %v3152_v17, %v6278_v20  ;;  %v4301_v3 = vpop.f32.mrf.mxu2  ;;  %v2789_v2 = vpop.xlane.xlu2 %2788  ;;  %2803 = vadd.xlane.f32.xlu2 %v2802_v37  ;;  %3169 = vadd.xlane.f32.xlu0 %v3168_v12  ;;  %v1872_v17 = vmul.f32 0.5, %v9375_v44  ;;  %v3554_v37 = vmul.f32 0.5, %v3553_v47  ;;  %v4903_v54 = vadd.f32 1.0, %v5893_v23  ;;  %vm9619_vm7 = vmor %vm3557_vm6, %vm3558_vm5 }
 0x586   :  { %v9560_v34 = vadd.f32 %v9291_v45, %v4301_v3  ;;  %v2939_v30 = vmul.f32 %v2789_v2, %v6278_v20  ;;  %v1536_v42 = vpack.c.bf16 %v1500_v46, %v1499_v10  ;;  %v4712_v56 = vadd.f32 %v4648_v59, %v9497_v39 }
 0x587   :  { %v9557_v4 = vadd.f32 1e-05, %v3316_v27  ;;  %v2384_v59 = vmul.f32 %v2320_v18, %v1872_v17  ;;  %v4966_v3 = vmul.f32 %v4902_v28, %v4454_v60  ;;  %v4967_v2 = vmul.f32 %v4903_v54, %v4455_v53 }
 0x588   :  { %v4521_v1 = vmul.f32 %v9560_v34, %v9560_v34  ;;  %v9569_v0 = vsub.f32 %v11874_v62, %v2939_v30  ;;  %v4776_v19 = vmul.f32 0.7978846, %v4712_v56  ;;  %v2571_v44 = vadd.f32 %v9197_v57, %v9150_v5  ;;  %v9591_v56 = vpop.f32.mrf.mxu1 }
 0x589   :  { %v5895_v50 = vpop.eup %5894  ;;  %5896 = vrsqrt.f32 %v9557_v4  ;;  %5472 = vmatmul.msk.bf16.gmra.mxu0 %vm85_vm0, %v1536_v42  ;;  %v3555_v31 = vsub.f32 1.5, %v3554_v37  ;;  %v5047_v46 = vpack.c.bf16 %v4967_v2, %v4966_v3  ;;  %v2805_v23 = vsel %vm85_vm0, %v9537_v38, 0.0 }
 0x58a   :  { %v2321_v33 = vadd.f32 1.0, %v5895_v50  ;;  %v4585_v63 = vmul.f32 %v4521_v1, %v9560_v34  ;;  %v3067_v27 = vmul.f32 %v9569_v0, %v9569_v0  ;;  %v2574_v60 = vadd.f32 %v9197_v57, %v9213_v32  ;;  %v6171_v32 = vld [vmem:[%s11666_s0 + $0xd8] sm:$0xff] }
 0x58b   :  { %5140 = vmatmul.bf16.vlgmr.msra.gmra.mxu3 %v5047_v46  ;;  %5898 = vtanh.f32 %v4776_v19  ;;  %v9598_v1 = vadd.f32 %v6171_v32, %v2571_v44  ;;  %v3556_v54 = vmul.f32 %v9526_v43, %v3555_v31  ;;  %vm3567_vm9 = vweird.f32 %v9557_v4 }
 0x58c   :  { %v3155_v22 = vpop.xlane.xlu0 %3154  ;;  %v2385_v12 = vmul.f32 %v2321_v33, %v1873_v61  ;;  %v3171_v10 = vsel %vm85_vm0, %v3067_v27, 0.0  ;;  %v4649_v29 = vmul.f32 0.044715, %v4585_v63  ;;  %v6172_v63 = vld [vmem:[%s11666_s0 + $0xe0] sm:$0xff] }
 0x58d   :  { %v3317_v47 = vmul.f32 %v3155_v22, %v6278_v20  ;;  %v3158_v18 = vpop.xlane.xlu1 %3157  ;;  %2806 = vadd.xlane.f32.xlu2 %v2805_v23  ;;  %3172 = vadd.xlane.f32.xlu0 %v3171_v10  ;;  %11875 = vst [vmem:[#allocation18_spill] sm:$0xff] %v9598_v1  ;;  %v2808_v58 = vsel %vm85_vm0, %v9598_v1, 0.0  ;;  %v3560_v31 = vsel %vm9619_vm7, %v9526_v43, %v3556_v54  ;;  %v11878_v54 = vld [vmem:[#allocation25_spill] sm:$0xff] }
 0x58e   :  { %v2437_v30 = vpack.c.bf16 %v2385_v12, %v2384_v59  ;;  %v3318_v5 = vmul.f32 %v3158_v18, %v6278_v20  ;;  %v4713_v28 = vadd.f32 %v4649_v29, %v9560_v34  ;;  %v9609_v59 = vadd.f32 %v6172_v63, %v2574_v60 }
 0x58f   :  { %v9583_v42 = vpop.eup %5896  ;;  %v9587_v53 = vadd.f32 1e-05, %v3317_v47 }
 0x590   :  { %v3562_v50 = vmul.f32 %v9583_v42, %v9557_v4  ;;  %2637 = vmatmul.bf16.gmra.mxu1 %v2437_v30  ;;  %v9601_v37 = vadd.f32 1e-05, %v3318_v5  ;;  %v4777_v33 = vmul.f32 0.7978846, %v4713_v28  ;;  %vm3568_vm8 = vweird.f32 %v9583_v42 }
 0x591   :  { %5900 = vrsqrt.f32 %v9587_v53  ;;  %v4304_v17 = vpop.f32.mrf.mxu2  ;;  %v5899_v47 = vpop.eup %5898  ;;  %v2811_v23 = vsel %vm85_vm0, %v9609_v59, 0.0  ;;  %v4456_v5 = vmul.f32 0.5, %v9497_v39  ;;  %vm9655_vm10 = vmor %vm3567_vm9, %vm3568_vm8  ;;  %vm3577_vm14 = vweird.f32 %v9587_v53 }
 0x592   :  { %v3563_v61 = vmul.f32 %v9583_v42, %v3562_v50  ;;  %v9612_v27 = vadd.f32 %v9291_v45, %v4304_v17  ;;  %5902 = vrsqrt.f32 %v9601_v37  ;;  %vm3587_vm11 = vweird.f32 %v9601_v37 }
 0x593   :  { %v1798_v22 = vpop.f32.mrf.mxu0  ;;  %5904 = vtanh.f32 %v4777_v33  ;;  %v4457_v33 = vmul.f32 0.5, %v9560_v34 }
 0x594   :  { %v3564_v3 = vmul.f32 0.5, %v3563_v61  ;;  %v9617_v2 = vadd.f32 %v9372_v41, %v1798_v22  ;;  %v2792_v12 = vpop.xlane.xlu0 %2791  ;;  %v4522_v30 = vmul.f32 %v9612_v27, %v9612_v27  ;;  %v4083_v61 = vmul.f32 %v3560_v31, %v11878_v54 }
 0x595   :  { %v2940_v44 = vmul.f32 %v2792_v12, %v6278_v20  ;;  %2809 = vadd.xlane.f32.xlu0 %v2808_v58  ;;  %v4904_v12 = vadd.f32 1.0, %v5899_v47 }
 0x596   :  { %v3565_v10 = vsub.f32 1.5, %v3564_v3  ;;  %v1938_v29 = vmul.f32 %v9617_v2, %v9617_v2  ;;  %v4586_v19 = vmul.f32 %v4522_v30, %v9612_v27 }
 0x597   :  { %v9631_v46 = vpop.eup %5900  ;;  %v9637_v18 = vsub.f32 %v9232_v16, %v2940_v44 }
 0x598   :  { %v3566_v60 = vmul.f32 %v9583_v42, %v3565_v10  ;;  %v3572_v43 = vmul.f32 %v9631_v46, %v9587_v53  ;;  %v9646_v28 = vpop.eup %5902  ;;  %v2002_v50 = vmul.f32 %v1938_v29, %v9617_v2  ;;  %vm3578_vm13 = vweird.f32 %v9631_v46 }
 0x599   :  { %v4306_v32 = vpop.f32.mrf.mxu2  ;;  %v3068_v17 = vmul.f32 %v9637_v18, %v9637_v18  ;;  %v5905_v63 = vpop.eup %5904  ;;  %v3582_v22 = vmul.f32 %v9646_v28, %v9601_v37  ;;  %vm3588_vm12 = vweird.f32 %v9646_v28  ;;  %v6173_v37 = vld [vmem:[%s11666_s0 + $0xe8] sm:$0xff]  ;;  %vm9732_vm1 = vmor %vm3577_vm14, %vm3578_vm13 }
 0x59a   :  { %v3573_v39 = vmul.f32 %v9631_v46, %v3572_v43  ;;  %v9663_v3 = vadd.f32 %v9291_v45, %v4306_v32  ;;  %v2066_v44 = vmul.f32 0.044715, %v2002_v50  ;;  %v3570_v29 = vsel %vm9655_vm10, %v9583_v42, %v3566_v60  ;;  %vm9711_vm15 = vmor %vm3587_vm11, %vm3588_vm12 }
 0x59b   :  { %v1800_v34 = vpop.f32.mrf.mxu0  ;;  %v3174_v10 = vsel %vm85_vm0, %v3068_v17, 0.0  ;;  %v3583_v31 = vmul.f32 %v9646_v28, %v3582_v22  ;;  %v4084_v17 = vmul.f32 %v3570_v29, %v9112_v7  ;;  %v4905_v54 = vadd.f32 1.0, %v5905_v63 }
 0x59c   :  { %v3574_v58 = vmul.f32 0.5, %v3573_v39  ;;  %v4523_v43 = vmul.f32 %v9663_v3, %v9663_v3  ;;  %v9674_v32 = vadd.f32 %v9372_v41, %v1800_v34  ;;  %3175 = vadd.xlane.f32.xlu1 %v3174_v10  ;;  %v2795_v47 = vpop.xlane.xlu0 %2794  ;;  %v2130_v30 = vadd.f32 %v2066_v44, %v9617_v2 }
 0x59d   :  { %v2941_v50 = vmul.f32 %v2795_v47, %v6278_v20  ;;  %v3584_v42 = vmul.f32 0.5, %v3583_v31  ;;  %v4968_v39 = vmul.f32 %v4904_v12, %v4456_v5  ;;  %v4146_v10 = vpack.c.bf16 %v4084_v17, %v4083_v61  ;;  %2812 = vadd.xlane.f32.xlu0 %v2811_v23 }
 0x59e   :  { %v3575_v4 = vsub.f32 1.5, %v3574_v58  ;;  %v1939_v60 = vmul.f32 %v9674_v32, %v9674_v32  ;;  %v4587_v22 = vmul.f32 %v4523_v43, %v9663_v3  ;;  %v4969_v16 = vmul.f32 %v4905_v54, %v4457_v33 }
 0x59f   :  { %v9683_v34 = vsub.f32 %v9256_v13, %v2941_v50  ;;  %v2576_v44 = vadd.f32 %v9197_v57, %v9250_v26  ;;  %v2194_v47 = vmul.f32 0.7978846, %v2130_v30  ;;  %v3585_v7 = vsub.f32 1.5, %v3584_v42  ;;  %5524 = vmatmul.msk.bf16.gmra.mxu2 %vm85_vm0, %v4146_v10  ;;  %v9728_v10 = vpop.f32.mrf.mxu1 }
 0x5a0   :  { %v2003_v63 = vmul.f32 %v1939_v60, %v9674_v32  ;;  %v4650_v29 = vmul.f32 0.044715, %v4586_v19  ;;  %v5048_v5 = vpack.c.bf16 %v4969_v16, %v4968_v39  ;;  %v3576_v33 = vmul.f32 %v9631_v46, %v3575_v4 }
 0x5a1   :  { %v4309_v58 = vpop.f32.mrf.mxu2  ;;  %v3069_v12 = vmul.f32 %v9683_v34, %v9683_v34  ;;  %v3586_v61 = vmul.f32 %v9646_v28, %v3585_v7  ;;  %v4651_v16 = vmul.f32 0.044715, %v4587_v22  ;;  %5906 = vtanh.f32 %v2194_v47 }
 0x5a2   :  { %v2067_v23 = vmul.f32 0.044715, %v2003_v63  ;;  %v9695_v26 = vadd.f32 %v9291_v45, %v4309_v58  ;;  %5145 = vmatmul.bf16.gmra.mxu3 %v5048_v5  ;;  %v4714_v54 = vadd.f32 %v4650_v29, %v9612_v27  ;;  %v9726_v22 = vadd.f32 %v6173_v37, %v2576_v44 }
 0x5a3   :  { %v1803_v19 = vpop.f32.mrf.mxu0  ;;  %v3177_v31 = vsel %vm85_vm0, %v3069_v12, 0.0  ;;  %v4715_v4 = vadd.f32 %v4651_v16, %v9663_v3  ;;  %v3590_v53 = vsel %vm9711_vm15, %v9646_v28, %v3586_v61  ;;  %v3580_v58 = vsel %vm9732_vm1, %v9631_v46, %v3576_v33 }
 0x5a4   :  { %v2131_v43 = vadd.f32 %v2067_v23, %v9674_v32  ;;  %v4524_v30 = vmul.f32 %v9695_v26, %v9695_v26  ;;  %v9704_v50 = vadd.f32 %v9372_v41, %v1803_v19  ;;  %3178 = vadd.xlane.f32.xlu1 %v3177_v31  ;;  %v4778_v7 = vmul.f32 0.7978846, %v4714_v54  ;;  %v6174_v54 = vld [vmem:[%s11666_s0 + $0xf0] sm:$0xff] }
 0x5a5   :  { %v4779_v63 = vmul.f32 0.7978846, %v4715_v4  ;;  %v4086_v5 = vmul.f32 %v3590_v53, %v9189_v40  ;;  %v2579_v61 = vadd.f32 %v9197_v57, %v9546_v11  ;;  %v2814_v16 = vsel %vm85_vm0, %v9726_v22, 0.0 }
 0x5a6   :  { %v2195_v42 = vmul.f32 0.7978846, %v2131_v43  ;;  %v4588_v60 = vmul.f32 %v4524_v30, %v9695_v26  ;;  %v1940_v39 = vmul.f32 %v9704_v50, %v9704_v50  ;;  %v4085_v43 = vmul.f32 %v3580_v58, %v9153_v35 }
 0x5a7   :  { %v5907_v12 = vpop.eup %5906  ;;  %v9759_v4 = vadd.f32 %v6174_v54, %v2579_v61  ;;  %v1874_v53 = vmul.f32 0.5, %v9617_v2  ;;  %v1875_v37 = vmul.f32 0.5, %v9674_v32 }
 0x5a8   :  { %5908 = vtanh.f32 %v2195_v42  ;;  %v4652_v29 = vmul.f32 0.044715, %v4588_v60  ;;  %v2004_v28 = vmul.f32 %v1940_v39, %v9704_v50  ;;  %v4147_v11 = vpack.c.bf16 %v4086_v5, %v4085_v43  ;;  %v9768_v5 = vpop.f32.mrf.mxu1 }
 0x5a9   :  { %v4311_v44 = vpop.f32.mrf.mxu2  ;;  %5910 = vtanh.f32 %v4778_v7  ;;  %v2322_v30 = vadd.f32 1.0, %v5907_v12  ;;  %v4458_v60 = vmul.f32 0.5, %v9612_v27  ;;  %v4459_v27 = vmul.f32 0.5, %v9663_v3 }
 0x5aa   :  { %v2068_v23 = vmul.f32 0.044715, %v2004_v28  ;;  %v9744_v19 = vadd.f32 %v9291_v45, %v4311_v44  ;;  %5912 = vtanh.f32 %v4779_v63  ;;  %v4716_v46 = vadd.f32 %v4652_v29, %v9695_v26 }
 0x5ab   :  { %v1805_v31 = vpop.f32.mrf.mxu0 }
 0x5ac   :  { %v2132_v40 = vadd.f32 %v2068_v23, %v9704_v50  ;;  %v4525_v33 = vmul.f32 %v9744_v19, %v9744_v19  ;;  %v9754_v57 = vadd.f32 %v9372_v41, %v1805_v31  ;;  %2815 = vadd.xlane.f32.xlu1 %v2814_v16  ;;  %v4780_v7 = vmul.f32 0.7978846, %v4716_v46 }
 0x5ad   :  { %v2386_v23 = vmul.f32 %v2322_v30, %v1874_v53  ;;  %v2817_v16 = vsel %vm85_vm0, %v9759_v4, 0.0 }
 0x5ae   :  { %v5909_v17 = vpop.eup %5908  ;;  %v4589_v35 = vmul.f32 %v4525_v33, %v9744_v19  ;;  %v1941_v42 = vmul.f32 %v9754_v57, %v9754_v57  ;;  %v2196_v29 = vmul.f32 0.7978846, %v2132_v40  ;;  %5914 = vtanh.f32 %v4780_v7 }
 0x5af   :  { %v5911_v39 = vpop.eup %5910  ;;  %v2323_v47 = vadd.f32 1.0, %v5909_v17  ;;  %5525 = vmatmul.msk.bf16.gmra.mxu2 %vm85_vm0, %v4147_v11 }
 0x5b0   :  { %v5913_v63 = vpop.eup %5912  ;;  %v2005_v28 = vmul.f32 %v1941_v42, %v9754_v57  ;;  %v4906_v58 = vadd.f32 1.0, %v5911_v39  ;;  %v4653_v44 = vmul.f32 0.044715, %v4589_v35  ;;  %5916 = vtanh.f32 %v2196_v29 }
 0x5b1   :  { %v4314_v12 = vpop.f32.mrf.mxu2  ;;  %v4907_v61 = vadd.f32 1.0, %v5913_v63  ;;  %v2387_v2 = vmul.f32 %v2323_v47, %v1875_v37  ;;  %v9778_v47 = vpop.f32.mrf.mxu1 }
 0x5b2   :  { %v2069_v31 = vmul.f32 0.044715, %v2005_v28  ;;  %v4315_v32 = vadd.f32 %v9291_v45, %v4314_v12  ;;  %v4717_v43 = vadd.f32 %v4653_v44, %v9744_v19  ;;  %v4970_v46 = vmul.f32 %v4906_v58, %v4458_v60 }
 0x5b3   :  { %v4971_v40 = vmul.f32 %v4907_v61, %v4459_v27  ;;  %v2438_v33 = vpack.c.bf16 %v2387_v2, %v2386_v23  ;;  %v4461_v28 = vmul.f32 0.5, %v9744_v19  ;;  %v4460_v23 = vmul.f32 0.5, %v9695_v26 }
 0x5b4   :  { %v2133_v11 = vadd.f32 %v2069_v31, %v9754_v57  ;;  %v4526_v17 = vmul.f32 %v4315_v32, %v4315_v32  ;;  %2818 = vadd.xlane.f32.xlu1 %v2817_v16  ;;  %v4781_v3 = vmul.f32 0.7978846, %v4717_v43  ;;  %v5915_v39 = vpop.eup %5914  ;;  %v1876_v31 = vmul.f32 0.5, %v9704_v50 }
 0x5b5   :  { %v5049_v30 = vpack.c.bf16 %v4971_v40, %v4970_v46  ;;  %2642 = vmatmul.bf16.gmra.mxu1 %v2438_v33  ;;  %v4908_v58 = vadd.f32 1.0, %v5915_v39  ;;  %v1877_v16 = vmul.f32 0.5, %v9754_v57  ;;  %v4462_v39 = vmul.f32 0.5, %v4315_v32 }
 0x5b6   :  { %v2197_v54 = vmul.f32 0.7978846, %v2133_v11  ;;  %v4590_v35 = vmul.f32 %v4526_v17, %v4315_v32  ;;  %5918 = vtanh.f32 %v4781_v3  ;;  %v5917_v60 = vpop.eup %5916 }
 0x5b7   :  { %5150 = vmatmul.bf16.gmra.mxu3 %v5049_v30  ;;  %v2324_v12 = vadd.f32 1.0, %v5917_v60  ;;  %v4972_v40 = vmul.f32 %v4908_v58, %v4460_v23 }
 0x5b8   :  { %5920 = vtanh.f32 %v2197_v54  ;;  %v4654_v42 = vmul.f32 0.044715, %v4590_v35 }
 0x5b9   :  { %v4316_v53 = vpop.f32.mrf.mxu2  ;;  %v2388_v33 = vmul.f32 %v2324_v12, %v1876_v31  ;;  %v9784_v54 = vpop.f32.mrf.mxu1 }
 0x5ba   :  { %v4317_v37 = vadd.f32 %v9291_v45, %v4316_v53  ;;  %v4718_v29 = vadd.f32 %v4654_v42, %v4315_v32 }
 0x5bc   :  { %v5919_v7 = vpop.eup %5918  ;;  %v4527_v63 = vmul.f32 %v4317_v37, %v4317_v37  ;;  %v4782_v46 = vmul.f32 0.7978846, %v4718_v29  ;;  %v4463_v35 = vmul.f32 0.5, %v4317_v37 }
 0x5bd   :  { %v4909_v44 = vadd.f32 1.0, %v5919_v7 }
 0x5be   :  { %v5921_v27 = vpop.eup %5920  ;;  %v4591_v61 = vmul.f32 %v4527_v63, %v4317_v37  ;;  %5922 = vtanh.f32 %v4782_v46 }
 0x5bf   :  { %v4973_v2 = vmul.f32 %v4909_v44, %v4461_v28  ;;  %v2325_v45 = vadd.f32 1.0, %v5921_v27 }
 0x5c0   :  { %v4655_v43 = vmul.f32 0.044715, %v4591_v61 }
 0x5c1   :  { %v2389_v11 = vmul.f32 %v2325_v45, %v1877_v16  ;;  %v5050_v19 = vpack.c.bf16 %v4973_v2, %v4972_v40 }
 0x5c2   :  { %v4719_v17 = vadd.f32 %v4655_v43, %v4317_v37 }
 0x5c3   :  { %v2439_v3 = vpack.c.bf16 %v2389_v11, %v2388_v33 }
 0x5c4   :  { %v4783_v30 = vmul.f32 0.7978846, %v4719_v17  ;;  %v5923_v26 = vpop.eup %5922 }
 0x5c5   :  { %2647 = vmatmul.bf16.gmra.mxu1 %v2439_v3  ;;  %v4910_v57 = vadd.f32 1.0, %v5923_v26 }
 0x5c6   :  { %5924 = vtanh.f32 %v4783_v30 }
 0x5c7   :  { %5155 = vmatmul.bf16.gmra.mxu3 %v5050_v19  ;;  %v4974_v60 = vmul.f32 %v4910_v57, %v4462_v39 }
 0x5cc   :  { %v5925_v50 = vpop.eup %5924 }
 0x5cd   :  { %v4911_v42 = vadd.f32 1.0, %v5925_v50  ;;  %v9807_v50 = vld [vmem:[%s11670_s4] ss:$0 sm:$0xff] }
 0x5cf   :  { %v4975_v53 = vmul.f32 %v4911_v42, %v4463_v35  ;;  %v2581_v35 = vadd.f32 %v9807_v50, %v9591_v56 }
 0x5d1   :  { %v5051_v7 = vpack.c.bf16 %v4975_v53, %v4974_v60 }
 0x5d7   :  { %5160 = vmatmul.bf16.gmra.mxu3 %v5051_v7 }
 0x5e0   :  { %v3161_v63 = vpop.xlane.xlu1 %3160 }
 0x5e1   :  { %v3319_v29 = vmul.f32 %v3161_v63, %v6278_v20  ;;  %v6176_v63 = vld [vmem:[%s11666_s0 + $0xf8] sm:$0xff] }
 0x5e3   :  { %v3383_v28 = vadd.f32 1e-05, %v3319_v29  ;;  %v9819_v29 = vadd.f32 %v6176_v63, %v2581_v35 }
 0x5e5   :  { %5926 = vrsqrt.f32 %v3383_v28  ;;  %vm3597_vm3 = vweird.f32 %v3383_v28 }
 0x5e7   :  { %v3164_v12 = vpop.xlane.xlu2 %3163 }
 0x5e8   :  { %v2798_v58 = vpop.xlane.xlu1 %2797  ;;  %v3320_v27 = vmul.f32 %v3164_v12, %v6278_v20 }
 0x5e9   :  { %v2942_v44 = vmul.f32 %v2798_v58, %v6278_v20 }
 0x5ea   :  { %v3384_v23 = vadd.f32 1e-05, %v3320_v27 }
 0x5eb   :  { %v5927_v61 = vpop.eup %5926  ;;  %v9790_v37 = vsub.f32 %v9310_v14, %v2942_v44 }
 0x5ec   :  { %v3592_v32 = vmul.f32 %v5927_v61, %v3383_v28  ;;  %5928 = vrsqrt.f32 %v3384_v23  ;;  %vm3598_vm2 = vweird.f32 %v5927_v61  ;;  %vm3607_vm6 = vweird.f32 %v3384_v23 }
 0x5ed   :  { %v3070_v2 = vmul.f32 %v9790_v37, %v9790_v37  ;;  %vm9823_vm4 = vmor %vm3597_vm3, %vm3598_vm2 }
 0x5ee   :  { %v3593_v31 = vmul.f32 %v5927_v61, %v3592_v32 }
 0x5ef   :  { %v3180_v16 = vsel %vm85_vm0, %v3070_v2, 0.0 }
 0x5f0   :  { %v3594_v45 = vmul.f32 0.5, %v3593_v31  ;;  %v2801_v43 = vpop.xlane.xlu1 %2800  ;;  %3181 = vadd.xlane.f32.xlu2 %v3180_v16  ;;  %v3167_v40 = vpop.xlane.xlu2 %3166 }
 0x5f1   :  { %v2943_v46 = vmul.f32 %v2801_v43, %v6278_v20  ;;  %v3321_v11 = vmul.f32 %v3167_v40, %v6278_v20  ;;  %v2584_v40 = vadd.f32 %v9807_v50, %v9728_v10 }
 0x5f2   :  { %v5929_v17 = vpop.eup %5928  ;;  %v3595_v19 = vsub.f32 1.5, %v3594_v45 }
 0x5f3   :  { %v9797_v33 = vsub.f32 %v9315_v51, %v2943_v46  ;;  %v3602_v3 = vmul.f32 %v5929_v17, %v3384_v23  ;;  %v9800_v30 = vadd.f32 1e-05, %v3321_v11  ;;  %vm3608_vm5 = vweird.f32 %v5929_v17 }
 0x5f4   :  { %v3596_v53 = vmul.f32 %v5927_v61, %v3595_v19  ;;  %vm3609_vm7 = vmor %vm3607_vm6, %vm3608_vm5 }
 0x5f5   :  { %v3071_v26 = vmul.f32 %v9797_v33, %v9797_v33  ;;  %v3603_v57 = vmul.f32 %v5929_v17, %v3602_v3  ;;  %5930 = vrsqrt.f32 %v9800_v30  ;;  %vm3617_vm10 = vweird.f32 %v9800_v30 }
 0x5f6   :  { %v1808_v42 = vpop.f32.mrf.mxu0  ;;  %v3600_v28 = vsel %vm9823_vm4, %v5927_v61, %v3596_v53  ;;  %v2820_v61 = vsel %vm85_vm0, %v9819_v29, 0.0 }
 0x5f7   :  { %v3183_v39 = vsel %vm85_vm0, %v3071_v26, 0.0  ;;  %v9814_v60 = vadd.f32 %v9372_v41, %v1808_v42  ;;  %v3604_v7 = vmul.f32 0.5, %v3603_v57  ;;  %v4087_v35 = vmul.f32 %v3600_v28, %v9325_v15  ;;  %v6177_v15 = vld [vmem:[%s11666_s0 + $0x100] sm:$0xff] }
 0x5f8   :  { %3184 = vadd.xlane.f32.xlu2 %v3183_v39  ;;  %v2804_v58 = vpop.xlane.xlu2 %2803  ;;  %v3170_v44 = vpop.xlane.xlu0 %3169 }
 0x5f9   :  { %v1942_v56 = vmul.f32 %v9814_v60, %v9814_v60  ;;  %v3605_v27 = vsub.f32 1.5, %v3604_v7  ;;  %v2944_v32 = vmul.f32 %v2804_v58, %v6278_v20  ;;  %v3322_v2 = vmul.f32 %v3170_v44, %v6278_v20 }
 0x5fa   :  { %v9861_v58 = vadd.f32 %v6177_v15, %v2584_v40 }
 0x5fb   :  { %v2006_v31 = vmul.f32 %v1942_v56, %v9814_v60  ;;  %v9832_v16 = vpop.eup %5930  ;;  %v3606_v45 = vmul.f32 %v5929_v17, %v3605_v27  ;;  %v9835_v43 = vsub.f32 %v9345_v24, %v2944_v32  ;;  %v9837_v46 = vadd.f32 1e-05, %v3322_v2 }
 0x5fc   :  { %v3612_v11 = vmul.f32 %v9832_v16, %v9800_v30  ;;  %vm3618_vm8 = vweird.f32 %v9832_v16 }
 0x5fd   :  { %v2070_v19 = vmul.f32 0.044715, %v2006_v31  ;;  %5932 = vrsqrt.f32 %v9837_v46  ;;  %v3072_v23 = vmul.f32 %v9835_v43, %v9835_v43  ;;  %v3610_v26 = vsel %vm3609_vm7, %v5929_v17, %v3606_v45  ;;  %vm9926_vm11 = vmor %vm3617_vm10, %vm3618_vm8 }
 0x5fe   :  { %v1810_v3 = vpop.f32.mrf.mxu0  ;;  %v3613_v57 = vmul.f32 %v9832_v16, %v3612_v11  ;;  %v4088_v39 = vmul.f32 %v3610_v26, %v9393_v6  ;;  %v2586_v31 = vadd.f32 %v9807_v50, %v9768_v5  ;;  %vm3627_vm12 = vweird.f32 %v9837_v46 }
 0x5ff   :  { %v2134_v10 = vadd.f32 %v2070_v19, %v9814_v60  ;;  %v9852_v42 = vadd.f32 %v9372_v41, %v1810_v3  ;;  %v3186_v53 = vsel %vm85_vm0, %v3072_v23, 0.0  ;;  %v2823_v23 = vsel %vm85_vm0, %v9861_v58, 0.0 }
 0x600   :  { %2821 = vadd.xlane.f32.xlu2 %v2820_v61  ;;  %v2807_v63 = vpop.xlane.xlu2 %2806  ;;  %3187 = vadd.xlane.f32.xlu0 %v3186_v53  ;;  %v3173_v17 = vpop.xlane.xlu0 %3172  ;;  %v4148_v56 = vpack.c.bf16 %v4088_v39, %v4087_v35  ;;  %v3614_v44 = vmul.f32 0.5, %v3613_v57  ;;  %v2589_v53 = vadd.f32 %v9807_v50, %v9778_v47 }
 0x601   :  { %v1943_v7 = vmul.f32 %v9852_v42, %v9852_v42  ;;  %v2945_v12 = vmul.f32 %v2807_v63, %v6278_v20  ;;  %v3323_v6 = vmul.f32 %v3173_v17, %v6278_v20  ;;  %v2198_v27 = vmul.f32 0.7978846, %v2134_v10  ;;  %v6178_v10 = vld [vmem:[%s11666_s0 + $0x108] sm:$0xff] }
 0x602   :  { %5526 = vmatmul.msk.bf16.gmra.mxu2 %vm85_vm0, %v4148_v56  ;;  %v3615_v19 = vsub.f32 1.5, %v3614_v44  ;;  %v9891_v39 = vadd.f32 %v6178_v10, %v2586_v31  ;;  %v9899_v56 = vld [vmem:[%s11668_s2 + $0x1] ss:$0 sm:$0xff]  ;;  %v6180_v31 = vld [vmem:[%s11666_s0 + $0x110] sm:$0xff] }
 0x603   :  { %v2007_v32 = vmul.f32 %v1943_v7, %v9852_v42  ;;  %v9867_v2 = vpop.eup %5932  ;;  %v9872_v28 = vsub.f32 %v9537_v38, %v2945_v12  ;;  %v9874_v45 = vadd.f32 1e-05, %v3323_v6  ;;  %v4319_v61 = vpop.f32.mrf.mxu2 }
 0x604   :  { %v3622_v40 = vmul.f32 %v9867_v2, %v9837_v46  ;;  %v3616_v12 = vmul.f32 %v9832_v16, %v3615_v19  ;;  %vm3628_vm9 = vweird.f32 %v9867_v2  ;;  %v2826_v19 = vsel %vm85_vm0, %v9891_v39, 0.0 }
 0x605   :  { %v2071_v11 = vmul.f32 0.044715, %v2007_v32  ;;  %5934 = vrsqrt.f32 %v9874_v45  ;;  %v3073_v5 = vmul.f32 %v9872_v28, %v9872_v28  ;;  %vm9938_vm13 = vmor %vm3627_vm12, %vm3628_vm9  ;;  %vm3637_vm15 = vweird.f32 %v9874_v45 }
 0x606   :  { %v1813_v3 = vpop.f32.mrf.mxu0  ;;  %5936 = vtanh.f32 %v2198_v27  ;;  %v3623_v26 = vmul.f32 %v9867_v2, %v3622_v40  ;;  %v9916_v40 = vadd.f32 %v6180_v31, %v2589_v53  ;;  %v3620_v46 = vsel %vm9926_vm11, %v9832_v16, %v3616_v12  ;;  %v6181_v16 = vld [vmem:[%s11668_s2] ss:$0 sm:$0xff] }
 0x607   :  { %v2135_v35 = vadd.f32 %v2071_v11, %v9852_v42  ;;  %v9886_v57 = vadd.f32 %v9372_v41, %v1813_v3  ;;  %v3189_v7 = vsel %vm85_vm0, %v3073_v5, 0.0  ;;  %v9902_v41 = vadd.f32 %v9899_v56, %v4319_v61  ;;  %v9924_v3 = vpop.f32.mrf.mxu1 }
 0x608   :  { %2824 = vadd.xlane.f32.xlu2 %v2823_v23  ;;  %v3624_v63 = vmul.f32 0.5, %v3623_v26  ;;  %3190 = vadd.xlane.f32.xlu0 %v3189_v7  ;;  %v2810_v44 = vpop.xlane.xlu0 %2809  ;;  %v4089_v38 = vmul.f32 %v3620_v46, %v9465_v8 }
 0x609   :  { %v2199_v17 = vmul.f32 0.7978846, %v2135_v35  ;;  %v1944_v15 = vmul.f32 %v9886_v57, %v9886_v57  ;;  %v2946_v47 = vmul.f32 %v2810_v44, %v6278_v20  ;;  %v4528_v26 = vmul.f32 %v9902_v41, %v9902_v41 }
 0x60a   :  { %v3625_v6 = vsub.f32 1.5, %v3624_v63 }
 0x60b   :  { %5938 = vtanh.f32 %v2199_v17  ;;  %v2008_v27 = vmul.f32 %v1944_v15, %v9886_v57  ;;  %v9911_v32 = vpop.eup %5934  ;;  %v9920_v11 = vsub.f32 %v9598_v1, %v2946_v47  ;;  %v4321_v7 = vpop.f32.mrf.mxu2  ;;  %v1878_v17 = vmul.f32 0.5, %v9814_v60  ;;  %v9965_v60 = vld [vmem:[%s11670_s4 + $0x1] ss:$0 sm:$0xff] }
 0x60c   :  { %v5937_v61 = vpop.eup %5936  ;;  %v3626_v5 = vmul.f32 %v9867_v2, %v3625_v6  ;;  %v3632_v30 = vmul.f32 %v9911_v32, %v9874_v45  ;;  %v9951_v47 = vadd.f32 %v9899_v56, %v4321_v7  ;;  %v4592_v35 = vmul.f32 %v4528_v26, %v9902_v41 }
 0x60d   :  { %v2072_v10 = vmul.f32 0.044715, %v2008_v27  ;;  %v3074_v63 = vmul.f32 %v9920_v11, %v9920_v11  ;;  %vm3638_vm14 = vweird.f32 %v9911_v32 }
 0x60e   :  { %v3633_v15 = vmul.f32 %v9911_v32, %v3632_v30  ;;  %v1815_v6 = vpop.f32.mrf.mxu0  ;;  %v3630_v27 = vsel %vm9938_vm13, %v9867_v2, %v3626_v5  ;;  %v2326_v30 = vadd.f32 1.0, %v5937_v61  ;;  %v4529_v5 = vmul.f32 %v9951_v47, %v9951_v47  ;;  %vm10023_vm1 = vmor %vm3637_vm15, %vm3638_vm14 }
 0x60f   :  { %v3176_v53 = vpop.xlane.xlu1 %3175  ;;  %v2136_v31 = vadd.f32 %v2072_v10, %v9886_v57  ;;  %v9960_v12 = vadd.f32 %v6181_v16, %v1815_v6  ;;  %v3192_v23 = vsel %vm85_vm0, %v3074_v63, 0.0  ;;  %v4090_v7 = vmul.f32 %v3630_v27, %v9516_v49  ;;  %v5141_v16 = vpop.f32.mrf.mxu3 }
 0x610   :  { %v3324_v44 = vmul.f32 %v3176_v53, %v6278_v20  ;;  %2827 = vadd.xlane.f32.xlu0 %v2826_v19  ;;  %3193 = vadd.xlane.f32.xlu1 %v3192_v23  ;;  %v2813_v10 = vpop.xlane.xlu0 %2812  ;;  %v1879_v61 = vmul.f32 0.5, %v9852_v42  ;;  %v3634_v26 = vmul.f32 0.5, %v3633_v15  ;;  %v4593_v19 = vmul.f32 %v4529_v5, %v9951_v47  ;;  %v11891_v15 = vld [vmem:[#allocation4_spill] sm:$0xff]  ;;  %v9991_v46 = vpop.f32.mrf.mxu1 }
 0x611   :  { %v5939_v53 = vpop.eup %5938  ;;  %v1945_v6 = vmul.f32 %v9960_v12, %v9960_v12  ;;  %v2947_v63 = vmul.f32 %v2813_v10, %v6278_v20  ;;  %v5142_v49 = vadd.f32 %v9965_v60, %v5141_v16  ;;  %v4656_v24 = vmul.f32 0.044715, %v4592_v35 }
 0x612   :  { %v9969_v2 = vadd.f32 1e-05, %v3324_v44  ;;  %v2327_v1 = vadd.f32 1.0, %v5939_v53  ;;  %v2200_v44 = vmul.f32 0.7978846, %v2136_v31  ;;  %v4149_v10 = vpack.c.bf16 %v4090_v7, %v4089_v38 }
 0x613   :  { %v2009_v23 = vmul.f32 %v1945_v6, %v9960_v12  ;;  %v9984_v27 = vsub.f32 %v9609_v59, %v2947_v63  ;;  %v2390_v51 = vmul.f32 %v2326_v30, %v1878_v17  ;;  %v5301_v31 = vadd.f32 %v5142_v49, %v11891_v15  ;;  %v11893_v15 = vld [vmem:[#allocation2_spill] sm:$0xff] }
 0x614   :  { %5940 = vrsqrt.f32 %v9969_v2  ;;  %v2391_v42 = vmul.f32 %v2327_v1, %v1879_v61  ;;  %5527 = vmatmul.msk.bf16.gmra.mxu2 %vm85_vm0, %v4149_v10  ;;  %v2829_v35 = vsel %vm85_vm0, %v9916_v40, 0.0  ;;  %v3635_v38 = vsub.f32 1.5, %v3634_v26 }
 0x615   :  { %v2073_v53 = vmul.f32 0.044715, %v2009_v23  ;;  %v3075_v8 = vmul.f32 %v9984_v27, %v9984_v27  ;;  %5942 = vtanh.f32 %v2200_v44  ;;  %5365 = vst.msk [vmem:[%s11671_s5] sm:$0xff] %vm85_vm0, %v5301_v31  ;;  %v4657_v30 = vmul.f32 0.044715, %v4593_v19 }
 0x616   :  { %v2440_v5 = vpack.c.bf16 %v2391_v42, %v2390_v51  ;;  %v2591_v6 = vadd.f32 %v9807_v50, %v9784_v54  ;;  %v4720_v51 = vadd.f32 %v4656_v24, %v9902_v41  ;;  %v3636_v23 = vmul.f32 %v9911_v32, %v3635_v38  ;;  %v6182_v24 = vld [vmem:[%s11666_s0 + $0x118] sm:$0xff] }
 0x617   :  { %v9987_v14 = vpop.xlane.xlu1 %3178  ;;  %v2137_v1 = vadd.f32 %v2073_v53, %v9960_v12  ;;  %v3195_v17 = vsel %vm85_vm0, %v3075_v8, 0.0  ;;  %v5143_v61 = vpop.f32.mrf.mxu3  ;;  %v4721_v26 = vadd.f32 %v4657_v30, %v9951_v47  ;;  %v2594_v53 = vadd.f32 %v9807_v50, %v9924_v3  ;;  %v6183_v30 = vld [vmem:[%s11666_s0 + $0x120] sm:$0xff] }
 0x618   :  { %2652 = vmatmul.bf16.gmra.mxu1 %v2440_v5  ;;  %2830 = vadd.xlane.f32.xlu0 %v2829_v35  ;;  %v5144_v44 = vadd.f32 %v9965_v60, %v5143_v61  ;;  %v4784_v19 = vmul.f32 0.7978846, %v4720_v51  ;;  %v10013_v42 = vadd.f32 %v6182_v24, %v2591_v6  ;;  %v10019_v35 = vpop.f32.mrf.mxu1  ;;  %v3640_v45 = vsel %vm10023_vm1, %v9911_v32, %v3636_v23 }
 0x619   :  { %v2201_v63 = vmul.f32 0.7978846, %v2137_v1  ;;  %3196 = vadd.xlane.f32.xlu1 %v3195_v17  ;;  %v4785_v54 = vmul.f32 0.7978846, %v4721_v26  ;;  %v10038_v6 = vadd.f32 %v6183_v30, %v2594_v53  ;;  %vm3647_vm3 = vweird.f32 %v9969_v2 }
 0x61a   :  { %v5941_v7 = vpop.eup %5940  ;;  %11892 = vst [vmem:[#allocation22_spill] sm:$0xff] %v10013_v42  ;;  %v5302_v31 = vadd.f32 %v5144_v44, %v11893_v15  ;;  %v4465_v32 = vmul.f32 0.5, %v9951_v47  ;;  %v1880_v44 = vmul.f32 0.5, %v9886_v57 }
 0x61b   :  { %v3642_v16 = vmul.f32 %v5941_v7, %v9969_v2  ;;  %5944 = vtanh.f32 %v2201_v63  ;;  %v5943_v10 = vpop.eup %5942  ;;  %vm3648_vm2 = vweird.f32 %v5941_v7  ;;  %11896 = vst [vmem:[#allocation20_spill] sm:$0xff] %v10038_v6  ;;  %v4464_v63 = vmul.f32 0.5, %v9902_v41 }
 0x61c   :  { %5946 = vtanh.f32 %v4784_v19  ;;  %5366 = vst.msk [vmem:[%s11671_s5 + $0x8] sm:$0xff] %vm85_vm0, %v5302_v31  ;;  %v2328_v17 = vadd.f32 1.0, %v5943_v10  ;;  %vm3649_vm4 = vmor %vm3647_vm3, %vm3648_vm2  ;;  %v1881_v41 = vmul.f32 0.5, %v9960_v12 }
 0x61d   :  { %v3643_v49 = vmul.f32 %v5941_v7, %v3642_v16  ;;  %5948 = vtanh.f32 %v4785_v54  ;;  %v2832_v16 = vsel %vm85_vm0, %v10013_v42, 0.0  ;;  %v4091_v54 = vmul.f32 %v3640_v45, %v9569_v0 }
 0x61e   :  { %v2392_v15 = vmul.f32 %v2328_v17, %v1880_v44 }
 0x61f   :  { %v3644_v8 = vmul.f32 0.5, %v3643_v49  ;;  %v2816_v5 = vpop.xlane.xlu1 %2815 }
 0x620   :  { %v2948_v3 = vmul.f32 %v2816_v5, %v6278_v20 }
 0x621   :  { %v3645_v1 = vsub.f32 1.5, %v3644_v8  ;;  %v5945_v61 = vpop.eup %5944  ;;  %2833 = vadd.xlane.f32.xlu1 %v2832_v16 }
 0x622   :  { %v10041_v51 = vsub.f32 %v9726_v22, %v2948_v3  ;;  %v5947_v19 = vpop.eup %5946  ;;  %v4324_v23 = vpop.f32.mrf.mxu2  ;;  %v2329_v10 = vadd.f32 1.0, %v5945_v61  ;;  %v11897_v61 = vld [vmem:[#allocation5_spill] sm:$0xff] }
 0x623   :  { %v3646_v26 = vmul.f32 %v5941_v7, %v3645_v1  ;;  %v5949_v24 = vpop.eup %5948  ;;  %v10055_v2 = vadd.f32 %v9899_v56, %v4324_v23  ;;  %v4912_v47 = vadd.f32 1.0, %v5947_v19 }
 0x624   :  { %v3076_v49 = vmul.f32 %v10041_v51, %v10041_v51  ;;  %v4913_v5 = vadd.f32 1.0, %v5949_v24  ;;  %v2393_v38 = vmul.f32 %v2329_v10, %v1881_v41  ;;  %v2596_v41 = vadd.f32 %v9807_v50, %v9991_v46 }
 0x625   :  { %v3650_v53 = vsel %vm3649_vm4, %v5941_v7, %v3646_v26  ;;  %v5146_v57 = vpop.f32.mrf.mxu3  ;;  %v4530_v0 = vmul.f32 %v10055_v2, %v10055_v2  ;;  %v4976_v1 = vmul.f32 %v4912_v47, %v4464_v63  ;;  %v2835_v63 = vsel %vm85_vm0, %v10038_v6, 0.0 }
 0x626   :  { %v3198_v31 = vsel %vm85_vm0, %v3076_v49, 0.0  ;;  %v4092_v8 = vmul.f32 %v3650_v53, %v9637_v18  ;;  %v5147_v12 = vadd.f32 %v9965_v60, %v5146_v57  ;;  %v4977_v30 = vmul.f32 %v4913_v5, %v4465_v32  ;;  %v10065_v18 = vpop.f32.mrf.mxu1  ;;  %v6184_v5 = vld [vmem:[%s11666_s0 + $0x128] sm:$0xff] }
 0x627   :  { %3199 = vadd.xlane.f32.xlu2 %v3198_v31  ;;  %v2819_v3 = vpop.xlane.xlu1 %2818  ;;  %v2441_v17 = vpack.c.bf16 %v2393_v38, %v2392_v15  ;;  %v4594_v16 = vmul.f32 %v4530_v0, %v10055_v2  ;;  %v11898_v31 = vld [vmem:[#allocation3_spill] sm:$0xff]  ;;  %v10089_v38 = vadd.f32 %v6184_v5, %v2596_v41 }
 0x628   :  { %v2949_v45 = vmul.f32 %v2819_v3, %v6278_v20  ;;  %v4150_v7 = vpack.c.bf16 %v4092_v8, %v4091_v54  ;;  %v5303_v26 = vadd.f32 %v5147_v12, %v11897_v61  ;;  %v5052_v19 = vpack.c.bf16 %v4977_v30, %v4976_v1  ;;  %v6185_v61 = vld [vmem:[%s11666_s0 + $0x130] sm:$0xff] }
 0x629   :  { %2657 = vmatmul.bf16.gmra.mxu1 %v2441_v17  ;;  %2836 = vadd.xlane.f32.xlu1 %v2835_v63  ;;  %v4658_v32 = vmul.f32 0.044715, %v4594_v16 }
 0x62a   :  { %v10068_v44 = vsub.f32 %v9759_v4, %v2949_v45  ;;  %5528 = vmatmul.msk.bf16.gmra.mxu2 %vm85_vm0, %v4150_v7  ;;  %5367 = vst.msk [vmem:[%s11671_s5 + $0x10] sm:$0xff] %vm85_vm0, %v5303_v26  ;;  %v4326_v23 = vpop.f32.mrf.mxu2  ;;  %5165 = vmatmul.bf16.gmra.mxu3 %v5052_v19  ;;  %v2599_v45 = vadd.f32 %v9807_v50, %v10019_v35  ;;  %v2838_v7 = vsel %vm85_vm0, %v10089_v38, 0.0 }
 0x62b   :  { %v4327_v54 = vadd.f32 %v9899_v56, %v4326_v23  ;;  %v4722_v15 = vadd.f32 %v4658_v32, %v10055_v2 }
 0x62c   :  { %v3077_v49 = vmul.f32 %v10068_v44, %v10068_v44  ;;  %v10103_v26 = vadd.f32 %v6185_v61, %v2599_v45 }
 0x62d   :  { %v5148_v10 = vpop.f32.mrf.mxu3  ;;  %v4531_v53 = vmul.f32 %v4327_v54, %v4327_v54  ;;  %v4786_v0 = vmul.f32 0.7978846, %v4722_v15 }
 0x62e   :  { %v3201_v24 = vsel %vm85_vm0, %v3077_v49, 0.0  ;;  %v5149_v47 = vadd.f32 %v9965_v60, %v5148_v10  ;;  %v11899_v49 = vld [vmem:[#allocation8_spill] sm:$0xff] }
 0x62f   :  { %3202 = vadd.xlane.f32.xlu2 %v3201_v24  ;;  %v4595_v57 = vmul.f32 %v4531_v53, %v4327_v54  ;;  %5950 = vtanh.f32 %v4786_v0  ;;  %v2841_v24 = vsel %vm85_vm0, %v10103_v26, 0.0 }
 0x630   :  { %v5304_v8 = vadd.f32 %v5149_v47, %v11898_v31  ;;  %v4466_v31 = vmul.f32 0.5, %v10055_v2 }
 0x631   :  { %v4659_v46 = vmul.f32 0.044715, %v4595_v57 }
 0x632   :  { %5368 = vst.msk [vmem:[%s11671_s5 + $0x18] sm:$0xff] %vm85_vm0, %v5304_v8  ;;  %v4329_v12 = vpop.f32.mrf.mxu2  ;;  %v4467_v8 = vmul.f32 0.5, %v4327_v54 }
 0x633   :  { %v4330_v3 = vadd.f32 %v9899_v56, %v4329_v12  ;;  %v4723_v1 = vadd.f32 %v4659_v46, %v4327_v54 }
 0x635   :  { %v4532_v30 = vmul.f32 %v4330_v3, %v4330_v3  ;;  %v4787_v17 = vmul.f32 0.7978846, %v4723_v1  ;;  %v5951_v63 = vpop.eup %5950 }
 0x636   :  { %v4914_v53 = vadd.f32 1.0, %v5951_v63 }
 0x637   :  { %2839 = vadd.xlane.f32.xlu2 %v2838_v7  ;;  %v4596_v16 = vmul.f32 %v4532_v30, %v4330_v3  ;;  %5952 = vtanh.f32 %v4787_v17 }
 0x638   :  { %v4978_v1 = vmul.f32 %v4914_v53, %v4466_v31 }
 0x639   :  { %v4660_v32 = vmul.f32 0.044715, %v4596_v16  ;;  %v11900_v16 = vld [vmem:[#allocation6_spill] sm:$0xff] }
 0x63a   :  { %v5151_v19 = vpop.f32.mrf.mxu3  ;;  %v4331_v35 = vpop.f32.mrf.mxu2 }
 0x63b   :  { %v5152_v23 = vadd.f32 %v9965_v60, %v5151_v19  ;;  %v4332_v10 = vadd.f32 %v9899_v56, %v4331_v35  ;;  %v4724_v57 = vadd.f32 %v4660_v32, %v4330_v3 }
 0x63d   :  { %v5305_v41 = vadd.f32 %v5152_v23, %v11899_v49  ;;  %v5953_v47 = vpop.eup %5952  ;;  %v4533_v15 = vmul.f32 %v4332_v10, %v4332_v10  ;;  %v4788_v46 = vmul.f32 0.7978846, %v4724_v57  ;;  %v11901_v23 = vld [vmem:[#allocation7_spill] sm:$0xff]  ;;  %v4469_v53 = vmul.f32 0.5, %v4332_v10 }
 0x63e   :  { %v4915_v5 = vadd.f32 1.0, %v5953_v47 }
 0x63f   :  { %5369 = vst.msk [vmem:[%s11671_s5 + $0x20] sm:$0xff] %vm85_vm0, %v5305_v41  ;;  %2842 = vadd.xlane.f32.xlu2 %v2841_v24  ;;  %v4597_v0 = vmul.f32 %v4533_v15, %v4332_v10  ;;  %5954 = vtanh.f32 %v4788_v46  ;;  %v4468_v24 = vmul.f32 0.5, %v4330_v3  ;;  %v3325_v15 = vmul.f32 %v9987_v14, %v6278_v20  ;;  %v11902_v46 = vld [vmem:[#allocation11_spill] sm:$0xff]  ;;  %v11903_v14 = vld [vmem:[#allocation10_spill] sm:$0xff] }
 0x640   :  { %v4979_v45 = vmul.f32 %v4915_v5, %v4467_v8 }
 0x641   :  { %v4661_v30 = vmul.f32 0.044715, %v4597_v0 }
 0x642   :  { %v5153_v12 = vpop.f32.mrf.mxu3  ;;  %v5053_v17 = vpack.c.bf16 %v4979_v45, %v4978_v1  ;;  %v3389_v1 = vadd.f32 1e-05, %v3325_v15 }
 0x643   :  { %v5154_v7 = vadd.f32 %v9965_v60, %v5153_v12  ;;  %v4725_v19 = vadd.f32 %v4661_v30, %v4332_v10 }
 0x644   :  { %5170 = vmatmul.bf16.gmra.mxu3 %v5053_v17  ;;  %vm3657_vm6 = vweird.f32 %v3389_v1 }
 0x645   :  { %v5306_v61 = vadd.f32 %v5154_v7, %v11900_v16  ;;  %v4789_v2 = vmul.f32 0.7978846, %v4725_v19  ;;  %v5955_v63 = vpop.eup %5954 }
 0x646   :  { %v4916_v49 = vadd.f32 1.0, %v5955_v63 }
 0x647   :  { %5370 = vst.msk [vmem:[%s11671_s5 + $0x28] sm:$0xff] %vm85_vm0, %v5306_v61  ;;  %5956 = vtanh.f32 %v4789_v2  ;;  %v11904_v2 = vld [vmem:[#allocation9_spill] sm:$0xff] }
 0x648   :  { %v4980_v31 = vmul.f32 %v4916_v49, %v4468_v24  ;;  %5958 = vrsqrt.f32 %v3389_v1 }
 0x64a   :  { %v5156_v54 = vpop.f32.mrf.mxu3 }
 0x64b   :  { %v5157_v32 = vadd.f32 %v9965_v60, %v5156_v54 }
 0x64d   :  { %v5307_v35 = vadd.f32 %v5157_v32, %v11901_v23  ;;  %v5957_v41 = vpop.eup %5956 }
 0x64e   :  { %v4917_v47 = vadd.f32 1.0, %v5957_v41  ;;  %v5959_v7 = vpop.eup %5958 }
 0x64f   :  { %5371 = vst.msk [vmem:[%s11671_s5 + $0x30] sm:$0xff] %vm85_vm0, %v5307_v35  ;;  %v3652_v17 = vmul.f32 %v5959_v7, %v3389_v1  ;;  %vm3658_vm5 = vweird.f32 %v5959_v7 }
 0x650   :  { %v4981_v8 = vmul.f32 %v4917_v47, %v4469_v53  ;;  %vm3659_vm8 = vmor %vm3657_vm6, %vm3658_vm5 }
 0x651   :  { %v3653_v32 = vmul.f32 %v5959_v7, %v3652_v17 }
 0x652   :  { %v5158_v57 = vpop.f32.mrf.mxu3  ;;  %v5054_v0 = vpack.c.bf16 %v4981_v8, %v4980_v31 }
 0x653   :  { %v5159_v5 = vadd.f32 %v9965_v60, %v5158_v57  ;;  %v3654_v23 = vmul.f32 0.5, %v3653_v32 }
 0x654   :  { %5175 = vmatmul.bf16.gmra.mxu3 %v5054_v0 }
 0x655   :  { %v5308_v12 = vadd.f32 %v5159_v5, %v11902_v46  ;;  %v3655_v53 = vsub.f32 1.5, %v3654_v23 }
 0x657   :  { %5372 = vst.msk [vmem:[%s11671_s5 + $0x38] sm:$0xff] %vm85_vm0, %v5308_v12  ;;  %v3656_v57 = vmul.f32 %v5959_v7, %v3655_v53 }
 0x65a   :  { %v5161_v3 = vpop.f32.mrf.mxu3 }
 0x65b   :  { %v5162_v10 = vadd.f32 %v9965_v60, %v5161_v3 }
 0x65d   :  { %v5309_v45 = vadd.f32 %v5162_v10, %v11903_v14 }
 0x65f   :  { %5373 = vst.msk [vmem:[%s11671_s5 + $0x40] sm:$0xff] %vm85_vm0, %v5309_v45 }
 0x662   :  { %v5163_v30 = vpop.f32.mrf.mxu3 }
 0x663   :  { %v5164_v16 = vadd.f32 %v9965_v60, %v5163_v30  ;;  %v3182_v61 = vpop.xlane.xlu2 %3181  ;;  %v3660_v30 = vsel %vm3659_vm8, %v5959_v7, %v3656_v57 }
 0x664   :  { %v3326_v19 = vmul.f32 %v3182_v61, %v6278_v20 }
 0x665   :  { %v5310_v54 = vadd.f32 %v5164_v16, %v11904_v2  ;;  %v4093_v2 = vmul.f32 %v3660_v30, %v9683_v34 }
 0x666   :  { %v3390_v63 = vadd.f32 1e-05, %v3326_v19 }
 0x667   :  { %5374 = vst.msk [vmem:[%s11671_s5 + $0x48] sm:$0xff] %vm85_vm0, %v5310_v54 }
 0x668   :  { %5960 = vrsqrt.f32 %v3390_v63  ;;  %vm3667_vm9 = vweird.f32 %v3390_v63 }
 0x66b   :  { %v3185_v35 = vpop.xlane.xlu2 %3184 }
 0x66c   :  { %v3327_v49 = vmul.f32 %v3185_v35, %v6278_v20 }
 0x66e   :  { %v5961_v41 = vpop.eup %5960  ;;  %v10149_v24 = vadd.f32 1e-05, %v3327_v49 }
 0x66f   :  { %v3662_v47 = vmul.f32 %v5961_v41, %v3390_v63  ;;  %vm3668_vm7 = vweird.f32 %v5961_v41 }
 0x670   :  { %5962 = vrsqrt.f32 %v10149_v24  ;;  %vm3669_vm10 = vmor %vm3667_vm9, %vm3668_vm7  ;;  %vm3677_vm12 = vweird.f32 %v10149_v24 }
 0x671   :  { %v3663_v15 = vmul.f32 %v5961_v41, %v3662_v47  ;;  %v2603_v47 = vpop.f32.mrf.mxu1 }
 0x673   :  { %v3664_v31 = vmul.f32 0.5, %v3663_v15  ;;  %v2822_v8 = vpop.xlane.xlu2 %2821  ;;  %v3188_v46 = vpop.xlane.xlu0 %3187 }
 0x674   :  { %v2950_v5 = vmul.f32 %v2822_v8, %v6278_v20  ;;  %v3328_v10 = vmul.f32 %v3188_v46, %v6278_v20 }
 0x675   :  { %v3665_v0 = vsub.f32 1.5, %v3664_v31  ;;  %v2601_v31 = vadd.f32 %v9807_v50, %v10065_v18 }
 0x676   :  { %v10153_v12 = vpop.eup %5962  ;;  %v10156_v3 = vsub.f32 %v9819_v29, %v2950_v5  ;;  %v3392_v17 = vadd.f32 1e-05, %v3328_v10 }
 0x677   :  { %v3666_v14 = vmul.f32 %v5961_v41, %v3665_v0  ;;  %v3672_v45 = vmul.f32 %v10153_v12, %v10149_v24  ;;  %vm3678_vm11 = vweird.f32 %v10153_v12 }
 0x678   :  { %v3078_v1 = vmul.f32 %v10156_v3, %v10156_v3  ;;  %5964 = vrsqrt.f32 %v3392_v17  ;;  %vm10193_vm14 = vmor %vm3677_vm12, %vm3678_vm11  ;;  %vm3687_vm15 = vweird.f32 %v3392_v17 }
 0x679   :  { %v3673_v16 = vmul.f32 %v10153_v12, %v3672_v45  ;;  %v3670_v61 = vsel %vm3669_vm10, %v5961_v41, %v3666_v14  ;;  %v6186_v45 = vld [vmem:[%s11666_s0 + $0x138] sm:$0xff] }
 0x67a   :  { %v3204_v19 = vsel %vm85_vm0, %v3078_v1, 0.0  ;;  %v4094_v54 = vmul.f32 %v3670_v61, %v9790_v37  ;;  %v10186_v30 = vadd.f32 %v6186_v45, %v2601_v31 }
 0x67b   :  { %v2825_v63 = vpop.xlane.xlu2 %2824  ;;  %3205 = vadd.xlane.f32.xlu0 %v3204_v19  ;;  %v3674_v23 = vmul.f32 0.5, %v3673_v16  ;;  %v3191_v35 = vpop.xlane.xlu0 %3190 }
 0x67c   :  { %v2951_v32 = vmul.f32 %v2825_v63, %v6278_v20  ;;  %v4151_v7 = vpack.c.bf16 %v4094_v54, %v4093_v2  ;;  %v3329_v53 = vmul.f32 %v3191_v35, %v6278_v20  ;;  %11905 = vst [vmem:[#allocation21_spill] sm:$0xff] %v10186_v30  ;;  %v2604_v35 = vadd.f32 %v9807_v50, %v2603_v47 }
 0x67d   :  { %v3675_v37 = vsub.f32 1.5, %v3674_v23 }
 0x67e   :  { %v10169_v49 = vsub.f32 %v9861_v58, %v2951_v32  ;;  %5529 = vmatmul.msk.bf16.gmra.mxu2 %vm85_vm0, %v4151_v7  ;;  %v5965_v41 = vpop.eup %5964  ;;  %v10173_v15 = vadd.f32 1e-05, %v3329_v53  ;;  %v2605_v53 = vpop.f32.mrf.mxu1 }
 0x67f   :  { %v3682_v57 = vmul.f32 %v5965_v41, %v3392_v17  ;;  %v3676_v0 = vmul.f32 %v10153_v12, %v3675_v37  ;;  %vm3688_vm13 = vweird.f32 %v5965_v41  ;;  %v2844_v17 = vsel %vm85_vm0, %v10186_v30, 0.0 }
 0x680   :  { %v3079_v34 = vmul.f32 %v10169_v49, %v10169_v49  ;;  %5966 = vrsqrt.f32 %v10173_v15  ;;  %vm3689_vm1 = vmor %vm3687_vm15, %vm3688_vm13  ;;  %vm3697_vm3 = vweird.f32 %v10173_v15 }
 0x681   :  { %v3683_v5 = vmul.f32 %v5965_v41, %v3682_v57  ;;  %v3680_v32 = vsel %vm10193_vm14, %v10153_v12, %v3676_v0 }
 0x682   :  { %v3207_v8 = vsel %vm85_vm0, %v3079_v34, 0.0  ;;  %v4095_v31 = vmul.f32 %v3680_v32, %v9797_v33 }
 0x683   :  { %3208 = vadd.xlane.f32.xlu0 %v3207_v8  ;;  %v3684_v46 = vmul.f32 0.5, %v3683_v5  ;;  %v3194_v10 = vpop.xlane.xlu1 %3193  ;;  %v2828_v14 = vpop.xlane.xlu0 %2827 }
 0x684   :  { %v3330_v18 = vmul.f32 %v3194_v10, %v6278_v20  ;;  %v2952_v1 = vmul.f32 %v2828_v14, %v6278_v20 }
 0x685   :  { %v3685_v16 = vsub.f32 1.5, %v3684_v46  ;;  %v4334_v61 = vpop.f32.mrf.mxu2  ;;  %v6187_v46 = vld [vmem:[%s11666_s0 + $0x140] sm:$0xff] }
 0x686   :  { %v10191_v19 = vpop.eup %5966  ;;  %v10197_v54 = vadd.f32 1e-05, %v3330_v18  ;;  %v10200_v63 = vsub.f32 %v9891_v39, %v2952_v1  ;;  %v10208_v23 = vadd.f32 %v9899_v56, %v4334_v61 }
 0x687   :  { %v3686_v24 = vmul.f32 %v5965_v41, %v3685_v16  ;;  %v3692_v7 = vmul.f32 %v10191_v19, %v10173_v15  ;;  %vm3698_vm2 = vweird.f32 %v10191_v19 }
 0x688   :  { %5968 = vrsqrt.f32 %v10197_v54  ;;  %v3080_v34 = vmul.f32 %v10200_v63, %v10200_v63  ;;  %v4534_v5 = vmul.f32 %v10208_v23, %v10208_v23  ;;  %vm10258_vm4 = vmor %vm3697_vm3, %vm3698_vm2  ;;  %vm3707_vm6 = vweird.f32 %v10197_v54 }
 0x689   :  { %v3690_v12 = vsel %vm3689_vm1, %v5965_v41, %v3686_v24  ;;  %v3693_v37 = vmul.f32 %v10191_v19, %v3692_v7  ;;  %v10225_v41 = vadd.f32 %v6187_v46, %v2604_v35  ;;  %v2606_v7 = vadd.f32 %v9807_v50, %v2605_v53 }
 0x68a   :  { %v3210_v57 = vsel %vm85_vm0, %v3080_v34, 0.0  ;;  %v4096_v47 = vmul.f32 %v3690_v12, %v9835_v43  ;;  %v4598_v32 = vmul.f32 %v4534_v5, %v10208_v23  ;;  %v6188_v5 = vld [vmem:[%s11666_s0 + $0x148] sm:$0xff] }
 0x68b   :  { %2845 = vadd.xlane.f32.xlu0 %v2844_v17  ;;  %v3694_v8 = vmul.f32 0.5, %v3693_v37  ;;  %3211 = vadd.xlane.f32.xlu1 %v3210_v57  ;;  %v2831_v0 = vpop.xlane.xlu0 %2830  ;;  %11908 = vst [vmem:[#allocation23_spill] sm:$0xff] %v10225_v41  ;;  %v2847_v17 = vsel %vm85_vm0, %v10225_v41, 0.0  ;;  %v2608_v37 = vpop.f32.mrf.mxu1 }
 0x68c   :  { %v3197_v10 = vpop.xlane.xlu1 %3196  ;;  %v2953_v14 = vmul.f32 %v2831_v0, %v6278_v20  ;;  %v4152_v45 = vpack.c.bf16 %v4096_v47, %v4095_v31  ;;  %v4662_v47 = vmul.f32 0.044715, %v4598_v32  ;;  %v10255_v0 = vadd.f32 %v6188_v5, %v2606_v7 }
 0x68d   :  { %v3331_v33 = vmul.f32 %v3197_v10, %v6278_v20  ;;  %v4336_v18 = vpop.f32.mrf.mxu2  ;;  %v3695_v1 = vsub.f32 1.5, %v3694_v8  ;;  %v2609_v7 = vadd.f32 %v9807_v50, %v2608_v37 }
 0x68e   :  { %v5969_v43 = vpop.eup %5968  ;;  %v10230_v16 = vsub.f32 %v9916_v40, %v2953_v14  ;;  %v10233_v61 = vadd.f32 %v9899_v56, %v4336_v18  ;;  %5530 = vmatmul.msk.bf16.gmra.mxu2 %vm85_vm0, %v4152_v45  ;;  %11909 = vst [vmem:[#allocation24_spill] sm:$0xff] %v10255_v0  ;;  %v4726_v32 = vadd.f32 %v4662_v47, %v10208_v23 }
 0x68f   :  { %v3702_v2 = vmul.f32 %v5969_v43, %v10197_v54  ;;  %v10238_v24 = vadd.f32 1e-05, %v3331_v33  ;;  %v3696_v57 = vmul.f32 %v10191_v19, %v3695_v1  ;;  %vm3708_vm5 = vweird.f32 %v5969_v43 }
 0x690   :  { %v4535_v35 = vmul.f32 %v10233_v61, %v10233_v61  ;;  %v3081_v34 = vmul.f32 %v10230_v16, %v10230_v16  ;;  %vm3709_vm7 = vmor %vm3707_vm6, %vm3708_vm5  ;;  %v4790_v47 = vmul.f32 0.7978846, %v4726_v32 }
 0x691   :  { %v3703_v12 = vmul.f32 %v5969_v43, %v3702_v2  ;;  %5970 = vrsqrt.f32 %v10238_v24  ;;  %v3700_v33 = vsel %vm10258_vm4, %v10191_v19, %v3696_v57  ;;  %v2850_v19 = vsel %vm85_vm0, %v10255_v0, 0.0 }
 0x692   :  { %v3213_v53 = vsel %vm85_vm0, %v3081_v34, 0.0  ;;  %v4599_v8 = vmul.f32 %v4535_v35, %v10233_v61  ;;  %v4097_v50 = vmul.f32 %v3700_v33, %v9872_v28  ;;  %5972 = vtanh.f32 %v4790_v47 }
 0x693   :  { %2848 = vadd.xlane.f32.xlu0 %v2847_v17  ;;  %v3704_v31 = vmul.f32 0.5, %v3703_v12  ;;  %3214 = vadd.xlane.f32.xlu1 %v3213_v53  ;;  %vm3717_vm9 = vweird.f32 %v10238_v24 }
 0x694   :  { %v2834_v46 = vpop.xlane.xlu1 %2833  ;;  %v4663_v2 = vmul.f32 0.044715, %v4599_v8 }
 0x695   :  { %v3705_v14 = vsub.f32 1.5, %v3704_v31  ;;  %v2954_v45 = vmul.f32 %v2834_v46, %v6278_v20  ;;  %v2610_v46 = vpop.f32.mrf.mxu1 }
 0x696   :  { %v4727_v53 = vadd.f32 %v4663_v2, %v10233_v61 }
 0x697   :  { %v10267_v18 = vpop.eup %5970  ;;  %v3706_v1 = vmul.f32 %v5969_v43, %v3705_v14  ;;  %v10270_v15 = vsub.f32 %v10013_v42, %v2954_v45  ;;  %v4339_v12 = vpop.f32.mrf.mxu2 }
 0x698   :  { %v3712_v35 = vmul.f32 %v10267_v18, %v10238_v24  ;;  %v10283_v31 = vadd.f32 %v9899_v56, %v4339_v12  ;;  %v4791_v5 = vmul.f32 0.7978846, %v4727_v53  ;;  %v5973_v12 = vpop.eup %5972  ;;  %vm3718_vm8 = vweird.f32 %v10267_v18 }
 0x699   :  { %v3710_v54 = vsel %vm3709_vm7, %v5969_v43, %v3706_v1  ;;  %v3082_v57 = vmul.f32 %v10270_v15, %v10270_v15  ;;  %vm10339_vm11 = vmor %vm3717_vm9, %vm3718_vm8 }
 0x69a   :  { %v3200_v17 = vpop.xlane.xlu2 %3199  ;;  %v4098_v37 = vmul.f32 %v3710_v54, %v9920_v11  ;;  %v3713_v10 = vmul.f32 %v10267_v18, %v3712_v35  ;;  %v4536_v14 = vmul.f32 %v10283_v31, %v10283_v31  ;;  %v6189_v11 = vld [vmem:[%s11666_s0 + $0x150] sm:$0xff] }
 0x69b   :  { %v3332_v34 = vmul.f32 %v3200_v17, %v6278_v20  ;;  %v3216_v43 = vsel %vm85_vm0, %v3082_v57, 0.0  ;;  %2851 = vadd.xlane.f32.xlu1 %v2850_v19  ;;  %v10298_v33 = vadd.f32 %v6189_v11, %v2609_v7  ;;  %v4471_v11 = vmul.f32 0.5, %v10233_v61 }
 0x69c   :  { %3217 = vadd.xlane.f32.xlu2 %v3216_v43  ;;  %v2837_v45 = vpop.xlane.xlu1 %2836  ;;  %v4153_v1 = vpack.c.bf16 %v4098_v37, %v4097_v50  ;;  %v4600_v2 = vmul.f32 %v4536_v14, %v10283_v31  ;;  %v3714_v35 = vmul.f32 0.5, %v3713_v10  ;;  %v10318_v37 = vld [vmem:[%s11670_s4] ss:$0 sm:$0xff] }
 0x69d   :  { %v10287_v8 = vadd.f32 1e-05, %v3332_v34  ;;  %v2955_v28 = vmul.f32 %v2837_v45, %v6278_v20  ;;  %11912 = vst [vmem:[#allocation26_spill] sm:$0xff] %v10298_v33  ;;  %v2853_v57 = vsel %vm85_vm0, %v10298_v33, 0.0  ;;  %v2611_v47 = vadd.f32 %v10318_v37, %v2610_v46 }
 0x69e   :  { %5531 = vmatmul.msk.bf16.gmra.mxu2 %vm85_vm0, %v4153_v1  ;;  %v4664_v17 = vmul.f32 0.044715, %v4600_v2  ;;  %v3715_v14 = vsub.f32 1.5, %v3714_v35  ;;  %v6191_v35 = vld [vmem:[%s11666_s0 + $0x158] sm:$0xff] }
 0x69f   :  { %5974 = vrsqrt.f32 %v10287_v8  ;;  %v10303_v32 = vsub.f32 %v10038_v6, %v2955_v28  ;;  %v4341_v54 = vpop.f32.mrf.mxu2  ;;  %v4470_v28 = vmul.f32 0.5, %v10208_v23  ;;  %vm3727_vm12 = vweird.f32 %v10287_v8 }
 0x6a0   :  { %5976 = vtanh.f32 %v4791_v5  ;;  %v10310_v7 = vadd.f32 %v9899_v56, %v4341_v54  ;;  %v4728_v53 = vadd.f32 %v4664_v17, %v10283_v31  ;;  %v4918_v5 = vadd.f32 1.0, %v5973_v12  ;;  %v2613_v17 = vpop.f32.mrf.mxu1 }
 0x6a1   :  { %v3083_v34 = vmul.f32 %v10303_v32, %v10303_v32  ;;  %v10331_v12 = vadd.f32 %v6191_v35, %v2611_v47 }
 0x6a2   :  { %v10305_v19 = vpop.xlane.xlu2 %3202  ;;  %v4537_v1 = vmul.f32 %v10310_v7, %v10310_v7 }
 0x6a3   :  { %v3219_v43 = vsel %vm85_vm0, %v3083_v34, 0.0  ;;  %2854 = vadd.xlane.f32.xlu1 %v2853_v57  ;;  %v4792_v34 = vmul.f32 0.7978846, %v4728_v53  ;;  %11913 = vst [vmem:[#allocation25_spill] sm:$0xff] %v10331_v12  ;;  %v4982_v57 = vmul.f32 %v4918_v5, %v4470_v28  ;;  %v2856_v24 = vsel %vm85_vm0, %v10331_v12, 0.0 }
 0x6a4   :  { %3220 = vadd.xlane.f32.xlu2 %v3219_v43  ;;  %v4601_v46 = vmul.f32 %v4537_v1, %v10310_v7  ;;  %v3716_v43 = vmul.f32 %v10267_v18, %v3715_v14 }
 0x6a5   :  { %v5975_v50 = vpop.eup %5974  ;;  %5978 = vtanh.f32 %v4792_v34  ;;  %v6192_v34 = vld [vmem:[%s11666_s0 + $0x160] sm:$0xff] }
 0x6a6   :  { %v5977_v10 = vpop.eup %5976  ;;  %v3722_v45 = vmul.f32 %v5975_v50, %v10287_v8  ;;  %vm3728_vm10 = vweird.f32 %v5975_v50 }
 0x6a7   :  { %v4919_v2 = vadd.f32 1.0, %v5977_v10  ;;  %v4665_v10 = vmul.f32 0.044715, %v4601_v46  ;;  %vm3729_vm13 = vmor %vm3727_vm12, %vm3728_vm10 }
 0x6a8   :  { %v3723_v54 = vmul.f32 %v5975_v50, %v3722_v45  ;;  %v2614_v45 = vadd.f32 %v10318_v37, %v2613_v17 }
 0x6a9   :  { %v4983_v6 = vmul.f32 %v4919_v2, %v4471_v11  ;;  %v4729_v47 = vadd.f32 %v4665_v10, %v10310_v7 }
 0x6aa   :  { %v3724_v23 = vmul.f32 0.5, %v3723_v54  ;;  %v2840_v61 = vpop.xlane.xlu2 %2839  ;;  %v10360_v35 = vadd.f32 %v6192_v34, %v2614_v45 }
 0x6ab   :  { %v2956_v53 = vmul.f32 %v2840_v61, %v6278_v20  ;;  %v5055_v1 = vpack.c.bf16 %v4983_v6, %v4982_v57  ;;  %v3720_v6 = vsel %vm10339_vm11, %v10267_v18, %v3716_v43  ;;  %v4793_v46 = vmul.f32 0.7978846, %v4729_v47  ;;  %v5979_v61 = vpop.eup %5978 }
 0x6ac   :  { %v3725_v42 = vsub.f32 1.5, %v3724_v23  ;;  %2857 = vadd.xlane.f32.xlu2 %v2856_v24  ;;  %v4099_v43 = vmul.f32 %v3720_v6, %v9984_v27  ;;  %v4920_v24 = vadd.f32 1.0, %v5979_v61  ;;  %v2615_v6 = vpop.f32.mrf.mxu1 }
 0x6ad   :  { %v10344_v14 = vsub.f32 %v10089_v38, %v2956_v53  ;;  %v4344_v28 = vpop.f32.mrf.mxu2  ;;  %5180 = vmatmul.bf16.gmra.mxu3 %v5055_v1  ;;  %v5166_v17 = vpop.f32.mrf.mxu3  ;;  %5980 = vtanh.f32 %v4793_v46  ;;  %v11916_v53 = vld [vmem:[#allocation13_spill] sm:$0xff] }
 0x6ae   :  { %v3726_v11 = vmul.f32 %v5975_v50, %v3725_v42  ;;  %v10353_v2 = vadd.f32 %v9899_v56, %v4344_v28  ;;  %v5167_v8 = vadd.f32 %v9965_v60, %v5166_v17  ;;  %v2859_v28 = vsel %vm85_vm0, %v10360_v35, 0.0 }
 0x6af   :  { %v3084_v54 = vmul.f32 %v10344_v14, %v10344_v14 }
 0x6b0   :  { %v3730_v18 = vsel %vm3729_vm13, %v5975_v50, %v3726_v11  ;;  %v4538_v42 = vmul.f32 %v10353_v2, %v10353_v2  ;;  %v5311_v1 = vadd.f32 %v5167_v8, %v11916_v53  ;;  %v11917_v53 = vld [vmem:[#allocation12_spill] sm:$0xff] }
 0x6b1   :  { %v3222_v57 = vsel %vm85_vm0, %v3084_v54, 0.0  ;;  %v4100_v23 = vmul.f32 %v3730_v18, %v10041_v51  ;;  %v4472_v18 = vmul.f32 0.5, %v10283_v31 }
 0x6b2   :  { %v4602_v10 = vmul.f32 %v4538_v42, %v10353_v2  ;;  %3223 = vadd.xlane.f32.xlu0 %v3222_v57  ;;  %v2843_v45 = vpop.xlane.xlu2 %2842  ;;  %5375 = vst.msk [vmem:[%s11671_s5 + $0x50] sm:$0xff] %vm85_vm0, %v5311_v1  ;;  %v4473_v57 = vmul.f32 0.5, %v10310_v7  ;;  %v6193_v7 = vld [vmem:[%s11666_s0 + $0x168] sm:$0xff] }
 0x6b3   :  { %v2957_v50 = vmul.f32 %v2843_v45, %v6278_v20  ;;  %v4154_v47 = vpack.c.bf16 %v4100_v23, %v4099_v43  ;;  %v5981_v54 = vpop.eup %5980  ;;  %v2616_v23 = vadd.f32 %v10318_v37, %v2615_v6  ;;  %v4984_v61 = vmul.f32 %v4920_v24, %v4472_v18 }
 0x6b4   :  { %v4666_v5 = vmul.f32 0.044715, %v4602_v10  ;;  %2860 = vadd.xlane.f32.xlu2 %v2859_v28  ;;  %v4921_v43 = vadd.f32 1.0, %v5981_v54 }
 0x6b5   :  { %v10376_v27 = vsub.f32 %v10103_v26, %v2957_v50  ;;  %v4346_v51 = vpop.f32.mrf.mxu2  ;;  %5532 = vmatmul.msk.bf16.gmra.mxu2 %vm85_vm0, %v4154_v47  ;;  %v5168_v46 = vpop.f32.mrf.mxu3 }
 0x6b6   :  { %v4347_v11 = vadd.f32 %v9899_v56, %v4346_v51  ;;  %v4730_v17 = vadd.f32 %v4666_v5, %v10353_v2  ;;  %v5169_v8 = vadd.f32 %v9965_v60, %v5168_v46  ;;  %v4985_v45 = vmul.f32 %v4921_v43, %v4473_v57  ;;  %v2618_v51 = vpop.f32.mrf.mxu1  ;;  %v6194_v46 = vld [vmem:[%s11666_s0 + $0x170] sm:$0xff] }
 0x6b7   :  { %v3085_v34 = vmul.f32 %v10376_v27, %v10376_v27  ;;  %v10398_v5 = vadd.f32 %v6193_v7, %v2616_v23  ;;  %v2619_v6 = vadd.f32 %v10318_v37, %v2618_v51  ;;  %v4474_v43 = vmul.f32 0.5, %v10353_v2  ;;  %v10420_v2 = vld [vmem:[%s11670_s4 + $0x1] ss:$0 sm:$0xff] }
 0x6b8   :  { %v4539_v42 = vmul.f32 %v4347_v11, %v4347_v11  ;;  %v5312_v1 = vadd.f32 %v5169_v8, %v11917_v53  ;;  %v4794_v50 = vmul.f32 0.7978846, %v4730_v17  ;;  %v5056_v31 = vpack.c.bf16 %v4985_v45, %v4984_v61 }
 0x6b9   :  { %v3225_v56 = vsel %vm85_vm0, %v3085_v34, 0.0  ;;  %v2862_v17 = vsel %vm85_vm0, %v10398_v5, 0.0  ;;  %v10406_v34 = vadd.f32 %v6194_v46, %v2619_v6  ;;  %v4475_v23 = vmul.f32 0.5, %v4347_v11 }
 0x6ba   :  { %v4603_v10 = vmul.f32 %v4539_v42, %v4347_v11  ;;  %3226 = vadd.xlane.f32.xlu0 %v3225_v56  ;;  %5376 = vst.msk [vmem:[%s11671_s5 + $0x58] sm:$0xff] %vm85_vm0, %v5312_v1  ;;  %5982 = vtanh.f32 %v4794_v50  ;;  %v11918_v1 = vld [vmem:[#allocation14_spill] sm:$0xff] }
 0x6bb   :  { %v2865_v57 = vsel %vm85_vm0, %v10406_v34, 0.0 }
 0x6bc   :  { %v4667_v47 = vmul.f32 0.044715, %v4603_v10 }
 0x6bd   :  { %5185 = vmatmul.bf16.gmra.mxu3 %v5056_v31 }
 0x6be   :  { %v4731_v28 = vadd.f32 %v4667_v47, %v4347_v11 }
 0x6c0   :  { %v4795_v24 = vmul.f32 0.7978846, %v4731_v28  ;;  %v5983_v54 = vpop.eup %5982  ;;  %v3333_v28 = vmul.f32 %v10305_v19, %v6278_v20 }
 0x6c1   :  { %v4922_v18 = vadd.f32 1.0, %v5983_v54 }
 0x6c2   :  { %2863 = vadd.xlane.f32.xlu0 %v2862_v17  ;;  %5984 = vtanh.f32 %v4795_v24  ;;  %v3397_v24 = vadd.f32 1e-05, %v3333_v28 }
 0x6c3   :  { %v4986_v10 = vmul.f32 %v4922_v18, %v4474_v43 }
 0x6c4   :  { %5986 = vrsqrt.f32 %v3397_v24  ;;  %vm3737_vm15 = vweird.f32 %v3397_v24 }
 0x6c7   :  { %v5171_v8 = vpop.f32.mrf.mxu3 }
 0x6c8   :  { %v5985_v42 = vpop.eup %5984  ;;  %v5172_v61 = vadd.f32 %v9965_v60, %v5171_v8 }
 0x6c9   :  { %v4923_v56 = vadd.f32 1.0, %v5985_v42 }
 0x6ca   :  { %2866 = vadd.xlane.f32.xlu0 %v2865_v57  ;;  %v5313_v45 = vadd.f32 %v5172_v61, %v11918_v1 }
 0x6cb   :  { %v4987_v53 = vmul.f32 %v4923_v56, %v4475_v23 }
 0x6cc   :  { %5377 = vst.msk [vmem:[%s11671_s5 + $0x60] sm:$0xff] %vm85_vm0, %v5313_v45 }
 0x6cd   :  { %v5057_v50 = vpack.c.bf16 %v4987_v53, %v4986_v10 }
 0x6cf   :  { %5190 = vmatmul.bf16.gmra.mxu3 %v5057_v50  ;;  %v5173_v31 = vpop.f32.mrf.mxu3 }
 0x6d0   :  { %v5174_v60 = vadd.f32 %v10420_v2, %v5173_v31  ;;  %v2620_v31 = vpop.f32.mrf.mxu1 }
 0x6d2   :  { %v5314_v11 = vadd.f32 %v5174_v60, %v8677_v21 }
 0x6d4   :  { %5378 = vst.msk [vmem:[%s11671_s5 + $0x68] sm:$0xff] %vm85_vm0, %v5314_v11 }
 0x6d7   :  { %v5176_v47 = vpop.f32.mrf.mxu3 }
 0x6d8   :  { %v5177_v7 = vadd.f32 %v10420_v2, %v5176_v47 }
 0x6da   :  { %v5315_v51 = vadd.f32 %v5177_v7, %v8686_v52  ;;  %v5987_v52 = vpop.eup %5986 }
 0x6db   :  { %v3732_v54 = vmul.f32 %v5987_v52, %v3397_v24  ;;  %vm3738_vm14 = vweird.f32 %v5987_v52 }
 0x6dc   :  { %5379 = vst.msk [vmem:[%s11671_s5 + $0x70] sm:$0xff] %vm85_vm0, %v5315_v51  ;;  %vm3739_vm2 = vmor %vm3737_vm15, %vm3738_vm14 }
 0x6dd   :  { %v3733_v42 = vmul.f32 %v5987_v52, %v3732_v54 }
 0x6df   :  { %v5178_v21 = vpop.f32.mrf.mxu3  ;;  %v3734_v8 = vmul.f32 0.5, %v3733_v42 }
 0x6e0   :  { %v5179_v6 = vadd.f32 %v10420_v2, %v5178_v21 }
 0x6e1   :  { %v3735_v56 = vsub.f32 1.5, %v3734_v8 }
 0x6e2   :  { %v5316_v17 = vadd.f32 %v5179_v6, %v8712_v9 }
 0x6e3   :  { %v3736_v53 = vmul.f32 %v5987_v52, %v3735_v56 }
 0x6e4   :  { %5380 = vst.msk [vmem:[%s11671_s5 + $0x78] sm:$0xff] %vm85_vm0, %v5316_v17 }
 0x6e5   :  { %v3740_v21 = vsel %vm3739_vm2, %v5987_v52, %v3736_v53 }
 0x6e6   :  { %v4101_v8 = vmul.f32 %v3740_v21, %v10068_v44 }
 0x6ee   :  { %v3206_v19 = vpop.xlane.xlu0 %3205 }
 0x6ef   :  { %v3334_v46 = vmul.f32 %v3206_v19, %v6278_v20 }
 0x6f1   :  { %v3398_v18 = vadd.f32 1e-05, %v3334_v46 }
 0x6f3   :  { %5988 = vrsqrt.f32 %v3398_v18  ;;  %vm3747_vm3 = vweird.f32 %v3398_v18 }
 0x6f6   :  { %v3209_v57 = vpop.xlane.xlu0 %3208 }
 0x6f7   :  { %v3335_v43 = vmul.f32 %v3209_v57, %v6278_v20 }
 0x6f9   :  { %v5989_v23 = vpop.eup %5988  ;;  %v10444_v9 = vadd.f32 1e-05, %v3335_v43 }
 0x6fa   :  { %v3742_v61 = vmul.f32 %v5989_v23, %v3398_v18  ;;  %vm3748_vm1 = vweird.f32 %v5989_v23 }
 0x6fb   :  { %5990 = vrsqrt.f32 %v10444_v9  ;;  %vm3749_vm4 = vmor %vm3747_vm3, %vm3748_vm1  ;;  %vm3757_vm6 = vweird.f32 %v10444_v9 }
 0x6fc   :  { %v3743_v10 = vmul.f32 %v5989_v23, %v3742_v61 }
 0x6fe   :  { %v3744_v1 = vmul.f32 0.5, %v3743_v10  ;;  %v2846_v45 = vpop.xlane.xlu0 %2845  ;;  %v3212_v11 = vpop.xlane.xlu1 %3211 }
 0x6ff   :  { %v2958_v50 = vmul.f32 %v2846_v45, %v6278_v20  ;;  %v3336_v7 = vmul.f32 %v3212_v11, %v6278_v20  ;;  %v2621_v11 = vadd.f32 %v10318_v37, %v2620_v31 }
 0x700   :  { %v3745_v60 = vsub.f32 1.5, %v3744_v1  ;;  %v2623_v1 = vpop.f32.mrf.mxu1 }
 0x701   :  { %v10448_v47 = vpop.eup %5990  ;;  %v10452_v51 = vsub.f32 %v10186_v30, %v2958_v50  ;;  %v4349_v28 = vpop.f32.mrf.mxu2  ;;  %v3400_v24 = vadd.f32 1e-05, %v3336_v7 }
 0x702   :  { %v3746_v6 = vmul.f32 %v5989_v23, %v3745_v60  ;;  %v3752_v17 = vmul.f32 %v10448_v47, %v10444_v9  ;;  %vm3758_vm5 = vweird.f32 %v10448_v47 }
 0x703   :  { %v3086_v54 = vmul.f32 %v10452_v51, %v10452_v51  ;;  %5992 = vrsqrt.f32 %v3400_v24  ;;  %vm10495_vm7 = vmor %vm3757_vm6, %vm3758_vm5  ;;  %vm3767_vm9 = vweird.f32 %v3400_v24 }
 0x704   :  { %v3750_v19 = vsel %vm3749_vm4, %v5989_v23, %v3746_v6  ;;  %v3753_v46 = vmul.f32 %v10448_v47, %v3752_v17  ;;  %v10480_v17 = vld [vmem:[%s11668_s2 + $0x1] ss:$0 sm:$0xff] }
 0x705   :  { %v3228_v42 = vsel %vm85_vm0, %v3086_v54, 0.0  ;;  %v4102_v52 = vmul.f32 %v3750_v19, %v10156_v3  ;;  %v10483_v54 = vadd.f32 %v10480_v17, %v4349_v28 }
 0x706   :  { %3229 = vadd.xlane.f32.xlu1 %v3228_v42  ;;  %v2849_v18 = vpop.xlane.xlu0 %2848  ;;  %v3754_v57 = vmul.f32 0.5, %v3753_v46  ;;  %v3215_v61 = vpop.xlane.xlu1 %3214  ;;  %v6197_v42 = vld [vmem:[%s11666_s0 + $0x178] sm:$0xff] }
 0x707   :  { %v2959_v43 = vmul.f32 %v2849_v18, %v6278_v20  ;;  %v4155_v56 = vpack.c.bf16 %v4102_v52, %v4101_v8  ;;  %v3337_v10 = vmul.f32 %v3215_v61, %v6278_v20  ;;  %v10491_v8 = vadd.f32 %v6197_v42, %v2621_v11 }
 0x708   :  { %v3755_v44 = vsub.f32 1.5, %v3754_v57  ;;  %v4540_v9 = vmul.f32 %v10483_v54, %v10483_v54 }
 0x709   :  { %v10465_v23 = vsub.f32 %v10225_v41, %v2959_v43  ;;  %v4351_v53 = vpop.f32.mrf.mxu2  ;;  %5533 = vmatmul.msk.bf16.gmra.mxu2 %vm85_vm0, %v4155_v56  ;;  %v5993_v45 = vpop.eup %5992  ;;  %v10468_v50 = vadd.f32 1e-05, %v3337_v10 }
 0x70a   :  { %v3762_v60 = vmul.f32 %v5993_v45, %v3400_v24  ;;  %v3756_v6 = vmul.f32 %v10448_v47, %v3755_v44  ;;  %v10486_v31 = vadd.f32 %v10480_v17, %v4351_v53  ;;  %vm3768_vm8 = vweird.f32 %v5993_v45  ;;  %v2625_v44 = vpop.f32.mrf.mxu1 }
 0x70b   :  { %v3087_v3 = vmul.f32 %v10465_v23, %v10465_v23  ;;  %5994 = vrsqrt.f32 %v10468_v50  ;;  %vm3769_vm10 = vmor %vm3767_vm9, %vm3768_vm8  ;;  %v4604_v42 = vmul.f32 %v4540_v9, %v10483_v54  ;;  %vm3777_vm13 = vweird.f32 %v10468_v50 }
 0x70c   :  { %v3763_v21 = vmul.f32 %v5993_v45, %v3762_v60  ;;  %v3760_v61 = vsel %vm10495_vm7, %v10448_v47, %v3756_v6  ;;  %v4541_v11 = vmul.f32 %v10486_v31, %v10486_v31  ;;  %v2624_v47 = vadd.f32 %v10318_v37, %v2623_v1 }
 0x70d   :  { %v3231_v7 = vsel %vm85_vm0, %v3087_v3, 0.0  ;;  %v2868_v6 = vsel %vm85_vm0, %v10491_v8, 0.0 }
 0x70e   :  { %3232 = vadd.xlane.f32.xlu1 %v3231_v7  ;;  %v3764_v19 = vmul.f32 0.5, %v3763_v21  ;;  %v2852_v46 = vpop.xlane.xlu1 %2851  ;;  %v4605_v57 = vmul.f32 %v4541_v11, %v10486_v31 }
 0x70f   :  { %v3218_v52 = vpop.xlane.xlu2 %3217  ;;  %v2960_v18 = vmul.f32 %v2852_v46, %v6278_v20 }
 0x710   :  { %v3765_v28 = vsub.f32 1.5, %v3764_v19  ;;  %v3338_v43 = vmul.f32 %v3218_v52, %v6278_v20  ;;  %v4103_v52 = vmul.f32 %v3760_v61, %v10169_v49  ;;  %v4668_v61 = vmul.f32 0.044715, %v4604_v42 }
 0x711   :  { %v10500_v56 = vpop.eup %5994  ;;  %v10508_v10 = vsub.f32 %v10255_v0, %v2960_v18  ;;  %v4354_v53 = vpop.f32.mrf.mxu2 }
 0x712   :  { %v3766_v3 = vmul.f32 %v5993_v45, %v3765_v28  ;;  %v3772_v60 = vmul.f32 %v10500_v56, %v10468_v50  ;;  %v10514_v7 = vadd.f32 1e-05, %v3338_v43  ;;  %v10518_v24 = vadd.f32 %v10480_v17, %v4354_v53 }
 0x713   :  { %v3088_v21 = vmul.f32 %v10508_v10, %v10508_v10  ;;  %vm3778_vm11 = vweird.f32 %v10500_v56 }
 0x714   :  { %v3770_v19 = vsel %vm3769_vm10, %v5993_v45, %v3766_v3  ;;  %v3773_v46 = vmul.f32 %v10500_v56, %v3772_v60  ;;  %5996 = vrsqrt.f32 %v10514_v7  ;;  %v6198_v45 = vld [vmem:[%s11666_s0 + $0x180] sm:$0xff]  ;;  %v4542_v53 = vmul.f32 %v10518_v24, %v10518_v24  ;;  %vm10581_vm14 = vmor %vm3777_vm13, %vm3778_vm11 }
 0x715   :  { %v3234_v1 = vsel %vm85_vm0, %v3088_v21, 0.0  ;;  %v4104_v18 = vmul.f32 %v3770_v19, %v10200_v63  ;;  %v10534_v43 = vadd.f32 %v6198_v45, %v2624_v47  ;;  %v2626_v47 = vadd.f32 %v10318_v37, %v2625_v44  ;;  %v2628_v45 = vpop.f32.mrf.mxu1 }
 0x716   :  { %2869 = vadd.xlane.f32.xlu1 %v2868_v6  ;;  %3235 = vadd.xlane.f32.xlu2 %v3234_v1  ;;  %v2855_v28 = vpop.xlane.xlu1 %2854  ;;  %v3774_v49 = vmul.f32 0.5, %v3773_v46  ;;  %vm3787_vm15 = vweird.f32 %v10514_v7 }
 0x717   :  { %v3221_v9 = vpop.xlane.xlu2 %3220  ;;  %v2961_v3 = vmul.f32 %v2855_v28, %v6278_v20  ;;  %v4156_v60 = vpack.c.bf16 %v4104_v18, %v4103_v52  ;;  %v4669_v28 = vmul.f32 0.044715, %v4605_v57  ;;  %v4606_v52 = vmul.f32 %v4542_v53, %v10518_v24  ;;  %v6199_v53 = vld [vmem:[%s11666_s0 + $0x188] sm:$0xff] }
 0x718   :  { %v3339_v63 = vmul.f32 %v3221_v9, %v6278_v20  ;;  %v2871_v18 = vsel %vm85_vm0, %v10534_v43, 0.0  ;;  %v3775_v9 = vsub.f32 1.5, %v3774_v49 }
 0x719   :  { %v10541_v11 = vsub.f32 %v10298_v33, %v2961_v3  ;;  %v4356_v21 = vpop.f32.mrf.mxu2  ;;  %5534 = vmatmul.msk.bf16.gmra.mxu2 %vm85_vm0, %v4156_v60  ;;  %v4732_v60 = vadd.f32 %v4668_v61, %v10483_v54  ;;  %v4733_v49 = vadd.f32 %v4669_v28, %v10486_v31 }
 0x71a   :  { %v5997_v6 = vpop.eup %5996  ;;  %v10545_v19 = vadd.f32 1e-05, %v3339_v63  ;;  %v10548_v1 = vadd.f32 %v10480_v17, %v4356_v21  ;;  %v10564_v63 = vadd.f32 %v6199_v53, %v2626_v47  ;;  %v2629_v47 = vadd.f32 %v10318_v37, %v2628_v45 }
 0x71b   :  { %v3782_v46 = vmul.f32 %v5997_v6, %v10514_v7  ;;  %v3089_v42 = vmul.f32 %v10541_v11, %v10541_v11  ;;  %v4796_v0 = vmul.f32 0.7978846, %v4732_v60  ;;  %v4797_v30 = vmul.f32 0.7978846, %v4733_v49 }
 0x71c   :  { %5998 = vrsqrt.f32 %v10545_v19  ;;  %v4543_v44 = vmul.f32 %v10548_v1, %v10548_v1  ;;  %11921 = vst [vmem:[#allocation4_spill] sm:$0xff] %v10564_v63  ;;  %vm3788_vm12 = vweird.f32 %v5997_v6  ;;  %v2874_v49 = vsel %vm85_vm0, %v10564_v63, 0.0 }
 0x71d   :  { %v3783_v3 = vmul.f32 %v5997_v6, %v3782_v46  ;;  %v3237_v57 = vsel %vm85_vm0, %v3089_v42, 0.0  ;;  %v3776_v42 = vmul.f32 %v10500_v56, %v3775_v9  ;;  %6000 = vtanh.f32 %v4796_v0  ;;  %vm3789_vm1 = vmor %vm3787_vm15, %vm3788_vm12 }
 0x71e   :  { %2872 = vadd.xlane.f32.xlu1 %v2871_v18  ;;  %v4607_v21 = vmul.f32 %v4543_v44, %v10548_v1  ;;  %3238 = vadd.xlane.f32.xlu2 %v3237_v57  ;;  %v4670_v18 = vmul.f32 0.044715, %v4606_v52  ;;  %6002 = vtanh.f32 %v4797_v30  ;;  %v4476_v9 = vmul.f32 0.5, %v10483_v54 }
 0x71f   :  { %v3784_v33 = vmul.f32 0.5, %v3783_v3  ;;  %v2858_v46 = vpop.xlane.xlu2 %2857  ;;  %vm3797_vm3 = vweird.f32 %v10545_v19 }
 0x720   :  { %v4671_v61 = vmul.f32 0.044715, %v4607_v21  ;;  %v2962_v41 = vmul.f32 %v2858_v46, %v6278_v20  ;;  %v4734_v0 = vadd.f32 %v4670_v18, %v10518_v24  ;;  %v2630_v18 = vpop.f32.mrf.mxu1 }
 0x721   :  { %v3785_v53 = vsub.f32 1.5, %v3784_v33  ;;  %v4359_v44 = vpop.f32.mrf.mxu2 }
 0x722   :  { %v10572_v57 = vpop.eup %5998  ;;  %v4735_v28 = vadd.f32 %v4671_v61, %v10548_v1  ;;  %v10577_v52 = vsub.f32 %v10331_v12, %v2962_v41  ;;  %v3780_v41 = vsel %vm10581_vm14, %v10500_v56, %v3776_v42  ;;  %v10595_v3 = vadd.f32 %v10480_v17, %v4359_v44  ;;  %v6200_v44 = vld [vmem:[%s11666_s0 + $0x190] sm:$0xff] }
 0x723   :  { %v3786_v33 = vmul.f32 %v5997_v6, %v3785_v53  ;;  %v3792_v50 = vmul.f32 %v10572_v57, %v10545_v19  ;;  %v6001_v53 = vpop.eup %6000  ;;  %vm3798_vm2 = vweird.f32 %v10572_v57 }
 0x724   :  { %v3090_v7 = vmul.f32 %v10577_v52, %v10577_v52  ;;  %v4799_v61 = vmul.f32 0.7978846, %v4735_v28  ;;  %v4924_v28 = vadd.f32 1.0, %v6001_v53  ;;  %vm10658_vm4 = vmor %vm3797_vm3, %vm3798_vm2 }
 0x725   :  { %v3224_v45 = vpop.xlane.xlu0 %3223  ;;  %v3790_v60 = vsel %vm3789_vm1, %v5997_v6, %v3786_v33  ;;  %v3793_v21 = vmul.f32 %v10572_v57, %v3792_v50  ;;  %v10609_v6 = vadd.f32 %v6200_v44, %v2629_v47  ;;  %v4105_v50 = vmul.f32 %v3780_v41, %v10230_v16 }
 0x726   :  { %v3340_v30 = vmul.f32 %v3224_v45, %v6278_v20  ;;  %v3240_v56 = vsel %vm85_vm0, %v3090_v7, 0.0  ;;  %2875 = vadd.xlane.f32.xlu2 %v2874_v49  ;;  %v4106_v42 = vmul.f32 %v3790_v60, %v10270_v15  ;;  %v6003_v45 = vpop.eup %6002  ;;  %v4544_v15 = vmul.f32 %v10595_v3, %v10595_v3 }
 0x727   :  { %11924 = vst [vmem:[#allocation2_spill] sm:$0xff] %v10609_v6  ;;  %3241 = vadd.xlane.f32.xlu0 %v3240_v56  ;;  %v2861_v33 = vpop.xlane.xlu2 %2860  ;;  %v4477_v7 = vmul.f32 0.5, %v10486_v31  ;;  %v4925_v60 = vadd.f32 1.0, %v6003_v45  ;;  %v3794_v54 = vmul.f32 0.5, %v3793_v21  ;;  %v4988_v16 = vmul.f32 %v4924_v28, %v4476_v9 }
 0x728   :  { %v10602_v46 = vadd.f32 1e-05, %v3340_v30  ;;  %v4798_v30 = vmul.f32 0.7978846, %v4734_v0  ;;  %v2963_v47 = vmul.f32 %v2861_v33, %v6278_v20  ;;  %v4157_v44 = vpack.c.bf16 %v4106_v42, %v4105_v50 }
 0x729   :  { %v4361_v49 = vpop.f32.mrf.mxu2  ;;  %v4989_v0 = vmul.f32 %v4925_v60, %v4477_v7  ;;  %v2631_v31 = vadd.f32 %v10318_v37, %v2630_v18  ;;  %v4608_v53 = vmul.f32 %v4544_v15, %v10595_v3  ;;  %v2877_v9 = vsel %vm85_vm0, %v10609_v6, 0.0  ;;  %v6201_v60 = vld [vmem:[%s11666_s0 + $0x198] sm:$0xff] }
 0x72a   :  { %6004 = vrsqrt.f32 %v10602_v46  ;;  %v10619_v56 = vadd.f32 %v10480_v17, %v4361_v49  ;;  %v10622_v41 = vsub.f32 %v10360_v35, %v2963_v47  ;;  %5535 = vmatmul.msk.bf16.gmra.mxu2 %vm85_vm0, %v4157_v44  ;;  %v3795_v50 = vsub.f32 1.5, %v3794_v54  ;;  %v2633_v49 = vpop.f32.mrf.mxu1 }
 0x72b   :  { %6006 = vtanh.f32 %v4799_v61  ;;  %v5058_v42 = vpack.c.bf16 %v4989_v0, %v4988_v16  ;;  %v10642_v47 = vadd.f32 %v6201_v60, %v2631_v31  ;;  %v4672_v44 = vmul.f32 0.044715, %v4608_v53 }
 0x72c   :  { %6008 = vtanh.f32 %v4798_v30  ;;  %v4545_v21 = vmul.f32 %v10619_v56, %v10619_v56  ;;  %v3091_v61 = vmul.f32 %v10622_v41, %v10622_v41  ;;  %vm3807_vm6 = vweird.f32 %v10602_v46 }
 0x72d   :  { %v10624_v12 = vpop.xlane.xlu0 %3226  ;;  %5195 = vmatmul.bf16.gmra.mxu3 %v5058_v42  ;;  %11925 = vst [vmem:[#allocation5_spill] sm:$0xff] %v10642_v47  ;;  %v3796_v42 = vmul.f32 %v10572_v57, %v3795_v50 }
 0x72e   :  { %v4609_v45 = vmul.f32 %v4545_v21, %v10619_v56  ;;  %2878 = vadd.xlane.f32.xlu2 %v2877_v9  ;;  %v3243_v15 = vsel %vm85_vm0, %v3091_v61, 0.0  ;;  %v2634_v9 = vadd.f32 %v10318_v37, %v2633_v49 }
 0x72f   :  { %3244 = vadd.xlane.f32.xlu0 %v3243_v15  ;;  %v4479_v15 = vmul.f32 0.5, %v10548_v1  ;;  %v3800_v19 = vsel %vm10658_vm4, %v10572_v57, %v3796_v42 }
 0x730   :  { %v6005_v33 = vpop.eup %6004  ;;  %v5181_v28 = vpop.f32.mrf.mxu3  ;;  %v4673_v54 = vmul.f32 0.044715, %v4609_v45  ;;  %v2880_v45 = vsel %vm85_vm0, %v10642_v47, 0.0 }
 0x731   :  { %v3802_v18 = vmul.f32 %v6005_v33, %v10602_v46  ;;  %v5182_v30 = vadd.f32 %v10420_v2, %v5181_v28  ;;  %v6007_v7 = vpop.eup %6006  ;;  %vm3808_vm5 = vweird.f32 %v6005_v33 }
 0x732   :  { %v6009_v21 = vpop.eup %6008  ;;  %v4737_v61 = vadd.f32 %v4673_v54, %v10619_v56  ;;  %v4927_v53 = vadd.f32 1.0, %v6007_v7  ;;  %v4478_v54 = vmul.f32 0.5, %v10518_v24  ;;  %vm3809_vm7 = vmor %vm3807_vm6, %vm3808_vm5 }
 0x733   :  { %v3803_v16 = vmul.f32 %v6005_v33, %v3802_v18  ;;  %v5317_v0 = vadd.f32 %v5182_v30, %v8809_v25  ;;  %v4736_v25 = vadd.f32 %v4672_v44, %v10595_v3  ;;  %v4926_v60 = vadd.f32 1.0, %v6009_v21 }
 0x734   :  { %v4991_v1 = vmul.f32 %v4927_v53, %v4479_v15 }
 0x735   :  { %v3804_v28 = vmul.f32 0.5, %v3803_v16  ;;  %5381 = vst.msk [vmem:[%s11671_s5 + $0x80] sm:$0xff] %vm85_vm0, %v5317_v0  ;;  %v2864_v31 = vpop.xlane.xlu0 %2863  ;;  %v4801_v16 = vmul.f32 0.7978846, %v4737_v61  ;;  %v4800_v21 = vmul.f32 0.7978846, %v4736_v25  ;;  %v4990_v61 = vmul.f32 %v4926_v60, %v4478_v54 }
 0x736   :  { %v2964_v50 = vmul.f32 %v2864_v31, %v6278_v20  ;;  %v6202_v25 = vld [vmem:[%s11666_s0 + $0x1a0] sm:$0xff] }
 0x737   :  { %v3805_v30 = vsub.f32 1.5, %v3804_v28  ;;  %2881 = vadd.xlane.f32.xlu0 %v2880_v45  ;;  %6010 = vtanh.f32 %v4801_v16  ;;  %v10686_v45 = vadd.f32 %v6202_v25, %v2634_v9  ;;  %v2635_v9 = vpop.f32.mrf.mxu1 }
 0x738   :  { %v10667_v7 = vsub.f32 %v10398_v5, %v2964_v50  ;;  %v4364_v49 = vpop.f32.mrf.mxu2  ;;  %v5183_v44 = vpop.f32.mrf.mxu3  ;;  %v4107_v50 = vmul.f32 %v3800_v19, %v10303_v32  ;;  %6012 = vtanh.f32 %v4800_v21 }
 0x739   :  { %v3806_v0 = vmul.f32 %v6005_v33, %v3805_v30  ;;  %v10672_v28 = vadd.f32 %v10480_v17, %v4364_v49  ;;  %v5184_v31 = vadd.f32 %v10420_v2, %v5183_v44  ;;  %11928 = vst [vmem:[#allocation3_spill] sm:$0xff] %v10686_v45  ;;  %v2883_v44 = vsel %vm85_vm0, %v10686_v45, 0.0 }
 0x73a   :  { %v3092_v57 = vmul.f32 %v10667_v7, %v10667_v7 }
 0x73b   :  { %v3810_v42 = vsel %vm3809_vm7, %v6005_v33, %v3806_v0  ;;  %v4546_v24 = vmul.f32 %v10672_v28, %v10672_v28  ;;  %v5318_v46 = vadd.f32 %v5184_v31, %v8818_v55  ;;  %v5059_v33 = vpack.c.bf16 %v4991_v1, %v4990_v61 }
 0x73c   :  { %v3246_v18 = vsel %vm85_vm0, %v3092_v57, 0.0  ;;  %v4108_v53 = vmul.f32 %v3810_v42, %v10344_v14  ;;  %v2636_v57 = vadd.f32 %v10318_v37, %v2635_v9 }
 0x73d   :  { %3247 = vadd.xlane.f32.xlu1 %v3246_v18  ;;  %v2867_v30 = vpop.xlane.xlu0 %2866  ;;  %v4610_v15 = vmul.f32 %v4546_v24, %v10672_v28  ;;  %5382 = vst.msk [vmem:[%s11671_s5 + $0x88] sm:$0xff] %vm85_vm0, %v5318_v46  ;;  %5200 = vmatmul.bf16.gmra.mxu3 %v5059_v33  ;;  %v6011_v54 = vpop.eup %6010 }
 0x73e   :  { %v2965_v55 = vmul.f32 %v2867_v30, %v6278_v20  ;;  %v4158_v32 = vpack.c.bf16 %v4108_v53, %v4107_v50  ;;  %v6013_v31 = vpop.eup %6012  ;;  %v4929_v50 = vadd.f32 1.0, %v6011_v54  ;;  %v4481_v53 = vmul.f32 0.5, %v10619_v56 }
 0x73f   :  { %v4674_v16 = vmul.f32 0.044715, %v4610_v15  ;;  %2884 = vadd.xlane.f32.xlu0 %v2883_v44  ;;  %v4928_v25 = vadd.f32 1.0, %v6013_v31  ;;  %v2638_v30 = vpop.f32.mrf.mxu1 }
 0x740   :  { %v10695_v14 = vsub.f32 %v10406_v34, %v2965_v55  ;;  %v4366_v60 = vpop.f32.mrf.mxu2  ;;  %5536 = vmatmul.msk.bf16.gmra.mxu2 %vm85_vm0, %v4158_v32  ;;  %v5186_v49 = vpop.f32.mrf.mxu3  ;;  %v4480_v32 = vmul.f32 0.5, %v10595_v3  ;;  %v2639_v56 = vadd.f32 %v10318_v37, %v2638_v30  ;;  %v6204_v3 = vld [vmem:[%s11666_s0 + $0x1b0] sm:$0xff] }
 0x741   :  { %v4367_v19 = vadd.f32 %v10480_v17, %v4366_v60  ;;  %v5187_v0 = vadd.f32 %v10420_v2, %v5186_v49  ;;  %v4738_v46 = vadd.f32 %v4674_v16, %v10672_v28  ;;  %v4993_v60 = vmul.f32 %v4929_v50, %v4481_v53 }
 0x742   :  { %v3093_v1 = vmul.f32 %v10695_v14, %v10695_v14  ;;  %v4992_v44 = vmul.f32 %v4928_v25, %v4480_v32 }
 0x743   :  { %v4547_v21 = vmul.f32 %v4367_v19, %v4367_v19  ;;  %v5319_v42 = vadd.f32 %v5187_v0, %v8827_v48  ;;  %v6203_v48 = vld [vmem:[%s11666_s0 + $0x1a8] sm:$0xff]  ;;  %v4802_v9 = vmul.f32 0.7978846, %v4738_v46  ;;  %v4483_v50 = vmul.f32 0.5, %v4367_v19 }
 0x744   :  { %v3249_v24 = vsel %vm85_vm0, %v3093_v1, 0.0  ;;  %v10716_v33 = vadd.f32 %v6203_v48, %v2636_v57  ;;  %v5060_v1 = vpack.c.bf16 %v4993_v60, %v4992_v44 }
 0x745   :  { %v4611_v61 = vmul.f32 %v4547_v21, %v4367_v19  ;;  %3250 = vadd.xlane.f32.xlu1 %v3249_v24  ;;  %5383 = vst.msk [vmem:[%s11671_s5 + $0x90] sm:$0xff] %vm85_vm0, %v5319_v42  ;;  %v10731_v21 = vadd.f32 %v6204_v3, %v2639_v56 }
 0x746   :  { %v2886_v0 = vsel %vm85_vm0, %v10716_v33, 0.0 }
 0x747   :  { %v4675_v18 = vmul.f32 0.044715, %v4611_v61  ;;  %v2889_v42 = vsel %vm85_vm0, %v10731_v21, 0.0 }
 0x748   :  { %v5188_v55 = vpop.f32.mrf.mxu3 }
 0x749   :  { %v4739_v15 = vadd.f32 %v4675_v18, %v4367_v19  ;;  %v5189_v49 = vadd.f32 %v10420_v2, %v5188_v55  ;;  %v4482_v18 = vmul.f32 0.5, %v10672_v28 }
 0x74b   :  { %v4803_v54 = vmul.f32 0.7978846, %v4739_v15  ;;  %v5320_v16 = vadd.f32 %v5189_v49, %v11868_v36  ;;  %v11929_v15 = vld [vmem:[#allocation27_spill] sm:$0xff] }
 0x74d   :  { %2887 = vadd.xlane.f32.xlu1 %v2886_v0  ;;  %6014 = vtanh.f32 %v4803_v54  ;;  %5384 = vst.msk [vmem:[%s11671_s5 + $0x98] sm:$0xff] %vm85_vm0, %v5320_v16  ;;  %5205 = vmatmul.bf16.gmra.mxu3 %v5060_v1 }
 0x74e   :  { %6016 = vtanh.f32 %v4802_v9 }
 0x752   :  { %v5191_v36 = vpop.f32.mrf.mxu3 }
 0x753   :  { %v6015_v37 = vpop.eup %6014  ;;  %v5192_v31 = vadd.f32 %v10420_v2, %v5191_v36 }
 0x754   :  { %v6017_v57 = vpop.eup %6016  ;;  %v4931_v61 = vadd.f32 1.0, %v6015_v37 }
 0x755   :  { %v5321_v24 = vadd.f32 %v5192_v31, %v11874_v62  ;;  %2890 = vadd.xlane.f32.xlu1 %v2889_v42  ;;  %v4930_v46 = vadd.f32 1.0, %v6017_v57  ;;  %v3341_v62 = vmul.f32 %v10624_v12, %v6278_v20 }
 0x756   :  { %v4995_v53 = vmul.f32 %v4931_v61, %v4483_v50 }
 0x757   :  { %5385 = vst.msk [vmem:[%s11671_s5 + $0xa0] sm:$0xff] %vm85_vm0, %v5321_v24  ;;  %v4994_v30 = vmul.f32 %v4930_v46, %v4482_v18  ;;  %v3405_v19 = vadd.f32 1e-05, %v3341_v62 }
 0x759   :  { %v5061_v32 = vpack.c.bf16 %v4995_v53, %v4994_v30  ;;  %6018 = vrsqrt.f32 %v3405_v19  ;;  %vm3817_vm9 = vweird.f32 %v3405_v19  ;;  %v2640_v30 = vpop.f32.mrf.mxu1 }
 0x75a   :  { %v5193_v25 = vpop.f32.mrf.mxu3 }
 0x75b   :  { %v5194_v48 = vadd.f32 %v10420_v2, %v5193_v25 }
 0x75d   :  { %v5322_v55 = vadd.f32 %v5194_v48, %v11929_v15  ;;  %5210 = vmatmul.bf16.gmra.mxu3 %v5061_v32 }
 0x75f   :  { %5386 = vst.msk [vmem:[%s11671_s5 + $0xa8] sm:$0xff] %vm85_vm0, %v5322_v55  ;;  %v6019_v28 = vpop.eup %6018 }
 0x760   :  { %v3812_v60 = vmul.f32 %v6019_v28, %v3405_v19  ;;  %vm3818_vm8 = vweird.f32 %v6019_v28 }
 0x761   :  { %vm10756_vm10 = vmor %vm3817_vm9, %vm3818_vm8 }
 0x762   :  { %v3813_v49 = vmul.f32 %v6019_v28, %v3812_v60 }
 0x764   :  { %v3814_v54 = vmul.f32 0.5, %v3813_v49 }
 0x766   :  { %v3815_v1 = vsub.f32 1.5, %v3814_v54 }
 0x768   :  { %v3816_v37 = vmul.f32 %v6019_v28, %v3815_v1 }
 0x76a   :  { %v3820_v18 = vsel %vm10756_vm10, %v6019_v28, %v3816_v37 }
 0x779   :  { %v3230_v9 = vpop.xlane.xlu1 %3229 }
 0x77a   :  { %v3342_v2 = vmul.f32 %v3230_v9, %v6278_v20 }
 0x77c   :  { %v3406_v44 = vadd.f32 1e-05, %v3342_v2  ;;  %v4109_v2 = vmul.f32 %v3820_v18, %v10376_v27  ;;  %v2643_v27 = vpop.f32.mrf.mxu1  ;;  %v10798_v18 = vld [vmem:[%s11670_s4] ss:$0 sm:$0xff] }
 0x77e   :  { %6020 = vrsqrt.f32 %v3406_v44  ;;  %vm3827_vm12 = vweird.f32 %v3406_v44 }
 0x781   :  { %v3233_v56 = vpop.xlane.xlu1 %3232 }
 0x782   :  { %v3343_v16 = vmul.f32 %v3233_v56, %v6278_v20 }
 0x784   :  { %v6021_v0 = vpop.eup %6020  ;;  %v10752_v3 = vadd.f32 1e-05, %v3343_v16 }
 0x785   :  { %v3822_v36 = vmul.f32 %v6021_v0, %v3406_v44  ;;  %vm3828_vm11 = vweird.f32 %v6021_v0 }
 0x786   :  { %6022 = vrsqrt.f32 %v10752_v3  ;;  %vm3829_vm13 = vmor %vm3827_vm12, %vm3828_vm11  ;;  %vm3837_vm15 = vweird.f32 %v10752_v3 }
 0x787   :  { %v3823_v12 = vmul.f32 %v6021_v0, %v3822_v36 }
 0x789   :  { %v3824_v31 = vmul.f32 0.5, %v3823_v12  ;;  %v2870_v57 = vpop.xlane.xlu1 %2869  ;;  %v3236_v50 = vpop.xlane.xlu2 %3235 }
 0x78a   :  { %v2966_v42 = vmul.f32 %v2870_v57, %v6278_v20  ;;  %v3344_v53 = vmul.f32 %v3236_v50, %v6278_v20 }
 0x78b   :  { %v3825_v61 = vsub.f32 1.5, %v3824_v31 }
 0x78c   :  { %v10760_v46 = vpop.eup %6022  ;;  %v10766_v25 = vsub.f32 %v10491_v8, %v2966_v42  ;;  %v4369_v48 = vpop.f32.mrf.mxu2  ;;  %v3408_v62 = vadd.f32 1e-05, %v3344_v53  ;;  %v2641_v53 = vadd.f32 %v10798_v18, %v2640_v30  ;;  %v6206_v30 = vld [vmem:[%s11666_s0 + $0x1b8] sm:$0xff] }
 0x78d   :  { %v3826_v15 = vmul.f32 %v6021_v0, %v3825_v61  ;;  %v3832_v55 = vmul.f32 %v10760_v46, %v10752_v3  ;;  %v10771_v32 = vadd.f32 %v10480_v17, %v4369_v48  ;;  %vm3838_vm14 = vweird.f32 %v10760_v46 }
 0x78e   :  { %v3094_v19 = vmul.f32 %v10766_v25, %v10766_v25  ;;  %6024 = vrsqrt.f32 %v3408_v62  ;;  %vm10815_vm1 = vmor %vm3837_vm15, %vm3838_vm14  ;;  %vm3847_vm3 = vweird.f32 %v3408_v62 }
 0x78f   :  { %v3830_v28 = vsel %vm3829_vm13, %v6021_v0, %v3826_v15  ;;  %v3833_v60 = vmul.f32 %v10760_v46, %v3832_v55  ;;  %v4548_v44 = vmul.f32 %v10771_v32, %v10771_v32 }
 0x790   :  { %v3252_v9 = vsel %vm85_vm0, %v3094_v19, 0.0  ;;  %v4110_v49 = vmul.f32 %v3830_v28, %v10452_v51 }
 0x791   :  { %3253 = vadd.xlane.f32.xlu2 %v3252_v9  ;;  %v2873_v54 = vpop.xlane.xlu1 %2872  ;;  %v3834_v56 = vmul.f32 0.5, %v3833_v60  ;;  %v3239_v36 = vpop.xlane.xlu2 %3238  ;;  %v4612_v51 = vmul.f32 %v4548_v44, %v10771_v32 }
 0x792   :  { %v2967_v16 = vmul.f32 %v2873_v54, %v6278_v20  ;;  %v4159_v1 = vpack.c.bf16 %v4110_v49, %v4109_v2  ;;  %v3345_v0 = vmul.f32 %v3239_v36, %v6278_v20  ;;  %v10811_v49 = vadd.f32 %v6206_v30, %v2641_v53 }
 0x793   :  { %v3835_v42 = vsub.f32 1.5, %v3834_v56  ;;  %v4676_v19 = vmul.f32 0.044715, %v4612_v51 }
 0x794   :  { %v10784_v12 = vsub.f32 %v10534_v43, %v2967_v16  ;;  %v4371_v37 = vpop.f32.mrf.mxu2  ;;  %5537 = vmatmul.msk.bf16.gmra.mxu2 %vm85_vm0, %v4159_v1  ;;  %v6025_v57 = vpop.eup %6024  ;;  %v10791_v24 = vadd.f32 1e-05, %v3345_v0 }
 0x795   :  { %v10789_v31 = vadd.f32 %v10480_v17, %v4371_v37  ;;  %v3842_v50 = vmul.f32 %v6025_v57, %v3408_v62  ;;  %v3836_v28 = vmul.f32 %v10760_v46, %v3835_v42  ;;  %vm3848_vm2 = vweird.f32 %v6025_v57 }
 0x796   :  { %v3095_v61 = vmul.f32 %v10784_v12, %v10784_v12  ;;  %6026 = vrsqrt.f32 %v10791_v24  ;;  %v4740_v1 = vadd.f32 %v4676_v19, %v10771_v32  ;;  %v2644_v37 = vadd.f32 %v10798_v18, %v2643_v27  ;;  %vm3849_vm4 = vmor %vm3847_vm3, %vm3848_vm2 }
 0x797   :  { %v4549_v48 = vmul.f32 %v10789_v31, %v10789_v31  ;;  %v3843_v55 = vmul.f32 %v6025_v57, %v3842_v50  ;;  %v3840_v3 = vsel %vm10815_vm1, %v10760_v46, %v3836_v28  ;;  %v2892_v62 = vsel %vm85_vm0, %v10811_v49, 0.0 }
 0x798   :  { %v3255_v15 = vsel %vm85_vm0, %v3095_v61, 0.0  ;;  %v2645_v61 = vpop.f32.mrf.mxu1  ;;  %v4804_v19 = vmul.f32 0.7978846, %v4740_v1  ;;  %vm3857_vm6 = vweird.f32 %v10791_v24 }
 0x799   :  { %3256 = vadd.xlane.f32.xlu2 %v3255_v15  ;;  %v3844_v60 = vmul.f32 0.5, %v3843_v55  ;;  %v4613_v9 = vmul.f32 %v4549_v48, %v10789_v31  ;;  %v2876_v2 = vpop.xlane.xlu2 %2875  ;;  %v2646_v1 = vadd.f32 %v10798_v18, %v2645_v61 }
 0x79a   :  { %v2968_v44 = vmul.f32 %v2876_v2, %v6278_v20  ;;  %v3242_v54 = vpop.xlane.xlu0 %3241  ;;  %v4111_v2 = vmul.f32 %v3840_v3, %v10465_v23 }
 0x79b   :  { %v3845_v16 = vsub.f32 1.5, %v3844_v60  ;;  %v3346_v36 = vmul.f32 %v3242_v54, %v6278_v20  ;;  %v4677_v48 = vmul.f32 0.044715, %v4613_v9 }
 0x79c   :  { %v10821_v0 = vpop.eup %6026  ;;  %v10828_v51 = vsub.f32 %v10564_v63, %v2968_v44  ;;  %v4374_v42 = vpop.f32.mrf.mxu2  ;;  %v6207_v44 = vld [vmem:[%s11666_s0 + $0x1c0] sm:$0xff] }
 0x79d   :  { %v3846_v50 = vmul.f32 %v6025_v57, %v3845_v16  ;;  %v3852_v53 = vmul.f32 %v10821_v0, %v10791_v24  ;;  %v10832_v15 = vadd.f32 1e-05, %v3346_v36  ;;  %v10835_v27 = vadd.f32 %v10480_v17, %v4374_v42 }
 0x79e   :  { %v3096_v46 = vmul.f32 %v10828_v51, %v10828_v51  ;;  %v4741_v56 = vadd.f32 %v4677_v48, %v10789_v31  ;;  %vm3858_vm5 = vweird.f32 %v10821_v0 }
 0x79f   :  { %v3850_v55 = vsel %vm3849_vm4, %v6025_v57, %v3846_v50  ;;  %v3853_v28 = vmul.f32 %v10821_v0, %v3852_v53  ;;  %6028 = vrsqrt.f32 %v10832_v15  ;;  %v4550_v60 = vmul.f32 %v10835_v27, %v10835_v27  ;;  %vm10889_vm7 = vmor %vm3857_vm6, %vm3858_vm5 }
 0x7a0   :  { %v3258_v9 = vsel %vm85_vm0, %v3096_v46, 0.0  ;;  %v4112_v30 = vmul.f32 %v3850_v55, %v10508_v10  ;;  %v10851_v57 = vadd.f32 %v6207_v44, %v2644_v37  ;;  %6030 = vtanh.f32 %v4804_v19  ;;  %v6208_v55 = vld [vmem:[%s11666_s0 + $0x1c8] sm:$0xff] }
 0x7a1   :  { %2893 = vadd.xlane.f32.xlu2 %v2892_v62  ;;  %v3854_v54 = vmul.f32 0.5, %v3853_v28  ;;  %3259 = vadd.xlane.f32.xlu0 %v3258_v9  ;;  %v2879_v16 = vpop.xlane.xlu2 %2878  ;;  %v4614_v36 = vmul.f32 %v4550_v60, %v10835_v27  ;;  %v4805_v62 = vmul.f32 0.7978846, %v4741_v56  ;;  %v10868_v19 = vadd.f32 %v6208_v55, %v2646_v1 }
 0x7a2   :  { %v2969_v42 = vmul.f32 %v2879_v16, %v6278_v20  ;;  %v4160_v23 = vpack.c.bf16 %v4112_v30, %v4111_v2  ;;  %v3245_v10 = vpop.xlane.xlu0 %3244  ;;  %v2895_v9 = vsel %vm85_vm0, %v10851_v57, 0.0  ;;  %v2648_v2 = vpop.f32.mrf.mxu1  ;;  %vm3867_vm9 = vweird.f32 %v10832_v15 }
 0x7a3   :  { %v4678_v3 = vmul.f32 0.044715, %v4614_v36  ;;  %v3347_v37 = vmul.f32 %v3245_v10, %v6278_v20  ;;  %v3855_v46 = vsub.f32 1.5, %v3854_v54  ;;  %6032 = vtanh.f32 %v4805_v62 }
 0x7a4   :  { %v10858_v50 = vsub.f32 %v10609_v6, %v2969_v42  ;;  %v4376_v53 = vpop.f32.mrf.mxu2  ;;  %5538 = vmatmul.msk.bf16.gmra.mxu2 %vm85_vm0, %v4160_v23  ;;  %v2649_v23 = vadd.f32 %v10798_v18, %v2648_v2  ;;  %v2898_v62 = vsel %vm85_vm0, %v10868_v19, 0.0 }
 0x7a5   :  { %v6029_v48 = vpop.eup %6028  ;;  %v10863_v61 = vadd.f32 %v10480_v17, %v4376_v53  ;;  %v10871_v60 = vadd.f32 1e-05, %v3347_v37  ;;  %v4742_v30 = vadd.f32 %v4678_v3, %v10835_v27  ;;  %v3856_v1 = vmul.f32 %v10821_v0, %v3855_v46 }
 0x7a6   :  { %v3862_v28 = vmul.f32 %v6029_v48, %v10832_v15  ;;  %v3097_v54 = vmul.f32 %v10858_v50, %v10858_v50  ;;  %v6031_v16 = vpop.eup %6030  ;;  %vm3868_vm8 = vweird.f32 %v6029_v48 }
 0x7a7   :  { %v4551_v44 = vmul.f32 %v10863_v61, %v10863_v61  ;;  %6034 = vrsqrt.f32 %v10871_v60  ;;  %v4806_v3 = vmul.f32 0.7978846, %v4742_v30  ;;  %v3860_v24 = vsel %vm10889_vm7, %v10821_v0, %v3856_v1  ;;  %vm3869_vm10 = vmor %vm3867_vm9, %vm3868_vm8 }
 0x7a8   :  { %v3863_v56 = vmul.f32 %v6029_v48, %v3862_v28  ;;  %v3261_v42 = vsel %vm85_vm0, %v3097_v54, 0.0  ;;  %v4484_v30 = vmul.f32 0.5, %v10771_v32  ;;  %vm3877_vm12 = vweird.f32 %v10871_v60 }
 0x7a9   :  { %2896 = vadd.xlane.f32.xlu2 %v2895_v9  ;;  %v4615_v36 = vmul.f32 %v4551_v44, %v10863_v61  ;;  %3262 = vadd.xlane.f32.xlu0 %v3261_v42  ;;  %v4932_v9 = vadd.f32 1.0, %v6031_v16  ;;  %v6033_v2 = vpop.eup %6032  ;;  %v4485_v44 = vmul.f32 0.5, %v10789_v31  ;;  %6036 = vtanh.f32 %v4806_v3 }
 0x7aa   :  { %v3864_v10 = vmul.f32 0.5, %v3863_v56  ;;  %v2882_v53 = vpop.xlane.xlu0 %2881  ;;  %v4113_v3 = vmul.f32 %v3860_v24, %v10541_v11 }
 0x7ab   :  { %v4679_v37 = vmul.f32 0.044715, %v4615_v36  ;;  %v2970_v28 = vmul.f32 %v2882_v53, %v6278_v20  ;;  %v4933_v53 = vadd.f32 1.0, %v6033_v2  ;;  %v4996_v1 = vmul.f32 %v4932_v9, %v4484_v30  ;;  %v10926_v30 = vld [vmem:[%s11670_s4 + $0x1] ss:$0 sm:$0xff] }
 0x7ac   :  { %v3865_v55 = vsub.f32 1.5, %v3864_v10 }
 0x7ad   :  { %v10900_v54 = vpop.eup %6034  ;;  %v4743_v36 = vadd.f32 %v4679_v37, %v10863_v61  ;;  %v10904_v10 = vsub.f32 %v10642_v47, %v2970_v28  ;;  %v4379_v16 = vpop.f32.mrf.mxu2  ;;  %v4997_v37 = vmul.f32 %v4933_v53, %v4485_v44  ;;  %v6210_v53 = vld [vmem:[%s11666_s0 + $0x1d0] sm:$0xff] }
 0x7ae   :  { %v3866_v56 = vmul.f32 %v6029_v48, %v3865_v55  ;;  %v3872_v0 = vmul.f32 %v10900_v54, %v10871_v60  ;;  %v10911_v31 = vadd.f32 %v10480_v17, %v4379_v16  ;;  %vm3878_vm11 = vweird.f32 %v10900_v54 }
 0x7af   :  { %v3098_v46 = vmul.f32 %v10904_v10, %v10904_v10  ;;  %v5062_v16 = vpack.c.bf16 %v4997_v37, %v4996_v1  ;;  %v4807_v9 = vmul.f32 0.7978846, %v4743_v36  ;;  %v6037_v36 = vpop.eup %6036  ;;  %vm10988_vm14 = vmor %vm3877_vm12, %vm3878_vm11 }
 0x7b0   :  { %v3248_v42 = vpop.xlane.xlu1 %3247  ;;  %v3870_v15 = vsel %vm3869_vm10, %v6029_v48, %v3866_v56  ;;  %v4552_v28 = vmul.f32 %v10911_v31, %v10911_v31  ;;  %v5196_v47 = vpop.f32.mrf.mxu3 }
 0x7b1   :  { %v3348_v32 = vmul.f32 %v3248_v42, %v6278_v20  ;;  %v4114_v2 = vmul.f32 %v3870_v15, %v10577_v52  ;;  %v3873_v42 = vmul.f32 %v10900_v54, %v3872_v0  ;;  %2899 = vadd.xlane.f32.xlu0 %v2898_v62  ;;  %v3264_v48 = vsel %vm85_vm0, %v3098_v46, 0.0  ;;  %v2650_v52 = vpop.f32.mrf.mxu1  ;;  %5215 = vmatmul.bf16.gmra.mxu3 %v5062_v16 }
 0x7b2   :  { %v5197_v44 = vadd.f32 %v10926_v30, %v5196_v47  ;;  %3265 = vadd.xlane.f32.xlu1 %v3264_v48  ;;  %v2885_v11 = vpop.xlane.xlu0 %2884  ;;  %v4616_v24 = vmul.f32 %v4552_v28, %v10911_v31  ;;  %v10935_v0 = vadd.f32 %v6210_v53, %v2649_v23  ;;  %v2651_v28 = vadd.f32 %v10798_v18, %v2650_v52 }
 0x7b3   :  { %v10915_v55 = vadd.f32 1e-05, %v3348_v32  ;;  %v2971_v62 = vmul.f32 %v2885_v11, %v6278_v20  ;;  %v4161_v56 = vpack.c.bf16 %v4114_v2, %v4113_v3  ;;  %v3874_v32 = vmul.f32 0.5, %v3873_v42 }
 0x7b4   :  { %v5323_v47 = vadd.f32 %v5197_v44, %v9256_v13  ;;  %v4680_v15 = vmul.f32 0.044715, %v4616_v24  ;;  %v2901_v16 = vsel %vm85_vm0, %v10935_v0, 0.0  ;;  %v4934_v52 = vadd.f32 1.0, %v6037_v36  ;;  %v6211_v24 = vld [vmem:[%s11666_s0 + $0x1d8] sm:$0xff] }
 0x7b5   :  { %6038 = vrsqrt.f32 %v10915_v55  ;;  %v10941_v37 = vsub.f32 %v10686_v45, %v2971_v62  ;;  %v4381_v46 = vpop.f32.mrf.mxu2  ;;  %5539 = vmatmul.msk.bf16.gmra.mxu2 %vm85_vm0, %v4161_v56  ;;  %v10967_v62 = vadd.f32 %v6211_v24, %v2651_v28  ;;  %vm3887_vm15 = vweird.f32 %v10915_v55 }
 0x7b6   :  { %6040 = vtanh.f32 %v4807_v9  ;;  %5387 = vst.msk [vmem:[%s11671_s5 + $0xb0] sm:$0xff] %vm85_vm0, %v5323_v47  ;;  %v10950_v23 = vadd.f32 %v10480_v17, %v4381_v46  ;;  %v4744_v2 = vadd.f32 %v4680_v15, %v10911_v31  ;;  %v3875_v9 = vsub.f32 1.5, %v3874_v32 }
 0x7b7   :  { %v3099_v13 = vmul.f32 %v10941_v37, %v10941_v37  ;;  %v4486_v15 = vmul.f32 0.5, %v10835_v27  ;;  %v4487_v46 = vmul.f32 0.5, %v10863_v61 }
 0x7b8   :  { %v10938_v1 = vpop.xlane.xlu1 %3250  ;;  %v4553_v42 = vmul.f32 %v10950_v23, %v10950_v23  ;;  %v5198_v17 = vpop.f32.mrf.mxu3  ;;  %v4808_v36 = vmul.f32 0.7978846, %v4744_v2  ;;  %v3876_v24 = vmul.f32 %v10900_v54, %v3875_v9 }
 0x7b9   :  { %2902 = vadd.xlane.f32.xlu0 %v2901_v16  ;;  %v3267_v11 = vsel %vm85_vm0, %v3099_v13, 0.0  ;;  %v5199_v56 = vadd.f32 %v10926_v30, %v5198_v17  ;;  %v2653_v47 = vpop.f32.mrf.mxu1  ;;  %v11936_v16 = vld [vmem:[#allocation15_spill] sm:$0xff] }
 0x7ba   :  { %v4617_v53 = vmul.f32 %v4553_v42, %v10950_v23  ;;  %3268 = vadd.xlane.f32.xlu1 %v3267_v11  ;;  %v4998_v42 = vmul.f32 %v4934_v52, %v4486_v15  ;;  %v2654_v63 = vadd.f32 %v10798_v18, %v2653_v47  ;;  %6042 = vtanh.f32 %v4808_v36  ;;  %v11005_v47 = vld [vmem:[%s11668_s2 + $0x1] ss:$0 sm:$0xff] }
 0x7bb   :  { %v10954_v3 = vpop.eup %6038  ;;  %v5324_v45 = vadd.f32 %v5199_v56, %v11936_v16  ;;  %v3880_v60 = vsel %vm10988_vm14, %v10900_v54, %v3876_v24  ;;  %v6213_v54 = vld [vmem:[%s11666_s0 + $0x1e0] sm:$0xff]  ;;  %v11939_v16 = vld [vmem:[#allocation16_spill] sm:$0xff] }
 0x7bc   :  { %v6041_v48 = vpop.eup %6040  ;;  %v3882_v44 = vmul.f32 %v10954_v3, %v10915_v55  ;;  %v4681_v28 = vmul.f32 0.044715, %v4617_v53  ;;  %vm3888_vm13 = vweird.f32 %v10954_v3  ;;  %v11016_v55 = vadd.f32 %v6213_v54, %v2654_v63 }
 0x7bd   :  { %v4935_v13 = vadd.f32 1.0, %v6041_v48  ;;  %5388 = vst.msk [vmem:[%s11671_s5 + $0xb8] sm:$0xff] %vm85_vm0, %v5324_v45  ;;  %vm3889_vm1 = vmor %vm3887_vm15, %vm3888_vm13 }
 0x7be   :  { %v3883_v32 = vmul.f32 %v10954_v3, %v3882_v44  ;;  %v4745_v27 = vadd.f32 %v4681_v28, %v10950_v23 }
 0x7bf   :  { %v4999_v11 = vmul.f32 %v4935_v13, %v4487_v46 }
 0x7c0   :  { %v3884_v17 = vmul.f32 0.5, %v3883_v32  ;;  %v2888_v6 = vpop.xlane.xlu1 %2887  ;;  %v4809_v52 = vmul.f32 0.7978846, %v4745_v27  ;;  %v5201_v53 = vpop.f32.mrf.mxu3 }
 0x7c1   :  { %v2972_v61 = vmul.f32 %v2888_v6, %v6278_v20  ;;  %v5063_v48 = vpack.c.bf16 %v4999_v11, %v4998_v42  ;;  %v2904_v6 = vsel %vm85_vm0, %v10967_v62, 0.0  ;;  %v5202_v15 = vadd.f32 %v10926_v30, %v5201_v53  ;;  %v6043_v63 = vpop.eup %6042 }
 0x7c2   :  { %v3885_v2 = vsub.f32 1.5, %v3884_v17  ;;  %2905 = vadd.xlane.f32.xlu1 %v2904_v6  ;;  %6044 = vtanh.f32 %v4809_v52  ;;  %v4115_v17 = vmul.f32 %v3880_v60, %v10622_v41  ;;  %v4489_v6 = vmul.f32 0.5, %v10950_v23  ;;  %v11940_v23 = vld [vmem:[#allocation19_spill] sm:$0xff] }
 0x7c3   :  { %v10993_v44 = vsub.f32 %v10716_v33, %v2972_v61  ;;  %v4384_v45 = vpop.f32.mrf.mxu2  ;;  %5220 = vmatmul.bf16.gmra.mxu3 %v5063_v48  ;;  %v5325_v28 = vadd.f32 %v5202_v15, %v11939_v16  ;;  %v2655_v61 = vpop.f32.mrf.mxu1  ;;  %v4936_v53 = vadd.f32 1.0, %v6043_v63 }
 0x7c4   :  { %v3886_v56 = vmul.f32 %v10954_v3, %v3885_v2  ;;  %v11008_v32 = vadd.f32 %v11005_v47, %v4384_v45  ;;  %v2907_v45 = vsel %vm85_vm0, %v11016_v55, 0.0 }
 0x7c5   :  { %v3100_v46 = vmul.f32 %v10993_v44, %v10993_v44  ;;  %5389 = vst.msk [vmem:[%s11671_s5 + $0xc0] sm:$0xff] %vm85_vm0, %v5325_v28  ;;  %v2656_v28 = vadd.f32 %v10798_v18, %v2655_v61 }
 0x7c6   :  { %v3890_v13 = vsel %vm3889_vm1, %v10954_v3, %v3886_v56  ;;  %v4554_v36 = vmul.f32 %v11008_v32, %v11008_v32 }
 0x7c7   :  { %v3270_v24 = vsel %vm85_vm0, %v3100_v46, 0.0  ;;  %v4116_v42 = vmul.f32 %v3890_v13, %v10667_v7 }
 0x7c8   :  { %v4618_v11 = vmul.f32 %v4554_v36, %v11008_v32  ;;  %3271 = vadd.xlane.f32.xlu2 %v3270_v24  ;;  %v2891_v27 = vpop.xlane.xlu1 %2890  ;;  %v6045_v9 = vpop.eup %6044  ;;  %v4488_v36 = vmul.f32 0.5, %v10911_v31  ;;  %v6214_v31 = vld [vmem:[%s11666_s0 + $0x1e8] sm:$0xff] }
 0x7c9   :  { %v2973_v3 = vmul.f32 %v2891_v27, %v6278_v20  ;;  %v4162_v2 = vpack.c.bf16 %v4116_v42, %v4115_v17  ;;  %v5203_v60 = vpop.f32.mrf.mxu3  ;;  %v4937_v15 = vadd.f32 1.0, %v6045_v9  ;;  %v11054_v61 = vadd.f32 %v6214_v31, %v2656_v28 }
 0x7ca   :  { %v4682_v48 = vmul.f32 0.044715, %v4618_v11  ;;  %v5204_v46 = vadd.f32 %v10926_v30, %v5203_v60  ;;  %2908 = vadd.xlane.f32.xlu1 %v2907_v45  ;;  %v5000_v27 = vmul.f32 %v4936_v53, %v4488_v36 }
 0x7cb   :  { %v11032_v41 = vsub.f32 %v10731_v21, %v2973_v3  ;;  %v4386_v7 = vpop.f32.mrf.mxu2  ;;  %5540 = vmatmul.msk.bf16.gmra.mxu2 %vm85_vm0, %v4162_v2  ;;  %v5001_v16 = vmul.f32 %v4937_v15, %v4489_v6  ;;  %v2658_v2 = vpop.f32.mrf.mxu1  ;;  %v2910_v53 = vsel %vm85_vm0, %v11054_v61, 0.0 }
 0x7cc   :  { %v4746_v52 = vadd.f32 %v4682_v48, %v11008_v32  ;;  %v4387_v56 = vadd.f32 %v11005_v47, %v4386_v7  ;;  %v5326_v24 = vadd.f32 %v5204_v46, %v11940_v23  ;;  %v2659_v45 = vadd.f32 %v10798_v18, %v2658_v2  ;;  %v6215_v46 = vld [vmem:[%s11666_s0 + $0x1f0] sm:$0xff] }
 0x7cd   :  { %v3101_v54 = vmul.f32 %v11032_v41, %v11032_v41  ;;  %v5064_v3 = vpack.c.bf16 %v5001_v16, %v5000_v27 }
 0x7ce   :  { %v4555_v13 = vmul.f32 %v4387_v56, %v4387_v56  ;;  %v4810_v42 = vmul.f32 0.7978846, %v4746_v52  ;;  %5390 = vst.msk [vmem:[%s11671_s5 + $0xc8] sm:$0xff] %vm85_vm0, %v5326_v24  ;;  %v11941_v52 = vld [vmem:[#allocation17_spill] sm:$0xff]  ;;  %v11942_v24 = vld [vmem:[#allocation18_spill] sm:$0xff] }
 0x7cf   :  { %v3273_v17 = vsel %vm85_vm0, %v3101_v54, 0.0  ;;  %v11068_v54 = vadd.f32 %v6215_v46, %v2659_v45  ;;  %v3349_v45 = vmul.f32 %v10938_v1, %v6278_v20 }
 0x7d0   :  { %v4619_v11 = vmul.f32 %v4555_v13, %v4387_v56  ;;  %3274 = vadd.xlane.f32.xlu2 %v3273_v17  ;;  %6046 = vtanh.f32 %v4810_v42  ;;  %v4490_v42 = vmul.f32 0.5, %v11008_v32 }
 0x7d1   :  { %v5206_v9 = vpop.f32.mrf.mxu3  ;;  %v2913_v23 = vsel %vm85_vm0, %v11068_v54, 0.0 }
 0x7d2   :  { %v4683_v63 = vmul.f32 0.044715, %v4619_v11  ;;  %v5207_v7 = vadd.f32 %v10926_v30, %v5206_v9  ;;  %v4491_v11 = vmul.f32 0.5, %v4387_v56 }
 0x7d3   :  { %5225 = vmatmul.bf16.gmra.mxu3 %v5064_v3 }
 0x7d4   :  { %v4747_v48 = vadd.f32 %v4683_v63, %v4387_v56  ;;  %v5327_v60 = vadd.f32 %v5207_v7, %v11941_v52 }
 0x7d6   :  { %v4811_v6 = vmul.f32 0.7978846, %v4747_v48  ;;  %5391 = vst.msk [vmem:[%s11671_s5 + $0xd0] sm:$0xff] %vm85_vm0, %v5327_v60  ;;  %v6047_v15 = vpop.eup %6046 }
 0x7d7   :  { %v4938_v16 = vadd.f32 1.0, %v6047_v15 }
 0x7d8   :  { %2911 = vadd.xlane.f32.xlu2 %v2910_v53  ;;  %6048 = vtanh.f32 %v4811_v6  ;;  %v3413_v6 = vadd.f32 1e-05, %v3349_v45 }
 0x7d9   :  { %v5208_v13 = vpop.f32.mrf.mxu3  ;;  %v5002_v63 = vmul.f32 %v4938_v16, %v4490_v42 }
 0x7da   :  { %v5209_v36 = vadd.f32 %v10926_v30, %v5208_v13  ;;  %6050 = vrsqrt.f32 %v3413_v6  ;;  %vm3897_vm3 = vweird.f32 %v3413_v6 }
 0x7dc   :  { %v5328_v17 = vadd.f32 %v5209_v36, %v11942_v24 }
 0x7de   :  { %v6049_v28 = vpop.eup %6048  ;;  %5392 = vst.msk [vmem:[%s11671_s5 + $0xd8] sm:$0xff] %vm85_vm0, %v5328_v17 }
 0x7df   :  { %v4939_v27 = vadd.f32 1.0, %v6049_v28 }
 0x7e0   :  { %2914 = vadd.xlane.f32.xlu2 %v2913_v23 }
 0x7e1   :  { %v5003_v3 = vmul.f32 %v4939_v27, %v4491_v11  ;;  %v5211_v2 = vpop.f32.mrf.mxu3 }
 0x7e2   :  { %v5212_v48 = vadd.f32 %v10926_v30, %v5211_v2 }
 0x7e3   :  { %v5065_v31 = vpack.c.bf16 %v5003_v3, %v5002_v63 }
 0x7e4   :  { %v5329_v9 = vadd.f32 %v5212_v48, %v9609_v59  ;;  %v6051_v59 = vpop.eup %6050 }
 0x7e5   :  { %5230 = vmatmul.bf16.gmra.mxu3 %v5065_v31  ;;  %v3892_v52 = vmul.f32 %v6051_v59, %v3413_v6  ;;  %vm3898_vm2 = vweird.f32 %v6051_v59 }
 0x7e6   :  { %5393 = vst.msk [vmem:[%s11671_s5 + $0xe0] sm:$0xff] %vm85_vm0, %v5329_v9  ;;  %vm11099_vm4 = vmor %vm3897_vm3, %vm3898_vm2 }
 0x7e7   :  { %v3893_v15 = vmul.f32 %v6051_v59, %v3892_v52 }
 0x7e9   :  { %v5213_v32 = vpop.f32.mrf.mxu3  ;;  %v3894_v13 = vmul.f32 0.5, %v3893_v15 }
 0x7ea   :  { %v5214_v56 = vadd.f32 %v10926_v30, %v5213_v32 }
 0x7eb   :  { %v3895_v28 = vsub.f32 1.5, %v3894_v13 }
 0x7ec   :  { %v5330_v7 = vadd.f32 %v5214_v56, %v9726_v22 }
 0x7ed   :  { %v3896_v17 = vmul.f32 %v6051_v59, %v3895_v28 }
 0x7ee   :  { %5394 = vst.msk [vmem:[%s11671_s5 + $0xe8] sm:$0xff] %vm85_vm0, %v5330_v7 }
 0x7ef   :  { %v3900_v48 = vsel %vm11099_vm4, %v6051_v59, %v3896_v17 }
 0x7f0   :  { %v4117_v59 = vmul.f32 %v3900_v48, %v10695_v14 }
 0x804   :  { %v3254_v60 = vpop.xlane.xlu2 %3253 }
 0x805   :  { %v3350_v53 = vmul.f32 %v3254_v60, %v6278_v20 }
 0x807   :  { %v3414_v46 = vadd.f32 1e-05, %v3350_v53 }
 0x809   :  { %6052 = vrsqrt.f32 %v3414_v46  ;;  %vm3907_vm6 = vweird.f32 %v3414_v46 }
 0x80c   :  { %v3257_v22 = vpop.xlane.xlu2 %3256 }
 0x80d   :  { %v3351_v36 = vmul.f32 %v3257_v22, %v6278_v20 }
 0x80f   :  { %v6053_v16 = vpop.eup %6052  ;;  %v11095_v23 = vadd.f32 1e-05, %v3351_v36 }
 0x810   :  { %v3902_v24 = vmul.f32 %v6053_v16, %v3414_v46  ;;  %vm3908_vm5 = vweird.f32 %v6053_v16 }
 0x811   :  { %6054 = vrsqrt.f32 %v11095_v23  ;;  %vm3909_vm7 = vmor %vm3907_vm6, %vm3908_vm5  ;;  %vm3917_vm9 = vweird.f32 %v11095_v23 }
 0x812   :  { %v3903_v1 = vmul.f32 %v6053_v16, %v3902_v24  ;;  %v2660_v24 = vpop.f32.mrf.mxu1 }
 0x814   :  { %v3904_v42 = vmul.f32 0.5, %v3903_v1  ;;  %v2894_v11 = vpop.xlane.xlu2 %2893  ;;  %v3260_v31 = vpop.xlane.xlu0 %3259 }
 0x815   :  { %v2974_v27 = vmul.f32 %v2894_v11, %v6278_v20  ;;  %v3352_v32 = vmul.f32 %v3260_v31, %v6278_v20 }
 0x816   :  { %v3905_v3 = vsub.f32 1.5, %v3904_v42 }
 0x817   :  { %v11103_v2 = vpop.eup %6054  ;;  %v11108_v9 = vsub.f32 %v10811_v49, %v2974_v27  ;;  %v4389_v56 = vpop.f32.mrf.mxu2  ;;  %v3416_v6 = vadd.f32 1e-05, %v3352_v32 }
 0x818   :  { %v3906_v7 = vmul.f32 %v6053_v16, %v3905_v3  ;;  %v3912_v45 = vmul.f32 %v11103_v2, %v11095_v23  ;;  %v11118_v15 = vadd.f32 %v11005_v47, %v4389_v56  ;;  %v2661_v3 = vadd.f32 %v10798_v18, %v2660_v24 }
 0x819   :  { %v3102_v52 = vmul.f32 %v11108_v9, %v11108_v9  ;;  %6056 = vrsqrt.f32 %v3416_v6  ;;  %vm3918_vm8 = vweird.f32 %v11103_v2  ;;  %vm3927_vm12 = vweird.f32 %v3416_v6 }
 0x81a   :  { %v3910_v60 = vsel %vm3909_vm7, %v6053_v16, %v3906_v7  ;;  %v3913_v53 = vmul.f32 %v11103_v2, %v3912_v45  ;;  %v4556_v16 = vmul.f32 %v11118_v15, %v11118_v15  ;;  %vm11153_vm11 = vmor %vm3917_vm9, %vm3918_vm8 }
 0x81b   :  { %v3276_v13 = vsel %vm85_vm0, %v3102_v52, 0.0  ;;  %v4118_v46 = vmul.f32 %v3910_v60, %v10766_v25 }
 0x81c   :  { %3277 = vadd.xlane.f32.xlu0 %v3276_v13  ;;  %v2897_v22 = vpop.xlane.xlu2 %2896  ;;  %v3914_v1 = vmul.f32 0.5, %v3913_v53  ;;  %v3263_v17 = vpop.xlane.xlu0 %3262  ;;  %v4620_v32 = vmul.f32 %v4556_v16, %v11118_v15  ;;  %v6216_v53 = vld [vmem:[%s11666_s0 + $0x1f8] sm:$0xff] }
 0x81d   :  { %v2975_v36 = vmul.f32 %v2897_v22, %v6278_v20  ;;  %v4163_v28 = vpack.c.bf16 %v4118_v46, %v4117_v59  ;;  %v3353_v11 = vmul.f32 %v3263_v17, %v6278_v20  ;;  %v11148_v59 = vadd.f32 %v6216_v53, %v2661_v3 }
 0x81e   :  { %v3915_v31 = vsub.f32 1.5, %v3914_v1  ;;  %v4684_v13 = vmul.f32 0.044715, %v4620_v32 }
 0x81f   :  { %v11126_v14 = vsub.f32 %v10851_v57, %v2975_v36  ;;  %v4391_v42 = vpop.f32.mrf.mxu2  ;;  %5541 = vmatmul.msk.bf16.gmra.mxu2 %vm85_vm0, %v4163_v28  ;;  %v6057_v27 = vpop.eup %6056  ;;  %v11137_v56 = vadd.f32 1e-05, %v3353_v11  ;;  %v2916_v32 = vsel %vm85_vm0, %v11148_v59, 0.0 }
 0x820   :  { %v11131_v25 = vadd.f32 %v11005_v47, %v4391_v42  ;;  %v3922_v48 = vmul.f32 %v6057_v27, %v3416_v6  ;;  %v3916_v60 = vmul.f32 %v11103_v2, %v3915_v31  ;;  %vm3928_vm10 = vweird.f32 %v6057_v27 }
 0x821   :  { %v3103_v63 = vmul.f32 %v11126_v14, %v11126_v14  ;;  %6058 = vrsqrt.f32 %v11137_v56  ;;  %vm3929_vm13 = vmor %vm3927_vm12, %vm3928_vm10  ;;  %v4748_v31 = vadd.f32 %v4684_v13, %v11118_v15  ;;  %vm3937_vm15 = vweird.f32 %v11137_v56 }
 0x822   :  { %v4557_v7 = vmul.f32 %v11131_v25, %v11131_v25  ;;  %v3923_v52 = vmul.f32 %v6057_v27, %v3922_v48  ;;  %v3920_v42 = vsel %vm11153_vm11, %v11103_v2, %v3916_v60 }
 0x823   :  { %v3279_v45 = vsel %vm85_vm0, %v3103_v63, 0.0  ;;  %v4119_v60 = vmul.f32 %v3920_v42, %v10784_v12  ;;  %v4812_v13 = vmul.f32 0.7978846, %v4748_v31 }
 0x824   :  { %3280 = vadd.xlane.f32.xlu0 %v3279_v45  ;;  %v3924_v18 = vmul.f32 0.5, %v3923_v52  ;;  %v4621_v46 = vmul.f32 %v4557_v7, %v11131_v25  ;;  %v2900_v22 = vpop.xlane.xlu0 %2899 }
 0x825   :  { %v3266_v28 = vpop.xlane.xlu1 %3265  ;;  %v2976_v24 = vmul.f32 %v2900_v22, %v6278_v20 }
 0x826   :  { %v3925_v36 = vsub.f32 1.5, %v3924_v18  ;;  %v3354_v16 = vmul.f32 %v3266_v28, %v6278_v20  ;;  %v4685_v6 = vmul.f32 0.044715, %v4621_v46 }
 0x827   :  { %v4394_v17 = vpop.f32.mrf.mxu2  ;;  %v11162_v23 = vsub.f32 %v10868_v19, %v2976_v24  ;;  %v11167_v3 = vpop.eup %6058 }
 0x828   :  { %v3926_v11 = vmul.f32 %v6057_v27, %v3925_v36  ;;  %v11165_v63 = vadd.f32 %v11005_v47, %v4394_v17  ;;  %v11170_v48 = vadd.f32 1e-05, %v3354_v16  ;;  %v3932_v2 = vmul.f32 %v11167_v3, %v11137_v56 }
 0x829   :  { %v3104_v52 = vmul.f32 %v11162_v23, %v11162_v23  ;;  %v4749_v46 = vadd.f32 %v4685_v6, %v11131_v25  ;;  %vm3938_vm14 = vweird.f32 %v11167_v3 }
 0x82a   :  { %v3930_v7 = vsel %vm3929_vm13, %v6057_v27, %v3926_v11  ;;  %v4558_v45 = vmul.f32 %v11165_v63, %v11165_v63  ;;  %6060 = vrsqrt.f32 %v11170_v48  ;;  %v3933_v53 = vmul.f32 %v11167_v3, %v3932_v2  ;;  %vm11219_vm2 = vmor %vm3937_vm15, %vm3938_vm14 }
 0x82b   :  { %v4120_v18 = vmul.f32 %v3930_v7, %v10828_v51  ;;  %v3282_v22 = vsel %vm85_vm0, %v3104_v52, 0.0  ;;  %6062 = vtanh.f32 %v4812_v13  ;;  %v4813_v7 = vmul.f32 0.7978846, %v4749_v46 }
 0x82c   :  { %2917 = vadd.xlane.f32.xlu0 %v2916_v32  ;;  %v4622_v27 = vmul.f32 %v4558_v45, %v11165_v63  ;;  %v2903_v36 = vpop.xlane.xlu0 %2902  ;;  %v3934_v24 = vmul.f32 0.5, %v3933_v53  ;;  %3283 = vadd.xlane.f32.xlu1 %v3282_v22  ;;  %vm3947_vm1 = vweird.f32 %v11170_v48 }
 0x82d   :  { %v4164_v28 = vpack.c.bf16 %v4120_v18, %v4119_v60  ;;  %v3269_v1 = vpop.xlane.xlu1 %3268  ;;  %v2977_v16 = vmul.f32 %v2903_v36, %v6278_v20 }
 0x82e   :  { %v3355_v12 = vmul.f32 %v3269_v1, %v6278_v20  ;;  %v4686_v51 = vmul.f32 0.044715, %v4622_v27  ;;  %v3935_v6 = vsub.f32 1.5, %v3934_v24 }
 0x82f   :  { %v4396_v17 = vpop.f32.mrf.mxu2  ;;  %5542 = vmatmul.msk.bf16.gmra.mxu2 %vm85_vm0, %v4164_v28  ;;  %v11191_v42 = vsub.f32 %v10935_v0, %v2977_v16  ;;  %v4492_v16 = vmul.f32 0.5, %v11118_v15 }
 0x830   :  { %v11194_v11 = vadd.f32 %v11005_v47, %v4396_v17  ;;  %v11196_v31 = vpop.eup %6060  ;;  %v11198_v32 = vadd.f32 1e-05, %v3355_v12  ;;  %v4750_v18 = vadd.f32 %v4686_v51, %v11165_v63  ;;  %v3936_v53 = vmul.f32 %v11167_v3, %v3935_v6 }
 0x831   :  { %v3942_v2 = vmul.f32 %v11196_v31, %v11170_v48  ;;  %v3105_v52 = vmul.f32 %v11191_v42, %v11191_v42  ;;  %v6063_v36 = vpop.eup %6062  ;;  %vm3948_vm3 = vweird.f32 %v11196_v31 }
 0x832   :  { %6064 = vrsqrt.f32 %v11198_v32  ;;  %v4559_v45 = vmul.f32 %v11194_v11, %v11194_v11  ;;  %v4814_v56 = vmul.f32 0.7978846, %v4750_v18  ;;  %vm11243_vm4 = vmor %vm3947_vm1, %vm3948_vm3  ;;  %vm3957_vm6 = vweird.f32 %v11198_v32 }
 0x833   :  { %v3943_v60 = vmul.f32 %v11196_v31, %v3942_v2  ;;  %v3285_v13 = vsel %vm85_vm0, %v3105_v52, 0.0  ;;  %6066 = vtanh.f32 %v4813_v7  ;;  %v3940_v7 = vsel %vm11219_vm2, %v11167_v3, %v3936_v53 }
 0x834   :  { %v4623_v27 = vmul.f32 %v4559_v45, %v11194_v11  ;;  %3286 = vadd.xlane.f32.xlu1 %v3285_v13  ;;  %v5216_v24 = vpop.f32.mrf.mxu3  ;;  %6068 = vtanh.f32 %v4814_v56  ;;  %v4121_v56 = vmul.f32 %v3940_v7, %v10858_v50 }
 0x835   :  { %v3944_v46 = vmul.f32 0.5, %v3943_v60  ;;  %v2906_v22 = vpop.xlane.xlu1 %2905  ;;  %v5217_v51 = vadd.f32 %v10926_v30, %v5216_v24  ;;  %v4493_v60 = vmul.f32 0.5, %v11131_v25 }
 0x836   :  { %v4687_v28 = vmul.f32 0.044715, %v4623_v27  ;;  %v2978_v1 = vmul.f32 %v2906_v22, %v6278_v20 }
 0x837   :  { %v3945_v17 = vsub.f32 1.5, %v3944_v46  ;;  %v5331_v13 = vadd.f32 %v5217_v51, %v9759_v4  ;;  %v4940_v46 = vadd.f32 1.0, %v6063_v36 }
 0x838   :  { %v11225_v6 = vpop.eup %6064  ;;  %v4751_v15 = vadd.f32 %v4687_v28, %v11194_v11  ;;  %v11232_v45 = vsub.f32 %v10967_v62, %v2978_v1  ;;  %v4399_v52 = vpop.f32.mrf.mxu2 }
 0x839   :  { %v3946_v27 = vmul.f32 %v11196_v31, %v3945_v17  ;;  %v3952_v18 = vmul.f32 %v11225_v6, %v11198_v32  ;;  %v6067_v22 = vpop.eup %6066  ;;  %v11249_v28 = vadd.f32 %v11005_v47, %v4399_v52  ;;  %5395 = vst.msk [vmem:[%s11671_s5 + $0xf0] sm:$0xff] %vm85_vm0, %v5331_v13  ;;  %v5004_v51 = vmul.f32 %v4940_v46, %v4492_v16 }
 0x83a   :  { %v4815_v53 = vmul.f32 0.7978846, %v4751_v15  ;;  %v3106_v24 = vmul.f32 %v11232_v45, %v11232_v45  ;;  %v4941_v36 = vadd.f32 1.0, %v6067_v22  ;;  %vm3958_vm5 = vweird.f32 %v11225_v6 }
 0x83b   :  { %v3272_v2 = vpop.xlane.xlu2 %3271  ;;  %v3950_v4 = vsel %vm11243_vm4, %v11196_v31, %v3946_v27  ;;  %v3953_v48 = vmul.f32 %v11225_v6, %v3952_v18  ;;  %v4560_v12 = vmul.f32 %v11249_v28, %v11249_v28  ;;  %vm11303_vm7 = vmor %vm3957_vm6, %vm3958_vm5 }
 0x83c   :  { %v3356_v25 = vmul.f32 %v3272_v2, %v6278_v20  ;;  %6070 = vtanh.f32 %v4815_v53  ;;  %v3288_v17 = vsel %vm85_vm0, %v3106_v24, 0.0  ;;  %v5005_v15 = vmul.f32 %v4941_v36, %v4493_v60  ;;  %v5218_v27 = vpop.f32.mrf.mxu3 }
 0x83d   :  { %3289 = vadd.xlane.f32.xlu2 %v3288_v17  ;;  %v2909_v31 = vpop.xlane.xlu1 %2908  ;;  %v4122_v2 = vmul.f32 %v3950_v4, %v10904_v10  ;;  %v4624_v52 = vmul.f32 %v4560_v12, %v11249_v28  ;;  %v5219_v13 = vadd.f32 %v10926_v30, %v5218_v27  ;;  %v3954_v53 = vmul.f32 0.5, %v3953_v48  ;;  %v6069_v10 = vpop.eup %6068 }
 0x83e   :  { %v11261_v1 = vadd.f32 1e-05, %v3356_v25  ;;  %v2979_v18 = vmul.f32 %v2909_v31, %v6278_v20  ;;  %v5066_v22 = vpack.c.bf16 %v5005_v15, %v5004_v51 }
 0x83f   :  { %v4165_v3 = vpack.c.bf16 %v4122_v2, %v4121_v56  ;;  %v4688_v16 = vmul.f32 0.044715, %v4624_v52  ;;  %v5332_v7 = vadd.f32 %v5219_v13, %v9819_v29  ;;  %v3955_v29 = vsub.f32 1.5, %v3954_v53 }
 0x840   :  { %6072 = vrsqrt.f32 %v11261_v1  ;;  %v11275_v46 = vsub.f32 %v11016_v55, %v2979_v18  ;;  %v4401_v50 = vpop.f32.mrf.mxu2  ;;  %5235 = vmatmul.bf16.gmra.mxu3 %v5066_v22  ;;  %v4494_v2 = vmul.f32 0.5, %v11165_v63  ;;  %v4495_v18 = vmul.f32 0.5, %v11194_v11 }
 0x841   :  { %v11279_v25 = vadd.f32 %v11005_v47, %v4401_v50  ;;  %5543 = vmatmul.msk.bf16.gmra.mxu2 %vm85_vm0, %v4165_v3  ;;  %5396 = vst.msk [vmem:[%s11671_s5 + $0xf8] sm:$0xff] %vm85_vm0, %v5332_v7  ;;  %v4752_v12 = vadd.f32 %v4688_v16, %v11249_v28  ;;  %v4942_v13 = vadd.f32 1.0, %v6069_v10  ;;  %v3956_v22 = vmul.f32 %v11225_v6, %v3955_v29 }
 0x842   :  { %v6071_v24 = vpop.eup %6070  ;;  %v3107_v4 = vmul.f32 %v11275_v46, %v11275_v46  ;;  %vm3967_vm9 = vweird.f32 %v11261_v1 }
 0x843   :  { %v11272_v60 = vpop.xlane.xlu2 %3274  ;;  %v4561_v48 = vmul.f32 %v11279_v25, %v11279_v25  ;;  %v4943_v15 = vadd.f32 1.0, %v6071_v24  ;;  %v4816_v3 = vmul.f32 0.7978846, %v4752_v12  ;;  %v5006_v29 = vmul.f32 %v4942_v13, %v4494_v2 }
 0x844   :  { %v3291_v17 = vsel %vm85_vm0, %v3107_v4, 0.0  ;;  %v3960_v32 = vsel %vm11303_vm7, %v11225_v6, %v3956_v22 }
 0x845   :  { %3292 = vadd.xlane.f32.xlu0 %v3291_v17  ;;  %v4625_v31 = vmul.f32 %v4561_v48, %v11279_v25  ;;  %v5007_v4 = vmul.f32 %v4943_v15, %v4495_v18  ;;  %6074 = vtanh.f32 %v4816_v3  ;;  %v4123_v13 = vmul.f32 %v3960_v32, %v10941_v37 }
 0x846   :  { %v6073_v36 = vpop.eup %6072  ;;  %v5221_v56 = vpop.f32.mrf.mxu3  ;;  %v4497_v32 = vmul.f32 0.5, %v11279_v25 }
 0x847   :  { %v3962_v51 = vmul.f32 %v6073_v36, %v11261_v1  ;;  %v5222_v27 = vadd.f32 %v10926_v30, %v5221_v56  ;;  %v4689_v53 = vmul.f32 0.044715, %v4625_v31  ;;  %vm3968_vm8 = vweird.f32 %v6073_v36 }
 0x848   :  { %v5067_v15 = vpack.c.bf16 %v5007_v4, %v5006_v29  ;;  %vm3969_vm10 = vmor %vm3967_vm9, %vm3968_vm8 }
 0x849   :  { %v3963_v52 = vmul.f32 %v6073_v36, %v3962_v51  ;;  %v5333_v7 = vadd.f32 %v5222_v27, %v9861_v58  ;;  %v4753_v63 = vadd.f32 %v4689_v53, %v11279_v25 }
 0x84b   :  { %v2912_v16 = vpop.xlane.xlu2 %2911  ;;  %v3964_v50 = vmul.f32 0.5, %v3963_v52  ;;  %5397 = vst.msk [vmem:[%s11671_s5 + $0x100] sm:$0xff] %vm85_vm0, %v5333_v7  ;;  %v4817_v12 = vmul.f32 0.7978846, %v4753_v63 }
 0x84c   :  { %v2980_v24 = vmul.f32 %v2912_v16, %v6278_v20 }
 0x84d   :  { %v3965_v10 = vsub.f32 1.5, %v3964_v50  ;;  %6076 = vtanh.f32 %v4817_v12 }
 0x84e   :  { %v11312_v58 = vsub.f32 %v11054_v61, %v2980_v24  ;;  %v4404_v48 = vpop.f32.mrf.mxu2  ;;  %v5223_v2 = vpop.f32.mrf.mxu3 }
 0x84f   :  { %v11319_v17 = vadd.f32 %v11005_v47, %v4404_v48  ;;  %v3966_v51 = vmul.f32 %v6073_v36, %v3965_v10  ;;  %v5224_v6 = vadd.f32 %v10926_v30, %v5223_v2 }
 0x850   :  { %v3108_v31 = vmul.f32 %v11312_v58, %v11312_v58  ;;  %5240 = vmatmul.bf16.gmra.mxu3 %v5067_v15 }
 0x851   :  { %v4562_v56 = vmul.f32 %v11319_v17, %v11319_v17  ;;  %v3970_v52 = vsel %vm3969_vm10, %v6073_v36, %v3966_v51  ;;  %v5334_v3 = vadd.f32 %v5224_v6, %v9891_v39  ;;  %v6075_v36 = vpop.eup %6074 }
 0x852   :  { %v3294_v1 = vsel %vm85_vm0, %v3108_v31, 0.0  ;;  %v4124_v22 = vmul.f32 %v3970_v52, %v10993_v44  ;;  %v4944_v12 = vadd.f32 1.0, %v6075_v36  ;;  %v4496_v31 = vmul.f32 0.5, %v11249_v28 }
 0x853   :  { %v4626_v27 = vmul.f32 %v4562_v56, %v11319_v17  ;;  %v2915_v18 = vpop.xlane.xlu2 %2914  ;;  %3295 = vadd.xlane.f32.xlu1 %v3294_v1  ;;  %5398 = vst.msk [vmem:[%s11671_s5 + $0x108] sm:$0xff] %vm85_vm0, %v5334_v3  ;;  %v6077_v37 = vpop.eup %6076 }
 0x854   :  { %v2981_v53 = vmul.f32 %v2915_v18, %v6278_v20  ;;  %v4166_v50 = vpack.c.bf16 %v4124_v22, %v4123_v13  ;;  %v4945_v4 = vadd.f32 1.0, %v6077_v37  ;;  %v5008_v6 = vmul.f32 %v4944_v12, %v4496_v31  ;;  %v11954_v37 = vld [vmem:[#allocation20_spill] sm:$0xff] }
 0x855   :  { %v4690_v16 = vmul.f32 0.044715, %v4626_v27 }
 0x856   :  { %v11337_v7 = vsub.f32 %v11068_v54, %v2981_v53  ;;  %v4406_v24 = vpop.f32.mrf.mxu2  ;;  %5544 = vmatmul.msk.bf16.gmra.mxu2 %vm85_vm0, %v4166_v50  ;;  %v5226_v10 = vpop.f32.mrf.mxu3  ;;  %v5009_v56 = vmul.f32 %v4945_v4, %v4497_v32  ;;  %v4498_v4 = vmul.f32 0.5, %v11319_v17 }
 0x857   :  { %v4407_v44 = vadd.f32 %v11005_v47, %v4406_v24  ;;  %v4754_v63 = vadd.f32 %v4690_v16, %v11319_v17  ;;  %v5227_v48 = vadd.f32 %v10926_v30, %v5226_v10  ;;  %v3357_v17 = vmul.f32 %v11272_v60, %v6278_v20 }
 0x858   :  { %v3109_v39 = vmul.f32 %v11337_v7, %v11337_v7  ;;  %v5068_v27 = vpack.c.bf16 %v5009_v56, %v5008_v6 }
 0x859   :  { %v4563_v11 = vmul.f32 %v4407_v44, %v4407_v44  ;;  %v5335_v15 = vadd.f32 %v5227_v48, %v9916_v40  ;;  %v4818_v2 = vmul.f32 0.7978846, %v4754_v63  ;;  %v11953_v40 = vld [vmem:[#allocation22_spill] sm:$0xff]  ;;  %v4499_v50 = vmul.f32 0.5, %v4407_v44 }
 0x85a   :  { %v3297_v29 = vsel %vm85_vm0, %v3109_v39, 0.0 }
 0x85b   :  { %v4627_v51 = vmul.f32 %v4563_v11, %v4407_v44  ;;  %3298 = vadd.xlane.f32.xlu2 %v3297_v29  ;;  %5399 = vst.msk [vmem:[%s11671_s5 + $0x110] sm:$0xff] %vm85_vm0, %v5335_v15  ;;  %6078 = vtanh.f32 %v4818_v2 }
 0x85d   :  { %v4691_v52 = vmul.f32 0.044715, %v4627_v51 }
 0x85e   :  { %v5228_v18 = vpop.f32.mrf.mxu3 }
 0x85f   :  { %v4755_v1 = vadd.f32 %v4691_v52, %v4407_v44  ;;  %v5229_v13 = vadd.f32 %v10926_v30, %v5228_v18  ;;  %v3421_v44 = vadd.f32 1e-05, %v3357_v17 }
 0x860   :  { %5245 = vmatmul.bf16.gmra.mxu3 %v5068_v27 }
 0x861   :  { %v4819_v25 = vmul.f32 0.7978846, %v4755_v1  ;;  %v5336_v22 = vadd.f32 %v5229_v13, %v11953_v40  ;;  %v6079_v28 = vpop.eup %6078  ;;  %vm3977_vm12 = vweird.f32 %v3421_v44 }
 0x862   :  { %v4946_v36 = vadd.f32 1.0, %v6079_v28 }
 0x863   :  { %6080 = vtanh.f32 %v4819_v25  ;;  %5400 = vst.msk [vmem:[%s11671_s5 + $0x118] sm:$0xff] %vm85_vm0, %v5336_v22 }
 0x864   :  { %v5010_v11 = vmul.f32 %v4946_v36, %v4498_v4  ;;  %6082 = vrsqrt.f32 %v3421_v44 }
 0x868   :  { %v5231_v53 = vpop.f32.mrf.mxu3 }
 0x869   :  { %v6081_v3 = vpop.eup %6080  ;;  %v5232_v16 = vadd.f32 %v10926_v30, %v5231_v53 }
 0x86a   :  { %v4947_v24 = vadd.f32 1.0, %v6081_v3  ;;  %v6083_v12 = vpop.eup %6082 }
 0x86b   :  { %v5337_v39 = vadd.f32 %v5232_v16, %v11954_v37  ;;  %v3972_v51 = vmul.f32 %v6083_v12, %v3421_v44  ;;  %vm3978_vm11 = vweird.f32 %v6083_v12 }
 0x86c   :  { %v5011_v63 = vmul.f32 %v4947_v24, %v4499_v50  ;;  %vm11380_vm13 = vmor %vm3977_vm12, %vm3978_vm11 }
 0x86d   :  { %5401 = vst.msk [vmem:[%s11671_s5 + $0x120] sm:$0xff] %vm85_vm0, %v5337_v39  ;;  %v3973_v56 = vmul.f32 %v6083_v12, %v3972_v51 }
 0x86e   :  { %v5069_v10 = vpack.c.bf16 %v5011_v63, %v5010_v11 }
 0x870   :  { %v5233_v48 = vpop.f32.mrf.mxu3  ;;  %5250 = vmatmul.bf16.gmra.mxu3 %v5069_v10 }
 0x871   :  { %v5234_v29 = vadd.f32 %v10926_v30, %v5233_v48 }
 0x873   :  { %v5338_v32 = vadd.f32 %v5234_v29, %v10089_v38  ;;  %v3974_v38 = vmul.f32 0.5, %v3973_v56 }
 0x875   :  { %5402 = vst.msk [vmem:[%s11671_s5 + $0x128] sm:$0xff] %vm85_vm0, %v5338_v32  ;;  %v3975_v1 = vsub.f32 1.5, %v3974_v38 }
 0x877   :  { %v3976_v18 = vmul.f32 %v6083_v12, %v3975_v1 }
 0x879   :  { %v3980_v16 = vsel %vm11380_vm13, %v6083_v12, %v3976_v18 }
 0x87a   :  { %v4125_v17 = vmul.f32 %v3980_v16, %v11032_v41 }
 0x88f   :  { %v3278_v15 = vpop.xlane.xlu0 %3277 }
 0x890   :  { %v3358_v31 = vmul.f32 %v3278_v15, %v6278_v20 }
 0x892   :  { %v3422_v30 = vadd.f32 1e-05, %v3358_v31 }
 0x894   :  { %6084 = vrsqrt.f32 %v3422_v30  ;;  %vm3987_vm15 = vweird.f32 %v3422_v30 }
 0x897   :  { %v3281_v2 = vpop.xlane.xlu0 %3280 }
 0x898   :  { %v3359_v52 = vmul.f32 %v3281_v2, %v6278_v20 }
 0x89a   :  { %v6085_v6 = vpop.eup %6084  ;;  %v11376_v27 = vadd.f32 1e-05, %v3359_v52 }
 0x89b   :  { %v3982_v25 = vmul.f32 %v6085_v6, %v3422_v30  ;;  %vm3988_vm14 = vweird.f32 %v6085_v6 }
 0x89c   :  { %6086 = vrsqrt.f32 %v11376_v27  ;;  %vm3989_vm1 = vmor %vm3987_vm15, %vm3988_vm14  ;;  %vm3997_vm3 = vweird.f32 %v11376_v27 }
 0x89d   :  { %v3983_v60 = vmul.f32 %v6085_v6, %v3982_v25 }
 0x89f   :  { %v3984_v13 = vmul.f32 0.5, %v3983_v60  ;;  %v2918_v40 = vpop.xlane.xlu0 %2917  ;;  %v3284_v39 = vpop.xlane.xlu1 %3283 }
 0x8a0   :  { %v2982_v22 = vmul.f32 %v2918_v40, %v6278_v20  ;;  %v3360_v63 = vmul.f32 %v3284_v39, %v6278_v20 }
 0x8a1   :  { %v3985_v3 = vsub.f32 1.5, %v3984_v13 }
 0x8a2   :  { %v11384_v53 = vpop.eup %6086  ;;  %v11389_v50 = vsub.f32 %v11148_v59, %v2982_v22  ;;  %v4409_v36 = vpop.f32.mrf.mxu2  ;;  %v3424_v29 = vadd.f32 1e-05, %v3360_v63 }
 0x8a3   :  { %v3986_v24 = vmul.f32 %v6085_v6, %v3985_v3  ;;  %v3992_v37 = vmul.f32 %v11384_v53, %v11376_v27  ;;  %v11394_v4 = vadd.f32 %v11005_v47, %v4409_v36  ;;  %vm3998_vm2 = vweird.f32 %v11384_v53 }
 0x8a4   :  { %v3110_v11 = vmul.f32 %v11389_v50, %v11389_v50  ;;  %6088 = vrsqrt.f32 %v3424_v29  ;;  %vm3999_vm5 = vmor %vm3997_vm3, %vm3998_vm2  ;;  %vm4007_vm6 = vweird.f32 %v3424_v29 }
 0x8a5   :  { %v3990_v10 = vsel %vm3989_vm1, %v6085_v6, %v3986_v24  ;;  %v4564_v48 = vmul.f32 %v11394_v4, %v11394_v4  ;;  %v3993_v12 = vmul.f32 %v11384_v53, %v3992_v37 }
 0x8a6   :  { %v3300_v32 = vsel %vm85_vm0, %v3110_v11, 0.0  ;;  %v4126_v44 = vmul.f32 %v3990_v10, %v11108_v9 }
 0x8a7   :  { %v4628_v51 = vmul.f32 %v4564_v48, %v11394_v4  ;;  %3301 = vadd.xlane.f32.xlu0 %v3300_v32  ;;  %v3994_v30 = vmul.f32 0.5, %v3993_v12  ;;  %v3287_v38 = vpop.xlane.xlu1 %3286 }
 0x8a8   :  { %v4167_v15 = vpack.c.bf16 %v4126_v44, %v4125_v17  ;;  %v3361_v52 = vmul.f32 %v3287_v38, %v6278_v20 }
 0x8a9   :  { %v4692_v31 = vmul.f32 0.044715, %v4628_v51  ;;  %v3995_v25 = vsub.f32 1.5, %v3994_v30 }
 0x8aa   :  { %v4411_v56 = vpop.f32.mrf.mxu2  ;;  %5545 = vmatmul.msk.bf16.gmra.mxu2 %vm85_vm0, %v4167_v15  ;;  %v6089_v6 = vpop.eup %6088  ;;  %v11410_v1 = vadd.f32 1e-05, %v3361_v52 }
 0x8ab   :  { %v4412_v2 = vadd.f32 %v11005_v47, %v4411_v56  ;;  %v4756_v41 = vadd.f32 %v4692_v31, %v11394_v4  ;;  %v4002_v60 = vmul.f32 %v6089_v6, %v3424_v29  ;;  %v3996_v28 = vmul.f32 %v11384_v53, %v3995_v25 }
 0x8ac   :  { %6090 = vrsqrt.f32 %v11410_v1  ;;  %vm4008_vm4 = vweird.f32 %v6089_v6  ;;  %vm4017_vm9 = vweird.f32 %v11410_v1 }
 0x8ad   :  { %v4565_v9 = vmul.f32 %v4412_v2, %v4412_v2  ;;  %v4003_v13 = vmul.f32 %v6089_v6, %v4002_v60  ;;  %v4820_v40 = vmul.f32 0.7978846, %v4756_v41  ;;  %v4000_v32 = vsel %vm3999_vm5, %v11384_v53, %v3996_v28  ;;  %vm4009_vm7 = vmor %vm4007_vm6, %vm4008_vm4 }
 0x8ae   :  { %v4127_v29 = vmul.f32 %v4000_v32, %v11126_v14 }
 0x8af   :  { %v4629_v18 = vmul.f32 %v4565_v9, %v4412_v2  ;;  %v4004_v3 = vmul.f32 0.5, %v4003_v13  ;;  %6092 = vtanh.f32 %v4820_v40 }
 0x8b0   :  { %v3290_v36 = vpop.xlane.xlu2 %3289 }
 0x8b1   :  { %v4693_v22 = vmul.f32 0.044715, %v4629_v18  ;;  %v3362_v24 = vmul.f32 %v3290_v36, %v6278_v20  ;;  %v4005_v39 = vsub.f32 1.5, %v4004_v3  ;;  %v4500_v3 = vmul.f32 0.5, %v11394_v4 }
 0x8b2   :  { %v4414_v37 = vpop.f32.mrf.mxu2  ;;  %v11420_v10 = vpop.eup %6090 }
 0x8b3   :  { %v4757_v16 = vadd.f32 %v4693_v22, %v4412_v2  ;;  %v11418_v11 = vadd.f32 %v11005_v47, %v4414_v37  ;;  %v3426_v48 = vadd.f32 1e-05, %v3362_v24  ;;  %v4006_v17 = vmul.f32 %v6089_v6, %v4005_v39 }
 0x8b4   :  { %v4012_v27 = vmul.f32 %v11420_v10, %v11410_v1  ;;  %vm4018_vm8 = vweird.f32 %v11420_v10 }
 0x8b5   :  { %v4821_v63 = vmul.f32 0.7978846, %v4757_v16  ;;  %v4566_v44 = vmul.f32 %v11418_v11, %v11418_v11  ;;  %v4010_v47 = vsel %vm4009_vm7, %v6089_v6, %v4006_v17  ;;  %v6093_v15 = vpop.eup %6092  ;;  %v11436_v6 = vld [vmem:[%s11668_s2 + $0x1] ss:$0 sm:$0xff]  ;;  %v4501_v16 = vmul.f32 0.5, %v4412_v2  ;;  %vm11456_vm11 = vmor %vm4017_vm9, %vm4018_vm8 }
 0x8b6   :  { %v4013_v12 = vmul.f32 %v11420_v10, %v4012_v27  ;;  %v4128_v53 = vmul.f32 %v4010_v47, %v11162_v23  ;;  %v4948_v13 = vadd.f32 1.0, %v6093_v15  ;;  %vm4027_vm12 = vweird.f32 %v3426_v48 }
 0x8b7   :  { %6094 = vtanh.f32 %v4821_v63  ;;  %v4630_v51 = vmul.f32 %v4566_v44, %v11418_v11 }
 0x8b8   :  { %6096 = vrsqrt.f32 %v3426_v48  ;;  %v4014_v31 = vmul.f32 0.5, %v4013_v12  ;;  %v3293_v56 = vpop.xlane.xlu0 %3292  ;;  %v4168_v41 = vpack.c.bf16 %v4128_v53, %v4127_v29  ;;  %v5012_v39 = vmul.f32 %v4948_v13, %v4500_v3 }
 0x8b9   :  { %v4694_v30 = vmul.f32 0.044715, %v4630_v51  ;;  %v3363_v38 = vmul.f32 %v3293_v56, %v6278_v20  ;;  %v11468_v56 = vld [vmem:[%s11670_s4 + $0x1] ss:$0 sm:$0xff] }
 0x8ba   :  { %v4416_v52 = vpop.f32.mrf.mxu2  ;;  %v4015_v25 = vsub.f32 1.5, %v4014_v31  ;;  %5546 = vmatmul.msk.bf16.gmra.mxu2 %vm85_vm0, %v4168_v41 }
 0x8bb   :  { %v11439_v60 = vadd.f32 %v11436_v6, %v4416_v52  ;;  %v4758_v23 = vadd.f32 %v4694_v30, %v11418_v11  ;;  %v11442_v18 = vadd.f32 1e-05, %v3363_v38 }
 0x8bc   :  { %v4016_v32 = vmul.f32 %v11420_v10, %v4015_v25 }
 0x8bd   :  { %v6095_v9 = vpop.eup %6094  ;;  %v4567_v28 = vmul.f32 %v11439_v60, %v11439_v60  ;;  %v4822_v36 = vmul.f32 0.7978846, %v4758_v23  ;;  %6098 = vrsqrt.f32 %v11442_v18  ;;  %vm4037_vm15 = vweird.f32 %v11442_v18 }
 0x8be   :  { %v6097_v14 = vpop.eup %6096  ;;  %v4949_v40 = vadd.f32 1.0, %v6095_v9  ;;  %v4020_v29 = vsel %vm11456_vm11, %v11420_v10, %v4016_v32 }
 0x8bf   :  { %v4022_v22 = vmul.f32 %v6097_v14, %v3426_v48  ;;  %v4631_v37 = vmul.f32 %v4567_v28, %v11439_v60  ;;  %vm4028_vm10 = vweird.f32 %v6097_v14  ;;  %6100 = vtanh.f32 %v4822_v36 }
 0x8c0   :  { %v5013_v63 = vmul.f32 %v4949_v40, %v4501_v16  ;;  %vm4029_vm13 = vmor %vm4027_vm12, %vm4028_vm10  ;;  %v4129_v25 = vmul.f32 %v4020_v29, %v11191_v42 }
 0x8c1   :  { %v4023_v24 = vmul.f32 %v6097_v14, %v4022_v22  ;;  %v4695_v27 = vmul.f32 0.044715, %v4631_v37  ;;  %v4502_v37 = vmul.f32 0.5, %v11418_v11 }
 0x8c2   :  { %v5070_v44 = vpack.c.bf16 %v5013_v63, %v5012_v39  ;;  %v4503_v39 = vmul.f32 0.5, %v11439_v60 }
 0x8c3   :  { %v4024_v17 = vmul.f32 0.5, %v4023_v24  ;;  %v4759_v4 = vadd.f32 %v4695_v27, %v11439_v60  ;;  %v11454_v2 = vpop.eup %6098  ;;  %v5236_v31 = vpop.f32.mrf.mxu3 }
 0x8c4   :  { %5255 = vmatmul.bf16.gmra.mxu3 %v5070_v44  ;;  %v4032_v1 = vmul.f32 %v11454_v2, %v11442_v18  ;;  %v5237_v30 = vadd.f32 %v11468_v56, %v5236_v31  ;;  %v4419_v38 = vpop.f32.mrf.mxu2  ;;  %v11959_v44 = vld [vmem:[#allocation21_spill] sm:$0xff]  ;;  %vm4038_vm14 = vweird.f32 %v11454_v2 }
 0x8c5   :  { %v4025_v47 = vsub.f32 1.5, %v4024_v17  ;;  %v4823_v15 = vmul.f32 0.7978846, %v4759_v4  ;;  %v11473_v10 = vadd.f32 %v11436_v6, %v4419_v38  ;;  %v6101_v13 = vpop.eup %6100  ;;  %vm4039_vm2 = vmor %vm4037_vm15, %vm4038_vm14 }
 0x8c6   :  { %v3296_v51 = vpop.xlane.xlu1 %3295  ;;  %v5339_v41 = vadd.f32 %v5237_v30, %v10103_v26  ;;  %v4033_v40 = vmul.f32 %v11454_v2, %v4032_v1  ;;  %v4950_v42 = vadd.f32 1.0, %v6101_v13 }
 0x8c7   :  { %v4026_v53 = vmul.f32 %v6097_v14, %v4025_v47  ;;  %v3364_v48 = vmul.f32 %v3296_v51, %v6278_v20  ;;  %6102 = vtanh.f32 %v4823_v15  ;;  %v4568_v22 = vmul.f32 %v11473_v10, %v11473_v10 }
 0x8c8   :  { %5403 = vst.msk [vmem:[%s11671_s5 + $0x130] sm:$0xff] %vm85_vm0, %v5339_v41  ;;  %v5014_v4 = vmul.f32 %v4950_v42, %v4502_v37 }
 0x8c9   :  { %v4030_v52 = vsel %vm4029_vm13, %v6097_v14, %v4026_v53  ;;  %v3428_v9 = vadd.f32 1e-05, %v3364_v48  ;;  %v4632_v26 = vmul.f32 %v4568_v22, %v11473_v10 }
 0x8ca   :  { %v4130_v23 = vmul.f32 %v4030_v52, %v11232_v45  ;;  %v4034_v45 = vmul.f32 0.5, %v4033_v40 }
 0x8cb   :  { %6104 = vrsqrt.f32 %v3428_v9  ;;  %v4696_v3 = vmul.f32 0.044715, %v4632_v26  ;;  %v5238_v16 = vpop.f32.mrf.mxu3  ;;  %vm4047_vm3 = vweird.f32 %v3428_v9 }
 0x8cc   :  { %v4169_v14 = vpack.c.bf16 %v4130_v23, %v4129_v25  ;;  %v5239_v36 = vadd.f32 %v11468_v56, %v5238_v16  ;;  %v4421_v24 = vpop.f32.mrf.mxu2  ;;  %v4035_v51 = vsub.f32 1.5, %v4034_v45  ;;  %v11960_v23 = vld [vmem:[#allocation23_spill] sm:$0xff] }
 0x8cd   :  { %v6103_v28 = vpop.eup %6102  ;;  %v4422_v32 = vadd.f32 %v11436_v6, %v4421_v24  ;;  %v4760_v27 = vadd.f32 %v4696_v3, %v11473_v10 }
 0x8ce   :  { %5547 = vmatmul.msk.bf16.gmra.mxu2 %vm85_vm0, %v4169_v14  ;;  %v4951_v63 = vadd.f32 1.0, %v6103_v28  ;;  %v5340_v47 = vadd.f32 %v5239_v36, %v11959_v44  ;;  %v4036_v31 = vmul.f32 %v11454_v2, %v4035_v51 }
 0x8cf   :  { %v4569_v11 = vmul.f32 %v4422_v32, %v4422_v32  ;;  %v4824_v1 = vmul.f32 0.7978846, %v4760_v27 }
 0x8d0   :  { %v5015_v12 = vmul.f32 %v4951_v63, %v4503_v39  ;;  %5404 = vst.msk [vmem:[%s11671_s5 + $0x138] sm:$0xff] %vm85_vm0, %v5340_v47  ;;  %v4040_v22 = vsel %vm4039_vm2, %v11454_v2, %v4036_v31  ;;  %v11961_v39 = vld [vmem:[#allocation24_spill] sm:$0xff] }
 0x8d1   :  { %v6105_v17 = vpop.eup %6104  ;;  %v4633_v15 = vmul.f32 %v4569_v11, %v4422_v32  ;;  %6106 = vtanh.f32 %v4824_v1  ;;  %v4131_v45 = vmul.f32 %v4040_v22, %v11275_v46 }
 0x8d2   :  { %v4042_v29 = vmul.f32 %v6105_v17, %v3428_v9  ;;  %v5071_v53 = vpack.c.bf16 %v5015_v12, %v5014_v4  ;;  %vm4048_vm1 = vweird.f32 %v6105_v17  ;;  %v4505_v12 = vmul.f32 0.5, %v4422_v32 }
 0x8d3   :  { %v5241_v48 = vpop.f32.mrf.mxu3  ;;  %v4697_v38 = vmul.f32 0.044715, %v4633_v15  ;;  %vm4049_vm4 = vmor %vm4047_vm3, %vm4048_vm1 }
 0x8d4   :  { %v4043_v60 = vmul.f32 %v6105_v17, %v4042_v29  ;;  %5260 = vmatmul.bf16.gmra.mxu3 %v5071_v53  ;;  %v5242_v52 = vadd.f32 %v11468_v56, %v5241_v48  ;;  %v11962_v48 = vld [vmem:[#allocation26_spill] sm:$0xff] }
 0x8d5   :  { %v4761_v25 = vadd.f32 %v4697_v38, %v4422_v32 }
 0x8d6   :  { %v4044_v30 = vmul.f32 0.5, %v4043_v60  ;;  %v5341_v13 = vadd.f32 %v5242_v52, %v11960_v23  ;;  %v11963_v23 = vld [vmem:[#allocation25_spill] sm:$0xff] }
 0x8d7   :  { %v4825_v42 = vmul.f32 0.7978846, %v4761_v25  ;;  %v6107_v36 = vpop.eup %6106 }
 0x8d8   :  { %v4045_v41 = vsub.f32 1.5, %v4044_v30  ;;  %5405 = vst.msk [vmem:[%s11671_s5 + $0x140] sm:$0xff] %vm85_vm0, %v5341_v13  ;;  %v4952_v47 = vadd.f32 1.0, %v6107_v36 }
 0x8d9   :  { %v4424_v40 = vpop.f32.mrf.mxu2  ;;  %6108 = vtanh.f32 %v4825_v42 }
 0x8da   :  { %v4046_v14 = vmul.f32 %v6105_v17, %v4045_v41  ;;  %v4425_v26 = vadd.f32 %v11436_v6, %v4424_v40 }
 0x8db   :  { %v5243_v2 = vpop.f32.mrf.mxu3 }
 0x8dc   :  { %v4050_v18 = vsel %vm4049_vm4, %v6105_v17, %v4046_v14  ;;  %v4570_v28 = vmul.f32 %v4425_v26, %v4425_v26  ;;  %v5244_v9 = vadd.f32 %v11468_v56, %v5243_v2  ;;  %v4506_v14 = vmul.f32 0.5, %v4425_v26 }
 0x8dd   :  { %v4132_v3 = vmul.f32 %v4050_v18, %v11312_v58  ;;  %v4504_v58 = vmul.f32 0.5, %v11473_v10 }
 0x8de   :  { %v4634_v16 = vmul.f32 %v4570_v28, %v4425_v26  ;;  %v5342_v63 = vadd.f32 %v5244_v9, %v11961_v39 }
 0x8df   :  { %v4170_v24 = vpack.c.bf16 %v4132_v3, %v4131_v45  ;;  %v6109_v4 = vpop.eup %6108  ;;  %v5016_v60 = vmul.f32 %v4952_v47, %v4504_v58 }
 0x8e0   :  { %v4698_v37 = vmul.f32 0.044715, %v4634_v16  ;;  %5406 = vst.msk [vmem:[%s11671_s5 + $0x148] sm:$0xff] %vm85_vm0, %v5342_v63  ;;  %v4953_v51 = vadd.f32 1.0, %v6109_v4 }
 0x8e1   :  { %v4426_v27 = vpop.f32.mrf.mxu2  ;;  %5548 = vmatmul.msk.bf16.gmra.mxu2 %vm85_vm0, %v4170_v24 }
 0x8e2   :  { %v4762_v44 = vadd.f32 %v4698_v37, %v4425_v26  ;;  %v4427_v17 = vadd.f32 %v11436_v6, %v4426_v27  ;;  %v5017_v1 = vmul.f32 %v4953_v51, %v4505_v12  ;;  %v3299_v37 = vpop.xlane.xlu2 %3298 }
 0x8e3   :  { %v5246_v53 = vpop.f32.mrf.mxu3 }
 0x8e4   :  { %v4571_v46 = vmul.f32 %v4427_v17, %v4427_v17  ;;  %v4826_v29 = vmul.f32 0.7978846, %v4762_v44  ;;  %v5247_v15 = vadd.f32 %v11468_v56, %v5246_v53  ;;  %v5072_v30 = vpack.c.bf16 %v5017_v1, %v5016_v60 }
 0x8e5   :  { %v4507_v42 = vmul.f32 0.5, %v4427_v17 }
 0x8e6   :  { %v4635_v11 = vmul.f32 %v4571_v46, %v4427_v17  ;;  %v5343_v38 = vadd.f32 %v5247_v15, %v11962_v48  ;;  %6110 = vtanh.f32 %v4826_v29  ;;  %5265 = vmatmul.bf16.gmra.mxu3 %v5072_v30 }
 0x8e8   :  { %v4699_v31 = vmul.f32 0.044715, %v4635_v11  ;;  %5407 = vst.msk [vmem:[%s11671_s5 + $0x150] sm:$0xff] %vm85_vm0, %v5343_v38 }
 0x8ea   :  { %v4763_v52 = vadd.f32 %v4699_v31, %v4427_v17 }
 0x8eb   :  { %v5248_v32 = vpop.f32.mrf.mxu3 }
 0x8ec   :  { %v4827_v10 = vmul.f32 0.7978846, %v4763_v52  ;;  %v5249_v41 = vadd.f32 %v11468_v56, %v5248_v32  ;;  %v6111_v25 = vpop.eup %6110 }
 0x8ed   :  { %v4954_v40 = vadd.f32 1.0, %v6111_v25 }
 0x8ee   :  { %6112 = vtanh.f32 %v4827_v10  ;;  %v5344_v13 = vadd.f32 %v5249_v41, %v11963_v23 }
 0x8ef   :  { %v5018_v3 = vmul.f32 %v4954_v40, %v4506_v14 }
 0x8f0   :  { %5408 = vst.msk [vmem:[%s11671_s5 + $0x158] sm:$0xff] %vm85_vm0, %v5344_v13 }
 0x8f3   :  { %v5251_v28 = vpop.f32.mrf.mxu3 }
 0x8f4   :  { %v6113_v22 = vpop.eup %6112  ;;  %v5252_v45 = vadd.f32 %v11468_v56, %v5251_v28 }
 0x8f5   :  { %v4955_v18 = vadd.f32 1.0, %v6113_v22 }
 0x8f6   :  { %v5345_v2 = vadd.f32 %v5252_v45, %v10360_v35  ;;  %v3365_v35 = vmul.f32 %v3299_v37, %v6278_v20 }
 0x8f7   :  { %v5019_v16 = vmul.f32 %v4955_v18, %v4507_v42 }
 0x8f8   :  { %5409 = vst.msk [vmem:[%s11671_s5 + $0x160] sm:$0xff] %vm85_vm0, %v5345_v2  ;;  %v3429_v39 = vadd.f32 1e-05, %v3365_v35 }
 0x8f9   :  { %v5073_v36 = vpack.c.bf16 %v5019_v16, %v5018_v3 }
 0x8fa   :  { %6114 = vrsqrt.f32 %v3429_v39  ;;  %vm4057_vm6 = vweird.f32 %v3429_v39 }
 0x8fb   :  { %5270 = vmatmul.bf16.gmra.mxu3 %v5073_v36  ;;  %v5253_v9 = vpop.f32.mrf.mxu3 }
 0x8fc   :  { %v5254_v24 = vadd.f32 %v11468_v56, %v5253_v9 }
 0x8fe   :  { %v5346_v26 = vadd.f32 %v5254_v24, %v10398_v5 }
 0x900   :  { %5410 = vst.msk [vmem:[%s11671_s5 + $0x168] sm:$0xff] %vm85_vm0, %v5346_v26  ;;  %v6115_v63 = vpop.eup %6114 }
 0x901   :  { %v4052_v27 = vmul.f32 %v6115_v63, %v3429_v39  ;;  %vm4058_vm5 = vweird.f32 %v6115_v63 }
 0x902   :  { %vm4059_vm8 = vmor %vm4057_vm6, %vm4058_vm5 }
 0x903   :  { %v4053_v4 = vmul.f32 %v6115_v63, %v4052_v27 }
 0x905   :  { %v4054_v46 = vmul.f32 0.5, %v4053_v4 }
 0x907   :  { %v4055_v58 = vsub.f32 1.5, %v4054_v46 }
 0x909   :  { %v4056_v29 = vmul.f32 %v6115_v63, %v4055_v58 }
 0x90b   :  { %v4060_v1 = vsel %vm4059_vm8, %v6115_v63, %v4056_v29 }
 0x90c   :  { %v4133_v48 = vmul.f32 %v4060_v1, %v11337_v7 }
 0x91a   :  { %v3302_v44 = vpop.xlane.xlu0 %3301 }
 0x91b   :  { %v3366_v17 = vmul.f32 %v3302_v44, %v6278_v20 }
 0x91d   :  { %v3430_v47 = vadd.f32 1e-05, %v3366_v17 }
 0x91f   :  { %6116 = vrsqrt.f32 %v3430_v47  ;;  %vm4067_vm9 = vweird.f32 %v3430_v47 }
 0x925   :  { %v6117_v5 = vpop.eup %6116 }
 0x926   :  { %v4062_v12 = vmul.f32 %v6117_v5, %v3430_v47  ;;  %vm4068_vm7 = vweird.f32 %v6117_v5 }
 0x927   :  { %vm4069_vm10 = vmor %vm4067_vm9, %vm4068_vm7 }
 0x928   :  { %v4063_v51 = vmul.f32 %v6117_v5, %v4062_v12 }
 0x92a   :  { %v4064_v11 = vmul.f32 0.5, %v4063_v51 }
 0x92c   :  { %v4065_v53 = vsub.f32 1.5, %v4064_v11 }
 0x92d   :  { %v4429_v60 = vpop.f32.mrf.mxu2 }
 0x92e   :  { %v4066_v15 = vmul.f32 %v6117_v5, %v4065_v53  ;;  %v4430_v20 = vadd.f32 %v11436_v6, %v4429_v60 }
 0x930   :  { %v4070_v31 = vsel %vm4069_vm10, %v6117_v5, %v4066_v15  ;;  %v4572_v30 = vmul.f32 %v4430_v20, %v4430_v20  ;;  %v4508_v37 = vmul.f32 0.5, %v4430_v20 }
 0x931   :  { %v4134_v38 = vmul.f32 %v4070_v31, %v11389_v50 }
 0x932   :  { %v4636_v52 = vmul.f32 %v4572_v30, %v4430_v20 }
 0x933   :  { %v4171_v10 = vpack.c.bf16 %v4134_v38, %v4133_v48 }
 0x934   :  { %v4700_v32 = vmul.f32 0.044715, %v4636_v52 }
 0x935   :  { %v4431_v41 = vpop.f32.mrf.mxu2  ;;  %5549 = vmatmul.msk.bf16.gmra.mxu2 %vm85_vm0, %v4171_v10 }
 0x936   :  { %v4764_v25 = vadd.f32 %v4700_v32, %v4430_v20  ;;  %v4432_v23 = vadd.f32 %v11436_v6, %v4431_v41 }
 0x938   :  { %v4573_v13 = vmul.f32 %v4432_v23, %v4432_v23  ;;  %v4828_v40 = vmul.f32 0.7978846, %v4764_v25  ;;  %v4509_v35 = vmul.f32 0.5, %v4432_v23 }
 0x93a   :  { %v4637_v22 = vmul.f32 %v4573_v13, %v4432_v23  ;;  %6118 = vtanh.f32 %v4828_v40 }
 0x93c   :  { %v4701_v14 = vmul.f32 0.044715, %v4637_v22 }
 0x93d   :  { %v4434_v28 = vpop.f32.mrf.mxu2 }
 0x93e   :  { %v4765_v42 = vadd.f32 %v4701_v14, %v4432_v23  ;;  %v4435_v7 = vadd.f32 %v11436_v6, %v4434_v28 }
 0x940   :  { %v4829_v18 = vmul.f32 0.7978846, %v4765_v42  ;;  %v6119_v50 = vpop.eup %6118  ;;  %v4574_v45 = vmul.f32 %v4435_v7, %v4435_v7  ;;  %v4510_v13 = vmul.f32 0.5, %v4435_v7 }
 0x941   :  { %v4956_v16 = vadd.f32 1.0, %v6119_v50 }
 0x942   :  { %6120 = vtanh.f32 %v4829_v18  ;;  %v4638_v3 = vmul.f32 %v4574_v45, %v4435_v7 }
 0x943   :  { %v5020_v17 = vmul.f32 %v4956_v16, %v4508_v37 }
 0x944   :  { %v4702_v36 = vmul.f32 0.044715, %v4638_v3 }
 0x945   :  { %v4436_v24 = vpop.f32.mrf.mxu2 }
 0x946   :  { %v4766_v63 = vadd.f32 %v4702_v36, %v4435_v7  ;;  %v4437_v27 = vadd.f32 %v11436_v6, %v4436_v24  ;;  %v11964_v7 = vld [vmem:[#allocation4_spill] sm:$0xff] }
 0x947   :  { %v5256_v9 = vpop.f32.mrf.mxu3 }
 0x948   :  { %v6121_v2 = vpop.eup %6120  ;;  %v5257_v26 = vadd.f32 %v11468_v56, %v5256_v9  ;;  %v4575_v4 = vmul.f32 %v4437_v27, %v4437_v27  ;;  %v4830_v5 = vmul.f32 0.7978846, %v4766_v63  ;;  %v4511_v40 = vmul.f32 0.5, %v4437_v27 }
 0x949   :  { %v4957_v39 = vadd.f32 1.0, %v6121_v2 }
 0x94a   :  { %v5347_v44 = vadd.f32 %v5257_v26, %v10406_v34  ;;  %v4639_v58 = vmul.f32 %v4575_v4, %v4437_v27  ;;  %6122 = vtanh.f32 %v4830_v5 }
 0x94b   :  { %v5021_v47 = vmul.f32 %v4957_v39, %v4509_v35 }
 0x94c   :  { %5411 = vst.msk [vmem:[%s11671_s5 + $0x170] sm:$0xff] %vm85_vm0, %v5347_v44  ;;  %v4703_v12 = vmul.f32 0.044715, %v4639_v58 }
 0x94d   :  { %v5074_v46 = vpack.c.bf16 %v5021_v47, %v5020_v17 }
 0x94e   :  { %v4767_v53 = vadd.f32 %v4703_v12, %v4437_v27 }
 0x94f   :  { %5275 = vmatmul.bf16.gmra.mxu3 %v5074_v46  ;;  %v5258_v51 = vpop.f32.mrf.mxu3 }
 0x950   :  { %v5259_v11 = vadd.f32 %v11468_v56, %v5258_v51  ;;  %v4831_v1 = vmul.f32 0.7978846, %v4767_v53  ;;  %v6123_v31 = vpop.eup %6122  ;;  %v11965_v53 = vld [vmem:[#allocation2_spill] sm:$0xff] }
 0x951   :  { %v4439_v29 = vpop.f32.mrf.mxu2  ;;  %v4958_v41 = vadd.f32 1.0, %v6123_v31 }
 0x952   :  { %v4440_v34 = vadd.f32 %v11436_v6, %v4439_v29  ;;  %v5348_v60 = vadd.f32 %v5259_v11, %v10491_v8  ;;  %6124 = vtanh.f32 %v4831_v1 }
 0x953   :  { %v5022_v18 = vmul.f32 %v4958_v41, %v4510_v13 }
 0x954   :  { %v4576_v15 = vmul.f32 %v4440_v34, %v4440_v34  ;;  %5412 = vst.msk [vmem:[%s11671_s5 + $0x178] sm:$0xff] %vm85_vm0, %v5348_v60  ;;  %v4512_v17 = vmul.f32 0.5, %v4440_v34 }
 0x956   :  { %v4640_v20 = vmul.f32 %v4576_v15, %v4440_v34 }
 0x957   :  { %v5261_v38 = vpop.f32.mrf.mxu3 }
 0x958   :  { %v4704_v30 = vmul.f32 0.044715, %v4640_v20  ;;  %v5262_v32 = vadd.f32 %v11468_v56, %v5261_v38  ;;  %v6125_v8 = vpop.eup %6124 }
 0x959   :  { %v4441_v48 = vpop.f32.mrf.mxu2  ;;  %v4959_v22 = vadd.f32 1.0, %v6125_v8 }
 0x95a   :  { %v4768_v52 = vadd.f32 %v4704_v30, %v4440_v34  ;;  %v4442_v10 = vadd.f32 %v11436_v6, %v4441_v48  ;;  %v5349_v23 = vadd.f32 %v5262_v32, %v10534_v43 }
 0x95b   :  { %v5023_v28 = vmul.f32 %v4959_v22, %v4511_v40 }
 0x95c   :  { %v4577_v25 = vmul.f32 %v4442_v10, %v4442_v10  ;;  %v4832_v14 = vmul.f32 0.7978846, %v4768_v52  ;;  %5413 = vst.msk [vmem:[%s11671_s5 + $0x180] sm:$0xff] %vm85_vm0, %v5349_v23  ;;  %v4513_v47 = vmul.f32 0.5, %v4442_v10  ;;  %v11966_v52 = vld [vmem:[#allocation5_spill] sm:$0xff] }
 0x95d   :  { %v5075_v3 = vpack.c.bf16 %v5023_v28, %v5022_v18 }
 0x95e   :  { %v4641_v42 = vmul.f32 %v4577_v25, %v4442_v10  ;;  %6126 = vtanh.f32 %v4832_v14  ;;  %v11967_v14 = vld [vmem:[#allocation3_spill] sm:$0xff] }
 0x95f   :  { %v5263_v45 = vpop.f32.mrf.mxu3  ;;  %5280 = vmatmul.bf16.gmra.mxu3 %v5075_v3 }
 0x960   :  { %v4705_v50 = vmul.f32 0.044715, %v4641_v42  ;;  %v5264_v2 = vadd.f32 %v11468_v56, %v5263_v45 }
 0x962   :  { %v4769_v16 = vadd.f32 %v4705_v50, %v4442_v10  ;;  %v5350_v36 = vadd.f32 %v5264_v2, %v11964_v7 }
 0x964   :  { %v4833_v43 = vmul.f32 0.7978846, %v4769_v16  ;;  %v4444_v9 = vpop.f32.mrf.mxu2  ;;  %5414 = vst.msk [vmem:[%s11671_s5 + $0x188] sm:$0xff] %vm85_vm0, %v5350_v36  ;;  %v6127_v26 = vpop.eup %6126 }
 0x965   :  { %v4445_v24 = vadd.f32 %v11436_v6, %v4444_v9  ;;  %v4960_v39 = vadd.f32 1.0, %v6127_v26 }
 0x966   :  { %6128 = vtanh.f32 %v4833_v43 }
 0x967   :  { %v4578_v37 = vmul.f32 %v4445_v24, %v4445_v24  ;;  %v5024_v51 = vmul.f32 %v4960_v39, %v4512_v17  ;;  %v4514_v13 = vmul.f32 0.5, %v4445_v24 }
 0x969   :  { %v4642_v35 = vmul.f32 %v4578_v37, %v4445_v24  ;;  %v5266_v58 = vpop.f32.mrf.mxu3 }
 0x96a   :  { %v5267_v12 = vadd.f32 %v11468_v56, %v5266_v58 }
 0x96b   :  { %v4706_v27 = vmul.f32 0.044715, %v4642_v35 }
 0x96c   :  { %v6129_v63 = vpop.eup %6128  ;;  %v4446_v44 = vpop.f32.mrf.mxu2  ;;  %v5351_v60 = vadd.f32 %v5267_v12, %v11965_v53 }
 0x96d   :  { %v4961_v4 = vadd.f32 1.0, %v6129_v63  ;;  %v4770_v46 = vadd.f32 %v4706_v27, %v4445_v24  ;;  %v4447_v5 = vadd.f32 %v11436_v6, %v4446_v44 }
 0x96e   :  { %5415 = vst.msk [vmem:[%s11671_s5 + $0x190] sm:$0xff] %vm85_vm0, %v5351_v60 }
 0x96f   :  { %v5025_v29 = vmul.f32 %v4961_v4, %v4513_v47  ;;  %v4579_v11 = vmul.f32 %v4447_v5, %v4447_v5  ;;  %v4834_v15 = vmul.f32 0.7978846, %v4770_v46  ;;  %v4515_v40 = vmul.f32 0.5, %v4447_v5 }
 0x971   :  { %v5076_v1 = vpack.c.bf16 %v5025_v29, %v5024_v51  ;;  %v4643_v20 = vmul.f32 %v4579_v11, %v4447_v5  ;;  %6130 = vtanh.f32 %v4834_v15  ;;  %v5268_v30 = vpop.f32.mrf.mxu3 }
 0x972   :  { %v5269_v48 = vadd.f32 %v11468_v56, %v5268_v30 }
 0x973   :  { %5285 = vmatmul.bf16.gmra.mxu3 %v5076_v1  ;;  %v4707_v34 = vmul.f32 0.044715, %v4643_v20 }
 0x974   :  { %v5352_v10 = vadd.f32 %v5269_v48, %v11966_v52 }
 0x975   :  { %v4771_v31 = vadd.f32 %v4707_v34, %v4447_v5 }
 0x976   :  { %5416 = vst.msk [vmem:[%s11671_s5 + $0x198] sm:$0xff] %vm85_vm0, %v5352_v10 }
 0x977   :  { %v4835_v38 = vmul.f32 0.7978846, %v4771_v31  ;;  %v6131_v32 = vpop.eup %6130 }
 0x978   :  { %v4962_v8 = vadd.f32 1.0, %v6131_v32 }
 0x979   :  { %6132 = vtanh.f32 %v4835_v38 }
 0x97a   :  { %v5026_v18 = vmul.f32 %v4962_v8, %v4514_v13 }
 0x97e   :  { %v5271_v41 = vpop.f32.mrf.mxu3 }
 0x97f   :  { %v6133_v25 = vpop.eup %6132  ;;  %v5272_v23 = vadd.f32 %v11468_v56, %v5271_v41 }
 0x980   :  { %v4963_v22 = vadd.f32 1.0, %v6133_v25 }
 0x981   :  { %v5353_v42 = vadd.f32 %v5272_v23, %v11967_v14 }
 0x982   :  { %v5027_v28 = vmul.f32 %v4963_v22, %v4515_v40 }
 0x983   :  { %5417 = vst.msk [vmem:[%s11671_s5 + $0x1a0] sm:$0xff] %vm85_vm0, %v5353_v42 }
 0x984   :  { %v5077_v50 = vpack.c.bf16 %v5027_v28, %v5026_v18 }
 0x986   :  { %v5273_v45 = vpop.f32.mrf.mxu3  ;;  %5290 = vmatmul.bf16.gmra.mxu3 %v5077_v50 }
 0x987   :  { %v5274_v3 = vadd.f32 %v11468_v56, %v5273_v45 }
 0x989   :  { %v5354_v16 = vadd.f32 %v5274_v3, %v10716_v33 }
 0x98b   :  { %5418 = vst.msk [vmem:[%s11671_s5 + $0x1a8] sm:$0xff] %vm85_vm0, %v5354_v16 }
 0x9b8   :  { %v4449_v2 = vpop.f32.mrf.mxu2 }
 0x9b9   :  { %v4450_v43 = vadd.f32 %v11436_v6, %v4449_v2 }
 0x9bb   :  { %v4580_v7 = vmul.f32 %v4450_v43, %v4450_v43  ;;  %v4516_v58 = vmul.f32 0.5, %v4450_v43 }
 0x9bd   :  { %v4644_v36 = vmul.f32 %v4580_v7, %v4450_v43 }
 0x9bf   :  { %v4708_v9 = vmul.f32 0.044715, %v4644_v36 }
 0x9c0   :  { %v4451_v24 = vpop.f32.mrf.mxu2 }
 0x9c1   :  { %v4772_v26 = vadd.f32 %v4708_v9, %v4450_v43  ;;  %v4452_v37 = vadd.f32 %v11436_v6, %v4451_v24 }
 0x9c3   :  { %v4581_v35 = vmul.f32 %v4452_v37, %v4452_v37  ;;  %v4836_v39 = vmul.f32 0.7978846, %v4772_v26  ;;  %v4517_v12 = vmul.f32 0.5, %v4452_v37 }
 0x9c5   :  { %v4645_v63 = vmul.f32 %v4581_v35, %v4452_v37  ;;  %6134 = vtanh.f32 %v4836_v39 }
 0x9c7   :  { %v4709_v27 = vmul.f32 0.044715, %v4645_v63 }
 0x9c9   :  { %v4773_v33 = vadd.f32 %v4709_v27, %v4452_v37 }
 0x9cb   :  { %v4837_v44 = vmul.f32 0.7978846, %v4773_v33  ;;  %v6135_v17 = vpop.eup %6134 }
 0x9cc   :  { %v4964_v4 = vadd.f32 1.0, %v6135_v17 }
 0x9cd   :  { %6136 = vtanh.f32 %v4837_v44 }
 0x9ce   :  { %v5028_v6 = vmul.f32 %v4964_v4, %v4516_v58 }
 0x9d2   :  { %v5276_v47 = vpop.f32.mrf.mxu3 }
 0x9d3   :  { %v6137_v46 = vpop.eup %6136  ;;  %v5277_v5 = vadd.f32 %v11468_v56, %v5276_v47 }
 0x9d4   :  { %v4965_v51 = vadd.f32 1.0, %v6137_v46 }
 0x9d5   :  { %v5355_v29 = vadd.f32 %v5277_v5, %v10731_v21 }
 0x9d6   :  { %v5029_v11 = vmul.f32 %v4965_v51, %v4517_v12 }
 0x9d7   :  { %5419 = vst.msk [vmem:[%s11671_s5 + $0x1b0] sm:$0xff] %vm85_vm0, %v5355_v29 }
 0x9d8   :  { %v5078_v53 = vpack.c.bf16 %v5029_v11, %v5028_v6 }
 0x9da   :  { %v5278_v60 = vpop.f32.mrf.mxu3  ;;  %5295 = vmatmul.bf16.gmra.mxu3 %v5078_v53 }
 0x9db   :  { %v5279_v1 = vadd.f32 %v11468_v56, %v5278_v60 }
 0x9dd   :  { %v5356_v15 = vadd.f32 %v5279_v1, %v10811_v49 }
 0x9df   :  { %5420 = vst.msk [vmem:[%s11671_s5 + $0x1b8] sm:$0xff] %vm85_vm0, %v5356_v15 }
 0x9e2   :  { %v5281_v21 = vpop.f32.mrf.mxu3 }
 0x9e3   :  { %v5282_v20 = vadd.f32 %v11468_v56, %v5281_v21 }
 0x9e5   :  { %v5357_v34 = vadd.f32 %v5282_v20, %v10851_v57 }
 0x9e7   :  { %5421 = vst.msk [vmem:[%s11671_s5 + $0x1c0] sm:$0xff] %vm85_vm0, %v5357_v34 }
 0x9ea   :  { %v5283_v31 = vpop.f32.mrf.mxu3 }
 0x9eb   :  { %v5284_v30 = vadd.f32 %v11468_v56, %v5283_v31 }
 0x9ed   :  { %v5358_v49 = vadd.f32 %v5284_v30, %v10868_v19 }
 0x9ef   :  { %5422 = vst.msk [vmem:[%s11671_s5 + $0x1c8] sm:$0xff] %vm85_vm0, %v5358_v49 }
 0x9f6   :  { %v5286_v48 = vpop.f32.mrf.mxu3 }
 0x9f7   :  { %v5287_v38 = vadd.f32 %v11468_v56, %v5286_v48 }
 0x9f9   :  { %v5359_v57 = vadd.f32 %v5287_v38, %v10935_v0 }
 0x9fb   :  { %5423 = vst.msk [vmem:[%s11671_s5 + $0x1d0] sm:$0xff] %vm85_vm0, %v5359_v57 }
 0x9fe   :  { %v5288_v52 = vpop.f32.mrf.mxu3 }
 0x9ff   :  { %v5289_v10 = vadd.f32 %v11468_v56, %v5288_v52 }
 0xa01   :  { %v5360_v19 = vadd.f32 %v5289_v10, %v10967_v62 }
 0xa03   :  { %5424 = vst.msk [vmem:[%s11671_s5 + $0x1d8] sm:$0xff] %vm85_vm0, %v5360_v19 }
 0xa09   :  { %v5291_v32 = vpop.f32.mrf.mxu3 }
 0xa0a   :  { %v5292_v41 = vadd.f32 %v11468_v56, %v5291_v32 }
 0xa0c   :  { %v5361_v0 = vadd.f32 %v5292_v41, %v11016_v55 }
 0xa0e   :  { %5425 = vst.msk [vmem:[%s11671_s5 + $0x1e0] sm:$0xff] %vm85_vm0, %v5361_v0 }
 0xa11   :  { %v5293_v8 = vpop.f32.mrf.mxu3 }
 0xa12   :  { %v5294_v25 = vadd.f32 %v11468_v56, %v5293_v8 }
 0xa14   :  { %v5362_v62 = vadd.f32 %v5294_v25, %v11054_v61 }
 0xa16   :  { %5426 = vst.msk [vmem:[%s11671_s5 + $0x1e8] sm:$0xff] %vm85_vm0, %v5362_v62 }
 0xa5d   :  { %v5296_v23 = vpop.f32.mrf.mxu3 }
 0xa5e   :  { %v5297_v13 = vadd.f32 %v11468_v56, %v5296_v23 }
 0xa60   :  { %v5363_v55 = vadd.f32 %v5297_v13, %v11068_v54 }
 0xa62   :  { %5427 = vst.msk [vmem:[%s11671_s5 + $0x1f0] sm:$0xff] %vm85_vm0, %v5363_v55 }
 0xa65   :  { %v5298_v40 = vpop.f32.mrf.mxu3 }
 0xa66   :  { %v5299_v22 = vadd.f32 %v11468_v56, %v5298_v40 }
 0xa68   :  { %v5364_v61 = vadd.f32 %v5299_v22, %v11148_v59 }
 0xa6a   :  { %5428 = vst.msk [vmem:[%s11671_s5 + $0x1f8] sm:$0xff] %vm85_vm0, %v5364_v61 }

</bundles_post_ra>
